<compile_context>
chip_gen: v7x
topology: tpu7x:2x2x1
jax: 0.10.0
libtpu: 0.0.40
codegen_flags: <defaults>
</compile_context>

<pallas_src>
import functools

import jax
import jax.numpy as jnp
from jax.experimental import pallas as pl
from jax.experimental.pallas import tpu as pltpu


# ----------------------------------------------------------------------------
# small helpers
# ----------------------------------------------------------------------------
def _round_up(x, m):
    return (x + m - 1) // m * m


def _bf16(x):
    return x.astype(jnp.bfloat16)


def _gelu(x):
    # tanh-approx GELU (EUP-friendly); PyTorch nn.GELU uses exact erf (<1e-3 diff).
    return jax.nn.gelu(x, approximate=True)


def _ln(x, g, b, eps):
    mu = jnp.mean(x, axis=-1, keepdims=True)
    xc = x - mu
    var = jnp.mean(xc * xc, axis=-1, keepdims=True)
    return xc * jax.lax.rsqrt(var + eps) * g + b


_VMEM_LIMIT = 64 * 1024 * 1024


def _cparams(sem):
    return pltpu.CompilerParams(dimension_semantics=sem, vmem_limit_bytes=_VMEM_LIMIT)


# ----------------------------------------------------------------------------
# probe: single-buffered (Buffered(1)) weight BlockSpecs, with safe fallback
# ----------------------------------------------------------------------------
def _probe_buffered():
    try:
        def k(x_ref, w_ref, o_ref):
            o_ref[...] = x_ref[...] + w_ref[...]

        wspec = pl.BlockSpec((8, 128), lambda i: (0, 0), pipeline_mode=pl.Buffered(1))
        x = jnp.zeros((8, 128), jnp.float32)
        out = pl.pallas_call(
            k,
            out_shape=jax.ShapeDtypeStruct((8, 128), jnp.float32),
            grid=(2,),
            in_specs=[pl.BlockSpec((8, 128), lambda i: (0, 0)), wspec],
            out_specs=pl.BlockSpec((8, 128), lambda i: (0, 0)),
        )(x, x)
        jax.block_until_ready(out)
        return True
    except Exception:
        return False


_HAS_BUFFERED = _probe_buffered()


def _wspec(shape, index_map):
    """BlockSpec for a grid-invariant (or slowly varying) weight operand."""
    if _HAS_BUFFERED:
        return pl.BlockSpec(shape, index_map, pipeline_mode=pl.Buffered(1))
    return pl.BlockSpec(shape, index_map)


# ----------------------------------------------------------------------------
# Pallas kernel 1: matmul (+ bias, + optional fused activation)  [patch embed]
# ----------------------------------------------------------------------------
def _mm_kernel(a_ref, b_ref, bias_ref, o_ref, *, act):
    acc = jnp.dot(a_ref[...], b_ref[...], preferred_element_type=jnp.float32)
    acc = acc + bias_ref[...]
    if act == "gelu":
        acc = _gelu(acc)
    elif act == "relu":
        acc = jnp.maximum(acc, 0.0)
    o_ref[...] = acc.astype(o_ref.dtype)


def pallas_matmul(a, w, bias, act="none", block_m=512, out_dtype=jnp.float32):
    """(M, K)bf16 @ (K, N)bf16 + bias[1, N]; fp32 accumulate."""
    M, K = a.shape
    K2, N = w.shape
    assert K == K2
    bm = min(block_m, _round_up(M, 8))
    Mp = _round_up(M, bm)
    if Mp != M:
        a = jnp.pad(a, ((0, Mp - M), (0, 0)))
    out = pl.pallas_call(
        functools.partial(_mm_kernel, act=act),
        out_shape=jax.ShapeDtypeStruct((Mp, N), out_dtype),
        grid=(Mp // bm,),
        in_specs=[
            pl.BlockSpec((bm, K), lambda i: (i, 0)),
            _wspec((K, N), lambda i: (0, 0)),
            pl.BlockSpec((1, N), lambda i: (0, 0)),
        ],
        out_specs=pl.BlockSpec((bm, N), lambda i: (i, 0)),
        compiler_params=_cparams(("parallel",)),
    )(a, w, bias)
    return out[:M] if Mp != M else out


# ----------------------------------------------------------------------------
# Pallas kernel 2: LayerNorm over last dim  [final encoder norm]
# ----------------------------------------------------------------------------
def _ln_kernel(x_ref, g_ref, b_ref, o_ref, *, eps):
    o_ref[...] = _ln(x_ref[...].astype(jnp.float32), g_ref[...], b_ref[...], eps
                     ).astype(o_ref.dtype)


def pallas_layernorm(x, gamma, beta, eps=1e-5, block_m=512):
    """x (M, D) bf16 -> bf16; gamma/beta (1, D) fp32."""
    M, D = x.shape
    bm = min(block_m, _round_up(M, 8))
    Mp = _round_up(M, bm)
    if Mp != M:
        x = jnp.pad(x, ((0, Mp - M), (0, 0)))
    out = pl.pallas_call(
        functools.partial(_ln_kernel, eps=eps),
        out_shape=jax.ShapeDtypeStruct((Mp, D), jnp.bfloat16),
        grid=(Mp // bm,),
        in_specs=[
            pl.BlockSpec((bm, D), lambda i: (i, 0)),
            pl.BlockSpec((1, D), lambda i: (0, 0)),
            pl.BlockSpec((1, D), lambda i: (0, 0)),
        ],
        out_specs=pl.BlockSpec((bm, D), lambda i: (i, 0)),
        compiler_params=_cparams(("parallel",)),
    )(x, gamma, beta)
    return out[:M] if Mp != M else out


# ----------------------------------------------------------------------------
# Pallas kernel 3: fully-fused pre-norm transformer block (one call per block)
# ----------------------------------------------------------------------------
def _block_kernel(x_ref, ln1g, ln1b, qkvw, qkvb, projw, projb,
                  ln2g, ln2b, fc1w, fc1b, fc2w, fc2b, o_ref,
                  *, nh, dh, n_real, eps):
    E = nh * dh
    x = x_ref[0].astype(jnp.float32)                       # (Np, E)
    Np = x.shape[0]

    # ---- attention sub-layer: LN1 -> fused QKV -> per-head attn ----
    h = _ln(x, ln1g[...], ln1b[...], eps)
    qkv = jnp.dot(_bf16(h), qkvw[...], preferred_element_type=jnp.float32) + qkvb[...]
    key_ok = jax.lax.broadcasted_iota(jnp.int32, (1, Np), 1) < n_real   # mask padding
    scale = 1.0 / float(dh) ** 0.5
    heads = []
    for hd in range(nh):                                   # static unroll over heads
        q = qkv[:, hd * dh:(hd + 1) * dh]
        k = qkv[:, E + hd * dh:E + (hd + 1) * dh]
        v = qkv[:, 2 * E + hd * dh:2 * E + (hd + 1) * dh]
        s = jax.lax.dot_general(_bf16(q), _bf16(k), (((1,), (1,)), ((), ())),
                                preferred_element_type=jnp.float32) * scale
        s = jnp.where(key_ok, s, -1e30)
        m = jnp.max(s, axis=-1, keepdims=True)
        p = jnp.exp(s - m)
        p = p * pl.reciprocal(jnp.sum(p, axis=-1, keepdims=True), approx=True)
        heads.append(jnp.dot(_bf16(p), _bf16(v), preferred_element_type=jnp.float32))
    # concat heads once, then ONE full-depth (Np,E)@(E,E) projection matmul
    attn = _bf16(jnp.concatenate(heads, axis=-1))          # (Np, E) bf16
    x = x + jnp.dot(attn, projw[...], preferred_element_type=jnp.float32) + projb[...]

    # ---- MLP sub-layer: LN2 -> fc1 -> GELU -> fc2 -> residual ----
    h2 = _ln(x, ln2g[...], ln2b[...], eps)
    f1 = _bf16(_gelu(jnp.dot(_bf16(h2), fc1w[...],
                             preferred_element_type=jnp.float32) + fc1b[...]))
    f2 = jnp.dot(f1, fc2w[...], preferred_element_type=jnp.float32) + fc2b[...]
    o_ref[0] = (x + f2).astype(o_ref.dtype)


def transformer_block(x, blk, *, nh, n_real, eps=1e-5):
    """x: (B, Np, E) padded bf16 sequence; one fused Pallas call, grid over batch."""
    B, Np, E = x.shape
    dh = E // nh
    hid = blk["fc1_w"].shape[1]
    in_specs = [
        pl.BlockSpec((1, Np, E), lambda i: (i, 0, 0)),        # x
        pl.BlockSpec((1, E), lambda i: (0, 0)),               # ln1_g
        pl.BlockSpec((1, E), lambda i: (0, 0)),               # ln1_b
        _wspec((E, 3 * E), lambda i: (0, 0)),                 # qkv_w
        pl.BlockSpec((1, 3 * E), lambda i: (0, 0)),           # qkv_b
        _wspec((E, E), lambda i: (0, 0)),                     # proj_w
        pl.BlockSpec((1, E), lambda i: (0, 0)),               # proj_b
        pl.BlockSpec((1, E), lambda i: (0, 0)),               # ln2_g
        pl.BlockSpec((1, E), lambda i: (0, 0)),               # ln2_b
        _wspec((E, hid), lambda i: (0, 0)),                   # fc1_w
        pl.BlockSpec((1, hid), lambda i: (0, 0)),             # fc1_b
        _wspec((hid, E), lambda i: (0, 0)),                   # fc2_w
        pl.BlockSpec((1, E), lambda i: (0, 0)),               # fc2_b
    ]
    return pl.pallas_call(
        functools.partial(_block_kernel, nh=nh, dh=dh, n_real=n_real, eps=eps),
        out_shape=jax.ShapeDtypeStruct((B, Np, E), jnp.bfloat16),
        grid=(B,),
        in_specs=in_specs,
        out_specs=pl.BlockSpec((1, Np, E), lambda i: (i, 0, 0)),
        compiler_params=_cparams(("parallel",)),
    )(
        x,
        blk["ln1_g"], blk["ln1_b"],
        blk["qkv_w"], blk["qkv_b"],
        blk["proj_w"], blk["proj_b"],
        blk["ln2_g"], blk["ln2_b"],
        blk["fc1_w"], blk["fc1_b"],
        blk["fc2_w"], blk["fc2_b"],
    )


# ----------------------------------------------------------------------------
# Pallas kernel 4: Neck stage = ConvTranspose2d(k=2,s=2) + LayerNorm(C) + GELU
#   grid = (kernel position kk in 0..3, row tile); weight slab per step = (Cin,Cout)
# ----------------------------------------------------------------------------
def _convt_ln_gelu_kernel(y_ref, w_ref, b_ref, g_ref, be_ref, o_ref, *, eps):
    z = jnp.dot(y_ref[...], w_ref[0], preferred_element_type=jnp.float32) + b_ref[0]
    o_ref[0] = _gelu(_ln(z, g_ref[...], be_ref[...], eps)).astype(o_ref.dtype)


def neck_stage(y, ws, bs, gamma, beta, eps=1e-6, block_m=512):
    """y NHWC (B,H,W,Cin) bf16; ws (4,Cin,Cout) bf16; bs (4,1,Cout) fp32."""
    B, H, W, Cin = y.shape
    Cout = ws.shape[2]
    M = B * H * W
    bm = min(block_m, _round_up(M, 8))
    Mp = _round_up(M, bm)
    yf = y.reshape(M, Cin)
    if Mp != M:
        yf = jnp.pad(yf, ((0, Mp - M), (0, 0)))
    z = pl.pallas_call(
        functools.partial(_convt_ln_gelu_kernel, eps=eps),
        out_shape=jax.ShapeDtypeStruct((4, Mp, Cout), jnp.bfloat16),
        grid=(4, Mp // bm),                                 # kk outer, row tile inner
        in_specs=[
            pl.BlockSpec((bm, Cin), lambda kk, i: (i, 0)),
            _wspec((1, Cin, Cout), lambda kk, i: (kk, 0, 0)),
            pl.BlockSpec((1, 1, Cout), lambda kk, i: (kk, 0, 0)),
            pl.BlockSpec((1, Cout), lambda kk, i: (0, 0)),
            pl.BlockSpec((1, Cout), lambda kk, i: (0, 0)),
        ],
        out_specs=pl.BlockSpec((1, bm, Cout), lambda kk, i: (kk, i, 0)),
        compiler_params=_cparams(("parallel", "parallel")),
    )(yf, ws, bs, gamma, beta)
    z = z[:, :M].reshape(2, 2, B, H, W, Cout)               # (kh, kw, B, H, W, C)
    z = jnp.transpose(z, (2, 3, 0, 4, 1, 5)).reshape(B, 2 * H, 2 * W, Cout)
    return z


# ----------------------------------------------------------------------------
# Pallas kernel 5: FCNHead = Conv3x3(no bias)+BN(eval)+ReLU+Conv1x1, fused
#   3x3 im2col is laid out once in the wrapper -> kernel has no slice/reshape copies
# ----------------------------------------------------------------------------
def _fcn_head_kernel(xc_ref, w1_ref, b1_ref, w2_ref, b2_ref, o_ref):
    h = jnp.dot(xc_ref[...], w1_ref[...], preferred_element_type=jnp.float32) + b1_ref[...]
    h = jnp.maximum(h, 0.0)                                  # folded BN + ReLU
    # TODO(synk): Dropout2d(p=0.1) is identity in eval mode; training-mode RNG dropout not implemented.
    out = jnp.dot(_bf16(h), w2_ref[...], preferred_element_type=jnp.float32) + b2_ref[...]
    o_ref[...] = out.astype(o_ref.dtype)


def fcn_head(y, hd, n_classes, block_m=512):
    """y NHWC (B,H,W,Cin) bf16 -> NCHW (B, n_classes, H, W) fp32."""
    B, H, W, Cin = y.shape
    mid = hd["b1"].shape[1]
    ypad = jnp.pad(y, ((0, 0), (1, 1), (1, 1), (0, 0)))
    # wrapper-side im2col: tap order (kh, kw, cin) matches w1 row layout
    cols = [ypad[:, di:di + H, dj:dj + W, :] for di in range(3) for dj in range(3)]
    xcol = jnp.concatenate(cols, axis=-1).reshape(B * H * W, 9 * Cin)
    M = B * H * W
    bm = min(block_m, _round_up(M, 8))
    Mp = _round_up(M, bm)
    if Mp != M:
        xcol = jnp.pad(xcol, ((0, Mp - M), (0, 0)))
    out = pl.pallas_call(
        _fcn_head_kernel,
        out_shape=jax.ShapeDtypeStruct((Mp, n_classes), jnp.float32),
        grid=(Mp // bm,),
        in_specs=[
            pl.BlockSpec((bm, 9 * Cin), lambda i: (i, 0)),
            _wspec((9 * Cin, mid), lambda i: (0, 0)),
            pl.BlockSpec((1, mid), lambda i: (0, 0)),
            pl.BlockSpec((mid, n_classes), lambda i: (0, 0)),
            pl.BlockSpec((1, n_classes), lambda i: (0, 0)),
        ],
        out_specs=pl.BlockSpec((bm, n_classes), lambda i: (i, 0)),
        compiler_params=_cparams(("parallel",)),
    )(xcol, hd["w1"], hd["b1"], hd["w2"], hd["b2"])
    out = out[:M].reshape(B, H, W, n_classes)
    return jnp.transpose(out, (0, 3, 1, 2))


# ----------------------------------------------------------------------------
# PrithviWrapper forward (consumes prepared / pre-cast params)
# ----------------------------------------------------------------------------
def prithvi_wrapper_forward(x, params, *, n_frame, embed, num_heads,
                            patch, input_size, n_classes):
    B, Ctot, T, H, W = x.shape
    C = Ctot // n_frame
    x3 = jnp.transpose(x.reshape(B, n_frame, C, H, W), (0, 2, 1, 3, 4))  # (B,C,T,H,W)

    # ---------------- TemporalViTEncoder ----------------
    ph, pw = patch
    Hn, Wn = H // ph, W // pw
    P = Hn * Wn
    # 3D patch embed (Conv3d, kernel=stride=(1,ph,pw)) == per-patch matmul
    xr = x3.reshape(B, C, n_frame, Hn, ph, Wn, pw)
    xt = jnp.transpose(xr, (0, 2, 3, 5, 1, 4, 6))                       # (B,T,Hn,Wn,C,ph,pw)
    patches = _bf16(xt.reshape(B * n_frame * P, C * ph * pw))
    tok = pallas_matmul(patches, params["patch_w"], params["patch_b"])
    tok = tok.reshape(B, n_frame * P, embed)

    cls = jnp.broadcast_to(params["cls_token"], (B, 1, embed))
    seq = jnp.concatenate([cls, tok], axis=1) + params["pos_embed"]
    N = 1 + n_frame * P
    Np = _round_up(N, 8)
    seq = _bf16(jnp.pad(seq, ((0, 0), (0, Np - N), (0, 0))))            # pad once, keep padded

    for blk in params["blocks"]:
        seq = transformer_block(seq, blk, nh=num_heads, n_real=N)

    enc = pallas_layernorm(seq.reshape(B * Np, embed),
                           params["norm_g"], params["norm_b"], eps=1e-5)
    enc = enc.reshape(B, Np, embed)

    # ---------------- wrapper token -> feature-map reshuffle ----------------
    pri = enc[:, 1:N, :]                                                # drop cls + padding
    n_patch = (n_frame * P) // n_frame
    En = embed * n_frame
    p2 = pri.reshape(B, n_frame, n_patch, embed)
    p3 = jnp.transpose(p2, (0, 2, 1, 3))                                # (B, n_patch, T, E)
    p4 = p3.reshape(B, n_patch, En)
    Hs = input_size[1] // patch[1]
    feat = p4.reshape(B, Hs, Hs, En)                                    # NHWC directly

    # ---------------- Neck ----------------
    nk = params["neck"]
    y = neck_stage(feat, nk["t1_w"], nk["t1_b"], nk["n1_g"], nk["n1_b"], eps=1e-6)
    y = neck_stage(y, nk["t2_w"], nk["t2_b"], nk["n2_g"], nk["n2_b"], eps=1e-6)

    # ---------------- FCNHead ----------------
    return fcn_head(y, params["head"], n_classes)                       # NCHW output


# ----------------------------------------------------------------------------
# deterministic parameter init (PyTorch layouts) + one-time layout/dtype prep
# ----------------------------------------------------------------------------
def init_params(key, *, n_channels, n_frame, embed, depth, num_heads, mlp_ratio,
                patch, input_size, n_classes):
    keys = iter(jax.random.split(key, 256))

    def nrm(shape, s=0.02):
        return jax.random.normal(next(keys), shape, jnp.float32) * s

    ph, pw = patch
    P = (input_size[0] // ph) * (input_size[1] // pw)
    hid = int(embed * mlp_ratio)
    En = embed * n_frame

    params = {
        "patch_w": nrm((embed, n_channels, 1, ph, pw)),
        "patch_b": jnp.zeros((embed,), jnp.float32),
        "cls_token": nrm((1, 1, embed)),
        "pos_embed": nrm((1, 1 + n_frame * P, embed)),
        "norm_g": jnp.ones((embed,), jnp.float32),
        "norm_b": jnp.zeros((embed,), jnp.float32),
        "blocks": [],
    }
    for _ in range(depth):
        params["blocks"].append(dict(
            ln1_g=jnp.ones((embed,), jnp.float32), ln1_b=jnp.zeros((embed,), jnp.float32),
            qkv_w=nrm((embed, 3 * embed)), qkv_b=jnp.zeros((3 * embed,), jnp.float32),
            proj_w=nrm((embed, embed)), proj_b=jnp.zeros((embed,), jnp.float32),
            ln2_g=jnp.ones((embed,), jnp.float32), ln2_b=jnp.zeros((embed,), jnp.float32),
            fc1_w=nrm((embed, hid)), fc1_b=jnp.zeros((hid,), jnp.float32),
            fc2_w=nrm((hid, embed)), fc2_b=jnp.zeros((embed,), jnp.float32),
        ))
    params["neck"] = dict(
        t1_w=nrm((En, En, 2, 2)), t1_b=jnp.zeros((En,), jnp.float32),
        n1_g=jnp.ones((En,), jnp.float32), n1_b=jnp.zeros((En,), jnp.float32),
        t2_w=nrm((En, En, 2, 2)), t2_b=jnp.zeros((En,), jnp.float32),
        n2_g=jnp.ones((En,), jnp.float32), n2_b=jnp.zeros((En,), jnp.float32),
    )
    params["head"] = dict(
        c1_w=nrm((256, En, 3, 3)),
        bn_g=jnp.ones((256,), jnp.float32), bn_b=jnp.zeros((256,), jnp.float32),
        bn_mean=jnp.zeros((256,), jnp.float32), bn_var=jnp.ones((256,), jnp.float32),
        c2_w=nrm((n_classes, 256, 1, 1)), c2_b=jnp.zeros((n_classes,), jnp.float32),
    )
    return params


def prepare_params(params):
    """One-time (outside jit) weight pre-cast to bf16 + matmul-ready layouts."""
    embed = params["patch_b"].shape[0]
    q = {
        "patch_w": _bf16(params["patch_w"].reshape(embed, -1).T),
        "patch_b": params["patch_b"].reshape(1, -1),
        "cls_token": params["cls_token"],
        "pos_embed": params["pos_embed"],
        "norm_g": params["norm_g"].reshape(1, -1),
        "norm_b": params["norm_b"].reshape(1, -1),
        "blocks": [],
    }
    for blk in params["blocks"]:
        q["blocks"].append(dict(
            ln1_g=blk["ln1_g"].reshape(1, -1), ln1_b=blk["ln1_b"].reshape(1, -1),
            qkv_w=_bf16(blk["qkv_w"]), qkv_b=blk["qkv_b"].reshape(1, -1),
            proj_w=_bf16(blk["proj_w"]), proj_b=blk["proj_b"].reshape(1, -1),
            ln2_g=blk["ln2_g"].reshape(1, -1), ln2_b=blk["ln2_b"].reshape(1, -1),
            fc1_w=_bf16(blk["fc1_w"]), fc1_b=blk["fc1_b"].reshape(1, -1),
            fc2_w=_bf16(blk["fc2_w"]), fc2_b=blk["fc2_b"].reshape(1, -1),
        ))

    def convt_prep(w, b):
        # PyTorch ConvTranspose2d weight (Cin, Cout, 2, 2) -> (4, Cin, Cout), kk = kh*2+kw
        Cin, Cout = w.shape[0], w.shape[1]
        ws = _bf16(jnp.transpose(w, (2, 3, 0, 1)).reshape(4, Cin, Cout))
        bs = jnp.broadcast_to(b.reshape(1, 1, Cout), (4, 1, Cout)).astype(jnp.float32)
        return ws, bs

    nk = params["neck"]
    t1w, t1b = convt_prep(nk["t1_w"], nk["t1_b"])
    t2w, t2b = convt_prep(nk["t2_w"], nk["t2_b"])
    q["neck"] = dict(
        t1_w=t1w, t1_b=t1b,
        n1_g=nk["n1_g"].reshape(1, -1), n1_b=nk["n1_b"].reshape(1, -1),
        t2_w=t2w, t2_b=t2b,
        n2_g=nk["n2_g"].reshape(1, -1), n2_b=nk["n2_b"].reshape(1, -1),
    )

    hd = params["head"]
    mid, Cin = hd["c1_w"].shape[0], hd["c1_w"].shape[1]
    n_classes = hd["c2_w"].shape[0]
    inv = hd["bn_g"] / jnp.sqrt(hd["bn_var"] + 1e-5)                    # fold eval BatchNorm
    w1 = jnp.transpose(hd["c1_w"], (2, 3, 1, 0)).reshape(9 * Cin, mid) * inv[None, :]
    b1 = (hd["bn_b"] - hd["bn_mean"] * inv).reshape(1, mid)
    w2 = hd["c2_w"].reshape(n_classes, mid).T
    b2 = hd["c2_b"].reshape(1, n_classes)
    q["head"] = dict(w1=_bf16(w1), b1=b1, w2=_bf16(w2), b2=b2)
    return q


# ----------------------------------------------------------------------------
# main
# ----------------------------------------------------------------------------
if __name__ == "__main__":
    B = 2
    n_frame = 2
    n_channels = 4            # per-frame channels (backbone in_chans)
    T = 1                     # temporal dim of the raw input tensor
    H = W = 16
    input_size = (H, W)
    patch = (4, 4)
    embed = 32
    depth = 2
    num_heads = 4
    mlp_ratio = 2.0
    n_classes = 3

    key = jax.random.PRNGKey(0)
    k_param, k_x = jax.random.split(key)
    raw_params = init_params(
        k_param, n_channels=n_channels, n_frame=n_frame, embed=embed, depth=depth,
        num_heads=num_heads, mlp_ratio=mlp_ratio, patch=patch,
        input_size=input_size, n_classes=n_classes,
    )
    params = prepare_params(raw_params)   # one-time bf16 / layout prep (outside jit)

    # input: (B, n_channels * n_frame, T, H, W)   (T must be 1 for the reshape in forward)
    x = jax.random.normal(k_x, (B, n_channels * n_frame, T, H, W), jnp.float32)

    fwd = jax.jit(functools.partial(
        prithvi_wrapper_forward,
        n_frame=n_frame, embed=embed, num_heads=num_heads,
        patch=patch, input_size=input_size, n_classes=n_classes,
    ))
    out = fwd(x, params)
    out = jax.block_until_ready(out)

    assert out.shape == (B, n_classes, H, W), out.shape
    assert bool(jnp.all(jnp.isfinite(out)))
    print("KERNEL_OK")
</pallas_src>

<mosaic_0001>
module attributes {stable_mosaic.version = 11 : i64} {
  func.func @k(%arg0: i32, %arg1: memref<8x128xf32, #tpu.memory_space<vmem>>, %arg2: memref<8x128xf32, #tpu.memory_space<vmem>>, %arg3: memref<8x128xf32, #tpu.memory_space<vmem>>) attributes {dimension_semantics = [#tpu.dimension_semantics<arbitrary>], iteration_bounds = array<i64: 2>, scalar_prefetch = 0 : i64, scratch_operands = 0 : i64, tpu.core_type = #tpu.core_type<tc>, window_params = [{pipeline_mode = #tpu.pipeline_mode<synchronous>, transform_indices = @transform_0, window_bounds = array<i64: 8, 128>}, {pipeline_mode = #tpu.pipeline_mode<synchronous>, transform_indices = @transform_1, window_bounds = array<i64: 8, 128>}, {pipeline_mode = #tpu.pipeline_mode<synchronous>, transform_indices = @transform_2, window_bounds = array<i64: 8, 128>}]} {
    %c0 = arith.constant 0 : index
    %c0_0 = arith.constant 0 : index
    %0 = vector.load %arg1[%c0, %c0_0] : memref<8x128xf32, #tpu.memory_space<vmem>>, vector<8x128xf32>
    %c0_1 = arith.constant 0 : index
    %c0_2 = arith.constant 0 : index
    %1 = vector.load %arg2[%c0_1, %c0_2] : memref<8x128xf32, #tpu.memory_space<vmem>>, vector<8x128xf32>
    %2 = arith.addf %0, %1 : vector<8x128xf32>
    %c0_3 = arith.constant 0 : index
    %c0_4 = arith.constant 0 : index
    %3 = vector.load %arg3[%c0_3, %c0_4] : memref<8x128xf32, #tpu.memory_space<vmem>>, vector<8x128xf32>
    tpu.vector_store %arg3[%c0_3, %c0_4], %2 {strides = array<i32>} : memref<8x128xf32, #tpu.memory_space<vmem>>, vector<8x128xf32>,
    return
  }
  func.func @transform_0(%arg0: i32) -> (i32, i32) {
    %c0_i32 = arith.constant 0 : i32
    %c0_i32_0 = arith.constant 0 : i32
    %c0_i32_1 = arith.constant 0 : i32
    return %c0_i32, %c0_i32_0 : i32, i32
  }
  func.func @transform_1(%arg0: i32) -> (i32, i32) {
    %c0_i32 = arith.constant 0 : i32
    %c0_i32_0 = arith.constant 0 : i32
    %c0_i32_1 = arith.constant 0 : i32
    return %c0_i32, %c0_i32_0 : i32, i32
  }
  func.func @transform_2(%arg0: i32) -> (i32, i32) {
    %c0_i32 = arith.constant 0 : i32
    %c0_i32_0 = arith.constant 0 : i32
    %c0_i32_1 = arith.constant 0 : i32
    return %c0_i32, %c0_i32_0 : i32, i32
  }
}

module attributes {stable_mosaic.version = 11 : i64} {
  func.func @_mm_kernel(%arg0: i32, %arg1: memref<64x64xbf16, #tpu.memory_space<vmem>>, %arg2: memref<64x32xbf16, #tpu.memory_space<vmem>>, %arg3: memref<1x32xf32, #tpu.memory_space<vmem>>, %arg4: memref<64x32xf32, #tpu.memory_space<vmem>>) attributes {dimension_semantics = [#tpu.dimension_semantics<parallel>], iteration_bounds = array<i64: 1>, scalar_prefetch = 0 : i64, scratch_operands = 0 : i64, tpu.core_type = #tpu.core_type<tc>, window_params = [{transform_indices = @transform_0, window_bounds = array<i64: 64, 64>}, {pipeline_mode = #tpu.pipeline_mode<synchronous>, transform_indices = @transform_1, window_bounds = array<i64: 64, 32>}, {pipeline_mode = #tpu.pipeline_mode<synchronous>, transform_indices = @transform_2, window_bounds = array<i64: 1, 32>}, {transform_indices = @transform_3, window_bounds = array<i64: 64, 32>}]} {
    %c0 = arith.constant 0 : index
    %c0_0 = arith.constant 0 : index
    %0 = vector.load %arg1[%c0, %c0_0] : memref<64x64xbf16, #tpu.memory_space<vmem>>, vector<64x64xbf16>
    %c0_1 = arith.constant 0 : index
    %c0_2 = arith.constant 0 : index
    %1 = vector.load %arg2[%c0_1, %c0_2] : memref<64x32xbf16, #tpu.memory_space<vmem>>, vector<64x32xbf16>
    %cst = arith.constant dense<0.000000e+00> : vector<64x32xf32>
    %2 = tpu.matmul %0, %1, %cst {dimension_numbers = #tpu.dot_dimension_numbers<[1], [0], [0], [1], [0, 0, 1, 1], [], []>} : vector<64x64xbf16>, vector<64x32xbf16>, vector<64x32xf32> -> vector<64x32xf32>
    %c0_3 = arith.constant 0 : index
    %c0_4 = arith.constant 0 : index
    %3 = vector.load %arg3[%c0_3, %c0_4] : memref<1x32xf32, #tpu.memory_space<vmem>>, vector<1x32xf32>
    %4 = vector.broadcast %3 : vector<1x32xf32> to vector<64x32xf32>
    %5 = arith.addf %2, %4 : vector<64x32xf32>
    %c0_5 = arith.constant 0 : index
    %c0_6 = arith.constant 0 : index
    %6 = vector.load %arg4[%c0_5, %c0_6] : memref<64x32xf32, #tpu.memory_space<vmem>>, vector<64x32xf32>
    tpu.vector_store %arg4[%c0_5, %c0_6], %5 {strides = array<i32>} : memref<64x32xf32, #tpu.memory_space<vmem>>, vector<64x32xf32>,
    return
  }
  func.func @transform_0(%arg0: i32) -> (i32, i32) {
    %c0_i32 = arith.constant 0 : i32
    %c0_i32_0 = arith.constant 0 : i32
    return %arg0, %c0_i32 : i32, i32
  }
  func.func @transform_1(%arg0: i32) -> (i32, i32) {
    %c0_i32 = arith.constant 0 : i32
    %c0_i32_0 = arith.constant 0 : i32
    %c0_i32_1 = arith.constant 0 : i32
    return %c0_i32, %c0_i32_0 : i32, i32
  }
  func.func @transform_2(%arg0: i32) -> (i32, i32) {
    %c0_i32 = arith.constant 0 : i32
    %c0_i32_0 = arith.constant 0 : i32
    %c0_i32_1 = arith.constant 0 : i32
    return %c0_i32, %c0_i32_0 : i32, i32
  }
  func.func @transform_3(%arg0: i32) -> (i32, i32) {
    %c0_i32 = arith.constant 0 : i32
    %c0_i32_0 = arith.constant 0 : i32
    return %arg0, %c0_i32 : i32, i32
  }
}

module attributes {stable_mosaic.version = 11 : i64} {
  func.func @_block_kernel(%arg0: i32, %arg1: memref<1x40x32xbf16, #tpu.memory_space<vmem>>, %arg2: memref<1x32xf32, #tpu.memory_space<vmem>>, %arg3: memref<1x32xf32, #tpu.memory_space<vmem>>, %arg4: memref<32x96xbf16, #tpu.memory_space<vmem>>, %arg5: memref<1x96xf32, #tpu.memory_space<vmem>>, %arg6: memref<32x32xbf16, #tpu.memory_space<vmem>>, %arg7: memref<1x32xf32, #tpu.memory_space<vmem>>, %arg8: memref<1x32xf32, #tpu.memory_space<vmem>>, %arg9: memref<1x32xf32, #tpu.memory_space<vmem>>, %arg10: memref<32x64xbf16, #tpu.memory_space<vmem>>, %arg11: memref<1x64xf32, #tpu.memory_space<vmem>>, %arg12: memref<64x32xbf16, #tpu.memory_space<vmem>>, %arg13: memref<1x32xf32, #tpu.memory_space<vmem>>, %arg14: memref<1x40x32xbf16, #tpu.memory_space<vmem>>) attributes {dimension_semantics = [#tpu.dimension_semantics<parallel>], iteration_bounds = array<i64: 2>, scalar_prefetch = 0 : i64, scratch_operands = 0 : i64, tpu.core_type = #tpu.core_type<tc>, window_params = [{transform_indices = @transform_0, window_bounds = array<i64: 1, 40, 32>}, {pipeline_mode = #tpu.pipeline_mode<synchronous>, transform_indices = @transform_1, window_bounds = array<i64: 1, 32>}, {pipeline_mode = #tpu.pipeline_mode<synchronous>, transform_indices = @transform_2, window_bounds = array<i64: 1, 32>}, {pipeline_mode = #tpu.pipeline_mode<synchronous>, transform_indices = @transform_3, window_bounds = array<i64: 32, 96>}, {pipeline_mode = #tpu.pipeline_mode<synchronous>, transform_indices = @transform_4, window_bounds = array<i64: 1, 96>}, {pipeline_mode = #tpu.pipeline_mode<synchronous>, transform_indices = @transform_5, window_bounds = array<i64: 32, 32>}, {pipeline_mode = #tpu.pipeline_mode<synchronous>, transform_indices = @transform_6, window_bounds = array<i64: 1, 32>}, {pipeline_mode = #tpu.pipeline_mode<synchronous>, transform_indices = @transform_7, window_bounds = array<i64: 1, 32>}, {pipeline_mode = #tpu.pipeline_mode<synchronous>, transform_indices = @transform_8, window_bounds = array<i64: 1, 32>}, {pipeline_mode = #tpu.pipeline_mode<synchronous>, transform_indices = @transform_9, window_bounds = array<i64: 32, 64>}, {pipeline_mode = #tpu.pipeline_mode<synchronous>, transform_indices = @transform_10, window_bounds = array<i64: 1, 64>}, {pipeline_mode = #tpu.pipeline_mode<synchronous>, transform_indices = @transform_11, window_bounds = array<i64: 64, 32>}, {pipeline_mode = #tpu.pipeline_mode<synchronous>, transform_indices = @transform_12, window_bounds = array<i64: 1, 32>}, {transform_indices = @transform_13, window_bounds = array<i64: 1, 40, 32>}]} {
    %c0 = arith.constant 0 : index
    %c0_0 = arith.constant 0 : index
    %c0_1 = arith.constant 0 : index
    %0 = vector.load %arg1[%c0, %c0_0, %c0_1] : memref<1x40x32xbf16, #tpu.memory_space<vmem>>, vector<1x40x32xbf16>
    %1 = vector.shape_cast %0 : vector<1x40x32xbf16> to vector<40x32xbf16>
    %2 = arith.extf %1 : vector<40x32xbf16> to vector<40x32xf32>
    %c0_2 = arith.constant 0 : index
    %c0_3 = arith.constant 0 : index
    %3 = vector.load %arg2[%c0_2, %c0_3] : memref<1x32xf32, #tpu.memory_space<vmem>>, vector<1x32xf32>
    %c0_4 = arith.constant 0 : index
    %c0_5 = arith.constant 0 : index
    %4 = vector.load %arg3[%c0_4, %c0_5] : memref<1x32xf32, #tpu.memory_space<vmem>>, vector<1x32xf32>
    %cst = arith.constant dense<0.000000e+00> : vector<40xf32>
    %5 = vector.multi_reduction <add>, %2, %cst [1] : vector<40x32xf32> to vector<40xf32>
    %6 = vector.shape_cast %5 : vector<40xf32> to vector<40x1xf32>
    %cst_6 = arith.constant 3.200000e+01 : f32
    %7 = vector.broadcast %cst_6 : f32 to vector<40x1xf32>
    %8 = arith.divf %6, %7 : vector<40x1xf32>
    %9 = vector.broadcast %8 : vector<40x1xf32> to vector<40x32xf32>
    %10 = arith.subf %2, %9 : vector<40x32xf32>
    %11 = arith.mulf %10, %10 : vector<40x32xf32>
    %cst_7 = arith.constant dense<0.000000e+00> : vector<40xf32>
    %12 = vector.multi_reduction <add>, %11, %cst_7 [1] : vector<40x32xf32> to vector<40xf32>
    %13 = vector.shape_cast %12 : vector<40xf32> to vector<40x1xf32>
    %cst_8 = arith.constant 3.200000e+01 : f32
    %14 = vector.broadcast %cst_8 : f32 to vector<40x1xf32>
    %15 = arith.divf %13, %14 : vector<40x1xf32>
    %cst_9 = arith.constant 9.99999974E-6 : f32
    %16 = vector.broadcast %cst_9 : f32 to vector<40x1xf32>
    %17 = arith.addf %15, %16 : vector<40x1xf32>
    %18 = math.rsqrt %17 : vector<40x1xf32>
    %19 = vector.broadcast %18 : vector<40x1xf32> to vector<40x32xf32>
    %20 = arith.mulf %10, %19 : vector<40x32xf32>
    %21 = vector.broadcast %3 : vector<1x32xf32> to vector<40x32xf32>
    %22 = arith.mulf %20, %21 : vector<40x32xf32>
    %23 = vector.broadcast %4 : vector<1x32xf32> to vector<40x32xf32>
    %24 = arith.addf %22, %23 : vector<40x32xf32>
    %25 = arith.truncf %24 : vector<40x32xf32> to vector<40x32xbf16>
    %c0_10 = arith.constant 0 : index
    %c0_11 = arith.constant 0 : index
    %26 = vector.load %arg4[%c0_10, %c0_11] : memref<32x96xbf16, #tpu.memory_space<vmem>>, vector<32x96xbf16>
    %cst_12 = arith.constant dense<0.000000e+00> : vector<40x96xf32>
    %27 = tpu.matmul %25, %26, %cst_12 {dimension_numbers = #tpu.dot_dimension_numbers<[1], [0], [0], [1], [0, 0, 1, 1], [], []>} : vector<40x32xbf16>, vector<32x96xbf16>, vector<40x96xf32> -> vector<40x96xf32>
    %c0_13 = arith.constant 0 : index
    %c0_14 = arith.constant 0 : index
    %28 = vector.load %arg5[%c0_13, %c0_14] : memref<1x96xf32, #tpu.memory_space<vmem>>, vector<1x96xf32>
    %29 = vector.broadcast %28 : vector<1x96xf32> to vector<40x96xf32>
    %30 = arith.addf %27, %29 : vector<40x96xf32>
    %31 = tpu.iota {dimensions = array<i32: 1>} : vector<1x40xi32>
    %c33_i32 = arith.constant 33 : i32
    %32 = vector.broadcast %c33_i32 : i32 to vector<1x40xi32>
    %33 = arith.cmpi slt, %31, %32 : vector<1x40xi32>
    %34 = vector.extract_strided_slice %30 {offsets = [0, 0], sizes = [40, 8], strides = [1, 1]} : vector<40x96xf32> to vector<40x8xf32>
    %35 = vector.extract_strided_slice %30 {offsets = [0, 32], sizes = [40, 8], strides = [1, 1]} : vector<40x96xf32> to vector<40x8xf32>
    %36 = vector.extract_strided_slice %30 {offsets = [0, 64], sizes = [40, 8], strides = [1, 1]} : vector<40x96xf32> to vector<40x8xf32>
    %37 = arith.truncf %34 : vector<40x8xf32> to vector<40x8xbf16>
    %38 = arith.truncf %35 : vector<40x8xf32> to vector<40x8xbf16>
    %cst_15 = arith.constant dense<0.000000e+00> : vector<40x40xf32>
    %39 = tpu.matmul %37, %38, %cst_15 {dimension_numbers = #tpu.dot_dimension_numbers<[1], [1], [0], [0], [0, 0, 1, 0], [], []>} : vector<40x8xbf16>, vector<40x8xbf16>, vector<40x40xf32> -> vector<40x40xf32>
    %cst_16 = arith.constant 0.353553385 : f32
    %40 = vector.broadcast %cst_16 : f32 to vector<40x40xf32>
    %41 = arith.mulf %39, %40 : vector<40x40xf32>
    %cst_17 = arith.constant -1.000000e+30 : f32
    %42 = vector.shape_cast %33 : vector<1x40xi1> to vector<1x40xi1>
    %43 = vector.broadcast %42 : vector<1x40xi1> to vector<40x40xi1>
    %44 = vector.broadcast %cst_17 : f32 to vector<40x40xf32>
    %45 = arith.select %43, %41, %44 : vector<40x40xi1>, vector<40x40xf32>
    %cst_18 = arith.constant dense<0xFF800000> : vector<40xf32>
    %46 = vector.multi_reduction <maximumf>, %45, %cst_18 [1] : vector<40x40xf32> to vector<40xf32>
    %47 = vector.shape_cast %46 : vector<40xf32> to vector<40x1xf32>
    %48 = vector.broadcast %47 : vector<40x1xf32> to vector<40x40xf32>
    %49 = arith.subf %45, %48 : vector<40x40xf32>
    %50 = math.exp %49 : vector<40x40xf32>
    %cst_19 = arith.constant dense<0.000000e+00> : vector<40xf32>
    %51 = vector.multi_reduction <add>, %50, %cst_19 [1] : vector<40x40xf32> to vector<40xf32>
    %52 = vector.shape_cast %51 : vector<40xf32> to vector<40x1xf32>
    %53 = tpu.reciprocal %52 {approx = true} : vector<40x1xf32> -> vector<40x1xf32>
    %54 = vector.broadcast %53 : vector<40x1xf32> to vector<40x40xf32>
    %55 = arith.mulf %50, %54 : vector<40x40xf32>
    %56 = arith.truncf %55 : vector<40x40xf32> to vector<40x40xbf16>
    %57 = arith.truncf %36 : vector<40x8xf32> to vector<40x8xbf16>
    %cst_20 = arith.constant dense<0.000000e+00> : vector<40x8xf32>
    %58 = tpu.matmul %56, %57, %cst_20 {dimension_numbers = #tpu.dot_dimension_numbers<[1], [0], [0], [1], [0, 0, 1, 1], [], []>} : vector<40x40xbf16>, vector<40x8xbf16>, vector<40x8xf32> -> vector<40x8xf32>
    %59 = vector.extract_strided_slice %30 {offsets = [0, 8], sizes = [40, 8], strides = [1, 1]} : vector<40x96xf32> to vector<40x8xf32>
    %60 = vector.extract_strided_slice %30 {offsets = [0, 40], sizes = [40, 8], strides = [1, 1]} : vector<40x96xf32> to vector<40x8xf32>
    %61 = vector.extract_strided_slice %30 {offsets = [0, 72], sizes = [40, 8], strides = [1, 1]} : vector<40x96xf32> to vector<40x8xf32>
    %62 = arith.truncf %59 : vector<40x8xf32> to vector<40x8xbf16>
    %63 = arith.truncf %60 : vector<40x8xf32> to vector<40x8xbf16>
    %cst_21 = arith.constant dense<0.000000e+00> : vector<40x40xf32>
    %64 = tpu.matmul %62, %63, %cst_21 {dimension_numbers = #tpu.dot_dimension_numbers<[1], [1], [0], [0], [0, 0, 1, 0], [], []>} : vector<40x8xbf16>, vector<40x8xbf16>, vector<40x40xf32> -> vector<40x40xf32>
    %cst_22 = arith.constant 0.353553385 : f32
    %65 = vector.broadcast %cst_22 : f32 to vector<40x40xf32>
    %66 = arith.mulf %64, %65 : vector<40x40xf32>
    %cst_23 = arith.constant -1.000000e+30 : f32
    %67 = vector.shape_cast %33 : vector<1x40xi1> to vector<1x40xi1>
    %68 = vector.broadcast %67 : vector<1x40xi1> to vector<40x40xi1>
    %69 = vector.broadcast %cst_23 : f32 to vector<40x40xf32>
    %70 = arith.select %68, %66, %69 : vector<40x40xi1>, vector<40x40xf32>
    %cst_24 = arith.constant dense<0xFF800000> : vector<40xf32>
    %71 = vector.multi_reduction <maximumf>, %70, %cst_24 [1] : vector<40x40xf32> to vector<40xf32>
    %72 = vector.shape_cast %71 : vector<40xf32> to vector<40x1xf32>
    %73 = vector.broadcast %72 : vector<40x1xf32> to vector<40x40xf32>
    %74 = arith.subf %70, %73 : vector<40x40xf32>
    %75 = math.exp %74 : vector<40x40xf32>
    %cst_25 = arith.constant dense<0.000000e+00> : vector<40xf32>
    %76 = vector.multi_reduction <add>, %75, %cst_25 [1] : vector<40x40xf32> to vector<40xf32>
    %77 = vector.shape_cast %76 : vector<40xf32> to vector<40x1xf32>
    %78 = tpu.reciprocal %77 {approx = true} : vector<40x1xf32> -> vector<40x1xf32>
    %79 = vector.broadcast %78 : vector<40x1xf32> to vector<40x40xf32>
    %80 = arith.mulf %75, %79 : vector<40x40xf32>
    %81 = arith.truncf %80 : vector<40x40xf32> to vector<40x40xbf16>
    %82 = arith.truncf %61 : vector<40x8xf32> to vector<40x8xbf16>
    %cst_26 = arith.constant dense<0.000000e+00> : vector<40x8xf32>
    %83 = tpu.matmul %81, %82, %cst_26 {dimension_numbers = #tpu.dot_dimension_numbers<[1], [0], [0], [1], [0, 0, 1, 1], [], []>} : vector<40x40xbf16>, vector<40x8xbf16>, vector<40x8xf32> -> vector<40x8xf32>
    %84 = vector.extract_strided_slice %30 {offsets = [0, 16], sizes = [40, 8], strides = [1, 1]} : vector<40x96xf32> to vector<40x8xf32>
    %85 = vector.extract_strided_slice %30 {offsets = [0, 48], sizes = [40, 8], strides = [1, 1]} : vector<40x96xf32> to vector<40x8xf32>
    %86 = vector.extract_strided_slice %30 {offsets = [0, 80], sizes = [40, 8], strides = [1, 1]} : vector<40x96xf32> to vector<40x8xf32>
    %87 = arith.truncf %84 : vector<40x8xf32> to vector<40x8xbf16>
    %88 = arith.truncf %85 : vector<40x8xf32> to vector<40x8xbf16>
    %cst_27 = arith.constant dense<0.000000e+00> : vector<40x40xf32>
    %89 = tpu.matmul %87, %88, %cst_27 {dimension_numbers = #tpu.dot_dimension_numbers<[1], [1], [0], [0], [0, 0, 1, 0], [], []>} : vector<40x8xbf16>, vector<40x8xbf16>, vector<40x40xf32> -> vector<40x40xf32>
    %cst_28 = arith.constant 0.353553385 : f32
    %90 = vector.broadcast %cst_28 : f32 to vector<40x40xf32>
    %91 = arith.mulf %89, %90 : vector<40x40xf32>
    %cst_29 = arith.constant -1.000000e+30 : f32
    %92 = vector.shape_cast %33 : vector<1x40xi1> to vector<1x40xi1>
    %93 = vector.broadcast %92 : vector<1x40xi1> to vector<40x40xi1>
    %94 = vector.broadcast %cst_29 : f32 to vector<40x40xf32>
    %95 = arith.select %93, %91, %94 : vector<40x40xi1>, vector<40x40xf32>
    %cst_30 = arith.constant dense<0xFF800000> : vector<40xf32>
    %96 = vector.multi_reduction <maximumf>, %95, %cst_30 [1] : vector<40x40xf32> to vector<40xf32>
    %97 = vector.shape_cast %96 : vector<40xf32> to vector<40x1xf32>
    %98 = vector.broadcast %97 : vector<40x1xf32> to vector<40x40xf32>
    %99 = arith.subf %95, %98 : vector<40x40xf32>
    %100 = math.exp %99 : vector<40x40xf32>
    %cst_31 = arith.constant dense<0.000000e+00> : vector<40xf32>
    %101 = vector.multi_reduction <add>, %100, %cst_31 [1] : vector<40x40xf32> to vector<40xf32>
    %102 = vector.shape_cast %101 : vector<40xf32> to vector<40x1xf32>
    %103 = tpu.reciprocal %102 {approx = true} : vector<40x1xf32> -> vector<40x1xf32>
    %104 = vector.broadcast %103 : vector<40x1xf32> to vector<40x40xf32>
    %105 = arith.mulf %100, %104 : vector<40x40xf32>
    %106 = arith.truncf %105 : vector<40x40xf32> to vector<40x40xbf16>
    %107 = arith.truncf %86 : vector<40x8xf32> to vector<40x8xbf16>
    %cst_32 = arith.constant dense<0.000000e+00> : vector<40x8xf32>
    %108 = tpu.matmul %106, %107, %cst_32 {dimension_numbers = #tpu.dot_dimension_numbers<[1], [0], [0], [1], [0, 0, 1, 1], [], []>} : vector<40x40xbf16>, vector<40x8xbf16>, vector<40x8xf32> -> vector<40x8xf32>
    %109 = vector.extract_strided_slice %30 {offsets = [0, 24], sizes = [40, 8], strides = [1, 1]} : vector<40x96xf32> to vector<40x8xf32>
    %110 = vector.extract_strided_slice %30 {offsets = [0, 56], sizes = [40, 8], strides = [1, 1]} : vector<40x96xf32> to vector<40x8xf32>
    %111 = vector.extract_strided_slice %30 {offsets = [0, 88], sizes = [40, 8], strides = [1, 1]} : vector<40x96xf32> to vector<40x8xf32>
    %112 = arith.truncf %109 : vector<40x8xf32> to vector<40x8xbf16>
    %113 = arith.truncf %110 : vector<40x8xf32> to vector<40x8xbf16>
    %cst_33 = arith.constant dense<0.000000e+00> : vector<40x40xf32>
    %114 = tpu.matmul %112, %113, %cst_33 {dimension_numbers = #tpu.dot_dimension_numbers<[1], [1], [0], [0], [0, 0, 1, 0], [], []>} : vector<40x8xbf16>, vector<40x8xbf16>, vector<40x40xf32> -> vector<40x40xf32>
    %cst_34 = arith.constant 0.353553385 : f32
    %115 = vector.broadcast %cst_34 : f32 to vector<40x40xf32>
    %116 = arith.mulf %114, %115 : vector<40x40xf32>
    %cst_35 = arith.constant -1.000000e+30 : f32
    %117 = vector.shape_cast %33 : vector<1x40xi1> to vector<1x40xi1>
    %118 = vector.broadcast %117 : vector<1x40xi1> to vector<40x40xi1>
    %119 = vector.broadcast %cst_35 : f32 to vector<40x40xf32>
    %120 = arith.select %118, %116, %119 : vector<40x40xi1>, vector<40x40xf32>
    %cst_36 = arith.constant dense<0xFF800000> : vector<40xf32>
    %121 = vector.multi_reduction <maximumf>, %120, %cst_36 [1] : vector<40x40xf32> to vector<40xf32>
    %122 = vector.shape_cast %121 : vector<40xf32> to vector<40x1xf32>
    %123 = vector.broadcast %122 : vector<40x1xf32> to vector<40x40xf32>
    %124 = arith.subf %120, %123 : vector<40x40xf32>
    %125 = math.exp %124 : vector<40x40xf32>
    %cst_37 = arith.constant dense<0.000000e+00> : vector<40xf32>
    %126 = vector.multi_reduction <add>, %125, %cst_37 [1] : vector<40x40xf32> to vector<40xf32>
    %127 = vector.shape_cast %126 : vector<40xf32> to vector<40x1xf32>
    %128 = tpu.reciprocal %127 {approx = true} : vector<40x1xf32> -> vector<40x1xf32>
    %129 = vector.broadcast %128 : vector<40x1xf32> to vector<40x40xf32>
    %130 = arith.mulf %125, %129 : vector<40x40xf32>
    %131 = arith.truncf %130 : vector<40x40xf32> to vector<40x40xbf16>
    %132 = arith.truncf %111 : vector<40x8xf32> to vector<40x8xbf16>
    %cst_38 = arith.constant dense<0.000000e+00> : vector<40x8xf32>
    %133 = tpu.matmul %131, %132, %cst_38 {dimension_numbers = #tpu.dot_dimension_numbers<[1], [0], [0], [1], [0, 0, 1, 1], [], []>} : vector<40x40xbf16>, vector<40x8xbf16>, vector<40x8xf32> -> vector<40x8xf32>
    %134 = tpu.concatenate %58, %83, %108, %133 in 1 : vector<40x8xf32>, vector<40x8xf32>, vector<40x8xf32>, vector<40x8xf32> -> vector<40x32xf32>
    %135 = arith.truncf %134 : vector<40x32xf32> to vector<40x32xbf16>
    %c0_39 = arith.constant 0 : index
    %c0_40 = arith.constant 0 : index
    %136 = vector.load %arg6[%c0_39, %c0_40] : memref<32x32xbf16, #tpu.memory_space<vmem>>, vector<32x32xbf16>
    %cst_41 = arith.constant dense<0.000000e+00> : vector<40x32xf32>
    %137 = tpu.matmul %135, %136, %cst_41 {dimension_numbers = #tpu.dot_dimension_numbers<[1], [0], [0], [1], [0, 0, 1, 1], [], []>} : vector<40x32xbf16>, vector<32x32xbf16>, vector<40x32xf32> -> vector<40x32xf32>
    %138 = arith.addf %2, %137 : vector<40x32xf32>
    %c0_42 = arith.constant 0 : index
    %c0_43 = arith.constant 0 : index
    %139 = vector.load %arg7[%c0_42, %c0_43] : memref<1x32xf32, #tpu.memory_space<vmem>>, vector<1x32xf32>
    %140 = vector.broadcast %139 : vector<1x32xf32> to vector<40x32xf32>
    %141 = arith.addf %138, %140 : vector<40x32xf32>
    %c0_44 = arith.constant 0 : index
    %c0_45 = arith.constant 0 : index
    %142 = vector.load %arg8[%c0_44, %c0_45] : memref<1x32xf32, #tpu.memory_space<vmem>>, vector<1x32xf32>
    %c0_46 = arith.constant 0 : index
    %c0_47 = arith.constant 0 : index
    %143 = vector.load %arg9[%c0_46, %c0_47] : memref<1x32xf32, #tpu.memory_space<vmem>>, vector<1x32xf32>
    %cst_48 = arith.constant dense<0.000000e+00> : vector<40xf32>
    %144 = vector.multi_reduction <add>, %141, %cst_48 [1] : vector<40x32xf32> to vector<40xf32>
    %145 = vector.shape_cast %144 : vector<40xf32> to vector<40x1xf32>
    %cst_49 = arith.constant 3.200000e+01 : f32
    %146 = vector.broadcast %cst_49 : f32 to vector<40x1xf32>
    %147 = arith.divf %145, %146 : vector<40x1xf32>
    %148 = vector.broadcast %147 : vector<40x1xf32> to vector<40x32xf32>
    %149 = arith.subf %141, %148 : vector<40x32xf32>
    %150 = arith.mulf %149, %149 : vector<40x32xf32>
    %cst_50 = arith.constant dense<0.000000e+00> : vector<40xf32>
    %151 = vector.multi_reduction <add>, %150, %cst_50 [1] : vector<40x32xf32> to vector<40xf32>
    %152 = vector.shape_cast %151 : vector<40xf32> to vector<40x1xf32>
    %cst_51 = arith.constant 3.200000e+01 : f32
    %153 = vector.broadcast %cst_51 : f32 to vector<40x1xf32>
    %154 = arith.divf %152, %153 : vector<40x1xf32>
    %cst_52 = arith.constant 9.99999974E-6 : f32
    %155 = vector.broadcast %cst_52 : f32 to vector<40x1xf32>
    %156 = arith.addf %154, %155 : vector<40x1xf32>
    %157 = math.rsqrt %156 : vector<40x1xf32>
    %158 = vector.broadcast %157 : vector<40x1xf32> to vector<40x32xf32>
    %159 = arith.mulf %149, %158 : vector<40x32xf32>
    %160 = vector.broadcast %142 : vector<1x32xf32> to vector<40x32xf32>
    %161 = arith.mulf %159, %160 : vector<40x32xf32>
    %162 = vector.broadcast %143 : vector<1x32xf32> to vector<40x32xf32>
    %163 = arith.addf %161, %162 : vector<40x32xf32>
    %164 = arith.truncf %163 : vector<40x32xf32> to vector<40x32xbf16>
    %c0_53 = arith.constant 0 : index
    %c0_54 = arith.constant 0 : index
    %165 = vector.load %arg10[%c0_53, %c0_54] : memref<32x64xbf16, #tpu.memory_space<vmem>>, vector<32x64xbf16>
    %cst_55 = arith.constant dense<0.000000e+00> : vector<40x64xf32>
    %166 = tpu.matmul %164, %165, %cst_55 {dimension_numbers = #tpu.dot_dimension_numbers<[1], [0], [0], [1], [0, 0, 1, 1], [], []>} : vector<40x32xbf16>, vector<32x64xbf16>, vector<40x64xf32> -> vector<40x64xf32>
    %c0_56 = arith.constant 0 : index
    %c0_57 = arith.constant 0 : index
    %167 = vector.load %arg11[%c0_56, %c0_57] : memref<1x64xf32, #tpu.memory_space<vmem>>, vector<1x64xf32>
    %168 = vector.broadcast %167 : vector<1x64xf32> to vector<40x64xf32>
    %169 = arith.addf %166, %168 : vector<40x64xf32>
    %170 = arith.mulf %169, %169 : vector<40x64xf32>
    %171 = arith.mulf %169, %170 : vector<40x64xf32>
    %cst_58 = arith.constant 4.471500e-02 : f32
    %172 = vector.broadcast %cst_58 : f32 to vector<40x64xf32>
    %173 = arith.mulf %172, %171 : vector<40x64xf32>
    %174 = arith.addf %169, %173 : vector<40x64xf32>
    %cst_59 = arith.constant 0.797884583 : f32
    %175 = vector.broadcast %cst_59 : f32 to vector<40x64xf32>
    %176 = arith.mulf %175, %174 : vector<40x64xf32>
    %177 = math.tanh %176 : vector<40x64xf32>
    %cst_60 = arith.constant 1.000000e+00 : f32
    %178 = vector.broadcast %cst_60 : f32 to vector<40x64xf32>
    %179 = arith.addf %178, %177 : vector<40x64xf32>
    %cst_61 = arith.constant 5.000000e-01 : f32
    %180 = vector.broadcast %cst_61 : f32 to vector<40x64xf32>
    %181 = arith.mulf %180, %179 : vector<40x64xf32>
    %182 = arith.mulf %169, %181 : vector<40x64xf32>
    %183 = arith.truncf %182 : vector<40x64xf32> to vector<40x64xbf16>
    %c0_62 = arith.constant 0 : index
    %c0_63 = arith.constant 0 : index
    %184 = vector.load %arg12[%c0_62, %c0_63] : memref<64x32xbf16, #tpu.memory_space<vmem>>, vector<64x32xbf16>
    %cst_64 = arith.constant dense<0.000000e+00> : vector<40x32xf32>
    %185 = tpu.matmul %183, %184, %cst_64 {dimension_numbers = #tpu.dot_dimension_numbers<[1], [0], [0], [1], [0, 0, 1, 1], [], []>} : vector<40x64xbf16>, vector<64x32xbf16>, vector<40x32xf32> -> vector<40x32xf32>
    %c0_65 = arith.constant 0 : index
    %c0_66 = arith.constant 0 : index
    %186 = vector.load %arg13[%c0_65, %c0_66] : memref<1x32xf32, #tpu.memory_space<vmem>>, vector<1x32xf32>
    %187 = vector.broadcast %186 : vector<1x32xf32> to vector<40x32xf32>
    %188 = arith.addf %185, %187 : vector<40x32xf32>
    %189 = arith.addf %141, %188 : vector<40x32xf32>
    %190 = arith.truncf %189 : vector<40x32xf32> to vector<40x32xbf16>
    %c0_67 = arith.constant 0 : index
    %c0_68 = arith.constant 0 : index
    %c0_69 = arith.constant 0 : index
    %191 = vector.load %arg14[%c0_67, %c0_68, %c0_69] : memref<1x40x32xbf16, #tpu.memory_space<vmem>>, vector<1x40x32xbf16>
    %192 = vector.shape_cast %191 : vector<1x40x32xbf16> to vector<40x32xbf16>
    %193 = vector.shape_cast %190 : vector<40x32xbf16> to vector<1x40x32xbf16>
    tpu.vector_store %arg14[%c0_67, %c0_68, %c0_69], %193 {strides = array<i32>} : memref<1x40x32xbf16, #tpu.memory_space<vmem>>, vector<1x40x32xbf16>,
    return
  }
  func.func @transform_0(%arg0: i32) -> (i32, i32, i32) {
    %c0_i32 = arith.constant 0 : i32
    %c0_i32_0 = arith.constant 0 : i32
    %c0_i32_1 = arith.constant 0 : i32
    return %arg0, %c0_i32, %c0_i32_0 : i32, i32, i32
  }
  func.func @transform_1(%arg0: i32) -> (i32, i32) {
    %c0_i32 = arith.constant 0 : i32
    %c0_i32_0 = arith.constant 0 : i32
    %c0_i32_1 = arith.constant 0 : i32
    return %c0_i32, %c0_i32_0 : i32, i32
  }
  func.func @transform_2(%arg0: i32) -> (i32, i32) {
    %c0_i32 = arith.constant 0 : i32
    %c0_i32_0 = arith.constant 0 : i32
    %c0_i32_1 = arith.constant 0 : i32
    return %c0_i32, %c0_i32_0 : i32, i32
  }
  func.func @transform_3(%arg0: i32) -> (i32, i32) {
    %c0_i32 = arith.constant 0 : i32
    %c0_i32_0 = arith.constant 0 : i32
    %c0_i32_1 = arith.constant 0 : i32
    return %c0_i32, %c0_i32_0 : i32, i32
  }
  func.func @transform_4(%arg0: i32) -> (i32, i32) {
    %c0_i32 = arith.constant 0 : i32
    %c0_i32_0 = arith.constant 0 : i32
    %c0_i32_1 = arith.constant 0 : i32
    return %c0_i32, %c0_i32_0 : i32, i32
  }
  func.func @transform_5(%arg0: i32) -> (i32, i32) {
    %c0_i32 = arith.constant 0 : i32
    %c0_i32_0 = arith.constant 0 : i32
    %c0_i32_1 = arith.constant 0 : i32
    return %c0_i32, %c0_i32_0 : i32, i32
  }
  func.func @transform_6(%arg0: i32) -> (i32, i32) {
    %c0_i32 = arith.constant 0 : i32
    %c0_i32_0 = arith.constant 0 : i32
    %c0_i32_1 = arith.constant 0 : i32
    return %c0_i32, %c0_i32_0 : i32, i32
  }
  func.func @transform_7(%arg0: i32) -> (i32, i32) {
    %c0_i32 = arith.constant 0 : i32
    %c0_i32_0 = arith.constant 0 : i32
    %c0_i32_1 = arith.constant 0 : i32
    return %c0_i32, %c0_i32_0 : i32, i32
  }
  func.func @transform_8(%arg0: i32) -> (i32, i32) {
    %c0_i32 = arith.constant 0 : i32
    %c0_i32_0 = arith.constant 0 : i32
    %c0_i32_1 = arith.constant 0 : i32
    return %c0_i32, %c0_i32_0 : i32, i32
  }
  func.func @transform_9(%arg0: i32) -> (i32, i32) {
    %c0_i32 = arith.constant 0 : i32
    %c0_i32_0 = arith.constant 0 : i32
    %c0_i32_1 = arith.constant 0 : i32
    return %c0_i32, %c0_i32_0 : i32, i32
  }
  func.func @transform_10(%arg0: i32) -> (i32, i32) {
    %c0_i32 = arith.constant 0 : i32
    %c0_i32_0 = arith.constant 0 : i32
    %c0_i32_1 = arith.constant 0 : i32
    return %c0_i32, %c0_i32_0 : i32, i32
  }
  func.func @transform_11(%arg0: i32) -> (i32, i32) {
    %c0_i32 = arith.constant 0 : i32
    %c0_i32_0 = arith.constant 0 : i32
    %c0_i32_1 = arith.constant 0 : i32
    return %c0_i32, %c0_i32_0 : i32, i32
  }
  func.func @transform_12(%arg0: i32) -> (i32, i32) {
    %c0_i32 = arith.constant 0 : i32
    %c0_i32_0 = arith.constant 0 : i32
    %c0_i32_1 = arith.constant 0 : i32
    return %c0_i32, %c0_i32_0 : i32, i32
  }
  func.func @transform_13(%arg0: i32) -> (i32, i32, i32) {
    %c0_i32 = arith.constant 0 : i32
    %c0_i32_0 = arith.constant 0 : i32
    %c0_i32_1 = arith.constant 0 : i32
    return %arg0, %c0_i32, %c0_i32_0 : i32, i32, i32
  }
}

module attributes {stable_mosaic.version = 11 : i64} {
  func.func @_ln_kernel(%arg0: i32, %arg1: memref<80x32xbf16, #tpu.memory_space<vmem>>, %arg2: memref<1x32xf32, #tpu.memory_space<vmem>>, %arg3: memref<1x32xf32, #tpu.memory_space<vmem>>, %arg4: memref<80x32xbf16, #tpu.memory_space<vmem>>) attributes {dimension_semantics = [#tpu.dimension_semantics<parallel>], iteration_bounds = array<i64: 1>, scalar_prefetch = 0 : i64, scratch_operands = 0 : i64, tpu.core_type = #tpu.core_type<tc>, window_params = [{transform_indices = @transform_0, window_bounds = array<i64: 80, 32>}, {pipeline_mode = #tpu.pipeline_mode<synchronous>, transform_indices = @transform_1, window_bounds = array<i64: 1, 32>}, {pipeline_mode = #tpu.pipeline_mode<synchronous>, transform_indices = @transform_2, window_bounds = array<i64: 1, 32>}, {transform_indices = @transform_3, window_bounds = array<i64: 80, 32>}]} {
    %c0 = arith.constant 0 : index
    %c0_0 = arith.constant 0 : index
    %0 = vector.load %arg1[%c0, %c0_0] : memref<80x32xbf16, #tpu.memory_space<vmem>>, vector<80x32xbf16>
    %1 = arith.extf %0 : vector<80x32xbf16> to vector<80x32xf32>
    %c0_1 = arith.constant 0 : index
    %c0_2 = arith.constant 0 : index
    %2 = vector.load %arg2[%c0_1, %c0_2] : memref<1x32xf32, #tpu.memory_space<vmem>>, vector<1x32xf32>
    %c0_3 = arith.constant 0 : index
    %c0_4 = arith.constant 0 : index
    %3 = vector.load %arg3[%c0_3, %c0_4] : memref<1x32xf32, #tpu.memory_space<vmem>>, vector<1x32xf32>
    %cst = arith.constant dense<0.000000e+00> : vector<80xf32>
    %4 = vector.multi_reduction <add>, %1, %cst [1] : vector<80x32xf32> to vector<80xf32>
    %5 = vector.shape_cast %4 : vector<80xf32> to vector<80x1xf32>
    %cst_5 = arith.constant 3.200000e+01 : f32
    %6 = vector.broadcast %cst_5 : f32 to vector<80x1xf32>
    %7 = arith.divf %5, %6 : vector<80x1xf32>
    %8 = vector.broadcast %7 : vector<80x1xf32> to vector<80x32xf32>
    %9 = arith.subf %1, %8 : vector<80x32xf32>
    %10 = arith.mulf %9, %9 : vector<80x32xf32>
    %cst_6 = arith.constant dense<0.000000e+00> : vector<80xf32>
    %11 = vector.multi_reduction <add>, %10, %cst_6 [1] : vector<80x32xf32> to vector<80xf32>
    %12 = vector.shape_cast %11 : vector<80xf32> to vector<80x1xf32>
    %cst_7 = arith.constant 3.200000e+01 : f32
    %13 = vector.broadcast %cst_7 : f32 to vector<80x1xf32>
    %14 = arith.divf %12, %13 : vector<80x1xf32>
    %cst_8 = arith.constant 9.99999974E-6 : f32
    %15 = vector.broadcast %cst_8 : f32 to vector<80x1xf32>
    %16 = arith.addf %14, %15 : vector<80x1xf32>
    %17 = math.rsqrt %16 : vector<80x1xf32>
    %18 = vector.broadcast %17 : vector<80x1xf32> to vector<80x32xf32>
    %19 = arith.mulf %9, %18 : vector<80x32xf32>
    %20 = vector.broadcast %2 : vector<1x32xf32> to vector<80x32xf32>
    %21 = arith.mulf %19, %20 : vector<80x32xf32>
    %22 = vector.broadcast %3 : vector<1x32xf32> to vector<80x32xf32>
    %23 = arith.addf %21, %22 : vector<80x32xf32>
    %24 = arith.truncf %23 : vector<80x32xf32> to vector<80x32xbf16>
    %c0_9 = arith.constant 0 : index
    %c0_10 = arith.constant 0 : index
    %25 = vector.load %arg4[%c0_9, %c0_10] : memref<80x32xbf16, #tpu.memory_space<vmem>>, vector<80x32xbf16>
    tpu.vector_store %arg4[%c0_9, %c0_10], %24 {strides = array<i32>} : memref<80x32xbf16, #tpu.memory_space<vmem>>, vector<80x32xbf16>,
    return
  }
  func.func @transform_0(%arg0: i32) -> (i32, i32) {
    %c0_i32 = arith.constant 0 : i32
    %c0_i32_0 = arith.constant 0 : i32
    return %arg0, %c0_i32 : i32, i32
  }
  func.func @transform_1(%arg0: i32) -> (i32, i32) {
    %c0_i32 = arith.constant 0 : i32
    %c0_i32_0 = arith.constant 0 : i32
    %c0_i32_1 = arith.constant 0 : i32
    return %c0_i32, %c0_i32_0 : i32, i32
  }
  func.func @transform_2(%arg0: i32) -> (i32, i32) {
    %c0_i32 = arith.constant 0 : i32
    %c0_i32_0 = arith.constant 0 : i32
    %c0_i32_1 = arith.constant 0 : i32
    return %c0_i32, %c0_i32_0 : i32, i32
  }
  func.func @transform_3(%arg0: i32) -> (i32, i32) {
    %c0_i32 = arith.constant 0 : i32
    %c0_i32_0 = arith.constant 0 : i32
    return %arg0, %c0_i32 : i32, i32
  }
}

module attributes {stable_mosaic.version = 11 : i64} {
  func.func @_convt_ln_gelu_kernel(%arg0: i32, %arg1: i32, %arg2: memref<32x64xbf16, #tpu.memory_space<vmem>>, %arg3: memref<1x64x64xbf16, #tpu.memory_space<vmem>>, %arg4: memref<1x1x64xf32, #tpu.memory_space<vmem>>, %arg5: memref<1x64xf32, #tpu.memory_space<vmem>>, %arg6: memref<1x64xf32, #tpu.memory_space<vmem>>, %arg7: memref<1x32x64xbf16, #tpu.memory_space<vmem>>) attributes {dimension_semantics = [#tpu.dimension_semantics<parallel>, #tpu.dimension_semantics<parallel>], iteration_bounds = array<i64: 4, 1>, scalar_prefetch = 0 : i64, scratch_operands = 0 : i64, tpu.core_type = #tpu.core_type<tc>, window_params = [{transform_indices = @transform_0, window_bounds = array<i64: 32, 64>}, {transform_indices = @transform_1, window_bounds = array<i64: 1, 64, 64>}, {transform_indices = @transform_2, window_bounds = array<i64: 1, 1, 64>}, {pipeline_mode = #tpu.pipeline_mode<synchronous>, transform_indices = @transform_3, window_bounds = array<i64: 1, 64>}, {pipeline_mode = #tpu.pipeline_mode<synchronous>, transform_indices = @transform_4, window_bounds = array<i64: 1, 64>}, {transform_indices = @transform_5, window_bounds = array<i64: 1, 32, 64>}]} {
    %c0 = arith.constant 0 : index
    %c0_0 = arith.constant 0 : index
    %0 = vector.load %arg2[%c0, %c0_0] : memref<32x64xbf16, #tpu.memory_space<vmem>>, vector<32x64xbf16>
    %c0_1 = arith.constant 0 : index
    %c0_2 = arith.constant 0 : index
    %c0_3 = arith.constant 0 : index
    %1 = vector.load %arg3[%c0_1, %c0_2, %c0_3] : memref<1x64x64xbf16, #tpu.memory_space<vmem>>, vector<1x64x64xbf16>
    %2 = vector.shape_cast %1 : vector<1x64x64xbf16> to vector<64x64xbf16>
    %cst = arith.constant dense<0.000000e+00> : vector<32x64xf32>
    %3 = tpu.matmul %0, %2, %cst {dimension_numbers = #tpu.dot_dimension_numbers<[1], [0], [0], [1], [0, 0, 1, 1], [], []>} : vector<32x64xbf16>, vector<64x64xbf16>, vector<32x64xf32> -> vector<32x64xf32>
    %c0_4 = arith.constant 0 : index
    %c0_5 = arith.constant 0 : index
    %c0_6 = arith.constant 0 : index
    %4 = vector.load %arg4[%c0_4, %c0_5, %c0_6] : memref<1x1x64xf32, #tpu.memory_space<vmem>>, vector<1x1x64xf32>
    %5 = vector.shape_cast %4 : vector<1x1x64xf32> to vector<1x64xf32>
    %6 = vector.broadcast %5 : vector<1x64xf32> to vector<32x64xf32>
    %7 = arith.addf %3, %6 : vector<32x64xf32>
    %c0_7 = arith.constant 0 : index
    %c0_8 = arith.constant 0 : index
    %8 = vector.load %arg5[%c0_7, %c0_8] : memref<1x64xf32, #tpu.memory_space<vmem>>, vector<1x64xf32>
    %c0_9 = arith.constant 0 : index
    %c0_10 = arith.constant 0 : index
    %9 = vector.load %arg6[%c0_9, %c0_10] : memref<1x64xf32, #tpu.memory_space<vmem>>, vector<1x64xf32>
    %cst_11 = arith.constant dense<0.000000e+00> : vector<32xf32>
    %10 = vector.multi_reduction <add>, %7, %cst_11 [1] : vector<32x64xf32> to vector<32xf32>
    %11 = vector.shape_cast %10 : vector<32xf32> to vector<32x1xf32>
    %cst_12 = arith.constant 6.400000e+01 : f32
    %12 = vector.broadcast %cst_12 : f32 to vector<32x1xf32>
    %13 = arith.divf %11, %12 : vector<32x1xf32>
    %14 = vector.broadcast %13 : vector<32x1xf32> to vector<32x64xf32>
    %15 = arith.subf %7, %14 : vector<32x64xf32>
    %16 = arith.mulf %15, %15 : vector<32x64xf32>
    %cst_13 = arith.constant dense<0.000000e+00> : vector<32xf32>
    %17 = vector.multi_reduction <add>, %16, %cst_13 [1] : vector<32x64xf32> to vector<32xf32>
    %18 = vector.shape_cast %17 : vector<32xf32> to vector<32x1xf32>
    %cst_14 = arith.constant 6.400000e+01 : f32
    %19 = vector.broadcast %cst_14 : f32 to vector<32x1xf32>
    %20 = arith.divf %18, %19 : vector<32x1xf32>
    %cst_15 = arith.constant 9.99999997E-7 : f32
    %21 = vector.broadcast %cst_15 : f32 to vector<32x1xf32>
    %22 = arith.addf %20, %21 : vector<32x1xf32>
    %23 = math.rsqrt %22 : vector<32x1xf32>
    %24 = vector.broadcast %23 : vector<32x1xf32> to vector<32x64xf32>
    %25 = arith.mulf %15, %24 : vector<32x64xf32>
    %26 = vector.broadcast %8 : vector<1x64xf32> to vector<32x64xf32>
    %27 = arith.mulf %25, %26 : vector<32x64xf32>
    %28 = vector.broadcast %9 : vector<1x64xf32> to vector<32x64xf32>
    %29 = arith.addf %27, %28 : vector<32x64xf32>
    %30 = arith.mulf %29, %29 : vector<32x64xf32>
    %31 = arith.mulf %29, %30 : vector<32x64xf32>
    %cst_16 = arith.constant 4.471500e-02 : f32
    %32 = vector.broadcast %cst_16 : f32 to vector<32x64xf32>
    %33 = arith.mulf %32, %31 : vector<32x64xf32>
    %34 = arith.addf %29, %33 : vector<32x64xf32>
    %cst_17 = arith.constant 0.797884583 : f32
    %35 = vector.broadcast %cst_17 : f32 to vector<32x64xf32>
    %36 = arith.mulf %35, %34 : vector<32x64xf32>
    %37 = math.tanh %36 : vector<32x64xf32>
    %cst_18 = arith.constant 1.000000e+00 : f32
    %38 = vector.broadcast %cst_18 : f32 to vector<32x64xf32>
    %39 = arith.addf %38, %37 : vector<32x64xf32>
    %cst_19 = arith.constant 5.000000e-01 : f32
    %40 = vector.broadcast %cst_19 : f32 to vector<32x64xf32>
    %41 = arith.mulf %40, %39 : vector<32x64xf32>
    %42 = arith.mulf %29, %41 : vector<32x64xf32>
    %43 = arith.truncf %42 : vector<32x64xf32> to vector<32x64xbf16>
    %c0_20 = arith.constant 0 : index
    %c0_21 = arith.constant 0 : index
    %c0_22 = arith.constant 0 : index
    %44 = vector.load %arg7[%c0_20, %c0_21, %c0_22] : memref<1x32x64xbf16, #tpu.memory_space<vmem>>, vector<1x32x64xbf16>
    %45 = vector.shape_cast %44 : vector<1x32x64xbf16> to vector<32x64xbf16>
    %46 = vector.shape_cast %43 : vector<32x64xbf16> to vector<1x32x64xbf16>
    tpu.vector_store %arg7[%c0_20, %c0_21, %c0_22], %46 {strides = array<i32>} : memref<1x32x64xbf16, #tpu.memory_space<vmem>>, vector<1x32x64xbf16>,
    return
  }
  func.func @transform_0(%arg0: i32, %arg1: i32) -> (i32, i32) {
    %c0_i32 = arith.constant 0 : i32
    %c0_i32_0 = arith.constant 0 : i32
    return %arg1, %c0_i32 : i32, i32
  }
  func.func @transform_1(%arg0: i32, %arg1: i32) -> (i32, i32, i32) {
    %c0_i32 = arith.constant 0 : i32
    %c0_i32_0 = arith.constant 0 : i32
    %c0_i32_1 = arith.constant 0 : i32
    return %arg0, %c0_i32, %c0_i32_0 : i32, i32, i32
  }
  func.func @transform_2(%arg0: i32, %arg1: i32) -> (i32, i32, i32) {
    %c0_i32 = arith.constant 0 : i32
    %c0_i32_0 = arith.constant 0 : i32
    %c0_i32_1 = arith.constant 0 : i32
    return %arg0, %c0_i32, %c0_i32_0 : i32, i32, i32
  }
  func.func @transform_3(%arg0: i32, %arg1: i32) -> (i32, i32) {
    %c0_i32 = arith.constant 0 : i32
    %c0_i32_0 = arith.constant 0 : i32
    %c0_i32_1 = arith.constant 0 : i32
    return %c0_i32, %c0_i32_0 : i32, i32
  }
  func.func @transform_4(%arg0: i32, %arg1: i32) -> (i32, i32) {
    %c0_i32 = arith.constant 0 : i32
    %c0_i32_0 = arith.constant 0 : i32
    %c0_i32_1 = arith.constant 0 : i32
    return %c0_i32, %c0_i32_0 : i32, i32
  }
  func.func @transform_5(%arg0: i32, %arg1: i32) -> (i32, i32, i32) {
    %c0_i32 = arith.constant 0 : i32
    %c0_i32_0 = arith.constant 0 : i32
    return %arg0, %arg1, %c0_i32 : i32, i32, i32
  }
}

module attributes {stable_mosaic.version = 11 : i64} {
  func.func @_convt_ln_gelu_kernel(%arg0: i32, %arg1: i32, %arg2: memref<128x64xbf16, #tpu.memory_space<vmem>>, %arg3: memref<1x64x64xbf16, #tpu.memory_space<vmem>>, %arg4: memref<1x1x64xf32, #tpu.memory_space<vmem>>, %arg5: memref<1x64xf32, #tpu.memory_space<vmem>>, %arg6: memref<1x64xf32, #tpu.memory_space<vmem>>, %arg7: memref<1x128x64xbf16, #tpu.memory_space<vmem>>) attributes {dimension_semantics = [#tpu.dimension_semantics<parallel>, #tpu.dimension_semantics<parallel>], iteration_bounds = array<i64: 4, 1>, scalar_prefetch = 0 : i64, scratch_operands = 0 : i64, tpu.core_type = #tpu.core_type<tc>, window_params = [{transform_indices = @transform_0, window_bounds = array<i64: 128, 64>}, {transform_indices = @transform_1, window_bounds = array<i64: 1, 64, 64>}, {transform_indices = @transform_2, window_bounds = array<i64: 1, 1, 64>}, {pipeline_mode = #tpu.pipeline_mode<synchronous>, transform_indices = @transform_3, window_bounds = array<i64: 1, 64>}, {pipeline_mode = #tpu.pipeline_mode<synchronous>, transform_indices = @transform_4, window_bounds = array<i64: 1, 64>}, {transform_indices = @transform_5, window_bounds = array<i64: 1, 128, 64>}]} {
    %c0 = arith.constant 0 : index
    %c0_0 = arith.constant 0 : index
    %0 = vector.load %arg2[%c0, %c0_0] : memref<128x64xbf16, #tpu.memory_space<vmem>>, vector<128x64xbf16>
    %c0_1 = arith.constant 0 : index
    %c0_2 = arith.constant 0 : index
    %c0_3 = arith.constant 0 : index
    %1 = vector.load %arg3[%c0_1, %c0_2, %c0_3] : memref<1x64x64xbf16, #tpu.memory_space<vmem>>, vector<1x64x64xbf16>
    %2 = vector.shape_cast %1 : vector<1x64x64xbf16> to vector<64x64xbf16>
    %cst = arith.constant dense<0.000000e+00> : vector<128x64xf32>
    %3 = tpu.matmul %0, %2, %cst {dimension_numbers = #tpu.dot_dimension_numbers<[1], [0], [0], [1], [0, 0, 1, 1], [], []>} : vector<128x64xbf16>, vector<64x64xbf16>, vector<128x64xf32> -> vector<128x64xf32>
    %c0_4 = arith.constant 0 : index
    %c0_5 = arith.constant 0 : index
    %c0_6 = arith.constant 0 : index
    %4 = vector.load %arg4[%c0_4, %c0_5, %c0_6] : memref<1x1x64xf32, #tpu.memory_space<vmem>>, vector<1x1x64xf32>
    %5 = vector.shape_cast %4 : vector<1x1x64xf32> to vector<1x64xf32>
    %6 = vector.broadcast %5 : vector<1x64xf32> to vector<128x64xf32>
    %7 = arith.addf %3, %6 : vector<128x64xf32>
    %c0_7 = arith.constant 0 : index
    %c0_8 = arith.constant 0 : index
    %8 = vector.load %arg5[%c0_7, %c0_8] : memref<1x64xf32, #tpu.memory_space<vmem>>, vector<1x64xf32>
    %c0_9 = arith.constant 0 : index
    %c0_10 = arith.constant 0 : index
    %9 = vector.load %arg6[%c0_9, %c0_10] : memref<1x64xf32, #tpu.memory_space<vmem>>, vector<1x64xf32>
    %cst_11 = arith.constant dense<0.000000e+00> : vector<128xf32>
    %10 = vector.multi_reduction <add>, %7, %cst_11 [1] : vector<128x64xf32> to vector<128xf32>
    %11 = vector.shape_cast %10 : vector<128xf32> to vector<128x1xf32>
    %cst_12 = arith.constant 6.400000e+01 : f32
    %12 = vector.broadcast %cst_12 : f32 to vector<128x1xf32>
    %13 = arith.divf %11, %12 : vector<128x1xf32>
    %14 = vector.broadcast %13 : vector<128x1xf32> to vector<128x64xf32>
    %15 = arith.subf %7, %14 : vector<128x64xf32>
    %16 = arith.mulf %15, %15 : vector<128x64xf32>
    %cst_13 = arith.constant dense<0.000000e+00> : vector<128xf32>
    %17 = vector.multi_reduction <add>, %16, %cst_13 [1] : vector<128x64xf32> to vector<128xf32>
    %18 = vector.shape_cast %17 : vector<128xf32> to vector<128x1xf32>
    %cst_14 = arith.constant 6.400000e+01 : f32
    %19 = vector.broadcast %cst_14 : f32 to vector<128x1xf32>
    %20 = arith.divf %18, %19 : vector<128x1xf32>
    %cst_15 = arith.constant 9.99999997E-7 : f32
    %21 = vector.broadcast %cst_15 : f32 to vector<128x1xf32>
    %22 = arith.addf %20, %21 : vector<128x1xf32>
    %23 = math.rsqrt %22 : vector<128x1xf32>
    %24 = vector.broadcast %23 : vector<128x1xf32> to vector<128x64xf32>
    %25 = arith.mulf %15, %24 : vector<128x64xf32>
    %26 = vector.broadcast %8 : vector<1x64xf32> to vector<128x64xf32>
    %27 = arith.mulf %25, %26 : vector<128x64xf32>
    %28 = vector.broadcast %9 : vector<1x64xf32> to vector<128x64xf32>
    %29 = arith.addf %27, %28 : vector<128x64xf32>
    %30 = arith.mulf %29, %29 : vector<128x64xf32>
    %31 = arith.mulf %29, %30 : vector<128x64xf32>
    %cst_16 = arith.constant 4.471500e-02 : f32
    %32 = vector.broadcast %cst_16 : f32 to vector<128x64xf32>
    %33 = arith.mulf %32, %31 : vector<128x64xf32>
    %34 = arith.addf %29, %33 : vector<128x64xf32>
    %cst_17 = arith.constant 0.797884583 : f32
    %35 = vector.broadcast %cst_17 : f32 to vector<128x64xf32>
    %36 = arith.mulf %35, %34 : vector<128x64xf32>
    %37 = math.tanh %36 : vector<128x64xf32>
    %cst_18 = arith.constant 1.000000e+00 : f32
    %38 = vector.broadcast %cst_18 : f32 to vector<128x64xf32>
    %39 = arith.addf %38, %37 : vector<128x64xf32>
    %cst_19 = arith.constant 5.000000e-01 : f32
    %40 = vector.broadcast %cst_19 : f32 to vector<128x64xf32>
    %41 = arith.mulf %40, %39 : vector<128x64xf32>
    %42 = arith.mulf %29, %41 : vector<128x64xf32>
    %43 = arith.truncf %42 : vector<128x64xf32> to vector<128x64xbf16>
    %c0_20 = arith.constant 0 : index
    %c0_21 = arith.constant 0 : index
    %c0_22 = arith.constant 0 : index
    %44 = vector.load %arg7[%c0_20, %c0_21, %c0_22] : memref<1x128x64xbf16, #tpu.memory_space<vmem>>, vector<1x128x64xbf16>
    %45 = vector.shape_cast %44 : vector<1x128x64xbf16> to vector<128x64xbf16>
    %46 = vector.shape_cast %43 : vector<128x64xbf16> to vector<1x128x64xbf16>
    tpu.vector_store %arg7[%c0_20, %c0_21, %c0_22], %46 {strides = array<i32>} : memref<1x128x64xbf16, #tpu.memory_space<vmem>>, vector<1x128x64xbf16>,
    return
  }
  func.func @transform_0(%arg0: i32, %arg1: i32) -> (i32, i32) {
    %c0_i32 = arith.constant 0 : i32
    %c0_i32_0 = arith.constant 0 : i32
    return %arg1, %c0_i32 : i32, i32
  }
  func.func @transform_1(%arg0: i32, %arg1: i32) -> (i32, i32, i32) {
    %c0_i32 = arith.constant 0 : i32
    %c0_i32_0 = arith.constant 0 : i32
    %c0_i32_1 = arith.constant 0 : i32
    return %arg0, %c0_i32, %c0_i32_0 : i32, i32, i32
  }
  func.func @transform_2(%arg0: i32, %arg1: i32) -> (i32, i32, i32) {
    %c0_i32 = arith.constant 0 : i32
    %c0_i32_0 = arith.constant 0 : i32
    %c0_i32_1 = arith.constant 0 : i32
    return %arg0, %c0_i32, %c0_i32_0 : i32, i32, i32
  }
  func.func @transform_3(%arg0: i32, %arg1: i32) -> (i32, i32) {
    %c0_i32 = arith.constant 0 : i32
    %c0_i32_0 = arith.constant 0 : i32
    %c0_i32_1 = arith.constant 0 : i32
    return %c0_i32, %c0_i32_0 : i32, i32
  }
  func.func @transform_4(%arg0: i32, %arg1: i32) -> (i32, i32) {
    %c0_i32 = arith.constant 0 : i32
    %c0_i32_0 = arith.constant 0 : i32
    %c0_i32_1 = arith.constant 0 : i32
    return %c0_i32, %c0_i32_0 : i32, i32
  }
  func.func @transform_5(%arg0: i32, %arg1: i32) -> (i32, i32, i32) {
    %c0_i32 = arith.constant 0 : i32
    %c0_i32_0 = arith.constant 0 : i32
    return %arg0, %arg1, %c0_i32 : i32, i32, i32
  }
}

module attributes {stable_mosaic.version = 11 : i64} {
  func.func @_fcn_head_kernel(%arg0: i32, %arg1: memref<512x576xbf16, #tpu.memory_space<vmem>>, %arg2: memref<576x256xbf16, #tpu.memory_space<vmem>>, %arg3: memref<1x256xf32, #tpu.memory_space<vmem>>, %arg4: memref<256x3xbf16, #tpu.memory_space<vmem>>, %arg5: memref<1x3xf32, #tpu.memory_space<vmem>>, %arg6: memref<512x3xf32, #tpu.memory_space<vmem>>) attributes {dimension_semantics = [#tpu.dimension_semantics<parallel>], iteration_bounds = array<i64: 1>, scalar_prefetch = 0 : i64, scratch_operands = 0 : i64, tpu.core_type = #tpu.core_type<tc>, window_params = [{transform_indices = @transform_0, window_bounds = array<i64: 512, 576>}, {pipeline_mode = #tpu.pipeline_mode<synchronous>, transform_indices = @transform_1, window_bounds = array<i64: 576, 256>}, {pipeline_mode = #tpu.pipeline_mode<synchronous>, transform_indices = @transform_2, window_bounds = array<i64: 1, 256>}, {pipeline_mode = #tpu.pipeline_mode<synchronous>, transform_indices = @transform_3, window_bounds = array<i64: 256, 3>}, {pipeline_mode = #tpu.pipeline_mode<synchronous>, transform_indices = @transform_4, window_bounds = array<i64: 1, 3>}, {transform_indices = @transform_5, window_bounds = array<i64: 512, 3>}]} {
    %c0 = arith.constant 0 : index
    %c0_0 = arith.constant 0 : index
    %0 = vector.load %arg1[%c0, %c0_0] : memref<512x576xbf16, #tpu.memory_space<vmem>>, vector<512x576xbf16>
    %c0_1 = arith.constant 0 : index
    %c0_2 = arith.constant 0 : index
    %1 = vector.load %arg2[%c0_1, %c0_2] : memref<576x256xbf16, #tpu.memory_space<vmem>>, vector<576x256xbf16>
    %cst = arith.constant dense<0.000000e+00> : vector<512x256xf32>
    %2 = tpu.matmul %0, %1, %cst {dimension_numbers = #tpu.dot_dimension_numbers<[1], [0], [0], [1], [0, 0, 1, 1], [], []>} : vector<512x576xbf16>, vector<576x256xbf16>, vector<512x256xf32> -> vector<512x256xf32>
    %c0_3 = arith.constant 0 : index
    %c0_4 = arith.constant 0 : index
    %3 = vector.load %arg3[%c0_3, %c0_4] : memref<1x256xf32, #tpu.memory_space<vmem>>, vector<1x256xf32>
    %4 = vector.broadcast %3 : vector<1x256xf32> to vector<512x256xf32>
    %5 = arith.addf %2, %4 : vector<512x256xf32>
    %cst_5 = arith.constant 0.000000e+00 : f32
    %6 = vector.broadcast %cst_5 : f32 to vector<512x256xf32>
    %7 = arith.maximumf %5, %6 : vector<512x256xf32>
    %8 = arith.truncf %7 : vector<512x256xf32> to vector<512x256xbf16>
    %c0_6 = arith.constant 0 : index
    %c0_7 = arith.constant 0 : index
    %9 = vector.load %arg4[%c0_6, %c0_7] : memref<256x3xbf16, #tpu.memory_space<vmem>>, vector<256x3xbf16>
    %cst_8 = arith.constant dense<0.000000e+00> : vector<512x3xf32>
    %10 = tpu.matmul %8, %9, %cst_8 {dimension_numbers = #tpu.dot_dimension_numbers<[1], [0], [0], [1], [0, 0, 1, 1], [], []>} : vector<512x256xbf16>, vector<256x3xbf16>, vector<512x3xf32> -> vector<512x3xf32>
    %c0_9 = arith.constant 0 : index
    %c0_10 = arith.constant 0 : index
    %11 = vector.load %arg5[%c0_9, %c0_10] : memref<1x3xf32, #tpu.memory_space<vmem>>, vector<1x3xf32>
    %12 = vector.broadcast %11 : vector<1x3xf32> to vector<512x3xf32>
    %13 = arith.addf %10, %12 : vector<512x3xf32>
    %c0_11 = arith.constant 0 : index
    %c0_12 = arith.constant 0 : index
    %14 = vector.load %arg6[%c0_11, %c0_12] : memref<512x3xf32, #tpu.memory_space<vmem>>, vector<512x3xf32>
    tpu.vector_store %arg6[%c0_11, %c0_12], %13 {strides = array<i32>} : memref<512x3xf32, #tpu.memory_space<vmem>>, vector<512x3xf32>,
    return
  }
  func.func @transform_0(%arg0: i32) -> (i32, i32) {
    %c0_i32 = arith.constant 0 : i32
    %c0_i32_0 = arith.constant 0 : i32
    return %arg0, %c0_i32 : i32, i32
  }
  func.func @transform_1(%arg0: i32) -> (i32, i32) {
    %c0_i32 = arith.constant 0 : i32
    %c0_i32_0 = arith.constant 0 : i32
    %c0_i32_1 = arith.constant 0 : i32
    return %c0_i32, %c0_i32_0 : i32, i32
  }
  func.func @transform_2(%arg0: i32) -> (i32, i32) {
    %c0_i32 = arith.constant 0 : i32
    %c0_i32_0 = arith.constant 0 : i32
    %c0_i32_1 = arith.constant 0 : i32
    return %c0_i32, %c0_i32_0 : i32, i32
  }
  func.func @transform_3(%arg0: i32) -> (i32, i32) {
    %c0_i32 = arith.constant 0 : i32
    %c0_i32_0 = arith.constant 0 : i32
    %c0_i32_1 = arith.constant 0 : i32
    return %c0_i32, %c0_i32_0 : i32, i32
  }
  func.func @transform_4(%arg0: i32) -> (i32, i32) {
    %c0_i32 = arith.constant 0 : i32
    %c0_i32_0 = arith.constant 0 : i32
    %c0_i32_1 = arith.constant 0 : i32
    return %c0_i32, %c0_i32_0 : i32, i32
  }
  func.func @transform_5(%arg0: i32) -> (i32, i32) {
    %c0_i32 = arith.constant 0 : i32
    %c0_i32_0 = arith.constant 0 : i32
    return %arg0, %c0_i32 : i32, i32
  }
}

</mosaic_0001>

<bundles_post_ra>
// kernel: tpu_custom_call.1
= control target key start
LH: loop header
LB: loop body
LE: loop exit
PB: predicated region body
PF: predicated region fallthrough
CT: control target
= control target key end

     0   :  { %7 = vsyncpa [#allocation3], 0  ;;  %s479_s0 = inlined_call_operand.hbm [shape: f32[8,128], index: 0, kind: input, shape index: {}]   ;;  %s480_s1 = inlined_call_operand.hbm [shape: f32[8,128], index: 1, kind: input, shape index: {}]   ;;  %s481_s2 = inlined_call_operand.hbm [shape: f32[8,128], index: 2, kind: output, shape index: {}]  }
   0x1   :  { %8 = vsyncpa [#allocation6], 0 }
   0x2   :  { %9 = vsyncpa [#allocation4], 0  ;;  %s363_s9 = smov 0  }
   0x3 LB: > { %s196_s10 = sadd.s32 4294967295, %s343_s9   ;;  %p197_p0 = scmp.ge.s32.totalorder %s343_s9, 1  ;;  %s343_s9 = sphi %s363_s9, %s15_s9  }
   0x4   : > { %p83_p1 = scmp.lt.s32.totalorder %s343_s9, 3  ;;  %p373_p2 = scmp.eq.s32.totalorder %s196_s10, 0 }
   0x5   : > { %s345_s13 = smov [#allocation2]   ;;  %s346_s15 = smov [#allocation5]  }
   0x6   : > { %s485_s11 = scalar_select %p373_p2, 1, 0 }
   0x7   : > { %p377_p3 = pnand %p197_p0, %p83_p1  ;;  %s96_s14 = sshll.u32 %s345_s13, 4  ;;  %s97_s14 = int_to_ptr.vmem [resolvable:$true] %s96_s14 }
   0x8   : > { %s107_s16 = sshll.u32 %s346_s15, 4  ;;  %s243_s20 = scalar_lea.hbm %s479_s0, 128  ;;  %s389_s16 = int_to_ptr.vmem [resolvable:$true] %s107_s16 }
   0x9   : > { %s486_s12 = scalar_select %p377_p3, 1, 0 }
   0xa   : > { %p219_p4 = pneg %p377_p3  ;;  %p244_p6 = scmp.ne.s32.totalorder %s479_s0, %s243_s20 }
   0xb   : > { %p250_p10 = scmp.lt.u32.totalorder %s243_s20, %s479_s0 }
   0xc   : > { %p385_p5 = pnand %p373_p2, %p219_p4 }
   0xe   : > { %p245_p7 = pneg %p385_p5 }
  0x10   : > { %p246_p8 = pnand %p245_p7, %p244_p6 }
  0x12   : > { %p247_p9 = pneg %p246_p8 }
  0x14   : > { %p252_p11 = pnand %p250_p10, %p247_p9 }
  0x16   : > { %255 = shalt.err (!%p252_p11)
}
  0x17   : > { %s256_s25 = scalar_lea.vmem %s97_s14, 128  ;;  %p264_p1 = scmp.lt.s32.totalorder %s97_s14, %s97_s14 }
  0x18   : > { %p257_p12 = scmp.ne.s32.totalorder %s97_s14, %s256_s25  ;;  %p265_p4 = scmp.lt.s32.totalorder %s256_s25, %s256_s25 }
  0x1a   : > { %p259_p13 = pnand %p257_p12, %p245_p7  ;;  %p266_p2 = por %p265_p4, %p264_p1 }
  0x1c   : > { %p260_p0 = pneg %p259_p13 }
  0x1e   : > { %p267_p3 = pnand %p266_p2, %p260_p0 }
  0x20   : > { %270 = shalt.err (!%p267_p3)
}
  0x21   : > { %222 = dma.hbm_to_vmem [thread:$0]  (!%p385_p5), %s479_s0, 128, %s97_s14, [#allocation3]  }
  0x22   : > { %s271_s30 = scalar_lea.hbm %s480_s1, 128 }
  0x23   : > { %p272_p6 = scmp.ne.s32.totalorder %s480_s1, %s271_s30  ;;  %p278_p3 = scmp.lt.u32.totalorder %s271_s30, %s480_s1 }
  0x25   : > { %p274_p8 = pnand %p272_p6, %p245_p7 }
  0x27   : > { %p275_p2 = pneg %p274_p8 }
  0x29   : > { %p280_p9 = pnand %p278_p3, %p275_p2 }
  0x2b   : > { %283 = shalt.err (!%p280_p9)
}
  0x2c   : > { %s284_s7 = scalar_lea.vmem %s389_s16, 128  ;;  %p292_p13 = scmp.lt.s32.totalorder %s389_s16, %s389_s16 }
  0x2d   : > { %p285_p10 = scmp.ne.s32.totalorder %s389_s16, %s284_s7  ;;  %p293_p0 = scmp.lt.s32.totalorder %s284_s7, %s284_s7 }
  0x2f   : > { %p287_p11 = pnand %p285_p10, %p245_p7  ;;  %p294_p1 = por %p293_p0, %p292_p13 }
  0x31   : > { %p288_p12 = pneg %p287_p11 }
  0x33   : > { %p295_p4 = pnand %p294_p1, %p288_p12 }
  0x35   : > { %298 = shalt.err (!%p295_p4)
}
  0x36   : > { %225 = dma.hbm_to_vmem [thread:$0]  (!%p385_p5), %s480_s1, 128, %s389_s16, [#allocation6]  }
  0x37   : > { %p488_p6 = scmp.ne.s32.totalorder %s486_s12, 0 }
  0x38   : > { %p489_p8 = scmp.ne.s32.totalorder (!%p488_p6), %s485_s11, 0 }
  0x39   : > { %120 = sbr.rel (%p488_p6) target bundleno = 92 (0x5c), region = 28 }
  0x40   : > { %330 = dma.done.wait (%p489_p8), [#allocation3], 128  }
  0x41   : > { %332 = vsyncadd (%p489_p8), [#allocation3], 4294967168 }
  0x42   : > { %334 = dma.done.wait (%p489_p8), [#allocation6], 128  }
  0x43   : > { %336 = vsyncadd (%p489_p8), [#allocation6], 4294967168  ;;  %s347_s14 = smov [#allocation7]   ;;  %v136_v0 = vld [vmem:[#allocation2] sm:$0xff]  ;;  %v137_v1 = vld [vmem:[#allocation5] sm:$0xff]  ;;  %p450_p5 = scmp.eq.s32.totalorder %s196_s10, 1 }
  0x44   : > { %s147_s15 = sshll.u32 %s347_s14, 4  ;;  %v138_v2 = vadd.f32 %v137_v1, %v136_v0  ;;  %s148_s15 = int_to_ptr.vmem [resolvable:$true] %s147_s15 }
  0x45   : > { %s299_s16 = scalar_lea.vmem %s148_s15, 128  ;;  %p306_p9 = scmp.lt.s32.totalorder %s148_s15, %s148_s15 }
  0x46   : > { %139 = vst [vmem:[#allocation7] sm:$0xff] %v138_v2  ;;  %p300_p7 = scmp.ne.s32.totalorder %s148_s15, %s299_s16  ;;  %p307_p10 = scmp.lt.s32.totalorder %s299_s16, %s299_s16 }
  0x48   : > { %p301_p2 = pnand %p300_p7, %p450_p5  ;;  %p308_p11 = por %p307_p10, %p306_p9 }
  0x4a   : > { %p302_p3 = pneg %p301_p2 }
  0x4c   : > { %p309_p12 = pnand %p308_p11, %p302_p3 }
  0x4e   : > { %312 = shalt.err (!%p309_p12)
}
  0x4f   : > { %s313_s10 = scalar_lea.hbm %s481_s2, 128 }
  0x50   : > { %p314_p13 = scmp.ne.s32.totalorder %s481_s2, %s313_s10  ;;  %p319_p4 = scmp.lt.u32.totalorder %s313_s10, %s481_s2 }
  0x52   : > { %p315_p0 = pnand %p314_p13, %p450_p5 }
  0x54   : > { %p316_p1 = pneg %p315_p0 }
  0x56   : > { %p321_p6 = pnand %p319_p4, %p316_p1 }
  0x58   : > { %324 = shalt.err (!%p321_p6)
}
  0x59   : > { %216 = dma.vmem_to_hbm [thread:$0]  (%p450_p5), %s148_s15, 128, %s481_s2, [#allocation4]  }
  0x5a   : > { %338 = dma.done.wait (%p450_p5), [#allocation4], 128  }
  0x5b   : > { %340 = vsyncadd (%p450_p5), [#allocation4], 4294967168 }
  0x5c PF: > { %s15_s9 = sadd.s32 1, %s343_s9  }
  0x5d   : > { %p12_p8 = scmp.ge.s32.totalorder %s15_s9, 4  }
  0x5f   :  { %14 = sbr.rel (!%p12_p8) target bundleno = 3 (0x3), region = 61 }
  0x66   :  { %160 = vsyncpa [#allocation3], 1 }
  0x67   :  { %162 = vsyncpa [#allocation3 + $0x1], 1 }
  0x68   :  { %163 = vsyncpa [#allocation6], 1 }
  0x69   :  { %164 = vsyncpa [#allocation4], 1 }
  0x6a   :  { %166 = vsyncpa [#allocation4 + $0x1], 1 }

// kernel: prithvi_wrapper_forward.7
= control target key start
LH: loop header
LB: loop body
LE: loop exit
PB: predicated region body
PF: predicated region fallthrough
CT: control target
= control target key end

     0   :  { %8 = vsyncpa [#allocation3], 0  ;;  %s477_s0 = inlined_call_operand.hbm [shape: bf16[64,64], index: 0, kind: input, shape index: {}]   ;;  %s478_s1 = inlined_call_operand.hbm [shape: bf16[64,32], index: 1, kind: input, shape index: {}]   ;;  %s479_s2 = inlined_call_operand.hbm [shape: f32[1,32], index: 2, kind: input, shape index: {}]   ;;  %s480_s3 = inlined_call_operand.hbm [shape: f32[64,32], index: 3, kind: output, shape index: {}]  }
   0x1   :  { %9 = vsyncpa [#allocation6], 0 }
   0x2   :  { %10 = vsyncpa [#allocation4], 0  ;;  %s382_s12 = smov [#allocation5]   ;;  %s383_s14 = smov [#allocation2]  }
   0x3   :  { %s28_s13 = sshll.u32 %s382_s12, 4  ;;  %s16_s15 = sshll.u32 %s383_s14, 4  ;;  %s29_s13 = int_to_ptr.vmem [resolvable:$true] %s28_s13  ;;  %s410_s15 = int_to_ptr.vmem [resolvable:$true] %s16_s15 }
   0x4   :  { %s288_s18 = scalar_lea.hbm %s478_s1, 512 }
   0x5   :  { %p289_p0 = scmp.ne.s32.totalorder %s478_s1, %s288_s18  ;;  %p292_p1 = scmp.lt.u32.totalorder %s288_s18, %s478_s1 }
   0x7   :  { %p294_p2 = pnand %p292_p1, %p289_p0 }
   0x9   :  { %297 = shalt.err (!%p294_p2)
}
   0xa   :  { %s298_s23 = scalar_lea.vmem %s29_s13, 512  ;;  %p303_p4 = scmp.lt.s32.totalorder %s29_s13, %s29_s13 }
   0xb   :  { %p299_p3 = scmp.ne.s32.totalorder %s29_s13, %s298_s23  ;;  %p304_p5 = scmp.lt.s32.totalorder %s298_s23, %s298_s23 }
   0xd   :  { %p305_p6 = por %p304_p5, %p303_p4 }
   0xf   :  { %p306_p7 = pnand %p305_p6, %p299_p3 }
  0x11   :  { %309 = shalt.err (!%p306_p7)
}
  0x12   :  { %s384_s24 = smov 64   ;;  %s385_s25 = smov 4  }
  0x13   :  { %34 = dma.hbm_to_vmem [thread:$0]  %s478_s1, 512, %s29_s13, [#allocation6], %s384_s24, %s384_s24, %s385_s25  }
  0x14   :  { %s310_s30 = scalar_lea.hbm %s477_s0, 512 }
  0x15   :  { %p311_p8 = scmp.ne.s32.totalorder %s477_s0, %s310_s30  ;;  %p314_p9 = scmp.lt.u32.totalorder %s310_s30, %s477_s0 }
  0x17   :  { %p316_p10 = pnand %p314_p9, %p311_p8 }
  0x19   :  { %319 = shalt.err (!%p316_p10)
}
  0x1a   :  { %s320_s8 = scalar_lea.vmem %s410_s15, 512  ;;  %p325_p12 = scmp.lt.s32.totalorder %s410_s15, %s410_s15 }
  0x1b   :  { %p321_p11 = scmp.ne.s32.totalorder %s410_s15, %s320_s8  ;;  %p326_p13 = scmp.lt.s32.totalorder %s320_s8, %s320_s8 }
  0x1d   :  { %p327_p0 = por %p326_p13, %p325_p12 }
  0x1f   :  { %p328_p1 = pnand %p327_p0, %p321_p11 }
  0x21   :  { %331 = shalt.err (!%p328_p1)
}
  0x22   :  { %22 = dma.hbm_to_vmem [thread:$0]  %s477_s0, 512, %s410_s15, [#allocation3], %s384_s24, %s384_s24, %s385_s25  }
  0x23   :  { %s386_s10 = smov [#allocation7]   ;;  %s332_s14 = scalar_lea.hbm %s479_s2, 16 }
  0x24   :  { %s41_s11 = sshll.u32 %s386_s10, 4  ;;  %p333_p2 = scmp.ne.s32.totalorder %s479_s2, %s332_s14  ;;  %s42_s11 = int_to_ptr.vmem [resolvable:$true] %s41_s11 }
  0x25   :  { %p336_p3 = scmp.lt.u32.totalorder %s332_s14, %s479_s2 }
  0x27   :  { %p338_p4 = pnand %p336_p3, %p333_p2 }
  0x29   :  { %341 = shalt.err (!%p338_p4)
}
  0x2a   :  { %s342_s20 = scalar_lea.vmem %s42_s11, 16  ;;  %s346_s0 = scalar_lea.vmem %s42_s11, 32 }
  0x2b   :  { %p343_p5 = scmp.ne.s32.totalorder %s42_s11, %s342_s20  ;;  %p347_p6 = scmp.lt.s32.totalorder %s42_s11, %s42_s11 }
  0x2c   :  { %p348_p7 = scmp.lt.s32.totalorder %s346_s0, %s342_s20 }
  0x2e   :  { %p349_p8 = por %p348_p7, %p347_p6 }
  0x30   :  { %p350_p9 = pnand %p349_p8, %p343_p5 }
  0x32   :  { %353 = shalt.err (!%p350_p9)
}
  0x33   :  { %44 = dma.hbm_to_vmem [thread:$0]  %s479_s2, 16, %s42_s11, [#allocation6]  }
  0x34   :  { %376 = dma.done.wait [#allocation3], 512  }
  0x35   :  { %377 = vsyncadd [#allocation3], 4294966784 }
  0x36   :  { %378 = dma.done.wait [#allocation6], 528  }
  0x37   :  { %379 = vsyncadd [#allocation6], 4294966768  ;;  %v280_v0 = vld [vmem:[#allocation5] sm:$0xff]   ;;  %v281_v1 = vld [vmem:[#allocation5 + $0x8] sm:$0xff]   ;;  %vm122_vm0 = vcmask 523264   ;;  %vm200_vm1 = vcmask 261120  }
  0x38   :  { %248 = vmatprep.subr.bf16.mxu0 %v280_v0  ;;  %264 = vmatprep.subr.bf16.mxu1 %v280_v0  ;;  %v282_v2 = vld [vmem:[#allocation5 + $0x10] sm:$0xff]   ;;  %v284_v3 = vld [vmem:[#allocation2] sm:$0xff]   ;;  %v283_v5 = vld [vmem:[#allocation5 + $0x18] sm:$0xff]   ;;  %s387_s2 = smov [#allocation8]  }
  0x39   :  { %249 = vmatpush3.bf16.msra.mxu0 %v280_v0  ;;  %268 = vmatpush3.bf16.msra.mxu1 %v280_v0  ;;  %v285_v4 = vld [vmem:[#allocation2 + $0x10] sm:$0xff]   ;;  %v286_v6 = vld [vmem:[#allocation2 + $0x8] sm:$0xff]   ;;  %v287_v7 = vld [vmem:[#allocation2 + $0x18] sm:$0xff]   ;;  %s214_s22 = sshll.u32 %s387_s2, 4  ;;  %s215_s22 = int_to_ptr.vmem [resolvable:$true] %s214_s22 }
  0x3a   :  { %250 = vmatprep.subr.bf16.mxu0 %v281_v1  ;;  %265 = vmatprep.subr.bf16.mxu1 %v281_v1  ;;  %v227_v8 = vld [vmem:[#allocation7] ss:$0 sm:$0xff]  ;;  %s354_s23 = scalar_lea.vmem %s215_s22, 1024  ;;  %p359_p11 = scmp.lt.s32.totalorder %s215_s22, %s215_s22 }
  0x3b   :  { %256 = vmatprep.mubr.msk.bf16.mxu0 %vm122_vm0, %v284_v3  ;;  %260 = vmatprep.mubr.msk.bf16.mxu1 %vm122_vm0, %v285_v4  ;;  %p355_p10 = scmp.ne.s32.totalorder %s215_s22, %s354_s23  ;;  %p360_p12 = scmp.lt.s32.totalorder %s354_s23, %s354_s23 }
  0x3d   :  { %251 = vmatpush3.bf16.msra.mxu0 %v281_v1  ;;  %269 = vmatpush3.bf16.msra.mxu1 %v281_v1  ;;  %p361_p13 = por %p360_p12, %p359_p11 }
  0x3e   :  { %252 = vmatprep.subr.bf16.mxu0 %v282_v2  ;;  %266 = vmatprep.subr.bf16.mxu1 %v282_v2 }
  0x3f   :  { %p362_p0 = pnand %p361_p13, %p355_p10 }
  0x41   :  { %253 = vmatpush3.bf16.msra.mxu0 %v282_v2  ;;  %270 = vmatpush3.bf16.msra.mxu1 %v282_v2 }
  0x42   :  { %254 = vmatprep.subr.bf16.mxu0 %v283_v5  ;;  %267 = vmatprep.subr.bf16.mxu1 %v283_v5 }
  0x45   :  { %255 = vmatpush3.bf16.msra.mxu0 %v283_v5  ;;  %271 = vmatpush3.bf16.msra.mxu1 %v283_v5 }
  0x48   :  { %257 = vmatmul.mubr.msk.bf16.vlgmr.msra.gmra.mrb[0].mxu0 %vm122_vm0, %v286_v6  ;;  %261 = vmatmul.mubr.msk.bf16.vlgmr.msra.gmra.mrb[0].mxu1 %vm122_vm0, %v287_v7 }
 0x11b   :  { %v258_v9 = vpop.f32.mrb[0].mxu0  ;;  %v262_v10 = vpop.f32.mrb[0].mxu1 }
 0x11c   :  { %v178_v11 = vadd.f32 %v258_v9, %v227_v8  ;;  %v194_v12 = vadd.f32 %v262_v10, %v227_v8  ;;  %v169_v13 = vpop.f32.mrb[1].mxu0  ;;  %v185_v14 = vpop.f32.mrb[1].mxu1 }
 0x11d   :  { %v170_v15 = vadd.f32 %v227_v8, %v169_v13  ;;  %v186_v16 = vadd.f32 %v227_v8, %v185_v14  ;;  %v259_v17 = vpop.f32.mrb[2].mxu0  ;;  %v263_v18 = vpop.f32.mrb[2].mxu1 }
 0x11e   :  { %203 = vst.msk [vmem:[#allocation8 + $0x10] sm:$0xff] %vm200_vm1, %v178_v11  ;;  %207 = vst.msk [vmem:[#allocation8 + $0x30] sm:$0xff] %vm200_vm1, %v194_v12  ;;  %v181_v19 = vadd.f32 %v259_v17, %v227_v8  ;;  %v197_v20 = vadd.f32 %v263_v18, %v227_v8  ;;  %v172_v21 = vpop.f32.mrb[3].mxu0  ;;  %v188_v22 = vpop.f32.mrb[3].mxu1 }
 0x11f   :  { %201 = vst.msk [vmem:[#allocation8] sm:$0xff] %vm200_vm1, %v170_v15  ;;  %205 = vst.msk [vmem:[#allocation8 + $0x20] sm:$0xff] %vm200_vm1, %v186_v16  ;;  %v173_v23 = vadd.f32 %v227_v8, %v172_v21  ;;  %v189_v24 = vadd.f32 %v227_v8, %v188_v22 }
 0x120   :  { %204 = vst.msk [vmem:[#allocation8 + $0x18] sm:$0xff] %vm200_vm1, %v181_v19  ;;  %208 = vst.msk [vmem:[#allocation8 + $0x38] sm:$0xff] %vm200_vm1, %v197_v20 }
 0x121   :  { %202 = vst.msk [vmem:[#allocation8 + $0x8] sm:$0xff] %vm200_vm1, %v173_v23  ;;  %206 = vst.msk [vmem:[#allocation8 + $0x28] sm:$0xff] %vm200_vm1, %v189_v24 }
 0x122   :  { %365 = shalt.err (!%p362_p0)
}
 0x123   :  { %s366_s26 = scalar_lea.hbm %s480_s3, 1024 }
 0x124   :  { %p367_p1 = scmp.ne.s32.totalorder %s480_s3, %s366_s26  ;;  %p370_p2 = scmp.lt.u32.totalorder %s366_s26, %s480_s3 }
 0x126   :  { %p372_p3 = pnand %p370_p2, %p367_p1 }
 0x128   :  { %375 = shalt.err (!%p372_p3)
}
 0x129   :  { %s388_s4 = smov 128   ;;  %s389_s5 = smov 8  }
 0x12a   :  { %220 = dma.vmem_to_hbm [thread:$0]  %s215_s22, 1024, %s480_s3, [#allocation4], %s388_s4, %s388_s4, %s389_s5  }
 0x12b   :  { %380 = dma.done.wait [#allocation4], 1024  }
 0x12c   :  { %381 = vsyncadd [#allocation4], 4294966272 }
 0x12d   :  { %224 = vsyncpa [#allocation3], 1 }
 0x12e   :  { %225 = vsyncpa [#allocation6], 1 }
 0x12f   :  { %226 = vsyncpa [#allocation4], 1 }

// kernel: prithvi_wrapper_forward.10
= control target key start
LH: loop header
LB: loop body
LE: loop exit
PB: predicated region body
PF: predicated region fallthrough
CT: control target
= control target key end

     0   :  { %8 = vsyncpa [#allocation3], 0  ;;  %s664_s0 = inlined_call_operand.hbm [shape: bf16[80,32], index: 0, kind: input, shape index: {}]   ;;  %s665_s1 = inlined_call_operand.hbm [shape: f32[1,32], index: 1, kind: input, shape index: {}]   ;;  %s666_s2 = inlined_call_operand.hbm [shape: f32[1,32], index: 2, kind: input, shape index: {}]   ;;  %s667_s3 = inlined_call_operand.hbm [shape: bf16[80,32], index: 3, kind: output, shape index: {}]  }
   0x1   :  { %9 = vsyncpa [#allocation6], 0 }
   0x2   :  { %10 = vsyncpa [#allocation4], 0  ;;  %s473_s12 = smov [#allocation5]   ;;  %s474_s14 = smov [#allocation2]  }
   0x3   :  { %s29_s13 = sshll.u32 %s473_s12, 4  ;;  %s16_s15 = sshll.u32 %s474_s14, 4  ;;  %s30_s13 = int_to_ptr.vmem [resolvable:$true] %s29_s13  ;;  %s499_s15 = int_to_ptr.vmem [resolvable:$true] %s16_s15 }
   0x4   :  { %s379_s18 = scalar_lea.hbm %s665_s1, 16 }
   0x5   :  { %p380_p0 = scmp.ne.s32.totalorder %s665_s1, %s379_s18  ;;  %p383_p1 = scmp.lt.u32.totalorder %s379_s18, %s665_s1 }
   0x7   :  { %p385_p2 = pnand %p383_p1, %p380_p0 }
   0x9   :  { %388 = shalt.err (!%p385_p2)
}
   0xa   :  { %s389_s23 = scalar_lea.vmem %s30_s13, 16  ;;  %s393_s24 = scalar_lea.vmem %s30_s13, 32 }
   0xb   :  { %p390_p3 = scmp.ne.s32.totalorder %s30_s13, %s389_s23  ;;  %p394_p4 = scmp.lt.s32.totalorder %s30_s13, %s30_s13 }
   0xc   :  { %p395_p5 = scmp.lt.s32.totalorder %s393_s24, %s389_s23 }
   0xe   :  { %p396_p6 = por %p395_p5, %p394_p4 }
  0x10   :  { %p397_p7 = pnand %p396_p6, %p390_p3 }
  0x12   :  { %400 = shalt.err (!%p397_p7)
}
  0x13   :  { %32 = dma.hbm_to_vmem [thread:$0]  %s665_s1, 16, %s30_s13, [#allocation6]  }
  0x14   :  { %s401_s29 = scalar_lea.hbm %s664_s0, 640 }
  0x15   :  { %p402_p8 = scmp.ne.s32.totalorder %s664_s0, %s401_s29  ;;  %p405_p9 = scmp.lt.u32.totalorder %s401_s29, %s664_s0 }
  0x17   :  { %p407_p10 = pnand %p405_p9, %p402_p8 }
  0x19   :  { %410 = shalt.err (!%p407_p10)
}
  0x1a   :  { %s411_s7 = scalar_lea.vmem %s499_s15, 640  ;;  %p416_p12 = scmp.lt.s32.totalorder %s499_s15, %s499_s15 }
  0x1b   :  { %p412_p11 = scmp.ne.s32.totalorder %s499_s15, %s411_s7  ;;  %p417_p13 = scmp.lt.s32.totalorder %s411_s7, %s411_s7 }
  0x1d   :  { %p418_p0 = por %p417_p13, %p416_p12 }
  0x1f   :  { %p419_p1 = pnand %p418_p0, %p412_p11 }
  0x21   :  { %422 = shalt.err (!%p419_p1)
}
  0x22   :  { %s475_s1 = smov 64   ;;  %s476_s8 = smov 4  }
  0x23   :  { %22 = dma.hbm_to_vmem [thread:$0]  %s664_s0, 640, %s499_s15, [#allocation3], %s475_s1, %s475_s1, %s476_s8  }
  0x24   :  { %s477_s11 = smov [#allocation7]   ;;  %s423_s16 = scalar_lea.hbm %s666_s2, 16 }
  0x25   :  { %s39_s12 = sshll.u32 %s477_s11, 4  ;;  %p424_p2 = scmp.ne.s32.totalorder %s666_s2, %s423_s16  ;;  %s40_s12 = int_to_ptr.vmem [resolvable:$true] %s39_s12 }
  0x26   :  { %p427_p3 = scmp.lt.u32.totalorder %s423_s16, %s666_s2 }
  0x28   :  { %p429_p4 = pnand %p427_p3, %p424_p2 }
  0x2a   :  { %432 = shalt.err (!%p429_p4)
}
  0x2b   :  { %s433_s21 = scalar_lea.vmem %s40_s12, 16  ;;  %s437_s0 = scalar_lea.vmem %s40_s12, 32 }
  0x2c   :  { %p434_p5 = scmp.ne.s32.totalorder %s40_s12, %s433_s21  ;;  %p438_p6 = scmp.lt.s32.totalorder %s40_s12, %s40_s12 }
  0x2d   :  { %p439_p7 = scmp.lt.s32.totalorder %s437_s0, %s433_s21 }
  0x2f   :  { %p440_p8 = por %p439_p7, %p438_p6 }
  0x31   :  { %p441_p9 = pnand %p440_p8, %p434_p5 }
  0x33   :  { %444 = shalt.err (!%p441_p9)
}
  0x34   :  { %42 = dma.hbm_to_vmem [thread:$0]  %s666_s2, 16, %s40_s12, [#allocation6]  }
  0x35   :  { %467 = dma.done.wait [#allocation3], 640  }
  0x36   :  { %468 = vsyncadd [#allocation3], 4294966656 }
  0x37   :  { %469 = dma.done.wait [#allocation6], 32  }
  0x38   :  { %470 = vsyncadd [#allocation6], 4294967264  ;;  %v330_v0 = vld [vmem:[#allocation2] sm:$0xff]   ;;  %vm74_vm0 = vcmask 261120   ;;  %v349_v1 = vld [vmem:[#allocation2 + $0x8] sm:$0xff]   ;;  %vm278_vm1 = vcmask 257024  }
  0x39   :  { %v331_v2 = vunpack.c.l.bf16 %v330_v0  ;;  %v335_v3 = vunpack.c.l.bf16 %v349_v1  ;;  %v332_v4 = vunpack.c.h.bf16 %v330_v0  ;;  %v336_v5 = vunpack.c.h.bf16 %v349_v1  ;;  %v350_v6 = vld [vmem:[#allocation2 + $0x10] sm:$0xff]   ;;  %v351_v13 = vld [vmem:[#allocation2 + $0x18] sm:$0xff]   ;;  %v352_v18 = vld [vmem:[#allocation2 + $0x20] sm:$0xff]   ;;  %s478_s2 = smov [#allocation8]  }
  0x3a   :  { %v339_v11 = vunpack.c.l.bf16 %v350_v6  ;;  %v340_v12 = vunpack.c.h.bf16 %v350_v6  ;;  %v343_v16 = vunpack.c.l.bf16 %v351_v13  ;;  %v344_v17 = vunpack.c.h.bf16 %v351_v13  ;;  %s294_s23 = sshll.u32 %s478_s2, 4  ;;  %s295_s23 = int_to_ptr.vmem [resolvable:$true] %s294_s23 }
  0x3b   :  { %v75_v7 = vsel %vm74_vm0, %v331_v2, 0.0  ;;  %v81_v8 = vsel %vm74_vm0, %v335_v3, 0.0  ;;  %v78_v9 = vsel %vm74_vm0, %v332_v4, 0.0  ;;  %v84_v10 = vsel %vm74_vm0, %v336_v5, 0.0  ;;  %s445_s24 = scalar_lea.vmem %s295_s23, 640  ;;  %p450_p11 = scmp.lt.s32.totalorder %s295_s23, %s295_s23 }
  0x3c   :  { %76 = vadd.xlane.f32.xlu0 %v75_v7  ;;  %82 = vadd.xlane.f32.xlu1 %v81_v8  ;;  %v87_v14 = vsel %vm74_vm0, %v339_v11, 0.0  ;;  %v90_v15 = vsel %vm74_vm0, %v340_v12, 0.0  ;;  %v93_v19 = vsel %vm74_vm0, %v343_v16, 0.0  ;;  %v96_v20 = vsel %vm74_vm0, %v344_v17, 0.0  ;;  %p446_p10 = scmp.ne.s32.totalorder %s295_s23, %s445_s24  ;;  %p451_p12 = scmp.lt.s32.totalorder %s445_s24, %s445_s24 }
  0x3d   :  { %v347_v21 = vunpack.c.l.bf16 %v352_v18  ;;  %v348_v22 = vunpack.c.h.bf16 %v352_v18 }
  0x3e   :  { %p452_p13 = por %p451_p12, %p450_p11 }
  0x3f   :  { %v99_v23 = vsel %vm74_vm0, %v347_v21, 0.0  ;;  %v102_v24 = vsel %vm74_vm0, %v348_v22, 0.0 }
  0x40   :  { %79 = vadd.xlane.f32.xlu0 %v78_v9  ;;  %85 = vadd.xlane.f32.xlu1 %v84_v10  ;;  %p453_p0 = pnand %p452_p13, %p446_p10 }
  0x44   :  { %88 = vadd.xlane.f32.xlu0 %v87_v14  ;;  %91 = vadd.xlane.f32.xlu1 %v90_v15 }
  0x48   :  { %94 = vadd.xlane.f32.xlu0 %v93_v19  ;;  %97 = vadd.xlane.f32.xlu1 %v96_v20 }
  0x4c   :  { %100 = vadd.xlane.f32.xlu0 %v99_v23  ;;  %103 = vadd.xlane.f32.xlu1 %v102_v24 }
  0xc9   :  { %v77_v25 = vpop.xlane.xlu0 %76  ;;  %v83_v26 = vpop.xlane.xlu1 %82 }
  0xca   :  { %v106_v27 = vmul.f32 0.03125, %v77_v25  ;;  %v108_v28 = vmul.f32 0.03125, %v83_v26 }
  0xcc   :  { %v555_v29 = vsub.f32 %v331_v2, %v106_v27  ;;  %v557_v30 = vsub.f32 %v335_v3, %v108_v28 }
  0xcd   :  { %v80_v31 = vpop.xlane.xlu0 %79  ;;  %v86_v32 = vpop.xlane.xlu1 %85 }
  0xce   :  { %v107_v33 = vmul.f32 0.03125, %v80_v31  ;;  %v109_v34 = vmul.f32 0.03125, %v86_v32  ;;  %v126_v35 = vmul.f32 %v555_v29, %v555_v29  ;;  %v128_v36 = vmul.f32 %v557_v30, %v557_v30 }
  0xd0   :  { %v563_v37 = vsub.f32 %v332_v4, %v107_v33  ;;  %v565_v38 = vsub.f32 %v336_v5, %v109_v34  ;;  %v136_v39 = vsel %vm74_vm0, %v126_v35, 0.0  ;;  %v142_v42 = vsel %vm74_vm0, %v128_v36, 0.0  ;;  %v605_v33 = vld [vmem:[#allocation5] ss:$0 sm:$0xff] }
  0xd1   :  { %137 = vadd.xlane.f32.xlu0 %v136_v39  ;;  %v89_v40 = vpop.xlane.xlu0 %88  ;;  %v92_v41 = vpop.xlane.xlu1 %91 }
  0xd2   :  { %v110_v43 = vmul.f32 0.03125, %v89_v40  ;;  %v111_v44 = vmul.f32 0.03125, %v92_v41  ;;  %v127_v45 = vmul.f32 %v563_v37, %v563_v37  ;;  %v129_v46 = vmul.f32 %v565_v38, %v565_v38  ;;  %v608_v41 = vld [vmem:[#allocation7] ss:$0 sm:$0xff] }
  0xd4   :  { %v573_v47 = vsub.f32 %v339_v11, %v110_v43  ;;  %v575_v48 = vsub.f32 %v340_v12, %v111_v44  ;;  %v139_v49 = vsel %vm74_vm0, %v127_v45, 0.0  ;;  %v145_v52 = vsel %vm74_vm0, %v129_v46, 0.0 }
  0xd5   :  { %143 = vadd.xlane.f32.xlu0 %v142_v42  ;;  %140 = vadd.xlane.f32.xlu1 %v139_v49  ;;  %v95_v50 = vpop.xlane.xlu0 %94  ;;  %v98_v51 = vpop.xlane.xlu1 %97 }
  0xd6   :  { %v112_v53 = vmul.f32 0.03125, %v95_v50  ;;  %v113_v54 = vmul.f32 0.03125, %v98_v51  ;;  %v130_v55 = vmul.f32 %v573_v47, %v573_v47  ;;  %v131_v56 = vmul.f32 %v575_v48, %v575_v48 }
  0xd8   :  { %v583_v57 = vsub.f32 %v343_v16, %v112_v53  ;;  %v585_v58 = vsub.f32 %v344_v17, %v113_v54  ;;  %v148_v59 = vsel %vm74_vm0, %v130_v55, 0.0  ;;  %v151_v62 = vsel %vm74_vm0, %v131_v56, 0.0 }
  0xd9   :  { %146 = vadd.xlane.f32.xlu1 %v145_v52  ;;  %149 = vadd.xlane.f32.xlu0 %v148_v59  ;;  %v101_v60 = vpop.xlane.xlu0 %100  ;;  %v104_v61 = vpop.xlane.xlu1 %103 }
  0xda   :  { %v114_v63 = vmul.f32 0.03125, %v101_v60  ;;  %v115_v0 = vmul.f32 0.03125, %v104_v61  ;;  %v132_v1 = vmul.f32 %v583_v57, %v583_v57  ;;  %v133_v2 = vmul.f32 %v585_v58, %v585_v58 }
  0xdc   :  { %v593_v3 = vsub.f32 %v347_v21, %v114_v63  ;;  %v595_v4 = vsub.f32 %v348_v22, %v115_v0  ;;  %v154_v5 = vsel %vm74_vm0, %v132_v1, 0.0  ;;  %v157_v6 = vsel %vm74_vm0, %v133_v2, 0.0 }
  0xdd   :  { %152 = vadd.xlane.f32.xlu1 %v151_v62  ;;  %155 = vadd.xlane.f32.xlu0 %v154_v5 }
  0xde   :  { %v134_v7 = vmul.f32 %v593_v3, %v593_v3  ;;  %v135_v8 = vmul.f32 %v595_v4, %v595_v4 }
  0xe0   :  { %v160_v9 = vsel %vm74_vm0, %v134_v7, 0.0  ;;  %v163_v10 = vsel %vm74_vm0, %v135_v8, 0.0 }
  0xe1   :  { %158 = vadd.xlane.f32.xlu1 %v157_v6  ;;  %161 = vadd.xlane.f32.xlu0 %v160_v9 }
  0xe5   :  { %164 = vadd.xlane.f32.xlu1 %v163_v10 }
 0x15e   :  { %v138_v11 = vpop.xlane.xlu0 %137 }
 0x15f   :  { %v166_v12 = vmul.f32 0.03125, %v138_v11 }
 0x161   :  { %v176_v13 = vadd.f32 1e-05, %v166_v12 }
 0x162   :  { %v141_v14 = vpop.xlane.xlu1 %140  ;;  %v144_v15 = vpop.xlane.xlu0 %143 }
 0x163   :  { %359 = vrsqrt.f32 %v176_v13  ;;  %v167_v16 = vmul.f32 0.03125, %v141_v14  ;;  %v168_v17 = vmul.f32 0.03125, %v144_v15 }
 0x165   :  { %v177_v18 = vadd.f32 1e-05, %v167_v16  ;;  %v178_v19 = vadd.f32 1e-05, %v168_v17 }
 0x166   :  { %v147_v20 = vpop.xlane.xlu1 %146  ;;  %v150_v21 = vpop.xlane.xlu0 %149 }
 0x167   :  { %361 = vrsqrt.f32 %v177_v18  ;;  %v169_v22 = vmul.f32 0.03125, %v147_v20  ;;  %v170_v23 = vmul.f32 0.03125, %v150_v21 }
 0x168   :  { %363 = vrsqrt.f32 %v178_v19 }
 0x169   :  { %v179_v24 = vadd.f32 1e-05, %v169_v22  ;;  %v180_v25 = vadd.f32 1e-05, %v170_v23 }
 0x16a   :  { %v153_v26 = vpop.xlane.xlu1 %152  ;;  %v156_v27 = vpop.xlane.xlu0 %155 }
 0x16b   :  { %365 = vrsqrt.f32 %v179_v24  ;;  %v171_v28 = vmul.f32 0.03125, %v153_v26  ;;  %v172_v31 = vmul.f32 0.03125, %v156_v27 }
 0x16c   :  { %367 = vrsqrt.f32 %v180_v25 }
 0x16d   :  { %v360_v32 = vpop.eup %359  ;;  %v181_v34 = vadd.f32 1e-05, %v171_v28  ;;  %v182_v35 = vadd.f32 1e-05, %v172_v31 }
 0x16e   :  { %v196_v36 = vmul.f32 %v360_v32, %v555_v29  ;;  %v159_v39 = vpop.xlane.xlu1 %158  ;;  %v162_v40 = vpop.xlane.xlu0 %161 }
 0x16f   :  { %369 = vrsqrt.f32 %v181_v34  ;;  %v173_v42 = vmul.f32 0.03125, %v159_v39  ;;  %v174_v43 = vmul.f32 0.03125, %v162_v40 }
 0x170   :  { %v212_v44 = vmul.f32 %v605_v33, %v196_v36  ;;  %371 = vrsqrt.f32 %v182_v35 }
 0x171   :  { %v362_v45 = vpop.eup %361  ;;  %v183_v46 = vadd.f32 1e-05, %v173_v42  ;;  %v184_v49 = vadd.f32 1e-05, %v174_v43 }
 0x172   :  { %v364_v50 = vpop.eup %363  ;;  %v228_v51 = vadd.f32 %v608_v41, %v212_v44  ;;  %v197_v52 = vmul.f32 %v362_v45, %v563_v37  ;;  %v165_v53 = vpop.xlane.xlu1 %164 }
 0x173   :  { %v198_v29 = vmul.f32 %v364_v50, %v557_v30  ;;  %373 = vrsqrt.f32 %v183_v46  ;;  %v175_v54 = vmul.f32 0.03125, %v165_v53 }
 0x174   :  { %v319_v55 = vpack.c.bf16 %v228_v51, %v228_v51  ;;  %v213_v56 = vmul.f32 %v605_v33, %v197_v52  ;;  %375 = vrsqrt.f32 %v184_v49 }
 0x175   :  { %v366_v59 = vpop.eup %365  ;;  %v214_v60 = vmul.f32 %v605_v33, %v198_v29  ;;  %v185_v61 = vadd.f32 1e-05, %v175_v54 }
 0x176   :  { %v368_v62 = vpop.eup %367  ;;  %279 = vst.msk [vmem:[#allocation8] sm:$0xf] %vm278_vm1, %v319_v55  ;;  %v229_v63 = vadd.f32 %v608_v41, %v213_v56  ;;  %v199_v37 = vmul.f32 %v366_v59, %v565_v38 }
 0x177   :  { %v230_v0 = vadd.f32 %v608_v41, %v214_v60  ;;  %v200_v30 = vmul.f32 %v368_v62, %v573_v47  ;;  %377 = vrsqrt.f32 %v185_v61 }
 0x178   :  { %v320_v1 = vpack.c.bf16 %v229_v63, %v229_v63  ;;  %v215_v2 = vmul.f32 %v605_v33, %v199_v37 }
 0x179   :  { %v370_v5 = vpop.eup %369  ;;  %v321_v6 = vpack.c.bf16 %v230_v0, %v230_v0  ;;  %v216_v7 = vmul.f32 %v605_v33, %v200_v30 }
 0x17a   :  { %v372_v8 = vpop.eup %371  ;;  %280 = vst.msk [vmem:[#allocation8 + $0x4] sm:$0xf] %vm278_vm1, %v320_v1  ;;  %v231_v9 = vadd.f32 %v608_v41, %v215_v2  ;;  %v201_v10 = vmul.f32 %v370_v5, %v575_v48 }
 0x17b   :  { %281 = vst.msk [vmem:[#allocation8 + $0x8] sm:$0xf] %vm278_vm1, %v321_v6  ;;  %v232_v38 = vadd.f32 %v608_v41, %v216_v7  ;;  %v202_v47 = vmul.f32 %v372_v8, %v583_v57 }
 0x17c   :  { %v322_v11 = vpack.c.bf16 %v231_v9, %v231_v9  ;;  %v217_v12 = vmul.f32 %v605_v33, %v201_v10 }
 0x17d   :  { %v374_v13 = vpop.eup %373  ;;  %v323_v14 = vpack.c.bf16 %v232_v38, %v232_v38  ;;  %v218_v15 = vmul.f32 %v605_v33, %v202_v47 }
 0x17e   :  { %v376_v16 = vpop.eup %375  ;;  %282 = vst.msk [vmem:[#allocation8 + $0xc] sm:$0xf] %vm278_vm1, %v322_v11  ;;  %v233_v17 = vadd.f32 %v608_v41, %v217_v12  ;;  %v203_v48 = vmul.f32 %v374_v13, %v585_v58 }
 0x17f   :  { %283 = vst.msk [vmem:[#allocation8 + $0x10] sm:$0xf] %vm278_vm1, %v323_v14  ;;  %v234_v18 = vadd.f32 %v608_v41, %v218_v15  ;;  %v204_v57 = vmul.f32 %v376_v16, %v593_v3 }
 0x180   :  { %v324_v19 = vpack.c.bf16 %v233_v17, %v233_v17  ;;  %v219_v20 = vmul.f32 %v605_v33, %v203_v48 }
 0x181   :  { %v378_v21 = vpop.eup %377  ;;  %v325_v22 = vpack.c.bf16 %v234_v18, %v234_v18  ;;  %v220_v23 = vmul.f32 %v605_v33, %v204_v57 }
 0x182   :  { %284 = vst.msk [vmem:[#allocation8 + $0x14] sm:$0xf] %vm278_vm1, %v324_v19  ;;  %v235_v24 = vadd.f32 %v608_v41, %v219_v20  ;;  %v205_v25 = vmul.f32 %v378_v21, %v595_v4 }
 0x183   :  { %285 = vst.msk [vmem:[#allocation8 + $0x18] sm:$0xf] %vm278_vm1, %v325_v22  ;;  %v236_v58 = vadd.f32 %v608_v41, %v220_v23 }
 0x184   :  { %v326_v26 = vpack.c.bf16 %v235_v24, %v235_v24  ;;  %v221_v3 = vmul.f32 %v605_v33, %v205_v25 }
 0x185   :  { %v327_v27 = vpack.c.bf16 %v236_v58, %v236_v58 }
 0x186   :  { %286 = vst.msk [vmem:[#allocation8 + $0x1c] sm:$0xf] %vm278_vm1, %v326_v26  ;;  %v237_v28 = vadd.f32 %v608_v41, %v221_v3 }
 0x187   :  { %287 = vst.msk [vmem:[#allocation8 + $0x20] sm:$0xf] %vm278_vm1, %v327_v27 }
 0x188   :  { %v328_v31 = vpack.c.bf16 %v237_v28, %v237_v28 }
 0x18a   :  { %288 = vst.msk [vmem:[#allocation8 + $0x24] sm:$0xf] %vm278_vm1, %v328_v31 }
 0x18b   :  { %456 = shalt.err (!%p453_p0)
}
 0x18c   :  { %s457_s27 = scalar_lea.hbm %s667_s3, 640 }
 0x18d   :  { %p458_p1 = scmp.ne.s32.totalorder %s667_s3, %s457_s27  ;;  %p461_p2 = scmp.lt.u32.totalorder %s457_s27, %s667_s3 }
 0x18f   :  { %p463_p3 = pnand %p461_p2, %p458_p1 }
 0x191   :  { %466 = shalt.err (!%p463_p3)
}
 0x192   :  { %300 = dma.vmem_to_hbm [thread:$0]  %s295_s23, 640, %s667_s3, [#allocation4], %s475_s1, %s475_s1, %s476_s8  }
 0x193   :  { %471 = dma.done.wait [#allocation4], 640  }
 0x194   :  { %472 = vsyncadd [#allocation4], 4294966656 }
 0x195   :  { %304 = vsyncpa [#allocation3], 1 }
 0x196   :  { %305 = vsyncpa [#allocation6], 1 }
 0x197   :  { %306 = vsyncpa [#allocation4], 1 }

// kernel: prithvi_wrapper_forward.8
= control target key start
LH: loop header
LB: loop body
LE: loop exit
PB: predicated region body
PF: predicated region fallthrough
CT: control target
= control target key end

     0   :  { %s4811_s0 = inlined_call_operand.hbm [shape: bf16[2,40,32], index: 0, kind: input, shape index: {}]   ;;  %s4812_s1 = inlined_call_operand.hbm [shape: f32[1,32], index: 1, kind: input, shape index: {}]   ;;  %s4813_s2 = inlined_call_operand.hbm [shape: f32[1,32], index: 2, kind: input, shape index: {}]   ;;  %s4814_s3 = inlined_call_operand.hbm [shape: bf16[32,96], index: 3, kind: input, shape index: {}]   ;;  %s4815_s4 = inlined_call_operand.hbm [shape: f32[1,96], index: 4, kind: input, shape index: {}]   ;;  %s4816_s5 = inlined_call_operand.hbm [shape: bf16[32,32], index: 5, kind: input, shape index: {}]   ;;  %s4817_s6 = inlined_call_operand.hbm [shape: f32[1,32], index: 6, kind: input, shape index: {}]   ;;  %s4818_s7 = inlined_call_operand.hbm [shape: f32[1,32], index: 7, kind: input, shape index: {}]   ;;  %s4819_s8 = inlined_call_operand.hbm [shape: f32[1,32], index: 8, kind: input, shape index: {}]   ;;  %s4820_s9 = inlined_call_operand.hbm [shape: bf16[32,64], index: 9, kind: input, shape index: {}]   ;;  %s4821_s10 = inlined_call_operand.hbm [shape: f32[1,64], index: 10, kind: input, shape index: {}]   ;;  %s4822_s11 = inlined_call_operand.hbm [shape: bf16[64,32], index: 11, kind: input, shape index: {}]   ;;  %s4823_s12 = inlined_call_operand.hbm [shape: f32[1,32], index: 12, kind: input, shape index: {}]   ;;  %s4824_s13 = inlined_call_operand.hbm [shape: bf16[2,40,32], index: 13, kind: output, shape index: {}]  }
   0x1   :  { %4836 = sst [smem:[#allocation34_spill]] %s4811_s0 }
   0x2   :  { %4837 = sst [smem:[#allocation35_spill]] %s4812_s1 }
   0x3   :  { %4838 = sst [smem:[#allocation36_spill]] %s4813_s2 }
   0x4   :  { %4839 = sst [smem:[#allocation37_spill]] %s4814_s3 }
   0x5   :  { %4840 = sst [smem:[#allocation38_spill]] %s4815_s4 }
   0x6   :  { %4841 = sst [smem:[#allocation39_spill]] %s4824_s13 }
   0x7   :  { %18 = vsyncpa [#allocation3], 0 }
   0x8   :  { %20 = vsyncpa [#allocation3 + $0x1], 0 }
   0x9   :  { %21 = vsyncpa [#allocation6], 0 }
   0xa   :  { %22 = vsyncpa [#allocation9], 0 }
   0xb   :  { %23 = vsyncpa [#allocation12], 0 }
   0xc   :  { %24 = vsyncpa [#allocation15], 0 }
   0xd   :  { %25 = vsyncpa [#allocation18], 0 }
   0xe   :  { %26 = vsyncpa [#allocation21], 0 }
   0xf   :  { %27 = vsyncpa [#allocation4], 0 }
  0x10   :  { %29 = vsyncpa [#allocation4 + $0x1], 0  ;;  %s3774_s25 = smov 0   ;;  %s3776_s26 = smov 0  }
  0x11   :  { %s3778_s27 = smov 0   ;;  %s3780_s28 = smov 0  }
  0x12 LB: > { %s3671_s29 = smov [#allocation5]   ;;  %s3795_s14 = sadd.s32 4294967295, %s3669_s28   ;;  %s3669_s28 = sphi %s3780_s28, %s4882_s28   ;;  %s3665_s27 = sphi %s3778_s27, %s4881_s27   ;;  %s3661_s26 = sphi %s3776_s26, %s4880_s26   ;;  %s3657_s25 = sphi %s3774_s25, %s4879_s25  }
  0x13   : > { %s357_s30 = sshll.u32 %s3671_s29, 4  ;;  %4842 = sst [smem:[#allocation32_spill]] %s3795_s14  ;;  %s3800_s30 = int_to_ptr.vmem [resolvable:$true] %s357_s30 }
  0x14   : > { %p2483_p0 = scmp.ge.s32.totalorder %s3669_s28, 1  ;;  %p4831_p1 = scmp.eq.s32.totalorder %s3795_s14, 0 }
  0x15   : > { %p344_p2 = scmp.lt.s32.totalorder %s3669_s28, 3  ;;  %s3672_s16 = smov [#allocation8]  }
  0x16   : > { %s378_s17 = sshll.u32 %s3672_s16, 4  ;;  %s3673_s19 = smov [#allocation11]   ;;  %s3809_s17 = int_to_ptr.vmem [resolvable:$true] %s378_s17 }
  0x17   : > { %p3802_p3 = pnand %p2483_p0, %p344_p2  ;;  %s402_s20 = sshll.u32 %s3673_s19, 4  ;;  %s3817_s20 = int_to_ptr.vmem [resolvable:$true] %s402_s20 }
  0x18   : > { %s4846_s1 = sld [smem:[#allocation35_spill]] }
  0x19   : > { %s4843_s15 = scalar_select %p3802_p3, 1, 0 }
  0x1a   : > { %p2929_p5 = pneg %p3802_p3 }
  0x1b   : > { %4844 = sst [smem:[#allocation33_spill]] %s4843_s15 }
  0x1c   : > { %p3813_p6 = pnand %p2929_p5, %p4831_p1 }
  0x1e   : > { %s3213_s23 = scalar_lea.hbm %s4846_s1, 16  ;;  %p3827_p8 = pneg %p3813_p6 }
  0x1f   : > { %p3214_p7 = scmp.ne.s32.totalorder %s4846_s1, %s3213_s23  ;;  %p3220_p11 = scmp.lt.u32.totalorder %s3213_s23, %s4846_s1 }
  0x21   : > { %p3216_p9 = pnand %p3827_p8, %p3214_p7 }
  0x23   : > { %p3217_p10 = pneg %p3216_p9 }
  0x25   : > { %p3222_p12 = pnand %p3220_p11, %p3217_p10 }
  0x27   : > { %3225 = shalt.err (!%p3222_p12)
}
  0x28   : > { %s3226_s21 = scalar_lea.vmem %s3800_s30, 16  ;;  %s3233_s22 = scalar_lea.vmem %s3800_s30, 32 }
  0x29   : > { %p3227_p13 = scmp.ne.s32.totalorder %s3800_s30, %s3226_s21  ;;  %p3234_p5 = scmp.lt.s32.totalorder %s3800_s30, %s3800_s30 }
  0x2a   : > { %p3235_p7 = scmp.lt.s32.totalorder %s3233_s22, %s3226_s21 }
  0x2b   : > { %p3229_p0 = pnand %p3227_p13, %p3827_p8 }
  0x2c   : > { %p3236_p9 = por %p3235_p7, %p3234_p5 }
  0x2d   : > { %p3230_p2 = pneg %p3229_p0 }
  0x2f   : > { %p3237_p4 = pnand %p3236_p9, %p3230_p2 }
  0x31   : > { %3240 = shalt.err (!%p3237_p4)
}
  0x32   : > { %2932 = dma.hbm_to_vmem [thread:$0]  (!%p3813_p6), %s4846_s1, 16, %s3800_s30, [#allocation6]  }
  0x33   : > { %s4848_s3 = sld [smem:[#allocation37_spill]] }
  0x39   : > { %s3241_s19 = scalar_lea.hbm %s4848_s3, 256 }
  0x3a   : > { %p3242_p10 = scmp.ne.s32.totalorder %s4848_s3, %s3241_s19  ;;  %p3248_p4 = scmp.lt.u32.totalorder %s3241_s19, %s4848_s3 }
  0x3c   : > { %p3244_p11 = pnand %p3242_p10, %p3827_p8 }
  0x3e   : > { %p3245_p12 = pneg %p3244_p11 }
  0x40   : > { %p3250_p13 = pnand %p3248_p4, %p3245_p12 }
  0x42   : > { %3253 = shalt.err (!%p3250_p13)
}
  0x43   : > { %s3254_s30 = scalar_lea.vmem %s3809_s17, 256  ;;  %p3262_p7 = scmp.lt.s32.totalorder %s3809_s17, %s3809_s17 }
  0x44   : > { %p3255_p0 = scmp.ne.s32.totalorder %s3809_s17, %s3254_s30  ;;  %p3263_p9 = scmp.lt.s32.totalorder %s3254_s30, %s3254_s30 }
  0x46   : > { %p3257_p2 = pnand %p3255_p0, %p3827_p8  ;;  %p3264_p10 = por %p3263_p9, %p3262_p7 }
  0x48   : > { %p3258_p5 = pneg %p3257_p2 }
  0x4a   : > { %p3265_p11 = pnand %p3264_p10, %p3258_p5 }
  0x4c   : > { %3268 = shalt.err (!%p3265_p11)
}
  0x4d   : > { %s4833_s0 = smov 64   ;;  %s4834_s15 = smov 4  }
  0x4e   : > { %2938 = dma.hbm_to_vmem [thread:$0]  (!%p3813_p6), %s4848_s3, 256, %s3809_s17, [#allocation9], %s4833_s0, %s4833_s0, %s4834_s15  }
  0x4f   : > { %s3269_s19 = scalar_lea.hbm %s4816_s5, 256 }
  0x50   : > { %p3270_p12 = scmp.ne.s32.totalorder %s4816_s5, %s3269_s19  ;;  %p3276_p0 = scmp.lt.u32.totalorder %s3269_s19, %s4816_s5 }
  0x52   : > { %p3272_p4 = pnand %p3270_p12, %p3827_p8 }
  0x54   : > { %p3273_p13 = pneg %p3272_p4 }
  0x56   : > { %p3278_p2 = pnand %p3276_p0, %p3273_p13 }
  0x58   : > { %3281 = shalt.err (!%p3278_p2)
}
  0x59   : > { %s3282_s17 = scalar_lea.vmem %s3817_s20, 256  ;;  %p3290_p10 = scmp.lt.s32.totalorder %s3817_s20, %s3817_s20 }
  0x5a   : > { %p3283_p5 = scmp.ne.s32.totalorder %s3817_s20, %s3282_s17  ;;  %p3291_p11 = scmp.lt.s32.totalorder %s3282_s17, %s3282_s17 }
  0x5c   : > { %p3285_p7 = pnand %p3283_p5, %p3827_p8  ;;  %p3292_p12 = por %p3291_p11, %p3290_p10 }
  0x5e   : > { %p3286_p9 = pneg %p3285_p7 }
  0x60   : > { %p3293_p4 = pnand %p3292_p12, %p3286_p9 }
  0x62   : > { %3296 = shalt.err (!%p3293_p4)
}
  0x63   : > { %2944 = dma.hbm_to_vmem [thread:$0]  (!%p3813_p6), %s4816_s5, 256, %s3817_s20, [#allocation12], %s4833_s0, %s4833_s0, %s4834_s15  }
  0x64   : > { %s3676_s23 = smov [#allocation14]   ;;  %s3677_s29 = smov [#allocation17]  }
  0x65   : > { %s427_s24 = sshll.u32 %s3676_s23, 4  ;;  %s448_s19 = sshll.u32 %s3677_s29, 4  ;;  %s428_s24 = int_to_ptr.vmem [resolvable:$true] %s427_s24  ;;  %s449_s19 = int_to_ptr.vmem [resolvable:$true] %s448_s19 }
  0x66   : > { %s3297_s30 = scalar_lea.hbm %s4818_s7, 16 }
  0x67   : > { %p3298_p13 = scmp.ne.s32.totalorder %s4818_s7, %s3297_s30  ;;  %p3304_p5 = scmp.lt.u32.totalorder %s3297_s30, %s4818_s7 }
  0x69   : > { %p3300_p0 = pnand %p3298_p13, %p3827_p8 }
  0x6b   : > { %p3301_p2 = pneg %p3300_p0 }
  0x6d   : > { %p3306_p7 = pnand %p3304_p5, %p3301_p2 }
  0x6f   : > { %3309 = shalt.err (!%p3306_p7)
}
  0x70   : > { %s3310_s20 = scalar_lea.vmem %s428_s24, 16  ;;  %s3317_s13 = scalar_lea.vmem %s428_s24, 32 }
  0x71   : > { %p3311_p9 = scmp.ne.s32.totalorder %s428_s24, %s3310_s20  ;;  %p3318_p12 = scmp.lt.s32.totalorder %s428_s24, %s428_s24 }
  0x72   : > { %p3319_p4 = scmp.lt.s32.totalorder %s3317_s13, %s3310_s20 }
  0x73   : > { %p3313_p10 = pnand %p3311_p9, %p3827_p8 }
  0x74   : > { %p3320_p1 = por %p3319_p4, %p3318_p12 }
  0x75   : > { %p3314_p11 = pneg %p3313_p10 }
  0x77   : > { %p3321_p3 = pnand %p3320_p1, %p3314_p11 }
  0x79   : > { %3324 = shalt.err (!%p3321_p3)
}
  0x7a   : > { %2950 = dma.hbm_to_vmem [thread:$0]  (!%p3813_p6), %s4818_s7, 16, %s428_s24, [#allocation15]  }
  0x7b   : > { %s3325_s21 = scalar_lea.hbm %s4820_s9, 256 }
  0x7c   : > { %p3326_p13 = scmp.ne.s32.totalorder %s4820_s9, %s3325_s21  ;;  %p3332_p3 = scmp.lt.u32.totalorder %s3325_s21, %s4820_s9 }
  0x7e   : > { %p3328_p0 = pnand %p3326_p13, %p3827_p8 }
  0x80   : > { %p3329_p1 = pneg %p3328_p0 }
  0x82   : > { %p3334_p2 = pnand %p3332_p3, %p3329_p1 }
  0x84   : > { %3337 = shalt.err (!%p3334_p2)
}
  0x85   : > { %s3338_s20 = scalar_lea.vmem %s449_s19, 256  ;;  %p3346_p10 = scmp.lt.s32.totalorder %s449_s19, %s449_s19 }
  0x86   : > { %p3339_p5 = scmp.ne.s32.totalorder %s449_s19, %s3338_s20  ;;  %p3347_p11 = scmp.lt.s32.totalorder %s3338_s20, %s3338_s20 }
  0x88   : > { %p3341_p7 = pnand %p3339_p5, %p3827_p8  ;;  %p3348_p12 = por %p3347_p11, %p3346_p10 }
  0x8a   : > { %p3342_p9 = pneg %p3341_p7 }
  0x8c   : > { %p3349_p4 = pnand %p3348_p12, %p3342_p9 }
  0x8e   : > { %3352 = shalt.err (!%p3349_p4)
}
  0x8f   : > { %2956 = dma.hbm_to_vmem [thread:$0]  (!%p3813_p6), %s4820_s9, 256, %s449_s19, [#allocation18], %s4833_s0, %s4833_s0, %s4834_s15  }
  0x90   : > { %s3678_s3 = smov [#allocation20]   ;;  %s3679_s14 = smov [#allocation7]  }
  0x91   : > { %s472_s23 = sshll.u32 %s3678_s3, 4  ;;  %s368_s29 = sshll.u32 %s3679_s14, 4  ;;  %s473_s23 = int_to_ptr.vmem [resolvable:$true] %s472_s23  ;;  %s369_s29 = int_to_ptr.vmem [resolvable:$true] %s368_s29 }
  0x92   : > { %s3353_s30 = scalar_lea.hbm %s4822_s11, 512 }
  0x93   : > { %p3354_p13 = scmp.ne.s32.totalorder %s4822_s11, %s3353_s30  ;;  %p3360_p3 = scmp.lt.u32.totalorder %s3353_s30, %s4822_s11 }
  0x95   : > { %p3356_p0 = pnand %p3354_p13, %p3827_p8 }
  0x97   : > { %p3357_p1 = pneg %p3356_p0 }
  0x99   : > { %p3362_p2 = pnand %p3360_p3, %p3357_p1 }
  0x9b   : > { %3365 = shalt.err (!%p3362_p2)
}
  0x9c   : > { %s3366_s19 = scalar_lea.vmem %s473_s23, 512  ;;  %p3374_p10 = scmp.lt.s32.totalorder %s473_s23, %s473_s23 }
  0x9d   : > { %p3367_p5 = scmp.ne.s32.totalorder %s473_s23, %s3366_s19  ;;  %p3375_p11 = scmp.lt.s32.totalorder %s3366_s19, %s3366_s19 }
  0x9f   : > { %p3369_p7 = pnand %p3367_p5, %p3827_p8  ;;  %p3376_p12 = por %p3375_p11, %p3374_p10 }
  0xa1   : > { %p3370_p9 = pneg %p3369_p7 }
  0xa3   : > { %p3377_p4 = pnand %p3376_p12, %p3370_p9 }
  0xa5   : > { %3380 = shalt.err (!%p3377_p4)
}
  0xa6   : > { %2962 = dma.hbm_to_vmem [thread:$0]  (!%p3813_p6), %s4822_s11, 512, %s473_s23, [#allocation21], %s4833_s0, %s4833_s0, %s4834_s15  }
  0xa7   : > { %s4849_s2 = sld [smem:[#allocation36_spill]] }
  0xad   : > { %s3381_s22 = scalar_lea.hbm %s4849_s2, 16 }
  0xae   : > { %p3382_p13 = scmp.ne.s32.totalorder %s4849_s2, %s3381_s22  ;;  %p3388_p3 = scmp.lt.u32.totalorder %s3381_s22, %s4849_s2 }
  0xb0   : > { %p3384_p0 = pnand %p3382_p13, %p3827_p8 }
  0xb2   : > { %p3385_p1 = pneg %p3384_p0 }
  0xb4   : > { %p3390_p2 = pnand %p3388_p3, %p3385_p1 }
  0xb6   : > { %3393 = shalt.err (!%p3390_p2)
}
  0xb7   : > { %s3394_s24 = scalar_lea.vmem %s369_s29, 16  ;;  %s3401_s23 = scalar_lea.vmem %s369_s29, 32 }
  0xb8   : > { %p3395_p5 = scmp.ne.s32.totalorder %s369_s29, %s3394_s24  ;;  %p3402_p10 = scmp.lt.s32.totalorder %s369_s29, %s369_s29 }
  0xb9   : > { %p3403_p11 = scmp.lt.s32.totalorder %s3401_s23, %s3394_s24 }
  0xba   : > { %p3397_p7 = pnand %p3395_p5, %p3827_p8 }
  0xbb   : > { %p3404_p12 = por %p3403_p11, %p3402_p10 }
  0xbc   : > { %p3398_p9 = pneg %p3397_p7 }
  0xbe   : > { %p3405_p4 = pnand %p3404_p12, %p3398_p9 }
  0xc0   : > { %3408 = shalt.err (!%p3405_p4)
}
  0xc1   : > { %2935 = dma.hbm_to_vmem [thread:$0]  (!%p3813_p6), %s4849_s2, 16, %s369_s29, [#allocation6]  }
  0xc2   : > { %s3680_s3 = smov [#allocation10]   ;;  %s3681_s21 = smov [#allocation13]  }
  0xc3   : > { %s392_s14 = sshll.u32 %s3680_s3, 4  ;;  %s416_s22 = sshll.u32 %s3681_s21, 4  ;;  %s393_s14 = int_to_ptr.vmem [resolvable:$true] %s392_s14  ;;  %s417_s22 = int_to_ptr.vmem [resolvable:$true] %s416_s22 }
  0xc4   : > { %s4850_s4 = sld [smem:[#allocation38_spill]] }
  0xca   : > { %s3409_s1 = scalar_lea.hbm %s4850_s4, 16 }
  0xcb   : > { %p3410_p13 = scmp.ne.s32.totalorder %s4850_s4, %s3409_s1  ;;  %p3416_p3 = scmp.lt.u32.totalorder %s3409_s1, %s4850_s4 }
  0xcd   : > { %p3412_p0 = pnand %p3410_p13, %p3827_p8 }
  0xcf   : > { %p3413_p1 = pneg %p3412_p0 }
  0xd1   : > { %p3418_p2 = pnand %p3416_p3, %p3413_p1 }
  0xd3   : > { %3421 = shalt.err (!%p3418_p2)
}
  0xd4   : > { %s3422_s29 = scalar_lea.vmem %s393_s14, 16  ;;  %s3429_s13 = scalar_lea.vmem %s393_s14, 32 }
  0xd5   : > { %p3423_p5 = scmp.ne.s32.totalorder %s393_s14, %s3422_s29  ;;  %p3430_p10 = scmp.lt.s32.totalorder %s393_s14, %s393_s14 }
  0xd6   : > { %p3431_p11 = scmp.lt.s32.totalorder %s3429_s13, %s3422_s29 }
  0xd7   : > { %p3425_p7 = pnand %p3423_p5, %p3827_p8 }
  0xd8   : > { %p3432_p12 = por %p3431_p11, %p3430_p10 }
  0xd9   : > { %p3426_p9 = pneg %p3425_p7 }
  0xdb   : > { %p3433_p4 = pnand %p3432_p12, %p3426_p9 }
  0xdd   : > { %3436 = shalt.err (!%p3433_p4)
}
  0xde   : > { %2941 = dma.hbm_to_vmem [thread:$0]  (!%p3813_p6), %s4850_s4, 16, %s393_s14, [#allocation9]  }
  0xdf   : > { %s3437_s1 = scalar_lea.hbm %s4817_s6, 16 }
  0xe0   : > { %p3438_p13 = scmp.ne.s32.totalorder %s4817_s6, %s3437_s1  ;;  %p3444_p3 = scmp.lt.u32.totalorder %s3437_s1, %s4817_s6 }
  0xe2   : > { %p3440_p0 = pnand %p3438_p13, %p3827_p8 }
  0xe4   : > { %p3441_p1 = pneg %p3440_p0 }
  0xe6   : > { %p3446_p2 = pnand %p3444_p3, %p3441_p1 }
  0xe8   : > { %3449 = shalt.err (!%p3446_p2)
}
  0xe9   : > { %s3450_s29 = scalar_lea.vmem %s417_s22, 16  ;;  %s3457_s14 = scalar_lea.vmem %s417_s22, 32 }
  0xea   : > { %p3451_p5 = scmp.ne.s32.totalorder %s417_s22, %s3450_s29  ;;  %p3458_p10 = scmp.lt.s32.totalorder %s417_s22, %s417_s22 }
  0xeb   : > { %p3459_p11 = scmp.lt.s32.totalorder %s3457_s14, %s3450_s29 }
  0xec   : > { %p3453_p7 = pnand %p3451_p5, %p3827_p8 }
  0xed   : > { %p3460_p12 = por %p3459_p11, %p3458_p10 }
  0xee   : > { %p3454_p9 = pneg %p3453_p7 }
  0xf0   : > { %p3461_p4 = pnand %p3460_p12, %p3454_p9 }
  0xf2   : > { %3464 = shalt.err (!%p3461_p4)
}
  0xf3   : > { %2947 = dma.hbm_to_vmem [thread:$0]  (!%p3813_p6), %s4817_s6, 16, %s417_s22, [#allocation12]  }
  0xf4   : > { %s3682_s21 = smov [#allocation16]   ;;  %s3683_s17 = smov [#allocation19]  }
  0xf5   : > { %s438_s30 = sshll.u32 %s3682_s21, 4  ;;  %s462_s1 = sshll.u32 %s3683_s17, 4  ;;  %s439_s30 = int_to_ptr.vmem [resolvable:$true] %s438_s30  ;;  %s463_s1 = int_to_ptr.vmem [resolvable:$true] %s462_s1 }
  0xf6   : > { %s3465_s23 = scalar_lea.hbm %s4819_s8, 16 }
  0xf7   : > { %p3466_p13 = scmp.ne.s32.totalorder %s4819_s8, %s3465_s23  ;;  %p3472_p3 = scmp.lt.u32.totalorder %s3465_s23, %s4819_s8 }
  0xf9   : > { %p3468_p0 = pnand %p3466_p13, %p3827_p8 }
  0xfb   : > { %p3469_p1 = pneg %p3468_p0 }
  0xfd   : > { %p3474_p2 = pnand %p3472_p3, %p3469_p1 }
  0xff   : > { %3477 = shalt.err (!%p3474_p2)
}
 0x100   : > { %s3478_s22 = scalar_lea.vmem %s439_s30, 16  ;;  %s3485_s3 = scalar_lea.vmem %s439_s30, 32 }
 0x101   : > { %p3479_p5 = scmp.ne.s32.totalorder %s439_s30, %s3478_s22  ;;  %p3486_p10 = scmp.lt.s32.totalorder %s439_s30, %s439_s30 }
 0x102   : > { %p3487_p11 = scmp.lt.s32.totalorder %s3485_s3, %s3478_s22 }
 0x103   : > { %p3481_p7 = pnand %p3479_p5, %p3827_p8 }
 0x104   : > { %p3488_p12 = por %p3487_p11, %p3486_p10 }
 0x105   : > { %p3482_p9 = pneg %p3481_p7 }
 0x107   : > { %p3489_p4 = pnand %p3488_p12, %p3482_p9 }
 0x109   : > { %3492 = shalt.err (!%p3489_p4)
}
 0x10a   : > { %2953 = dma.hbm_to_vmem [thread:$0]  (!%p3813_p6), %s4819_s8, 16, %s439_s30, [#allocation15]  }
 0x10b   : > { %s3493_s23 = scalar_lea.hbm %s4821_s10, 16 }
 0x10c   : > { %p3494_p13 = scmp.ne.s32.totalorder %s4821_s10, %s3493_s23  ;;  %p3500_p3 = scmp.lt.u32.totalorder %s3493_s23, %s4821_s10 }
 0x10e   : > { %p3496_p0 = pnand %p3494_p13, %p3827_p8 }
 0x110   : > { %p3497_p1 = pneg %p3496_p0 }
 0x112   : > { %p3502_p2 = pnand %p3500_p3, %p3497_p1 }
 0x114   : > { %3505 = shalt.err (!%p3502_p2)
}
 0x115   : > { %s3506_s22 = scalar_lea.vmem %s463_s1, 16  ;;  %s3513_s30 = scalar_lea.vmem %s463_s1, 32 }
 0x116   : > { %p3507_p5 = scmp.ne.s32.totalorder %s463_s1, %s3506_s22  ;;  %p3514_p10 = scmp.lt.s32.totalorder %s463_s1, %s463_s1 }
 0x117   : > { %p3515_p11 = scmp.lt.s32.totalorder %s3513_s30, %s3506_s22 }
 0x118   : > { %p3509_p7 = pnand %p3507_p5, %p3827_p8 }
 0x119   : > { %p3516_p12 = por %p3515_p11, %p3514_p10 }
 0x11a   : > { %p3510_p9 = pneg %p3509_p7 }
 0x11c   : > { %p3517_p4 = pnand %p3516_p12, %p3510_p9 }
 0x11e   : > { %3520 = shalt.err (!%p3517_p4)
}
 0x11f   : > { %2959 = dma.hbm_to_vmem [thread:$0]  (!%p3813_p6), %s4821_s10, 16, %s463_s1, [#allocation18]  }
 0x120   : > { %s3684_s17 = smov [#allocation22]   ;;  %s3521_s19 = scalar_lea.hbm %s4823_s12, 16 }
 0x121   : > { %s486_s20 = sshll.u32 %s3684_s17, 4  ;;  %p3522_p13 = scmp.ne.s32.totalorder %s4823_s12, %s3521_s19  ;;  %s487_s20 = int_to_ptr.vmem [resolvable:$true] %s486_s20 }
 0x122   : > { %p3528_p3 = scmp.lt.u32.totalorder %s3521_s19, %s4823_s12 }
 0x123   : > { %p3524_p0 = pnand %p3522_p13, %p3827_p8 }
 0x125   : > { %p3525_p1 = pneg %p3524_p0 }
 0x127   : > { %p3530_p2 = pnand %p3528_p3, %p3525_p1 }
 0x129   : > { %3533 = shalt.err (!%p3530_p2)
}
 0x12a   : > { %s3534_s1 = scalar_lea.vmem %s487_s20, 16  ;;  %s3541_s30 = scalar_lea.vmem %s487_s20, 32 }
 0x12b   : > { %p3535_p5 = scmp.ne.s32.totalorder %s487_s20, %s3534_s1  ;;  %p3542_p10 = scmp.lt.s32.totalorder %s487_s20, %s487_s20 }
 0x12c   : > { %p3543_p11 = scmp.lt.s32.totalorder %s3541_s30, %s3534_s1 }
 0x12d   : > { %p3537_p7 = pnand %p3535_p5, %p3827_p8 }
 0x12e   : > { %p3544_p12 = por %p3543_p11, %p3542_p10 }
 0x12f   : > { %p3538_p9 = pneg %p3537_p7 }
 0x131   : > { %p3545_p4 = pnand %p3544_p12, %p3538_p9 }
 0x133   : > { %3548 = shalt.err (!%p3545_p4)
}
 0x134   : > { %s4851_s16 = sld [smem:[#allocation32_spill]]  ;;  %s2482_s17 = sadd.s32 4294967294, %s3669_s28  }
 0x135   : > { %2965 = dma.hbm_to_vmem [thread:$0]  (!%p3813_p6), %s4823_s12, 16, %s487_s20, [#allocation21]  }
 0x136   : > { %s4071_s18 = sadd.s32 1, %s3669_s28   ;;  %s42_s23 = sadd.s32 1, %s3665_s27 }
 0x137   : > { %s39_s24 = ssub.s32 %s3669_s28, %s4071_s18  ;;  %p49_p13 = scmp.ne.s32.totalorder %s3665_s27, %s3661_s26 }
 0x138   : > { %p40_p8 = scmp.eq.s32.totalorder %s39_s24, 0  ;;  %p50_p0 = scmp.eq.s32.totalorder %s3669_s28, 0 }
 0x139   : > { %p55_p1 = scmp.ne.s32.totalorder %s3661_s26, %s3657_s25  ;;  %p337_p7 = scmp.eq.s32.totalorder %s2482_s17, 1 }
 0x13a   : > { %s4082_s19 = scalar_select %p40_p8, %s3665_s27, %s42_s23  }
 0x13b   : > { %p51_p3 = por %p50_p0, %p49_p13  ;;  %p4852_p2 = scmp.eq.s32.totalorder %s4851_s16, 0 }
 0x13c   : > { %p331_p6 = scmp.eq.s32.totalorder %s4851_s16, 1  ;;  %p2986_p9 = scmp.lt.s32.totalorder %s3669_s28, 2 }
 0x13d   : > { %p4086_p5 = por %p4852_p2, %p55_p1  ;;  %s497_s20 = sand.u32 1, %s3665_s27  }
 0x13e   : > { %p4093_p10 = por %p331_p6, %p49_p13  ;;  %p4097_p11 = por %p337_p7, %p55_p1 }
 0x13f   : > { %s2873_s22 = smul.u32 20, %s497_s20  ;;  %p4102_p12 = pnand %p2986_p9, %p51_p3 }
 0x140   : > { %s4854_s14 = scalar_select %p4093_p10, 1, 0 }
 0x141   : > { %s4855_s13 = scalar_select %p4097_p11, 1, 0 }
 0x142   : > { %s2874_s1 = smul.u32 320, %s3669_s28  ;;  %s4857_s16 = sld [smem:[#allocation34_spill]] }
 0x143   : > { %s501_s24 = scalar_lea.vmem [#allocation2], %s2873_s22  ;;  %s4113_s0 = scalar_lea.sflag [#allocation3], %s497_s20 }
 0x144   : > { %s508_s23 = sshll.u32 %s501_s24, 4  ;;  %p3551_p8 = pneg %p4102_p12  ;;  %s4111_s23 = int_to_ptr.vmem [resolvable:$true] %s508_s23 }
 0x148   : > { %s4109_s17 = scalar_lea.hbm %s4857_s16, %s2874_s1  ;;  %s3554_s21 = scalar_lea.hbm %s4857_s16, 640 }
 0x149   : > { %s3549_s15 = scalar_lea.hbm %s4109_s17, 320  ;;  %p3555_p1 = scmp.lt.u32.totalorder %s4109_s17, %s4857_s16 }
 0x14a   : > { %p3550_p4 = scmp.ne.s32.totalorder %s4109_s17, %s3549_s15  ;;  %p3556_p3 = scmp.lt.u32.totalorder %s3554_s21, %s3549_s15 }
 0x14b   : > { %p3558_p6 = scmp.lt.u32.totalorder %s3549_s15, %s4109_s17 }
 0x14c   : > { %p3552_p13 = pnand %p3551_p8, %p3550_p4  ;;  %p3557_p2 = por %p3556_p3, %p3555_p1 }
 0x14e   : > { %p3553_p0 = pneg %p3552_p13  ;;  %p3559_p7 = por %p3558_p6, %p3557_p2 }
 0x150   : > { %p3560_p9 = pnand %p3559_p7, %p3553_p0 }
 0x152   : > { %3563 = shalt.err (!%p3560_p9)
}
 0x153   : > { %s3564_s20 = scalar_lea.vmem %s4111_s23, 320  ;;  %s3685_s22 = smov [#allocation2]  }
 0x154   : > { %p3565_p4 = scmp.ne.s32.totalorder %s4111_s23, %s3564_s20  ;;  %s3569_s24 = sshll.u32 %s3685_s22, 4  ;;  %s3570_s24 = int_to_ptr.vmem [resolvable:$false] %s3569_s24 }
 0x155   : > { %s3571_s2 = scalar_lea.vmem %s3570_s24, 640  ;;  %p3572_p10 = scmp.lt.s32.totalorder %s4111_s23, %s3570_s24 }
 0x156   : > { %p3567_p13 = pnand %p3565_p4, %p3551_p8  ;;  %p3573_p1 = scmp.lt.s32.totalorder %s3571_s2, %s3564_s20 }
 0x158   : > { %p3568_p11 = pneg %p3567_p13  ;;  %p3574_p3 = por %p3573_p1, %p3572_p10 }
 0x15a   : > { %p3575_p2 = pnand %p3574_p3, %p3568_p11 }
 0x15c   : > { %3578 = shalt.err (!%p3575_p2)
}
 0x15d   : > { %s4858_s4 = smov 4   ;;  %s4859_s15 = smov 64  }
 0x15e   : > { %2969 = dma.hbm_to_vmem [thread:$0]  (!%p4102_p12), %s4109_s17, 320, %s4111_s23, %s4113_s0, %s4859_s15, %s4859_s15, %s4858_s4  }
 0x15f   : > { %s4860_s1 = sld [smem:[#allocation33_spill]] }
 0x165   : > { %p4861_p8 = scmp.ne.s32.totalorder %s4860_s1, 0 }
 0x166   : > { %s4147_s3 = sand.u32 (!%p4861_p8), 1, %s3661_s26  }
 0x167   : > { %520 = sbr.rel (%p4861_p8) target bundleno = 3088 (0xc10), region = 72  ;;  %s523_s20 = scalar_lea.sflag (!%p4861_p8), [#allocation3], %s4147_s3 }
 0x168   : > { %s2875_s21 = smul.u32 (!%p4861_p8), 20, %s4147_s3 }
 0x16a   : > { %s526_s30 = scalar_lea.vmem (!%p4861_p8), [#allocation2], %s2875_s21 }
 0x16e   : > { %3624 = dma.done.wait (%p4086_p5), %s523_s20, 320  }
 0x16f   : > { %3626 = vsyncadd (%p4086_p5), %s523_s20, 4294966976  ;;  %s4862_s0 = sld [smem:[#allocation32_spill]] }
 0x175   : > { %p4863_p10 = scmp.eq.s32.totalorder %s4862_s0, 0 }
 0x177   : > { %3628 = dma.done.wait (%p4863_p10), [#allocation6], 32   ;;  %p4864_p11 = pmov %p4863_p10 }
 0x178   : > { %p4865_p12 = pmov %p4863_p10 }
 0x179   : > { %3630 = vsyncadd (%p4864_p11), [#allocation6], 4294967264 }
 0x17a   : > { %3632 = dma.done.wait (%p4865_p12), [#allocation9], 272   ;;  %p4866_p0 = pmov %p4863_p10 }
 0x17c   : > { %3634 = vsyncadd (%p4866_p0), [#allocation9], 4294967024  ;;  %p4867_p6 = pmov %p4866_p0 }
 0x17d   : > { %p4868_p7 = pmov %p4866_p0 }
 0x17e   : > { %3636 = dma.done.wait (%p4867_p6), [#allocation12], 272  }
 0x17f   : > { %3638 = vsyncadd (%p4868_p7), [#allocation12], 4294967024  ;;  %p4869_p5 = pmov %p4866_p0 }
 0x180   : > { %p4870_p9 = pmov %p4866_p0 }
 0x181   : > { %3640 = dma.done.wait (%p4869_p5), [#allocation15], 32  }
 0x182   : > { %3642 = vsyncadd (%p4870_p9), [#allocation15], 4294967264  ;;  %p4871_p4 = pmov %p4866_p0 }
 0x183   : > { %p4872_p13 = pmov %p4866_p0 }
 0x184   : > { %3644 = dma.done.wait (%p4871_p4), [#allocation18], 272  }
 0x185   : > { %3646 = vsyncadd (%p4872_p13), [#allocation18], 4294967024  ;;  %p4873_p1 = pmov %p4866_p0 }
 0x186   : > { %p4874_p3 = pmov %p4866_p0 }
 0x187   : > { %3648 = dma.done.wait (%p4873_p1), [#allocation21], 528  }
 0x188   : > { %3650 = vsyncadd (%p4874_p3), [#allocation21], 4294966768  ;;  %v2579_v0 = vld [vmem:[%s526_s30] sm:$0xff]   ;;  %vm630_vm0 = vcmask 261120   ;;  %v2586_v1 = vld [vmem:[%s526_s30 + $0x8] sm:$0xff]   ;;  %v3686_v39 = vmov 0.0  }
 0x189   : > { %v622_v2 = vld [vmem:[%s526_s30 + $0x10] sm:$0xf]  ;;  %v4181_v3 = vunpack.c.l.bf16 %v2579_v0  ;;  %v4183_v4 = vunpack.c.l.bf16 %v2586_v1  ;;  %v4185_v5 = vunpack.c.h.bf16 %v2579_v0  ;;  %v4187_v6 = vunpack.c.h.bf16 %v2586_v1  ;;  %2657 = vmatprep.subr.bf16.mxu0 %v3686_v39  ;;  %2673 = vmatprep.subr.bf16.mxu1 %v3686_v39  ;;  %v3094_v40 = vld [vmem:[#allocation8 + $0x8] sm:$0xff]   ;;  %v2511_v58 = vld [vmem:[#allocation5] ss:$0 sm:$0xff]  ;;  %s3688_s29 = smov 96  }
 0x18a   : > { %v4197_v11 = vunpack.c.l.bf16 %v622_v2  ;;  %v3093_v38 = vld [vmem:[#allocation8] sm:$0xff]   ;;  %vm3687_vm1 = vmmov 0   ;;  %v2512_v63 = vld [vmem:[#allocation7] ss:$0 sm:$0xff]  ;;  %s3689_s17 = smov 88   ;;  %s3690_s23 = smov 120  }
 0x18b   : > { %v631_v7 = vsel %vm630_vm0, %v4181_v3, 0.0  ;;  %v637_v8 = vsel %vm630_vm0, %v4183_v4, 0.0  ;;  %v634_v9 = vsel %vm630_vm0, %v4185_v5, 0.0  ;;  %v640_v10 = vsel %vm630_vm0, %v4187_v6, 0.0  ;;  %2658 = vmatpush3.bf16.msra.mxu0 %v3093_v38  ;;  %2661 = vmatprep.mubr.msk.bf16.mxu0 %vm3687_vm1, %v3686_v39  ;;  %s3691_s22 = smov 112   ;;  %s3692_s24 = smov 80  }
 0x18c   : > { %632 = vadd.xlane.f32.xlu0 %v631_v7  ;;  %638 = vadd.xlane.f32.xlu1 %v637_v8  ;;  %v643_v12 = vsel %vm630_vm0, %v4197_v11, 0.0  ;;  %s3693_s2 = smov 104   ;;  %s3694_s4 = smov 72   ;;  %vm825_vm2 = vcmask 64512   ;;  %vm988_vm3 = vcmask 1043456   ;;  %vm912_vm5 = vcmask 326656  }
 0x18d   : > { %2659 = vmatprep.subr.bf16.mxu0 %v3686_v39  ;;  %2679 = vmatprep.mubr.msk.bf16.mxu1 %vm3687_vm1, %v3686_v39  ;;  %s3695_s15 = smov 64   ;;  %s3696_s1 = smov 56   ;;  %vm1803_vm6 = vcmask 130048   ;;  %vm1809_vm7 = vcmask 195584   ;;  %vm2183_vm8 = vcmask 523264   ;;  %vm2275_vm9 = vcmask 257024  }
 0x18e   : > { %s3697_s20 = smov 48   ;;  %s3698_s30 = smov 40  }
 0x18f   : > { %2660 = vmatpush3.bf16.msra.mxu0 %v3094_v40  ;;  %p4876_p8 = scmp.ne.s32.totalorder %s4854_s14, 0 }
 0x190   : > { %635 = vadd.xlane.f32.xlu0 %v634_v9  ;;  %641 = vadd.xlane.f32.xlu1 %v640_v10 }
 0x191   : > { %2691 = vmatprep.subr.bf16.mxu0 %v3686_v39 }
 0x194   : > { %644 = vadd.xlane.f32.xlu0 %v643_v12 }
 0x219   : > { %v633_v13 = vpop.xlane.xlu0 %632  ;;  %v639_v14 = vpop.xlane.xlu1 %638 }
 0x21a   : > { %v647_v15 = vmul.f32 0.03125, %v633_v13  ;;  %v649_v16 = vmul.f32 0.03125, %v639_v14 }
 0x21c   : > { %v652_v17 = vsub.f32 %v4181_v3, %v647_v15  ;;  %v4203_v18 = vsub.f32 %v4183_v4, %v649_v16 }
 0x21d   : > { %v636_v19 = vpop.xlane.xlu0 %635  ;;  %v642_v20 = vpop.xlane.xlu1 %641 }
 0x21e   : > { %v648_v21 = vmul.f32 0.03125, %v636_v19  ;;  %v650_v22 = vmul.f32 0.03125, %v642_v20  ;;  %v657_v23 = vmul.f32 %v652_v17, %v652_v17  ;;  %v659_v24 = vmul.f32 %v4203_v18, %v4203_v18 }
 0x220   : > { %v653_v25 = vsub.f32 %v4185_v5, %v648_v21  ;;  %v655_v26 = vsub.f32 %v4187_v6, %v650_v22  ;;  %v662_v27 = vsel %vm630_vm0, %v657_v23, 0.0  ;;  %v668_v30 = vsel %vm630_vm0, %v659_v24, 0.0  ;;  %v2513_v22 = vld [vmem:[#allocation10] ss:$0 sm:$0xff] }
 0x221   : > { %663 = vadd.xlane.f32.xlu1 %v662_v27  ;;  %v645_v28 = vpop.xlane.xlu0 %644 }
 0x222   : > { %v651_v29 = vmul.f32 0.03125, %v645_v28  ;;  %v658_v31 = vmul.f32 %v653_v25, %v653_v25  ;;  %v660_v32 = vmul.f32 %v655_v26, %v655_v26 }
 0x224   : > { %v656_v33 = vsub.f32 %v4197_v11, %v651_v29  ;;  %v665_v34 = vsel %vm630_vm0, %v658_v31, 0.0  ;;  %v671_v35 = vsel %vm630_vm0, %v660_v32, 0.0 }
 0x225   : > { %669 = vadd.xlane.f32.xlu1 %v668_v30  ;;  %666 = vadd.xlane.f32.xlu0 %v665_v34 }
 0x226   : > { %v661_v36 = vmul.f32 %v656_v33, %v656_v33 }
 0x228   : > { %v674_v37 = vsel %vm630_vm0, %v661_v36, 0.0 }
 0x229   : > { %672 = vadd.xlane.f32.xlu0 %v671_v35  ;;  %675 = vadd.xlane.f32.xlu1 %v674_v37 }
 0x2ae   : > { %v664_v41 = vpop.xlane.xlu1 %663 }
 0x2af   : > { %v677_v42 = vmul.f32 0.03125, %v664_v41 }
 0x2b1   : > { %v682_v43 = vadd.f32 1e-05, %v677_v42 }
 0x2b2   : > { %v670_v44 = vpop.xlane.xlu1 %669  ;;  %v667_v45 = vpop.xlane.xlu0 %666 }
 0x2b3   : > { %3103 = vrsqrt.f32 %v682_v43  ;;  %v679_v46 = vmul.f32 0.03125, %v670_v44  ;;  %v678_v47 = vmul.f32 0.03125, %v667_v45 }
 0x2b5   : > { %v683_v48 = vadd.f32 1e-05, %v678_v47  ;;  %v684_v49 = vadd.f32 1e-05, %v679_v46 }
 0x2b6   : > { %v676_v50 = vpop.xlane.xlu1 %675  ;;  %v673_v51 = vpop.xlane.xlu0 %672 }
 0x2b7   : > { %v680_v52 = vmul.f32 0.03125, %v673_v51  ;;  %3105 = vrsqrt.f32 %v683_v48  ;;  %v681_v53 = vmul.f32 0.03125, %v676_v50 }
 0x2b8   : > { %3107 = vrsqrt.f32 %v684_v49 }
 0x2b9   : > { %v685_v54 = vadd.f32 1e-05, %v680_v52  ;;  %v686_v55 = vadd.f32 1e-05, %v681_v53 }
 0x2bb   : > { %3109 = vrsqrt.f32 %v685_v54 }
 0x2bc   : > { %3111 = vrsqrt.f32 %v686_v55 }
 0x2bd   : > { %v3104_v56 = vpop.eup %3103 }
 0x2be   : > { %v692_v57 = vmul.f32 %v3104_v56, %v652_v17 }
 0x2c0   : > { %v703_v61 = vmul.f32 %v2511_v58, %v692_v57 }
 0x2c1   : > { %v3106_v59 = vpop.eup %3105 }
 0x2c2   : > { %v693_v60 = vmul.f32 %v3106_v59, %v653_v25  ;;  %v3108_v62 = vpop.eup %3107  ;;  %v714_v8 = vadd.f32 %v2512_v63, %v703_v61 }
 0x2c3   : > { %v694_v2 = vmul.f32 %v3108_v62, %v4203_v18 }
 0x2c4   : > { %v704_v0 = vmul.f32 %v2511_v58, %v693_v60 }
 0x2c5   : > { %v3110_v1 = vpop.eup %3109  ;;  %v705_v14 = vmul.f32 %v2511_v58, %v694_v2 }
 0x2c6   : > { %v695_v7 = vmul.f32 %v3110_v1, %v655_v26  ;;  %v715_v9 = vadd.f32 %v2512_v63, %v704_v0  ;;  %v3112_v13 = vpop.eup %3111 }
 0x2c7   : > { %v696_v16 = vmul.f32 %v3112_v13, %v656_v33  ;;  %v716_v17 = vadd.f32 %v2512_v63, %v705_v14 }
 0x2c8   : > { %v719_v10 = vpack.c.bf16 %v715_v9, %v714_v8  ;;  %v706_v12 = vmul.f32 %v2511_v58, %v695_v7 }
 0x2c9   : > { %v707_v20 = vmul.f32 %v2511_v58, %v696_v16 }
 0x2ca   : > { %2662 = vmatmul.mubr.msk.bf16.vlgmr.msra.gmra.mrb[0].mxu0 %vm630_vm0, %v719_v10  ;;  %v717_v15 = vadd.f32 %v2512_v63, %v706_v12 }
 0x2cb   : > { %2665 = vmatprep.mubr.msk.bf16.mxu0 %vm3687_vm1, %v3686_v39  ;;  %v718_v18 = vadd.f32 %v2512_v63, %v707_v20 }
 0x2cc   : > { %v720_v19 = vpack.c.bf16 %v717_v15, %v716_v17 }
 0x2cd   : > { %v721_v21 = vpack.c.bf16 %v718_v18, %v718_v18 }
 0x2d2   : > { %2666 = vmatmul.mubr.msk.bf16.gmra.mrb[4].mxu0 %vm630_vm0, %v720_v19 }
 0x2d3   : > { %2669 = vmatprep.mubr.msk.bf16.mxu0 %vm3687_vm1, %v3686_v39 }
 0x2da   : > { %2670 = vmatmul.mubr.msk.bf16.gmra.mrb[8].mxu0 %vm630_vm0, %v721_v21 }
 0x2db   : > { %2697 = vmatprep.mubr.msk.bf16.mxu0 %vm3687_vm1, %v3686_v39 }
 0x39d   : > { %v788_v23 = vpop.f32.mrb[0].mxu0 }
 0x39e   : > { %v2663_v24 = vpop.f32.mrb[1].mxu0  ;;  %v789_v26 = vadd.f32 %v2513_v22, %v788_v23 }
 0x39f   : > { %v791_v25 = vpop.f32.mrb[2].mxu0 }
 0x3a0   : > { %v792_v27 = vadd.f32 %v2513_v22, %v791_v25  ;;  %v2664_v28 = vpop.f32.mrb[3].mxu0 }
 0x3a2   : > { %v4233_v29 = vpack.c.bf16 %v792_v27, %v789_v26 }
 0x3a4   : > { %819 = vrot.lane.b32.xlu0 %v4233_v29, %s3688_s29 }
 0x3a5   : > { %v796_v30 = vpop.f32.mrb[4].mxu0 }
 0x3a6   : > { %v2667_v31 = vpop.f32.mrb[5].mxu0  ;;  %v797_v33 = vadd.f32 %v2513_v22, %v796_v30 }
 0x3a7   : > { %v799_v32 = vpop.f32.mrb[6].mxu0 }
 0x3a8   : > { %v800_v34 = vadd.f32 %v2513_v22, %v799_v32  ;;  %v2668_v35 = vpop.f32.mrb[7].mxu0 }
 0x3aa   : > { %v4236_v36 = vpack.c.bf16 %v800_v34, %v797_v33 }
 0x3ac   : > { %1056 = vrot.lane.b32.xlu0 %v4236_v36, %s3689_s17  ;;  %821 = vrot.lane.b32.xlu1 %v4236_v36, %s3688_s29 }
 0x3ad   : > { %v804_v37 = vpop.f32.mrb[8].mxu0 }
 0x3ae   : > { %v805_v38 = vadd.f32 %v2513_v22, %v804_v37  ;;  %v2671_v40 = vpop.f32.mrb[9].mxu0  ;;  %v810_v22 = vlaneseq }
 0x3af   : > { %v807_v41 = vpop.f32.mrb[10].mxu0 }
 0x3b0   : > { %v4240_v42 = vpack.c.bf16 %v805_v38, %v805_v38  ;;  %1048 = vrot.lane.b32.xlu0 %v4233_v29, %s3690_s23  ;;  %v2672_v43 = vpop.f32.mrb[11].mxu0  ;;  %v4337_v23 = vand.u32 127, %v810_v22 }
 0x3b2   : > { %823 = vrot.lane.b32.xlu1 %v4240_v42, %s3688_s29  ;;  %vm812_vm4 = vcmp.lt.s32.totalorder %v4337_v23, 33  ;;  %s3699_s29 = smov 8  }
 0x3b4   : > { %1050 = vrot.lane.b32.xlu0 %v4236_v36, %s3690_s23 }
 0x3b6   : > { %1054 = vrot.lane.b32.xlu1 %v4233_v29, %s3689_s17 }
 0x3b8   : > { %1052 = vrot.lane.b32.xlu0 %v4240_v42, %s3690_s23  ;;  %s3701_s23 = smov 24  }
 0x3ba   : > { %1058 = vrot.lane.b32.xlu1 %v4240_v42, %s3689_s17  ;;  %s3700_s17 = smov 16  }
 0x3bc   : > { %1278 = vrot.lane.b32.xlu0 %v4233_v29, %s3691_s22 }
 0x3be   : > { %1284 = vrot.lane.b32.xlu1 %v4233_v29, %s3692_s24 }
 0x3c0   : > { %1280 = vrot.lane.b32.xlu0 %v4236_v36, %s3691_s22 }
 0x3c2   : > { %1286 = vrot.lane.b32.xlu1 %v4236_v36, %s3692_s24 }
 0x3c4   : > { %1282 = vrot.lane.b32.xlu0 %v4240_v42, %s3691_s22  ;;  %s616_s22 = scalar_lea.vmem [#allocation23], %s2875_s21 }
 0x3c5   : > { %s2295_s21 = sshll.u32 %s616_s22, 4  ;;  %s4759_s21 = int_to_ptr.vmem [resolvable:$true] %s2295_s21 }
 0x3c6   : > { %1288 = vrot.lane.b32.xlu1 %v4240_v42, %s3692_s24  ;;  %s2876_s24 = smul.u32 320, %s4862_s0  ;;  %s3702_s0 = smov [#allocation23]  }
 0x3c8   : > { %1508 = vrot.lane.b32.xlu0 %v4233_v29, %s3693_s2 }
 0x3ca   : > { %1514 = vrot.lane.b32.xlu1 %v4233_v29, %s3694_s4 }
 0x3cc   : > { %1512 = vrot.lane.b32.xlu0 %v4240_v42, %s3693_s2 }
 0x3ce   : > { %1516 = vrot.lane.b32.xlu1 %v4236_v36, %s3694_s4 }
 0x3d0   : > { %971 = vrot.lane.b32.xlu0 %v4233_v29, %s3695_s15 }
 0x3d2   : > { %1518 = vrot.lane.b32.xlu1 %v4240_v42, %s3694_s4 }
 0x3d4   : > { %975 = vrot.lane.b32.xlu0 %v4240_v42, %s3695_s15 }
 0x3d6   : > { %1510 = vrot.lane.b32.xlu1 %v4236_v36, %s3693_s2 }
 0x3d8   : > { %1204 = vrot.lane.b32.xlu0 %v4236_v36, %s3696_s1 }
 0x3da   : > { %973 = vrot.lane.b32.xlu1 %v4236_v36, %s3695_s15 }
 0x3dc   : > { %1206 = vrot.lane.b32.xlu0 %v4240_v42, %s3696_s1 }
 0x416   : > { %v820_v44 = vpop.permute.xlu0 %819 }
 0x417   : > { %v836_v45 = vsel %vm825_vm2, %v820_v44, 0 }
 0x418   : > { %2674 = vmatpush3.bf16.xpose.msra.mxu1 %v836_v45 }
 0x419   : > { %2675 = vmatprep.subr.bf16.mxu1 %v3686_v39 }
 0x41e   : > { %v822_v46 = vpop.permute.xlu1 %821  ;;  %v1057_v47 = vpop.permute.xlu0 %1056 }
 0x41f   : > { %v839_v48 = vsel %vm825_vm2, %v822_v46, 0  ;;  %v1073_v62 = vsel %vm825_vm2, %v1057_v47, 0 }
 0x420   : > { %2676 = vmatpush3.bf16.xpose.msra.mxu1 %v839_v48 }
 0x421   : > { %2677 = vmatprep.subr.bf16.mxu1 %v3686_v39 }
 0x422   : > { %v1049_v49 = vpop.permute.xlu0 %1048 }
 0x424   : > { %v824_v50 = vpop.permute.xlu1 %823 }
 0x425   : > { %v842_v52 = vsel %vm825_vm2, %v824_v50, 0 }
 0x426   : > { %v1051_v51 = vpop.permute.xlu0 %1050 }
 0x428   : > { %v1055_v53 = vpop.permute.xlu1 %1054  ;;  %2678 = vmatpush3.bf16.xpose.msra.mxu1 %v842_v52 }
 0x429   : > { %2709 = vmatprep.subr.bf16.mxu1 %v3686_v39  ;;  %v1070_v57 = vsel %vm825_vm2, %v1055_v53, 0 }
 0x42a   : > { %v1053_v54 = vpop.permute.xlu0 %1052 }
 0x42c   : > { %v1059_v55 = vpop.permute.xlu1 %1058 }
 0x42d   : > { %v1076_v7 = vsel %vm825_vm2, %v1059_v55, 0 }
 0x42e   : > { %v1279_v56 = vpop.permute.xlu0 %1278 }
 0x42f   : > { %2680 = vmatmul.mubr.msk.bf16.vlgmr.msra.gmra.mrb[0].mxu1 %vm825_vm2, %v4233_v29 }
 0x430   : > { %v1285_v58 = vpop.permute.xlu1 %1284  ;;  %2710 = vmatpush3.bf16.xpose.msra.mxu1 %v1070_v57  ;;  %2683 = vmatprep.mubr.msk.bf16.mxu1 %vm3687_vm1, %v3686_v39 }
 0x431   : > { %2711 = vmatprep.subr.bf16.mxu1 %v3686_v39  ;;  %v1300_v12 = vsel %vm825_vm2, %v1285_v58, 0 }
 0x432   : > { %v1281_v59 = vpop.permute.xlu0 %1280 }
 0x434   : > { %v1287_v60 = vpop.permute.xlu1 %1286 }
 0x435   : > { %v1303_v16 = vsel %vm825_vm2, %v1287_v60, 0 }
 0x436   : > { %v1283_v61 = vpop.permute.xlu0 %1282 }
 0x437   : > { %2684 = vmatmul.mubr.msk.bf16.gmra.mrb[4].mxu1 %vm825_vm2, %v4236_v36 }
 0x438   : > { %v1289_v63 = vpop.permute.xlu1 %1288  ;;  %2712 = vmatpush3.bf16.xpose.msra.mxu1 %v1073_v62  ;;  %2687 = vmatprep.mubr.msk.bf16.mxu1 %vm3687_vm1, %v3686_v39 }
 0x439   : > { %2713 = vmatprep.subr.bf16.mxu1 %v3686_v39  ;;  %v1306_v19 = vsel %vm825_vm2, %v1289_v63, 0 }
 0x43a   : > { %v1509_v0 = vpop.permute.xlu0 %1508 }
 0x43c   : > { %v1515_v1 = vpop.permute.xlu1 %1514 }
 0x43d   : > { %v1530_v20 = vsel %vm825_vm2, %v1515_v1, 0 }
 0x43e   : > { %v1513_v2 = vpop.permute.xlu0 %1512 }
 0x43f   : > { %2688 = vmatmul.mubr.msk.bf16.gmra.mrb[8].mxu1 %vm825_vm2, %v4240_v42 }
 0x440   : > { %v1517_v8 = vpop.permute.xlu1 %1516  ;;  %2714 = vmatpush3.bf16.xpose.msra.mxu1 %v1076_v7  ;;  %2715 = vmatprep.mubr.msk.bf16.mxu1 %vm3687_vm1, %v3686_v39 }
 0x441   : > { %2745 = vmatprep.subr.bf16.mxu1 %v3686_v39  ;;  %v1533_v18 = vsel %vm825_vm2, %v1517_v8, 0 }
 0x442   : > { %v972_v9 = vpop.permute.xlu0 %971 }
 0x443   : > { %2692 = vmatpush3.bf16.msra.mxu0 %v972_v9 }
 0x444   : > { %v1519_v10 = vpop.permute.xlu1 %1518  ;;  %2693 = vmatprep.subr.bf16.mxu0 %v3686_v39 }
 0x445   : > { %v1536_v21 = vsel %vm825_vm2, %v1519_v10, 0 }
 0x446   : > { %v976_v15 = vpop.permute.xlu0 %975 }
 0x447   : > { %2716 = vmatmul.mubr.msk.bf16.vlgmr.msra.gmra.mrb[12].mxu1 %vm825_vm2, %v1049_v49  ;;  %v990_v17 = vsel %vm988_vm3, %v976_v15, 0 }
 0x448   : > { %v1511_v13 = vpop.permute.xlu1 %1510  ;;  %2746 = vmatpush3.bf16.xpose.msra.mxu1 %v1300_v12  ;;  %2719 = vmatprep.mubr.msk.bf16.mxu1 %vm3687_vm1, %v3686_v39 }
 0x449   : > { %2747 = vmatprep.subr.bf16.mxu1 %v3686_v39 }
 0x44c   : > { %v974_v14 = vpop.permute.xlu1 %973 }
 0x44d   : > { %2694 = vmatpush3.bf16.msra.mxu0 %v974_v14 }
 0x44e   : > { %2695 = vmatprep.subr.bf16.mxu0 %v3686_v39 }
 0x44f   : > { %2720 = vmatmul.mubr.msk.bf16.gmra.mrb[16].mxu1 %vm825_vm2, %v1051_v51 }
 0x450   : > { %2748 = vmatpush3.bf16.xpose.msra.mxu1 %v1303_v16  ;;  %2723 = vmatprep.mubr.msk.bf16.mxu1 %vm3687_vm1, %v3686_v39 }
 0x451   : > { %2696 = vmatpush3.bf16.msra.mxu0 %v990_v17  ;;  %2749 = vmatprep.subr.bf16.mxu1 %v3686_v39 }
 0x452   : > { %2727 = vmatprep.subr.bf16.mxu0 %v3686_v39 }
 0x457   : > { %2724 = vmatmul.mubr.msk.bf16.gmra.mrb[20].mxu1 %vm825_vm2, %v1053_v54 }
 0x458   : > { %2750 = vmatpush3.bf16.xpose.msra.mxu1 %v1306_v19  ;;  %2751 = vmatprep.mubr.msk.bf16.mxu1 %vm3687_vm1, %v3686_v39 }
 0x459   : > { %2781 = vmatprep.subr.bf16.mxu1 %v3686_v39 }
 0x45f   : > { %2752 = vmatmul.mubr.msk.bf16.vlgmr.msra.gmra.mrb[24].mxu1 %vm825_vm2, %v1279_v56 }
 0x460   : > { %2782 = vmatpush3.bf16.xpose.msra.mxu1 %v1530_v20  ;;  %2755 = vmatprep.mubr.msk.bf16.mxu1 %vm3687_vm1, %v3686_v39 }
 0x461   : > { %2783 = vmatprep.subr.bf16.mxu1 %v3686_v39 }
 0x467   : > { %2756 = vmatmul.mubr.msk.bf16.gmra.mrb[28].mxu1 %vm825_vm2, %v1281_v59 }
 0x468   : > { %2784 = vmatpush3.bf16.xpose.msra.mxu1 %v1533_v18  ;;  %2759 = vmatprep.mubr.msk.bf16.mxu1 %vm3687_vm1, %v3686_v39 }
 0x469   : > { %2785 = vmatprep.subr.bf16.mxu1 %v3686_v39 }
 0x46f   : > { %2760 = vmatmul.mubr.msk.bf16.gmra.mrb[32].mxu1 %vm825_vm2, %v1283_v61 }
 0x470   : > { %2786 = vmatpush3.bf16.xpose.msra.mxu1 %v1536_v21  ;;  %2787 = vmatprep.mubr.msk.bf16.mxu1 %vm3687_vm1, %v3686_v39 }
 0x471   : > { %2869 = vmatprep.subr.bf16.mxu1 %v3686_v39 }
 0x477   : > { %2788 = vmatmul.mubr.msk.bf16.vlgmr.msra.gmra.mrb[36].mxu1 %vm825_vm2, %v1509_v0 }
 0x478   : > { %2791 = vmatprep.mubr.msk.bf16.mxu1 %vm3687_vm1, %v3686_v39 }
 0x47f   : > { %2792 = vmatmul.mubr.msk.bf16.gmra.mrb[40].mxu1 %vm825_vm2, %v1511_v13 }
 0x480   : > { %2795 = vmatprep.mubr.msk.bf16.mxu1 %vm3687_vm1, %v3686_v39 }
 0x487   : > { %2796 = vmatmul.mubr.msk.bf16.gmra.mrb[44].mxu1 %vm825_vm2, %v1513_v2 }
 0x488   : > { %2825 = vmatprep.mubr.msk.bf16.mxu1 %vm3687_vm1, %v3686_v39 }
 0x502   : > { %v878_v24 = vpop.f32.mrb[0].mxu1 }
 0x503   : > { %v900_v25 = vmul.f32 0.35355338, %v878_v24  ;;  %v2681_v26 = vpop.f32.mrb[1].mxu1 }
 0x504   : > { %v881_v27 = vpop.f32.mrb[2].mxu1 }
 0x505   : > { %v901_v28 = vmul.f32 0.35355338, %v881_v27  ;;  %v2682_v30 = vpop.f32.mrb[3].mxu1  ;;  %v4342_v31 = vsel %vm812_vm4, %v900_v25, -1e+30 }
 0x506   : > { %v913_v32 = vsel %vm912_vm5, %v4342_v31, -inf }
 0x507   : > { %914 = vmax.xlane.f32.xlu1 %v913_v32  ;;  %v4348_v33 = vsel %vm812_vm4, %v901_v28, -1e+30 }
 0x508   : > { %v916_v34 = vsel %vm912_vm5, %v4348_v33, -inf }
 0x509   : > { %917 = vmax.xlane.f32.xlu0 %v916_v34 }
 0x50a   : > { %v886_v35 = vpop.f32.mrb[4].mxu1 }
 0x50b   : > { %v902_v37 = vmul.f32 0.35355338, %v886_v35  ;;  %v2685_v38 = vpop.f32.mrb[5].mxu1 }
 0x50c   : > { %v889_v40 = vpop.f32.mrb[6].mxu1 }
 0x50d   : > { %v903_v41 = vmul.f32 0.35355338, %v889_v40  ;;  %v2686_v43 = vpop.f32.mrb[7].mxu1  ;;  %v4354_v44 = vsel %vm812_vm4, %v902_v37, -1e+30 }
 0x50e   : > { %v919_v45 = vsel %vm912_vm5, %v4354_v44, -inf }
 0x50f   : > { %920 = vmax.xlane.f32.xlu0 %v919_v45  ;;  %v4360_v46 = vsel %vm812_vm4, %v903_v41, -1e+30 }
 0x510   : > { %v922_v48 = vsel %vm912_vm5, %v4360_v46, -inf }
 0x512   : > { %v894_v47 = vpop.f32.mrb[8].mxu1 }
 0x513   : > { %923 = vmax.xlane.f32.xlu0 %v922_v48  ;;  %v2689_v49 = vpop.f32.mrb[9].mxu1  ;;  %v904_v16 = vmul.f32 0.35355338, %v894_v47 }
 0x514   : > { %v897_v50 = vpop.f32.mrb[10].mxu1 }
 0x515   : > { %v2690_v51 = vpop.f32.mrb[11].mxu1  ;;  %v4392_v24 = vsel %vm812_vm4, %v904_v16, -1e+30 }
 0x516   : > { %v925_v27 = vsel %vm912_vm5, %v4392_v24, -inf }
 0x518   : > { %1202 = vrot.lane.b32.xlu1 %v4233_v29, %s3696_s1  ;;  %s4875_s1 = sld [smem:[#allocation39_spill]] }
 0x51a   : > { %v1112_v52 = vpop.f32.mrb[12].mxu1 }
 0x51b   : > { %v1134_v53 = vmul.f32 0.35355338, %v1112_v52  ;;  %v2717_v54 = vpop.f32.mrb[13].mxu1 }
 0x51c   : > { %v1115_v55 = vpop.f32.mrb[14].mxu1 }
 0x51d   : > { %v2718_v56 = vpop.f32.mrb[15].mxu1  ;;  %v4368_v57 = vsel %vm812_vm4, %v1134_v53, -1e+30  ;;  %v1135_v21 = vmul.f32 0.35355338, %v1115_v55 }
 0x51e   : > { %v1144_v58 = vsel %vm912_vm5, %v4368_v57, -inf }
 0x51f   : > { %1145 = vmax.xlane.f32.xlu0 %v1144_v58  ;;  %v4398_v32 = vsel %vm812_vm4, %v1135_v21, -1e+30 }
 0x520   : > { %v1147_v37 = vsel %vm912_vm5, %v4398_v32, -inf }
 0x522   : > { %v1120_v59 = vpop.f32.mrb[16].mxu1 }
 0x523   : > { %v1136_v60 = vmul.f32 0.35355338, %v1120_v59  ;;  %v2721_v61 = vpop.f32.mrb[17].mxu1 }
 0x524   : > { %v1123_v62 = vpop.f32.mrb[18].mxu1 }
 0x525   : > { %v2722_v63 = vpop.f32.mrb[19].mxu1  ;;  %v4374_v0 = vsel %vm812_vm4, %v1136_v60, -1e+30  ;;  %v1137_v28 = vmul.f32 0.35355338, %v1123_v62 }
 0x526   : > { %v1150_v1 = vsel %vm912_vm5, %v4374_v0, -inf }
 0x527   : > { %1151 = vmax.xlane.f32.xlu0 %v1150_v1  ;;  %v4410_v43 = vsel %vm812_vm4, %v1137_v28, -1e+30 }
 0x528   : > { %v1153_v48 = vsel %vm912_vm5, %v4410_v43, -inf }
 0x52a   : > { %v1128_v2 = vpop.f32.mrb[20].mxu1 }
 0x52b   : > { %v1138_v7 = vmul.f32 0.35355338, %v1128_v2  ;;  %v2725_v8 = vpop.f32.mrb[21].mxu1 }
 0x52c   : > { %v1131_v9 = vpop.f32.mrb[22].mxu1 }
 0x52d   : > { %v2726_v10 = vpop.f32.mrb[23].mxu1  ;;  %v4380_v12 = vsel %vm812_vm4, %v1138_v7, -1e+30 }
 0x52e   : > { %v1156_v13 = vsel %vm912_vm5, %v4380_v12, -inf }
 0x52f   : > { %1157 = vmax.xlane.f32.xlu0 %v1156_v13 }
 0x532   : > { %v1342_v14 = vpop.f32.mrb[24].mxu1 }
 0x533   : > { %v2753_v15 = vpop.f32.mrb[25].mxu1  ;;  %v1364_v40 = vmul.f32 0.35355338, %v1342_v14 }
 0x534   : > { %v1345_v17 = vpop.f32.mrb[26].mxu1 }
 0x535   : > { %v1365_v19 = vmul.f32 0.35355338, %v1345_v17  ;;  %v2754_v20 = vpop.f32.mrb[27].mxu1  ;;  %v4416_v51 = vsel %vm812_vm4, %v1364_v40, -1e+30  ;;  %v4462_v40 = vpop.permute.xlu0 %1204 }
 0x536   : > { %v1374_v53 = vsel %vm912_vm5, %v4416_v51, -inf }
 0x537   : > { %v4386_v18 = vsel %vm812_vm4, %v1365_v19, -1e+30 }
 0x538   : > { %v1377_v22 = vsel %vm912_vm5, %v4386_v18, -inf }
 0x539   : > { %1378 = vmax.xlane.f32.xlu0 %v1377_v22 }
 0x53a   : > { %v1350_v25 = vpop.f32.mrb[28].mxu1 }
 0x53b   : > { %v2757_v26 = vpop.f32.mrb[29].mxu1  ;;  %v1366_v49 = vmul.f32 0.35355338, %v1350_v25 }
 0x53c   : > { %926 = vmax.xlane.f32.xlu1 %v925_v27  ;;  %v1353_v30 = vpop.f32.mrb[30].mxu1 }
 0x53d   : > { %v1367_v34 = vmul.f32 0.35355338, %v1353_v30  ;;  %v2758_v35 = vpop.f32.mrb[31].mxu1  ;;  %v4422_v55 = vsel %vm812_vm4, %v1366_v49, -1e+30 }
 0x53e   : > { %v1380_v60 = vsel %vm912_vm5, %v4422_v55, -inf }
 0x53f   : > { %v4404_v38 = vsel %vm812_vm4, %v1367_v34, -1e+30 }
 0x540   : > { %1148 = vmax.xlane.f32.xlu1 %v1147_v37  ;;  %v1383_v41 = vsel %vm912_vm5, %v4404_v38, -inf }
 0x541   : > { %1384 = vmax.xlane.f32.xlu0 %v1383_v41  ;;  %v4464_v41 = vpop.permute.xlu0 %1206 }
 0x542   : > { %v1358_v45 = vpop.f32.mrb[32].mxu1 }
 0x543   : > { %v2761_v47 = vpop.f32.mrb[33].mxu1  ;;  %v1368_v54 = vmul.f32 0.35355338, %v1358_v45 }
 0x544   : > { %1154 = vmax.xlane.f32.xlu1 %v1153_v48  ;;  %v1361_v50 = vpop.f32.mrb[34].mxu1 }
 0x545   : > { %v2762_v52 = vpop.f32.mrb[35].mxu1  ;;  %v4428_v62 = vsel %vm812_vm4, %v1368_v54, -1e+30 }
 0x546   : > { %v1386_v8 = vsel %vm912_vm5, %v4428_v62, -inf }
 0x548   : > { %1375 = vmax.xlane.f32.xlu1 %v1374_v53 }
 0x54a   : > { %v1572_v56 = vpop.f32.mrb[36].mxu1 }
 0x54b   : > { %v1594_v58 = vmul.f32 0.35355338, %v1572_v56  ;;  %v2789_v59 = vpop.f32.mrb[37].mxu1 }
 0x54c   : > { %1381 = vmax.xlane.f32.xlu1 %v1380_v60  ;;  %v1575_v61 = vpop.f32.mrb[38].mxu1 }
 0x54d   : > { %v1595_v63 = vmul.f32 0.35355338, %v1575_v61  ;;  %v2790_v1 = vpop.f32.mrb[39].mxu1  ;;  %v4432_v2 = vsel %vm812_vm4, %v1594_v58, -1e+30 }
 0x54e   : > { %v1604_v7 = vsel %vm912_vm5, %v4432_v2, -inf }
 0x54f   : > { %1605 = vmax.xlane.f32.xlu0 %v1604_v7  ;;  %v4440_v9 = vsel %vm812_vm4, %v1595_v63, -1e+30 }
 0x550   : > { %1387 = vmax.xlane.f32.xlu1 %v1386_v8  ;;  %v1607_v15 = vsel %vm912_vm5, %v4440_v9, -inf }
 0x552   : > { %v1580_v10 = vpop.f32.mrb[40].mxu1 }
 0x553   : > { %v1596_v13 = vmul.f32 0.35355338, %v1580_v10  ;;  %v2793_v14 = vpop.f32.mrb[41].mxu1 }
 0x554   : > { %1608 = vmax.xlane.f32.xlu1 %v1607_v15  ;;  %v1583_v16 = vpop.f32.mrb[42].mxu1 }
 0x555   : > { %v1597_v17 = vmul.f32 0.35355338, %v1583_v16  ;;  %v2794_v19 = vpop.f32.mrb[43].mxu1  ;;  %v4446_v20 = vsel %vm812_vm4, %v1596_v13, -1e+30 }
 0x556   : > { %v1610_v21 = vsel %vm912_vm5, %v4446_v20, -inf }
 0x557   : > { %1611 = vmax.xlane.f32.xlu0 %v1610_v21  ;;  %v4452_v22 = vsel %vm812_vm4, %v1597_v17, -1e+30 }
 0x558   : > { %v1613_v25 = vsel %vm912_vm5, %v4452_v22, -inf }
 0x559   : > { %1614 = vmax.xlane.f32.xlu1 %v1613_v25 }
 0x55a   : > { %v1588_v26 = vpop.f32.mrb[44].mxu1 }
 0x55b   : > { %v1598_v27 = vmul.f32 0.35355338, %v1588_v26  ;;  %v2797_v28 = vpop.f32.mrb[45].mxu1 }
 0x55c   : > { %v1591_v30 = vpop.f32.mrb[46].mxu1 }
 0x55d   : > { %v2798_v34 = vpop.f32.mrb[47].mxu1  ;;  %v4458_v35 = vsel %vm812_vm4, %v1598_v27, -1e+30 }
 0x55e   : > { %v1616_v37 = vsel %vm912_vm5, %v4458_v35, -inf }
 0x55f   : > { %1617 = vmax.xlane.f32.xlu0 %v1616_v37 }
 0x594   : > { %v915_v45 = vpop.xlane.xlu1 %914 }
 0x595   : > { %v928_v47 = vsub.f32 %v4342_v31, %v915_v45 }
 0x596   : > { %v918_v48 = vpop.xlane.xlu0 %917 }
 0x597   : > { %v933_v49 = vmul.f32 1.442695, %v928_v47  ;;  %v929_v50 = vsub.f32 %v4348_v33, %v918_v48 }
 0x599   : > { %3113 = vpow2.f32 %v933_v49  ;;  %v935_v52 = vmul.f32 1.442695, %v929_v50 }
 0x59b   : > { %3115 = vpow2.f32 %v935_v52 }
 0x59c   : > { %v921_v23 = vpop.xlane.xlu0 %920 }
 0x59d   : > { %v930_v53 = vsub.f32 %v4354_v44, %v921_v23  ;;  %v4484_v44 = vpop.permute.xlu1 %1202 }
 0x59f   : > { %v937_v54 = vmul.f32 1.442695, %v930_v53 }
 0x5a0   : > { %v924_v61 = vpop.xlane.xlu0 %923 }
 0x5a1   : > { %3117 = vpow2.f32 %v937_v54  ;;  %v931_v63 = vsub.f32 %v4360_v46, %v924_v61 }
 0x5a3   : > { %v4469_v56 = vpop.eup %3113  ;;  %v939_v8 = vmul.f32 1.442695, %v931_v63 }
 0x5a4   : > { %v943_v58 = vsel %vm912_vm5, %v4469_v56, 0.0 }
 0x5a5   : > { %v4473_v59 = vpop.eup %3115  ;;  %944 = vadd.xlane.f32.xlu0 %v943_v58  ;;  %3119 = vpow2.f32 %v939_v8 }
 0x5a6   : > { %v946_v31 = vsel %vm912_vm5, %v4473_v59, 0.0 }
 0x5a7   : > { %947 = vadd.xlane.f32.xlu1 %v946_v31 }
 0x5ab   : > { %v4477_v33 = vpop.eup %3117 }
 0x5ac   : > { %v949_v60 = vsel %vm912_vm5, %v4477_v33, 0.0  ;;  %v1146_v10 = vpop.xlane.xlu0 %1145 }
 0x5ad   : > { %950 = vadd.xlane.f32.xlu1 %v949_v60  ;;  %v1159_v16 = vsub.f32 %v4368_v57, %v1146_v10 }
 0x5af   : > { %v1164_v25 = vmul.f32 1.442695, %v1159_v16  ;;  %v4493_v34 = vpop.eup %3119 }
 0x5b0   : > { %v952_v47 = vsel %vm912_vm5, %v4493_v34, 0.0 }
 0x5b4   : > { %v1152_v19 = vpop.xlane.xlu0 %1151 }
 0x5b5   : > { %v1161_v26 = vsub.f32 %v4374_v0, %v1152_v19 }
 0x5b7   : > { %v1168_v27 = vmul.f32 1.442695, %v1161_v26 }
 0x5bb   : > { %1434 = vrot.lane.b32.xlu0 %v4236_v36, %s3697_s20 }
 0x5bc   : > { %v1158_v30 = vpop.xlane.xlu0 %1157 }
 0x5bd   : > { %v1163_v57 = vsub.f32 %v4380_v12, %v1158_v30 }
 0x5be   : > { %1432 = vrot.lane.b32.xlu1 %v4233_v29, %s3697_s20 }
 0x5bf   : > { %1436 = vrot.lane.b32.xlu0 %v4240_v42, %s3697_s20  ;;  %v1172_v48 = vmul.f32 1.442695, %v1163_v57  ;;  %s4764_s20 = scalar_lea.hbm %s4875_s1, %s2876_s24 }
 0x5c6   : > { %v1379_v0 = vpop.xlane.xlu0 %1378 }
 0x5c9   : > { %v927_v1 = vpop.xlane.xlu1 %926 }
 0x5ca   : > { %v932_v7 = vsub.f32 %v4392_v24, %v927_v1 }
 0x5cc   : > { %v941_v15 = vmul.f32 1.442695, %v932_v7 }
 0x5cd   : > { %v1149_v13 = vpop.xlane.xlu1 %1148 }
 0x5ce   : > { %v1160_v14 = vsub.f32 %v4398_v32, %v1149_v13  ;;  %3121 = vpow2.f32 %v941_v15  ;;  %v1385_v58 = vpop.xlane.xlu0 %1384 }
 0x5cf   : > { %v1392_v63 = vsub.f32 %v4404_v38, %v1385_v58 }
 0x5d0   : > { %v1166_v17 = vmul.f32 1.442695, %v1160_v14 }
 0x5d1   : > { %v1155_v21 = vpop.xlane.xlu1 %1154  ;;  %v1400_v8 = vmul.f32 1.442695, %v1392_v63 }
 0x5d2   : > { %3123 = vpow2.f32 %v1166_v17  ;;  %v1162_v28 = vsub.f32 %v4410_v43, %v1155_v21  ;;  %v1390_v43 = vsub.f32 %v4386_v18, %v1379_v0 }
 0x5d3   : > { %3125 = vpow2.f32 %v1164_v25 }
 0x5d4   : > { %v1170_v37 = vmul.f32 1.442695, %v1162_v28  ;;  %v1396_v53 = vmul.f32 1.442695, %v1390_v43 }
 0x5d5   : > { %v1376_v46 = vpop.xlane.xlu1 %1375 }
 0x5d6   : > { %v1389_v24 = vsub.f32 %v4416_v51, %v1376_v46 }
 0x5d8   : > { %v1394_v32 = vmul.f32 1.442695, %v1389_v24  ;;  %v4496_v45 = vpop.eup %3121 }
 0x5d9   : > { %v1382_v49 = vpop.xlane.xlu1 %1381  ;;  %v955_v50 = vsel %vm912_vm5, %v4496_v45, 0.0 }
 0x5da   : > { %3127 = vpow2.f32 %v1394_v32  ;;  %v1391_v54 = vsub.f32 %v4422_v55, %v1382_v49 }
 0x5db   : > { %3129 = vpow2.f32 %v1168_v27 }
 0x5dc   : > { %v4500_v51 = vpop.eup %3123  ;;  %3131 = vpow2.f32 %v1170_v37  ;;  %v1398_v1 = vmul.f32 1.442695, %v1391_v54  ;;  %v1606_v13 = vpop.xlane.xlu0 %1605 }
 0x5dd   : > { %v1177_v12 = vsel %vm912_vm5, %v4500_v51, 0.0  ;;  %v4507_v52 = vpop.eup %3125  ;;  %3133 = vpow2.f32 %v1172_v48  ;;  %v1388_v61 = vpop.xlane.xlu1 %1387 }
 0x5de   : > { %953 = vadd.xlane.f32.xlu0 %v952_v47  ;;  %v1174_v31 = vsel %vm912_vm5, %v4507_v52, 0.0  ;;  %3135 = vpow2.f32 %v1396_v53  ;;  %v1393_v10 = vsub.f32 %v4428_v62, %v1388_v61 }
 0x5df   : > { %3137 = vpow2.f32 %v1398_v1 }
 0x5e0   : > { %3139 = vpow2.f32 %v1400_v8  ;;  %v1402_v38 = vmul.f32 1.442695, %v1393_v10 }
 0x5e1   : > { %v1609_v14 = vpop.xlane.xlu1 %1608 }
 0x5e2   : > { %956 = vadd.xlane.f32.xlu1 %v955_v50  ;;  %1178 = vadd.xlane.f32.xlu0 %v1177_v12  ;;  %v1620_v17 = vsub.f32 %v4440_v9, %v1609_v14  ;;  %3141 = vpow2.f32 %v1402_v38 }
 0x5e4   : > { %v4509_v23 = vpop.eup %3127  ;;  %v1612_v19 = vpop.xlane.xlu0 %1611  ;;  %v1626_v62 = vmul.f32 1.442695, %v1620_v17 }
 0x5e5   : > { %v1404_v18 = vsel %vm912_vm5, %v4509_v23, 0.0  ;;  %v4516_v60 = vpop.eup %3129  ;;  %v1621_v26 = vsub.f32 %v4446_v20, %v1612_v19 }
 0x5e6   : > { %1405 = vadd.xlane.f32.xlu0 %v1404_v18  ;;  %1175 = vadd.xlane.f32.xlu1 %v1174_v31  ;;  %v1180_v7 = vsel %vm912_vm5, %v4516_v60, 0.0  ;;  %v4521_v55 = vpop.eup %3131  ;;  %v1615_v46 = vpop.xlane.xlu1 %1614  ;;  %3143 = vpow2.f32 %v1626_v62 }
 0x5e7   : > { %v1183_v15 = vsel %vm912_vm5, %v4521_v55, 0.0  ;;  %v4526_v16 = vpop.eup %3133  ;;  %v1628_v9 = vmul.f32 1.442695, %v1621_v26  ;;  %v1622_v28 = vsub.f32 %v4452_v22, %v1615_v46 }
 0x5e8   : > { %v1186_v21 = vsel %vm912_vm5, %v4526_v16, 0.0  ;;  %v4531_v25 = vpop.eup %3135 }
 0x5e9   : > { %v1407_v24 = vsel %vm912_vm5, %v4531_v25, 0.0  ;;  %v4536_v27 = vpop.eup %3137  ;;  %3145 = vpow2.f32 %v1628_v9  ;;  %v1630_v20 = vmul.f32 1.442695, %v1622_v28 }
 0x5ea   : > { %1181 = vadd.xlane.f32.xlu1 %v1180_v7  ;;  %v1410_v30 = vsel %vm912_vm5, %v4536_v27, 0.0  ;;  %v4541_v57 = vpop.eup %3139 }
 0x5eb   : > { %v1413_v0 = vsel %vm912_vm5, %v4541_v57, 0.0  ;;  %3147 = vpow2.f32 %v1630_v20 }
 0x5ec   : > { %v1618_v32 = vpop.xlane.xlu0 %1617  ;;  %v4547_v47 = vpop.eup %3141 }
 0x5ed   : > { %v1623_v37 = vsub.f32 %v4458_v35, %v1618_v32  ;;  %v1416_v48 = vsel %vm912_vm5, %v4547_v47, 0.0  ;;  %v1619_v35 = vsub.f32 %v4432_v2, %v1606_v13 }
 0x5ee   : > { %1184 = vadd.xlane.f32.xlu1 %v1183_v15 }
 0x5ef   : > { %v1632_v22 = vmul.f32 1.442695, %v1623_v37  ;;  %v1624_v50 = vmul.f32 1.442695, %v1619_v35 }
 0x5f0   : > { %v4551_v43 = vpop.eup %3143 }
 0x5f1   : > { %3149 = vpow2.f32 %v1632_v22 }
 0x5f2   : > { %1187 = vadd.xlane.f32.xlu1 %v1186_v21  ;;  %3151 = vpow2.f32 %v1624_v50 }
 0x5f3   : > { %v4556_v49 = vpop.eup %3145 }
 0x5f4   : > { %v1640_v12 = vsel %vm912_vm5, %v4556_v49, 0.0 }
 0x5f5   : > { %v4560_v53 = vpop.eup %3147 }
 0x5f6   : > { %1408 = vadd.xlane.f32.xlu1 %v1407_v24  ;;  %v1643_v54 = vsel %vm912_vm5, %v4560_v53, 0.0 }
 0x5fa   : > { %1411 = vadd.xlane.f32.xlu1 %v1410_v30 }
 0x5fb   : > { %v4564_v58 = vpop.eup %3149 }
 0x5fc   : > { %1662 = vrot.lane.b32.xlu0 %v4233_v29, %s3698_s30  ;;  %v1637_v29 = vsel %vm912_vm5, %v4551_v43, 0.0  ;;  %v1646_v2 = vsel %vm912_vm5, %v4564_v58, 0.0  ;;  %v4568_v18 = vpop.eup %3151 }
 0x5fd   : > { %v1634_v31 = vsel %vm912_vm5, %v4568_v18, 0.0 }
 0x5fe   : > { %1414 = vadd.xlane.f32.xlu1 %v1413_v0 }
 0x602   : > { %1417 = vadd.xlane.f32.xlu1 %v1416_v48 }
 0x606   : > { %1638 = vadd.xlane.f32.xlu1 %v1637_v29 }
 0x60a   : > { %1641 = vadd.xlane.f32.xlu1 %v1640_v12 }
 0x60e   : > { %1644 = vadd.xlane.f32.xlu1 %v1643_v54 }
 0x612   : > { %1647 = vadd.xlane.f32.xlu1 %v1646_v2 }
 0x61b   : > { %1635 = vadd.xlane.f32.xlu0 %v1634_v31 }
 0x623   : > { %1666 = vrot.lane.b32.xlu1 %v4240_v42, %s3698_s30 }
 0x631   : > { %1664 = vrot.lane.b32.xlu0 %v4236_v36, %s3698_s30  ;;  %v1220_v36 = vsel %vm988_vm3, %v4464_v41, 0  ;;  %s2282_s30 = scalar_lea.sflag [#allocation4], %s4147_s3 }
 0x632   : > { %v945_v61 = vpop.xlane.xlu0 %944 }
 0x633   : > { %3153 = vrcp.f32 %v945_v61 }
 0x634   : > { %v948_v63 = vpop.xlane.xlu1 %947 }
 0x635   : > { %3155 = vrcp.f32 %v948_v63 }
 0x636   : > { %v1435_v42 = vpop.permute.xlu0 %1434 }
 0x63d   : > { %v3154_v1 = vpop.eup %3153 }
 0x63e   : > { %v963_v8 = vmul.f32 %v3154_v1, %v4469_v56  ;;  %v951_v56 = vpop.xlane.xlu1 %950 }
 0x63f   : > { %v3156_v7 = vpop.eup %3155  ;;  %3157 = vrcp.f32 %v951_v56 }
 0x640   : > { %v964_v10 = vmul.f32 %v3156_v7, %v4473_v59  ;;  %v1437_v59 = vpop.permute.xlu0 %1436 }
 0x641   : > { %v1450_v2 = vsel %vm988_vm3, %v1437_v59, 0 }
 0x642   : > { %v968_v13 = vpack.c.bf16 %v964_v10, %v963_v8 }
 0x644   : > { %2698 = vmatmul.mubr.msk.bf16.vlgmr.msra.gmra.mrb[12].mxu0 %vm912_vm5, %v968_v13 }
 0x645   : > { %2728 = vmatpush3.bf16.msra.mxu0 %v4484_v44  ;;  %2701 = vmatprep.mubr.msk.bf16.mxu0 %vm3687_vm1, %v3686_v39  ;;  %v1433_v44 = vpop.permute.xlu1 %1432 }
 0x646   : > { %2729 = vmatprep.subr.bf16.mxu0 %v3686_v39 }
 0x649   : > { %2730 = vmatpush3.bf16.msra.mxu0 %v4462_v40  ;;  %v3158_v17 = vpop.eup %3157 }
 0x64a   : > { %2731 = vmatprep.subr.bf16.mxu0 %v3686_v39  ;;  %v965_v62 = vmul.f32 %v3158_v17, %v4477_v33 }
 0x64d   : > { %2732 = vmatpush3.bf16.msra.mxu0 %v1220_v36 }
 0x64e   : > { %2763 = vmatprep.subr.bf16.mxu0 %v3686_v39 }
 0x66b   : > { %v954_v14 = vpop.xlane.xlu0 %953 }
 0x66c   : > { %3159 = vrcp.f32 %v954_v14 }
 0x66f   : > { %v957_v15 = vpop.xlane.xlu1 %956  ;;  %v1179_v19 = vpop.xlane.xlu0 %1178 }
 0x670   : > { %3161 = vrcp.f32 %v957_v15 }
 0x673   : > { %v1176_v38 = vpop.xlane.xlu1 %1175  ;;  %v1406_v50 = vpop.xlane.xlu0 %1405 }
 0x674   : > { %3163 = vrcp.f32 %v1176_v38 }
 0x675   : > { %3165 = vrcp.f32 %v1179_v19 }
 0x676   : > { %v3160_v40 = vpop.eup %3159 }
 0x677   : > { %v1182_v21 = vpop.xlane.xlu1 %1181  ;;  %v966_v41 = vmul.f32 %v3160_v40, %v4493_v34  ;;  %v1663_v36 = vpop.permute.xlu0 %1662 }
 0x679   : > { %v969_v26 = vpack.c.bf16 %v966_v41, %v965_v62 }
 0x67a   : > { %v3162_v46 = vpop.eup %3161 }
 0x67b   : > { %v1185_v24 = vpop.xlane.xlu1 %1184  ;;  %2702 = vmatmul.mubr.msk.bf16.gmra.mrb[16].mxu0 %vm912_vm5, %v969_v26  ;;  %v967_v9 = vmul.f32 %v3162_v46, %v4496_v45 }
 0x67c   : > { %2705 = vmatprep.mubr.msk.bf16.mxu0 %vm3687_vm1, %v3686_v39  ;;  %3167 = vrcp.f32 %v1185_v24 }
 0x67d   : > { %v970_v32 = vpack.c.bf16 %v967_v9, %v967_v9  ;;  %3169 = vrcp.f32 %v1182_v21 }
 0x67e   : > { %v3164_v30 = vpop.eup %3163 }
 0x67f   : > { %v1188_v28 = vpop.xlane.xlu1 %1187  ;;  %v3166_v34 = vpop.eup %3165  ;;  %v1194_v20 = vmul.f32 %v3164_v30, %v4507_v52 }
 0x680   : > { %v1195_v37 = vmul.f32 %v3166_v34, %v4500_v51  ;;  %3171 = vrcp.f32 %v1188_v28 }
 0x682   : > { %v1199_v22 = vpack.c.bf16 %v1195_v37, %v1194_v20 }
 0x683   : > { %v1409_v33 = vpop.xlane.xlu1 %1408  ;;  %2706 = vmatmul.mubr.msk.bf16.gmra.mrb[20].mxu0 %vm912_vm5, %v970_v32 }
 0x684   : > { %2733 = vmatprep.mubr.msk.bf16.mxu0 %vm3687_vm1, %v3686_v39  ;;  %3173 = vrcp.f32 %v1409_v33 }
 0x685   : > { %3175 = vrcp.f32 %v1406_v50 }
 0x686   : > { %v3168_v45 = vpop.eup %3167 }
 0x687   : > { %v1412_v0 = vpop.xlane.xlu1 %1411  ;;  %v3170_v35 = vpop.eup %3169  ;;  %v1197_v29 = vmul.f32 %v3168_v45, %v4521_v55 }
 0x688   : > { %v1196_v51 = vmul.f32 %v3170_v35, %v4516_v60 }
 0x68a   : > { %v1200_v12 = vpack.c.bf16 %v1197_v29, %v1196_v51  ;;  %v3172_v54 = vpop.eup %3171 }
 0x68b   : > { %v1415_v48 = vpop.xlane.xlu1 %1414  ;;  %2734 = vmatmul.mubr.msk.bf16.vlgmr.msra.gmra.mrb[24].mxu0 %vm912_vm5, %v1199_v22  ;;  %v1198_v31 = vmul.f32 %v3172_v54, %v4526_v16 }
 0x68c   : > { %2764 = vmatpush3.bf16.msra.mxu0 %v1433_v44  ;;  %2737 = vmatprep.mubr.msk.bf16.mxu0 %vm3687_vm1, %v3686_v39  ;;  %3177 = vrcp.f32 %v1415_v48 }
 0x68d   : > { %2765 = vmatprep.subr.bf16.mxu0 %v3686_v39  ;;  %v1201_v60 = vpack.c.bf16 %v1198_v31, %v1198_v31  ;;  %3179 = vrcp.f32 %v1412_v0 }
 0x68e   : > { %v3174_v61 = vpop.eup %3173 }
 0x68f   : > { %v1418_v52 = vpop.xlane.xlu1 %1417  ;;  %v3176_v1 = vpop.eup %3175  ;;  %v1425_v7 = vmul.f32 %v3174_v61, %v4531_v25 }
 0x690   : > { %2766 = vmatpush3.bf16.msra.mxu0 %v1435_v42  ;;  %v1424_v8 = vmul.f32 %v3176_v1, %v4509_v23  ;;  %3181 = vrcp.f32 %v1418_v52 }
 0x691   : > { %2767 = vmatprep.subr.bf16.mxu0 %v3686_v39 }
 0x692   : > { %v1429_v10 = vpack.c.bf16 %v1425_v7, %v1424_v8  ;;  %v3095_v7 = vld [vmem:[#allocation11] sm:$0xff]  }
 0x693   : > { %2738 = vmatmul.mubr.msk.bf16.gmra.mrb[28].mxu0 %vm912_vm5, %v1200_v12  ;;  %v1639_v55 = vpop.xlane.xlu1 %1638  ;;  %2871 = vmatpush3.bf16.msra.mxu1 %v3095_v7 }
 0x694   : > { %2768 = vmatpush3.bf16.msra.mxu0 %v1450_v2  ;;  %2741 = vmatprep.mubr.msk.bf16.mxu0 %vm3687_vm1, %v3686_v39 }
 0x695   : > { %2799 = vmatprep.subr.bf16.mxu0 %v3686_v39  ;;  %2870 = vmatprep.subr.bf16.mxu1 %v3686_v39 }
 0x696   : > { %v3178_v13 = vpop.eup %3177 }
 0x697   : > { %v1642_v63 = vpop.xlane.xlu1 %1641  ;;  %v3180_v42 = vpop.eup %3179  ;;  %v1427_v56 = vmul.f32 %v3178_v13, %v4541_v57 }
 0x698   : > { %v1426_v25 = vmul.f32 %v3180_v42, %v4536_v27 }
 0x69a   : > { %v1430_v44 = vpack.c.bf16 %v1427_v56, %v1426_v25  ;;  %v3182_v14 = vpop.eup %3181 }
 0x69b   : > { %2742 = vmatmul.mubr.msk.bf16.gmra.mrb[32].mxu0 %vm912_vm5, %v1201_v60  ;;  %v1645_v16 = vpop.xlane.xlu1 %1644  ;;  %v1428_v57 = vmul.f32 %v3182_v14, %v4547_v47 }
 0x69c   : > { %2769 = vmatprep.mubr.msk.bf16.mxu0 %vm3687_vm1, %v3686_v39 }
 0x69d   : > { %v1431_v17 = vpack.c.bf16 %v1428_v57, %v1428_v57 }
 0x69f   : > { %v1648_v59 = vpop.xlane.xlu1 %1647 }
 0x6a3   : > { %2770 = vmatmul.mubr.msk.bf16.vlgmr.msra.gmra.mrb[36].mxu0 %vm912_vm5, %v1429_v10  ;;  %v1667_v38 = vpop.permute.xlu1 %1666 }
 0x6a4   : > { %2800 = vmatpush3.bf16.msra.mxu0 %v1663_v36  ;;  %2773 = vmatprep.mubr.msk.bf16.mxu0 %vm3687_vm1, %v3686_v39  ;;  %v1680_v27 = vsel %vm988_vm3, %v1667_v38, 0  ;;  %v3096_v36 = vld [vmem:[#allocation11 + $0x8] sm:$0xff]  }
 0x6a5   : > { %2801 = vmatprep.subr.bf16.mxu0 %v3686_v39  ;;  %2872 = vmatpush3.bf16.msra.mxu1 %v3096_v36 }
 0x6a6   : > { %2849 = vmatprep.subr.bf16.mxu1 %v3686_v39 }
 0x6a8   : > { %v1636_v23 = vpop.xlane.xlu0 %1635 }
 0x6a9   : > { %3183 = vrcp.f32 %v1636_v23 }
 0x6aa   : > { %3185 = vrcp.f32 %v1639_v55 }
 0x6ab   : > { %2774 = vmatmul.mubr.msk.bf16.gmra.mrb[40].mxu0 %vm912_vm5, %v1430_v44  ;;  %3187 = vrcp.f32 %v1645_v16 }
 0x6ac   : > { %v1665_v15 = vpop.permute.xlu0 %1664  ;;  %2777 = vmatprep.mubr.msk.bf16.mxu0 %vm3687_vm1, %v3686_v39  ;;  %3189 = vrcp.f32 %v1642_v63 }
 0x6ad   : > { %2802 = vmatpush3.bf16.msra.mxu0 %v1665_v15  ;;  %3191 = vrcp.f32 %v1648_v59 }
 0x6ae   : > { %2803 = vmatprep.subr.bf16.mxu0 %v3686_v39 }
 0x6b1   : > { %2804 = vmatpush3.bf16.msra.mxu0 %v1680_v27 }
 0x6b2   : > { %2817 = vmatprep.subr.bf16.mxu0 %v3686_v39 }
 0x6b3   : > { %v3184_v40 = vpop.eup %3183  ;;  %2778 = vmatmul.mubr.msk.bf16.gmra.mrb[44].mxu0 %vm912_vm5, %v1431_v17 }
 0x6b4   : > { %v3186_v19 = vpop.eup %3185  ;;  %2805 = vmatprep.mubr.msk.bf16.mxu0 %vm3687_vm1, %v3686_v39  ;;  %v1654_v21 = vmul.f32 %v3184_v40, %v4568_v18 }
 0x6b5   : > { %v1655_v47 = vmul.f32 %v3186_v19, %v4551_v43  ;;  %v3188_v41 = vpop.eup %3187 }
 0x6b6   : > { %v3190_v26 = vpop.eup %3189  ;;  %v1657_v46 = vmul.f32 %v3188_v41, %v4560_v53 }
 0x6b7   : > { %v1659_v62 = vpack.c.bf16 %v1655_v47, %v1654_v21  ;;  %v1656_v24 = vmul.f32 %v3190_v26, %v4556_v49  ;;  %v3192_v28 = vpop.eup %3191 }
 0x6b8   : > { %v1658_v43 = vmul.f32 %v3192_v28, %v4564_v58 }
 0x6b9   : > { %v1660_v9 = vpack.c.bf16 %v1657_v46, %v1656_v24 }
 0x6ba   : > { %v1661_v18 = vpack.c.bf16 %v1658_v43, %v1658_v43 }
 0x6bb   : > { %2806 = vmatmul.mubr.msk.bf16.vlgmr.msra.gmra.mrb[48].mxu0 %vm912_vm5, %v1659_v62 }
 0x6bc   : > { %2809 = vmatprep.mubr.msk.bf16.mxu0 %vm3687_vm1, %v3686_v39  ;;  %2818 = vmatpush3.bf16.msra.mxu0 %v3095_v7 }
 0x6bd   : > { %2819 = vmatprep.subr.bf16.mxu0 %v3686_v39 }
 0x6c0   : > { %2820 = vmatpush3.bf16.msra.mxu0 %v3096_v36 }
 0x6c1   : > { %2833 = vmatprep.subr.bf16.mxu0 %v3686_v39 }
 0x6c3   : > { %2810 = vmatmul.mubr.msk.bf16.gmra.mrb[52].mxu0 %vm912_vm5, %v1660_v9 }
 0x6c4   : > { %2813 = vmatprep.mubr.msk.bf16.mxu0 %vm3687_vm1, %v3686_v39 }
 0x6cb   : > { %2814 = vmatmul.mubr.msk.bf16.gmra.mrb[56].mxu0 %vm912_vm5, %v1661_v18 }
 0x6cc   : > { %2821 = vmatprep.mubr.msk.bf16.mxu0 %vm3687_vm1, %v3686_v39 }
 0x717   : > { %v4645_v32 = vpop.f32.mrb[12].mxu0 }
 0x718   : > { %v2699_v53 = vpop.f32.mrb[13].mxu0 }
 0x719   : > { %v4647_v30 = vpop.f32.mrb[14].mxu0 }
 0x71a   : > { %v2700_v49 = vpop.f32.mrb[15].mxu0 }
 0x74e   : > { %v4649_v33 = vpop.f32.mrb[16].mxu0 }
 0x74f   : > { %v2703_v34 = vpop.f32.mrb[17].mxu0 }
 0x750   : > { %v4651_v20 = vpop.f32.mrb[18].mxu0 }
 0x751   : > { %v2704_v37 = vpop.f32.mrb[19].mxu0 }
 0x756   : > { %v4653_v0 = vpop.f32.mrb[20].mxu0 }
 0x757   : > { %v2707_v58 = vpop.f32.mrb[21].mxu0 }
 0x758   : > { %v1045_v22 = vpop.f32.mrb[22].mxu0 }
 0x759   : > { %v2708_v45 = vpop.f32.mrb[23].mxu0 }
 0x75e   : > { %v1256_v48 = vpop.f32.mrb[24].mxu0 }
 0x75f   : > { %v2735_v35 = vpop.f32.mrb[25].mxu0 }
 0x760   : > { %v1259_v29 = vpop.f32.mrb[26].mxu0 }
 0x761   : > { %v3063_v50 = vpack.i.bf16 %v1259_v29, %v1256_v48  ;;  %v2736_v52 = vpop.f32.mrb[27].mxu0 }
 0x763   : > { %3064 = vrot.lane.b32.xlu0 %v3063_v50, %s3699_s29 }
 0x766   : > { %v1264_v51 = vpop.f32.mrb[28].mxu0 }
 0x767   : > { %v2739_v12 = vpop.f32.mrb[29].mxu0 }
 0x768   : > { %v1267_v54 = vpop.f32.mrb[30].mxu0 }
 0x769   : > { %v3078_v2 = vpack.i.bf16 %v1267_v54, %v1264_v51  ;;  %v2740_v55 = vpop.f32.mrb[31].mxu0 }
 0x76e   : > { %v1272_v31 = vpop.f32.mrb[32].mxu0 }
 0x76f   : > { %v2743_v60 = vpop.f32.mrb[33].mxu0 }
 0x770   : > { %v1275_v61 = vpop.f32.mrb[34].mxu0 }
 0x771   : > { %v2744_v63 = vpop.f32.mrb[35].mxu0 }
 0x776   : > { %v1486_v1 = vpop.f32.mrb[36].mxu0 }
 0x777   : > { %v2771_v8 = vpop.f32.mrb[37].mxu0 }
 0x778   : > { %v1489_v10 = vpop.f32.mrb[38].mxu0 }
 0x779   : > { %v3068_v16 = vpack.i.bf16 %v1489_v10, %v1486_v1  ;;  %v2772_v13 = vpop.f32.mrb[39].mxu0 }
 0x77b   : > { %3069 = vrot.lane.b32.xlu0 %v3068_v16, %s3700_s17 }
 0x77e   : > { %v1494_v42 = vpop.f32.mrb[40].mxu0 }
 0x77f   : > { %v2775_v56 = vpop.f32.mrb[41].mxu0 }
 0x780   : > { %v1497_v59 = vpop.f32.mrb[42].mxu0 }
 0x781   : > { %v3083_v25 = vpack.i.bf16 %v1497_v59, %v1494_v42  ;;  %v2776_v23 = vpop.f32.mrb[43].mxu0 }
 0x783   : > { %3084 = vrot.lane.b32.xlu1 %v3083_v25, %s3700_s17 }
 0x786   : > { %v1502_v44 = vpop.f32.mrb[44].mxu0 }
 0x787   : > { %1751 = vrot.lane.b32.xlu1 %v1272_v31, %s3699_s29  ;;  %v2779_v14 = vpop.f32.mrb[45].mxu0 }
 0x788   : > { %v1505_v15 = vpop.f32.mrb[46].mxu0  ;;  %v2548_v14 = vld [vmem:[#allocation13] ss:$0 sm:$0xff] }
 0x789   : > { %v2780_v38 = vpop.f32.mrb[47].mxu0 }
 0x78e   : > { %v1716_v57 = vpop.f32.mrb[48].mxu0 }
 0x78f   : > { %v2807_v27 = vpop.f32.mrb[49].mxu0 }
 0x790   : > { %v1719_v17 = vpop.f32.mrb[50].mxu0 }
 0x791   : > { %v3073_v40 = vpack.i.bf16 %v1719_v17, %v1716_v57  ;;  %v2808_v19 = vpop.f32.mrb[51].mxu0 }
 0x793   : > { %3074 = vrot.lane.b32.xlu0 %v3073_v40, %s3701_s23 }
 0x796   : > { %v1724_v21 = vpop.f32.mrb[52].mxu0 }
 0x797   : > { %3079 = vrot.lane.b32.xlu0 %v3078_v2, %s3699_s29  ;;  %v2811_v47 = vpop.f32.mrb[53].mxu0  ;;  %s3579_s29 = scalar_lea.vmem %s4759_s21, 320 }
 0x798   : > { %v1727_v62 = vpop.f32.mrb[54].mxu0  ;;  %p3580_p2 = scmp.ne.s32.totalorder %s4759_s21, %s3579_s29 }
 0x799   : > { %v3088_v41 = vpack.i.bf16 %v1727_v62, %v1724_v21  ;;  %v2812_v26 = vpop.f32.mrb[55].mxu0 }
 0x79a   : > { %p3581_p10 = pnand %p3580_p2, %p4876_p8 }
 0x79b   : > { %3089 = vrot.lane.b32.xlu0 %v3088_v41, %s3701_s23 }
 0x79c   : > { %p3582_p11 = pneg %p3581_p10 }
 0x79e   : > { %v1732_v46 = vpop.f32.mrb[56].mxu0 }
 0x79f   : > { %1771 = vrot.lane.b32.xlu0 %v1502_v44, %s3700_s17  ;;  %1791 = vrot.lane.b32.xlu1 %v1732_v46, %s3701_s23  ;;  %v2815_v24 = vpop.f32.mrb[57].mxu0  ;;  %s3583_s17 = sshll.u32 %s3702_s0, 4  ;;  %s3584_s17 = int_to_ptr.vmem [resolvable:$false] %s3583_s17 }
 0x7a0   : > { %v1735_v9 = vpop.f32.mrb[58].mxu0  ;;  %s3585_s23 = scalar_lea.vmem %s3584_s17, 640  ;;  %p3586_p12 = scmp.lt.s32.totalorder %s4759_s21, %s3584_s17 }
 0x7a1   : > { %v2816_v28 = vpop.f32.mrb[59].mxu0  ;;  %p3587_p0 = scmp.lt.s32.totalorder %s3585_s23, %s3579_s29 }
 0x7a3   : > { %p3588_p6 = por %p3587_p0, %p3586_p12 }
 0x7a5   : > { %p3589_p7 = pnand %p3588_p6, %p3582_p11 }
 0x7d5   : > { %v3065_v43 = vpop.permute.xlu0 %3064 }
 0x7d6   : > { %v3067_v53 = vunpack.i.h.bf16 %v3065_v43  ;;  %v3066_v49 = vunpack.i.l.bf16 %v3065_v43 }
 0x7d8   : > { %v1799_v22 = vsel %vm825_vm2, %v4647_v30, %v3067_v53  ;;  %v1798_v45 = vsel %vm825_vm2, %v4645_v32, %v3066_v49 }
 0x7ed   : > { %v3070_v18 = vpop.permute.xlu0 %3069 }
 0x7ee   : > { %v3072_v34 = vunpack.i.h.bf16 %v3070_v18  ;;  %v3071_v37 = vunpack.i.l.bf16 %v3070_v18 }
 0x7f0   : > { %v1804_v29 = vsel %vm1803_vm6, %v1798_v45, %v3071_v37  ;;  %v1805_v50 = vsel %vm1803_vm6, %v1799_v22, %v3072_v34 }
 0x7f5   : > { %v3085_v12 = vpop.permute.xlu1 %3084 }
 0x7f6   : > { %v3087_v60 = vunpack.i.h.bf16 %v3085_v12  ;;  %v3086_v61 = vunpack.i.l.bf16 %v3085_v12 }
 0x7f9   : > { %v1752_v8 = vpop.permute.xlu1 %1751 }
 0x805   : > { %v3075_v58 = vpop.permute.xlu0 %3074 }
 0x806   : > { %v3077_v48 = vunpack.i.h.bf16 %v3075_v58  ;;  %v3076_v35 = vunpack.i.l.bf16 %v3075_v58 }
 0x808   : > { %v1810_v52 = vsel %vm1809_vm7, %v1804_v29, %v3076_v35  ;;  %v1811_v51 = vsel %vm1809_vm7, %v1805_v50, %v3077_v48 }
 0x809   : > { %v1815_v54 = vpack.c.bf16 %v1811_v51, %v1810_v52  ;;  %v3080_v2 = vpop.permute.xlu0 %3079 }
 0x80a   : > { %v3082_v55 = vunpack.i.h.bf16 %v3080_v2  ;;  %v3081_v31 = vunpack.i.l.bf16 %v3080_v2 }
 0x80b   : > { %2822 = vmatmul.mubr.msk.bf16.vlgmr.msra.gmra.mrb[60].mxu0 %vm630_vm0, %v1815_v54 }
 0x80c   : > { %v1801_v32 = vsel %vm825_vm2, %v4651_v20, %v3082_v55  ;;  %v1800_v30 = vsel %vm825_vm2, %v4649_v33, %v3081_v31  ;;  %2837 = vmatprep.mubr.msk.bf16.mxu0 %vm3687_vm1, %v3686_v39  ;;  %v1802_v33 = vsel %vm825_vm2, %v4653_v0, %v1752_v8 }
 0x80d   : > { %v3090_v63 = vpop.permute.xlu0 %3089  ;;  %v1806_v10 = vsel %vm1803_vm6, %v1800_v30, %v3086_v61  ;;  %v1807_v16 = vsel %vm1803_vm6, %v1801_v32, %v3087_v60 }
 0x80e   : > { %v3092_v1 = vunpack.i.h.bf16 %v3090_v63  ;;  %v3091_v7 = vunpack.i.l.bf16 %v3090_v63 }
 0x810   : > { %v1812_v13 = vsel %vm1809_vm7, %v1806_v10, %v3091_v7  ;;  %v1813_v20 = vsel %vm1809_vm7, %v1807_v16, %v3092_v1  ;;  %v3097_v16 = vld [vmem:[#allocation17] sm:$0xff]  }
 0x811   : > { %v1816_v36 = vpack.c.bf16 %v1813_v20, %v1812_v13  ;;  %v1772_v42 = vpop.permute.xlu0 %1771  ;;  %v1792_v56 = vpop.permute.xlu1 %1791  ;;  %2834 = vmatpush3.bf16.msra.mxu0 %v3097_v16  ;;  %v3098_v13 = vld [vmem:[#allocation17 + $0x8] sm:$0xff]  }
 0x812   : > { %v1808_v59 = vsel %vm1803_vm6, %v1802_v33, %v1772_v42  ;;  %2835 = vmatprep.subr.bf16.mxu0 %v3686_v39 }
 0x813   : > { %2826 = vmatmul.mubr.msk.bf16.vlgmr.msra.gmra.mrb[48].mxu1 %vm630_vm0, %v1816_v36  ;;  %v1814_v25 = vsel %vm1809_vm7, %v1808_v59, %v1792_v56 }
 0x814   : > { %2829 = vmatprep.mubr.msk.bf16.mxu1 %vm3687_vm1, %v3686_v39  ;;  %v1817_v23 = vpack.c.bf16 %v1814_v25, %v1814_v25 }
 0x815   : > { %2836 = vmatpush3.bf16.msra.mxu0 %v3098_v13 }
 0x81b   : > { %2830 = vmatmul.mubr.msk.bf16.gmra.mrb[52].mxu1 %vm630_vm0, %v1817_v23 }
 0x81c   : > { %2857 = vmatprep.mubr.msk.bf16.mxu1 %vm3687_vm1, %v3686_v39 }
 0x8de   : > { %v1877_v44 = vpop.f32.mrb[60].mxu0 }
 0x8df   : > { %v1899_v0 = vadd.f32 %v4181_v3, %v1877_v44  ;;  %v2823_v15 = vpop.f32.mrb[61].mxu0 }
 0x8e0   : > { %v1880_v38 = vpop.f32.mrb[62].mxu0 }
 0x8e1   : > { %v4695_v57 = vadd.f32 %v2548_v14, %v1899_v0  ;;  %v1900_v27 = vadd.f32 %v4185_v5, %v1880_v38  ;;  %v2824_v17 = vpop.f32.mrb[63].mxu0  ;;  %v2549_v38 = vld [vmem:[#allocation14] ss:$0 sm:$0xff] }
 0x8e3   : > { %v4698_v40 = vadd.f32 %v2548_v14, %v1900_v27  ;;  %v1918_v19 = vsel %vm630_vm0, %v4695_v57, 0.0 }
 0x8e4   : > { %1919 = vadd.xlane.f32.xlu0 %v1918_v19 }
 0x8e5   : > { %v1921_v21 = vsel %vm630_vm0, %v4698_v40, 0.0 }
 0x8e6   : > { %v1885_v47 = vpop.f32.mrb[48].mxu1  ;;  %1922 = vadd.xlane.f32.xlu1 %v1921_v21 }
 0x8e7   : > { %v1901_v3 = vadd.f32 %v4183_v4, %v1885_v47  ;;  %v2827_v62 = vpop.f32.mrb[49].mxu1 }
 0x8e8   : > { %v1888_v41 = vpop.f32.mrb[50].mxu1 }
 0x8e9   : > { %v4705_v26 = vadd.f32 %v2548_v14, %v1901_v3  ;;  %v1902_v5 = vadd.f32 %v4187_v6, %v1888_v41  ;;  %v2828_v46 = vpop.f32.mrb[51].mxu1 }
 0x8eb   : > { %v4708_v24 = vadd.f32 %v2548_v14, %v1902_v5  ;;  %v1924_v9 = vsel %vm630_vm0, %v4705_v26, 0.0  ;;  %v2550_v5 = vld [vmem:[#allocation16] ss:$0 sm:$0xff] }
 0x8ec   : > { %1925 = vadd.xlane.f32.xlu0 %v1924_v9 }
 0x8ed   : > { %v1927_v4 = vsel %vm630_vm0, %v4708_v24, 0.0 }
 0x8ee   : > { %v1893_v28 = vpop.f32.mrb[52].mxu1 }
 0x8ef   : > { %v1903_v43 = vadd.f32 %v1893_v28, %v4197_v11  ;;  %v2831_v18 = vpop.f32.mrb[53].mxu1 }
 0x8f0   : > { %v1896_v53 = vpop.f32.mrb[54].mxu1  ;;  %1928 = vadd.xlane.f32.xlu0 %v1927_v4 }
 0x8f1   : > { %v4715_v49 = vadd.f32 %v2548_v14, %v1903_v43  ;;  %v2832_v34 = vpop.f32.mrb[55].mxu1 }
 0x8f3   : > { %v1930_v6 = vsel %vm630_vm0, %v4715_v49, 0.0 }
 0x8f4   : > { %1931 = vadd.xlane.f32.xlu0 %v1930_v6 }
 0x971   : > { %v1920_v37 = vpop.xlane.xlu0 %1919 }
 0x972   : > { %v1933_v58 = vmul.f32 0.03125, %v1920_v37 }
 0x973   : > { %v1923_v22 = vpop.xlane.xlu1 %1922 }
 0x974   : > { %v1938_v45 = vsub.f32 %v4695_v57, %v1933_v58  ;;  %v1934_v48 = vmul.f32 0.03125, %v1923_v22 }
 0x976   : > { %v1939_v11 = vsub.f32 %v4698_v40, %v1934_v48  ;;  %v1943_v35 = vmul.f32 %v1938_v45, %v1938_v45 }
 0x978   : > { %v1948_v29 = vsel %vm630_vm0, %v1943_v35, 0.0  ;;  %v1944_v50 = vmul.f32 %v1939_v11, %v1939_v11 }
 0x979   : > { %v1926_v52 = vpop.xlane.xlu0 %1925  ;;  %1949 = vadd.xlane.f32.xlu1 %v1948_v29 }
 0x97a   : > { %v1935_v51 = vmul.f32 0.03125, %v1926_v52  ;;  %v1951_v12 = vsel %vm630_vm0, %v1944_v50, 0.0  ;;  %v3099_v52 = vld [vmem:[#allocation20] sm:$0xff]  }
 0x97b   : > { %1952 = vadd.xlane.f32.xlu0 %v1951_v12  ;;  %2850 = vmatpush3.bf16.msra.mxu1 %v3099_v52  ;;  %v3101_v12 = vld [vmem:[#allocation20 + $0x10] sm:$0xff]  }
 0x97c   : > { %v1940_v54 = vsub.f32 %v4705_v26, %v1935_v51  ;;  %2851 = vmatprep.subr.bf16.mxu1 %v3686_v39  ;;  %v3100_v51 = vld [vmem:[#allocation20 + $0x8] sm:$0xff]  }
 0x97d   : > { %v1929_v2 = vpop.xlane.xlu0 %1928 }
 0x97e   : > { %v1936_v55 = vmul.f32 0.03125, %v1929_v2  ;;  %v1945_v31 = vmul.f32 %v1940_v54, %v1940_v54  ;;  %v2551_v2 = vld [vmem:[#allocation19] ss:$0 sm:$0xff] }
 0x97f   : > { %2852 = vmatpush3.bf16.msra.mxu1 %v3100_v51 }
 0x980   : > { %v1941_v32 = vsub.f32 %v4708_v24, %v1936_v55  ;;  %v1954_v30 = vsel %vm630_vm0, %v1945_v31, 0.0  ;;  %2853 = vmatprep.subr.bf16.mxu1 %v3686_v39 }
 0x981   : > { %v1932_v60 = vpop.xlane.xlu0 %1931  ;;  %1955 = vadd.xlane.f32.xlu1 %v1954_v30 }
 0x982   : > { %v1937_v61 = vmul.f32 0.03125, %v1932_v60  ;;  %v1946_v63 = vmul.f32 %v1941_v32, %v1941_v32 }
 0x983   : > { %2854 = vmatpush3.bf16.msra.mxu1 %v3101_v12 }
 0x984   : > { %v1942_v1 = vsub.f32 %v4715_v49, %v1937_v61  ;;  %v1957_v7 = vsel %vm630_vm0, %v1946_v63, 0.0  ;;  %2855 = vmatprep.subr.bf16.mxu1 %v3686_v39 }
 0x985   : > { %1958 = vadd.xlane.f32.xlu0 %v1957_v7 }
 0x986   : > { %v1947_v8 = vmul.f32 %v1942_v1, %v1942_v1 }
 0x988   : > { %v1960_v10 = vsel %vm630_vm0, %v1947_v8, 0.0 }
 0x989   : > { %1961 = vadd.xlane.f32.xlu1 %v1960_v10 }
 0xa06   : > { %v1950_v20 = vpop.xlane.xlu1 %1949 }
 0xa07   : > { %v1963_v36 = vmul.f32 0.03125, %v1950_v20 }
 0xa08   : > { %v1953_v42 = vpop.xlane.xlu0 %1952 }
 0xa09   : > { %v1968_v33 = vadd.f32 1e-05, %v1963_v36  ;;  %v1964_v56 = vmul.f32 0.03125, %v1953_v42 }
 0xa0b   : > { %3193 = vrsqrt.f32 %v1968_v33  ;;  %v1969_v59 = vadd.f32 1e-05, %v1964_v56 }
 0xa0d   : > { %3195 = vrsqrt.f32 %v1969_v59 }
 0xa0e   : > { %v1956_v25 = vpop.xlane.xlu1 %1955 }
 0xa0f   : > { %v1965_v23 = vmul.f32 0.03125, %v1956_v25 }
 0xa11   : > { %v1970_v44 = vadd.f32 1e-05, %v1965_v23 }
 0xa12   : > { %v1959_v14 = vpop.xlane.xlu0 %1958 }
 0xa13   : > { %3197 = vrsqrt.f32 %v1970_v44  ;;  %v1966_v0 = vmul.f32 0.03125, %v1959_v14 }
 0xa15   : > { %v3194_v15 = vpop.eup %3193  ;;  %v1971_v27 = vadd.f32 1e-05, %v1966_v0 }
 0xa16   : > { %v1978_v17 = vmul.f32 %v3194_v15, %v1938_v45  ;;  %v1962_v19 = vpop.xlane.xlu1 %1961 }
 0xa17   : > { %v3196_v21 = vpop.eup %3195  ;;  %3199 = vrsqrt.f32 %v1971_v27  ;;  %v1967_v47 = vmul.f32 0.03125, %v1962_v19 }
 0xa18   : > { %v1989_v3 = vmul.f32 %v2549_v38, %v1978_v17  ;;  %v1979_v62 = vmul.f32 %v3196_v21, %v1939_v11 }
 0xa19   : > { %v1972_v41 = vadd.f32 1e-05, %v1967_v47 }
 0xa1a   : > { %v1990_v46 = vmul.f32 %v2549_v38, %v1979_v62  ;;  %v2000_v9 = vadd.f32 %v2550_v5, %v1989_v3 }
 0xa1b   : > { %3201 = vrsqrt.f32 %v1972_v41 }
 0xa1c   : > { %v2001_v28 = vadd.f32 %v2550_v5, %v1990_v46 }
 0xa1d   : > { %v3198_v43 = vpop.eup %3197 }
 0xa1e   : > { %v1980_v18 = vmul.f32 %v3198_v43, %v1940_v54  ;;  %v2005_v4 = vpack.c.bf16 %v2001_v28, %v2000_v9  ;;  %v3102_v54 = vld [vmem:[#allocation20 + $0x18] sm:$0xff]  }
 0xa1f   : > { %2856 = vmatpush3.bf16.msra.mxu1 %v3102_v54 }
 0xa20   : > { %2838 = vmatmul.mubr.msk.bf16.vlgmr.msra.gmra.mrb[64].mxu0 %vm630_vm0, %v2005_v4  ;;  %v1991_v6 = vmul.f32 %v2549_v38, %v1980_v18 }
 0xa21   : > { %v3200_v53 = vpop.eup %3199  ;;  %2841 = vmatprep.mubr.msk.bf16.mxu0 %vm3687_vm1, %v3686_v39 }
 0xa22   : > { %v1981_v34 = vmul.f32 %v3200_v53, %v1941_v32  ;;  %v2002_v45 = vadd.f32 %v2550_v5, %v1991_v6 }
 0xa24   : > { %v1992_v37 = vmul.f32 %v2549_v38, %v1981_v34 }
 0xa25   : > { %v3202_v58 = vpop.eup %3201 }
 0xa26   : > { %v1982_v22 = vmul.f32 %v3202_v58, %v1942_v1  ;;  %v2003_v48 = vadd.f32 %v2550_v5, %v1992_v37 }
 0xa28   : > { %v2006_v11 = vpack.c.bf16 %v2003_v48, %v2002_v45  ;;  %v1993_v35 = vmul.f32 %v2549_v38, %v1982_v22 }
 0xa2a   : > { %2842 = vmatmul.mubr.msk.bf16.gmra.mrb[68].mxu0 %vm630_vm0, %v2006_v11  ;;  %v2004_v29 = vadd.f32 %v2550_v5, %v1993_v35 }
 0xa2b   : > { %2845 = vmatprep.mubr.msk.bf16.mxu0 %vm3687_vm1, %v3686_v39 }
 0xa2c   : > { %v2007_v50 = vpack.c.bf16 %v2004_v29, %v2004_v29 }
 0xa32   : > { %2846 = vmatmul.mubr.msk.bf16.gmra.mrb[72].mxu0 %vm630_vm0, %v2007_v50 }
 0xaf3   : > { %v2074_v55 = vpop.f32.mrb[64].mxu0 }
 0xaf4   : > { %v2075_v31 = vadd.f32 %v2551_v2, %v2074_v55  ;;  %v2839_v32 = vpop.f32.mrb[65].mxu0 }
 0xaf5   : > { %v2077_v30 = vpop.f32.mrb[66].mxu0 }
 0xaf6   : > { %v2096_v60 = vmul.f32 %v2075_v31, %v2075_v31  ;;  %v2078_v61 = vadd.f32 %v2551_v2, %v2077_v30  ;;  %v2840_v63 = vpop.f32.mrb[67].mxu0 }
 0xaf8   : > { %v2101_v1 = vmul.f32 %v2096_v60, %v2075_v31  ;;  %v2097_v7 = vmul.f32 %v2078_v61, %v2078_v61 }
 0xafa   : > { %v2106_v8 = vmul.f32 0.044715, %v2101_v1  ;;  %v2102_v10 = vmul.f32 %v2097_v7, %v2078_v61  ;;  %v2557_v1 = vld [vmem:[#allocation22] ss:$0 sm:$0xff] }
 0xafc   : > { %v2111_v16 = vadd.f32 %v2106_v8, %v2075_v31  ;;  %v2107_v13 = vmul.f32 0.044715, %v2102_v10 }
 0xafd   : > { %v2082_v20 = vpop.f32.mrb[68].mxu0 }
 0xafe   : > { %v2116_v36 = vmul.f32 0.7978846, %v2111_v16  ;;  %v2112_v42 = vadd.f32 %v2107_v13, %v2078_v61  ;;  %v2083_v33 = vadd.f32 %v2551_v2, %v2082_v20  ;;  %v2843_v56 = vpop.f32.mrb[69].mxu0 }
 0xaff   : > { %v2085_v59 = vpop.f32.mrb[70].mxu0 }
 0xb00   : > { %3203 = vtanh.f32 %v2116_v36  ;;  %v2117_v25 = vmul.f32 0.7978846, %v2112_v42  ;;  %v2098_v23 = vmul.f32 %v2083_v33, %v2083_v33  ;;  %v2086_v44 = vadd.f32 %v2551_v2, %v2085_v59  ;;  %v2844_v14 = vpop.f32.mrb[71].mxu0 }
 0xb02   : > { %3205 = vtanh.f32 %v2117_v25  ;;  %v2103_v0 = vmul.f32 %v2098_v23, %v2083_v33  ;;  %v2099_v15 = vmul.f32 %v2086_v44, %v2086_v44 }
 0xb04   : > { %v2108_v38 = vmul.f32 0.044715, %v2103_v0  ;;  %v2104_v27 = vmul.f32 %v2099_v15, %v2086_v44 }
 0xb05   : > { %v2090_v17 = vpop.f32.mrb[72].mxu0 }
 0xb06   : > { %v2113_v19 = vadd.f32 %v2108_v38, %v2083_v33  ;;  %v2109_v21 = vmul.f32 0.044715, %v2104_v27  ;;  %v2091_v47 = vadd.f32 %v2551_v2, %v2090_v17  ;;  %v2847_v3 = vpop.f32.mrb[73].mxu0 }
 0xb07   : > { %v2093_v62 = vpop.f32.mrb[74].mxu0 }
 0xb08   : > { %v2118_v41 = vmul.f32 0.7978846, %v2113_v19  ;;  %v2114_v5 = vadd.f32 %v2109_v21, %v2086_v44  ;;  %v2100_v46 = vmul.f32 %v2091_v47, %v2091_v47  ;;  %v2848_v9 = vpop.f32.mrb[75].mxu0 }
 0xb0a   : > { %v3204_v28 = vpop.eup %3203  ;;  %3207 = vtanh.f32 %v2118_v41  ;;  %v2119_v43 = vmul.f32 0.7978846, %v2114_v5  ;;  %v2105_v18 = vmul.f32 %v2100_v46, %v2091_v47 }
 0xb0b   : > { %v2126_v4 = vadd.f32 1.0, %v3204_v28 }
 0xb0c   : > { %v3206_v53 = vpop.eup %3205  ;;  %3209 = vtanh.f32 %v2119_v43  ;;  %v2110_v34 = vmul.f32 0.044715, %v2105_v18 }
 0xb0d   : > { %v2131_v6 = vmul.f32 0.5, %v2126_v4  ;;  %v2127_v37 = vadd.f32 1.0, %v3206_v53 }
 0xb0e   : > { %v2115_v58 = vadd.f32 %v2110_v34, %v2091_v47 }
 0xb0f   : > { %v2132_v22 = vmul.f32 0.5, %v2127_v37  ;;  %v2136_v48 = vmul.f32 %v2131_v6, %v2075_v31 }
 0xb10   : > { %v2120_v45 = vmul.f32 0.7978846, %v2115_v58 }
 0xb11   : > { %v2137_v11 = vmul.f32 %v2132_v22, %v2078_v61 }
 0xb12   : > { %3211 = vtanh.f32 %v2120_v45 }
 0xb13   : > { %v2141_v35 = vpack.c.bf16 %v2137_v11, %v2136_v48 }
 0xb14   : > { %v3208_v29 = vpop.eup %3207 }
 0xb15   : > { %v2128_v50 = vadd.f32 1.0, %v3208_v29  ;;  %2858 = vmatmul.mubr.msk.bf16.vlgmr.msra.gmra.mrb[56].mxu1 %vm2183_vm8, %v2141_v35 }
 0xb16   : > { %v3210_v52 = vpop.eup %3209  ;;  %2861 = vmatprep.mubr.msk.bf16.mxu1 %vm3687_vm1, %v3686_v39 }
 0xb17   : > { %v2133_v51 = vmul.f32 0.5, %v2128_v50  ;;  %v2129_v12 = vadd.f32 1.0, %v3210_v52 }
 0xb19   : > { %v2134_v54 = vmul.f32 0.5, %v2129_v12  ;;  %v2138_v2 = vmul.f32 %v2133_v51, %v2083_v33 }
 0xb1b   : > { %v2139_v55 = vmul.f32 %v2134_v54, %v2086_v44 }
 0xb1c   : > { %v3212_v32 = vpop.eup %3211 }
 0xb1d   : > { %v2142_v30 = vpack.c.bf16 %v2139_v55, %v2138_v2  ;;  %v2130_v31 = vadd.f32 1.0, %v3212_v32 }
 0xb1f   : > { %2862 = vmatmul.mubr.msk.bf16.gmra.mrb[60].mxu1 %vm2183_vm8, %v2142_v30  ;;  %v2135_v60 = vmul.f32 0.5, %v2130_v31 }
 0xb20   : > { %2865 = vmatprep.mubr.msk.bf16.mxu1 %vm3687_vm1, %v3686_v39 }
 0xb21   : > { %v2140_v61 = vmul.f32 %v2135_v60, %v2091_v47 }
 0xb23   : > { %v2143_v63 = vpack.c.bf16 %v2140_v61, %v2140_v61 }
 0xb27   : > { %2866 = vmatmul.mubr.msk.bf16.gmra.mrb[64].mxu1 %vm2183_vm8, %v2143_v63 }
 0xbe8   : > { %v2227_v7 = vpop.f32.mrb[56].mxu1 }
 0xbe9   : > { %v2228_v8 = vadd.f32 %v2557_v1, %v2227_v7  ;;  %v2859_v10 = vpop.f32.mrb[57].mxu1 }
 0xbea   : > { %v2230_v16 = vpop.f32.mrb[58].mxu1 }
 0xbeb   : > { %v2249_v13 = vadd.f32 %v2228_v8, %v4695_v57  ;;  %v2231_v20 = vadd.f32 %v2557_v1, %v2230_v16  ;;  %v2860_v36 = vpop.f32.mrb[59].mxu1 }
 0xbed   : > { %v2573_v42 = vpack.c.bf16 %v2249_v13, %v2249_v13  ;;  %v2250_v33 = vadd.f32 %v2231_v20, %v4698_v40 }
 0xbef   : > { %2276 = vst.msk [vmem:[%s616_s22] sm:$0xf] %vm2275_vm9, %v2573_v42  ;;  %v2574_v39 = vpack.c.bf16 %v2250_v33, %v2250_v33 }
 0xbf1   : > { %2277 = vst.msk [vmem:[%s616_s22 + $0x4] sm:$0xf] %vm2275_vm9, %v2574_v39 }
 0xbf2   : > { %v2235_v56 = vpop.f32.mrb[60].mxu1 }
 0xbf3   : > { %v2236_v59 = vadd.f32 %v2557_v1, %v2235_v56  ;;  %v2863_v25 = vpop.f32.mrb[61].mxu1 }
 0xbf4   : > { %v2238_v23 = vpop.f32.mrb[62].mxu1 }
 0xbf5   : > { %v2251_v57 = vadd.f32 %v2236_v59, %v4705_v26  ;;  %v2239_v44 = vadd.f32 %v2557_v1, %v2238_v23  ;;  %v2864_v14 = vpop.f32.mrb[63].mxu1 }
 0xbf7   : > { %v2575_v0 = vpack.c.bf16 %v2251_v57, %v2251_v57  ;;  %v2252_v15 = vadd.f32 %v2239_v44, %v4708_v24 }
 0xbf9   : > { %2278 = vst.msk [vmem:[%s616_s22 + $0x8] sm:$0xf] %vm2275_vm9, %v2575_v0  ;;  %v2576_v40 = vpack.c.bf16 %v2252_v15, %v2252_v15 }
 0xbfa   : > { %v2243_v38 = vpop.f32.mrb[64].mxu1 }
 0xbfb   : > { %2279 = vst.msk [vmem:[%s616_s22 + $0xc] sm:$0xf] %vm2275_vm9, %v2576_v40  ;;  %v2244_v27 = vadd.f32 %v2557_v1, %v2243_v38  ;;  %v2867_v17 = vpop.f32.mrb[65].mxu1 }
 0xbfc   : > { %v2246_v19 = vpop.f32.mrb[66].mxu1 }
 0xbfd   : > { %v2253_v26 = vadd.f32 %v2244_v27, %v4715_v49  ;;  %v2868_v21 = vpop.f32.mrb[67].mxu1 }
 0xbff   : > { %v2577_v24 = vpack.c.bf16 %v2253_v26, %v2253_v26 }
 0xc01   : > { %2280 = vst.msk [vmem:[%s616_s22 + $0x10] sm:$0xf] %vm2275_vm9, %v2577_v24 }
 0xc02   : > { %3592 = shalt.err (!%p3589_p7)
}
 0xc03   : > { %s3593_s22 = scalar_lea.hbm %s4764_s20, 320  ;;  %s3597_s4 = scalar_lea.hbm %s4875_s1, 640 }
 0xc04   : > { %p3594_p5 = scmp.ne.s32.totalorder %s4764_s20, %s3593_s22  ;;  %p3598_p13 = scmp.lt.u32.totalorder %s4764_s20, %s4875_s1 }
 0xc05   : > { %p3599_p1 = scmp.lt.u32.totalorder %s3597_s4, %s3593_s22  ;;  %p3601_p2 = scmp.lt.u32.totalorder %s3593_s22, %s4764_s20 }
 0xc06   : > { %p3595_p9 = pnand %p3594_p5, %p4876_p8 }
 0xc07   : > { %p3600_p3 = por %p3599_p1, %p3598_p13 }
 0xc08   : > { %p3596_p4 = pneg %p3595_p9 }
 0xc09   : > { %p3602_p10 = por %p3601_p2, %p3600_p3 }
 0xc0b   : > { %p3603_p11 = pnand %p3602_p10, %p3596_p4 }
 0xc0d   : > { %3606 = shalt.err (!%p3603_p11)
}
 0xc0e   : > { %s3703_s29 = smov 4  }
 0xc0f   : > { %2927 = dma.vmem_to_hbm [thread:$0]  (%p4876_p8), %s4759_s21, 320, %s4764_s20, %s2282_s30, %s3695_s15, %s3695_s15, %s3703_s29  }
 0xc10 PF: > { %s2310_s23 = sand.u32 1, %s3657_s25   ;;  %p4877_p12 = scmp.ne.s32.totalorder %s4855_s13, 0 }
 0xc11   : > { %p4878_p0 = scmp.ge.s32.totalorder %s3669_s28, 2  ;;  %s2311_s22 = scalar_lea.sflag [#allocation4], %s2310_s23 }
 0xc13   : > { %p2971_p6 = pnand %p4878_p0, %p4877_p12 }
 0xc15   : > { %3652 = dma.done.wait (!%p2971_p6), %s2311_s22, 320  }
 0xc16   : > { %3654 = vsyncadd (!%p2971_p6), %s2311_s22, 4294966976  ;;  %p32_p7 = scmp.ge.s32.totalorder %s4071_s18, 4   ;;  %s4879_s25 = smov %s3661_s26 }
 0xc17   : > { %s4880_s26 = smov %s3665_s27  ;;  %s4881_s27 = smov %s4082_s19 }
 0xc18   : > { %s4882_s28 = smov %s4071_s18  ;;  %34 = sbr.rel (!%p32_p7) target bundleno = 18 (0x12), region = 165 }
 0xc1f   :  { %2316 = vsyncpa [#allocation3], 1 }
 0xc20   :  { %2318 = vsyncpa [#allocation3 + $0x1], 1 }
 0xc21   :  { %2319 = vsyncpa [#allocation6], 1 }
 0xc22   :  { %2320 = vsyncpa [#allocation9], 1 }
 0xc23   :  { %2321 = vsyncpa [#allocation12], 1 }
 0xc24   :  { %2322 = vsyncpa [#allocation15], 1 }
 0xc25   :  { %2323 = vsyncpa [#allocation18], 1 }
 0xc26   :  { %2324 = vsyncpa [#allocation21], 1 }
 0xc27   :  { %2325 = vsyncpa [#allocation4], 1 }
 0xc28   :  { %2327 = vsyncpa [#allocation4 + $0x1], 1 }

// kernel: prithvi_wrapper_forward.11
= control target key start
LH: loop header
LB: loop body
LE: loop exit
PB: predicated region body
PF: predicated region fallthrough
CT: control target
= control target key end

     0   :  { %s1507_s0 = inlined_call_operand.hbm [shape: bf16[32,64], index: 0, kind: input, shape index: {}]   ;;  %s1508_s1 = inlined_call_operand.hbm [shape: bf16[4,64,64], index: 1, kind: input, shape index: {}]   ;;  %s1509_s2 = inlined_call_operand.hbm [shape: f32[4,1,64], index: 2, kind: input, shape index: {}]   ;;  %s1510_s3 = inlined_call_operand.hbm [shape: f32[1,64], index: 3, kind: input, shape index: {}]   ;;  %s1511_s4 = inlined_call_operand.hbm [shape: f32[1,64], index: 4, kind: input, shape index: {}]   ;;  %s1512_s5 = inlined_call_operand.hbm [shape: bf16[4,32,64], index: 5, kind: output, shape index: {}]  }
   0x1   :  { %1524 = sst [smem:[#allocation20_spill]] %s1508_s1 }
   0x2   :  { %1525 = sst [smem:[#allocation21_spill]] %s1510_s3 }
   0x3   :  { %10 = vsyncpa [#allocation3], 0 }
   0x4   :  { %11 = vsyncpa [#allocation6], 0 }
   0x5   :  { %13 = vsyncpa [#allocation6 + $0x1], 0 }
   0x6   :  { %14 = vsyncpa [#allocation9], 0 }
   0x7   :  { %15 = vsyncpa [#allocation4], 0 }
   0x8   :  { %17 = vsyncpa [#allocation4 + $0x1], 0  ;;  %s1191_s18 = smov 0   ;;  %s1193_s19 = smov 0  }
   0x9   :  { %s1195_s20 = smov 0   ;;  %s1197_s21 = smov 0  }
   0xa   :  { %s1199_s22 = smov 0   ;;  %s1201_s23 = smov 0  }
   0xb LB: > { %1526 = sst [smem:[#allocation16_spill]] %s1129_s18  ;;  %s1222_s24 = sadd.s32 4294967295, %s1149_s23   ;;  %s1149_s23 = sphi %s1201_s23, %s23_s23   ;;  %s1145_s22 = sphi %s1199_s22, %s1562_s22   ;;  %s1141_s21 = sphi %s1197_s21, %s1561_s21   ;;  %s1137_s20 = sphi %s1195_s20, %s1560_s20   ;;  %s1133_s19 = sphi %s1193_s19, %s1559_s19   ;;  %s1129_s18 = sphi %s1191_s18, %s1558_s18  }
   0xc   : > { %s731_s25 = sadd.s32 4294967294, %s1149_s23   ;;  %p81_p0 = scmp.ne.s32.totalorder %s1133_s19, %s1129_s18 }
   0xd   : > { %p1513_p1 = scmp.eq.s32.totalorder %s1222_s24, 0  ;;  %p181_p3 = scmp.eq.s32.totalorder %s731_s25, 3 }
   0xe   : > { %p732_p5 = scmp.ge.s32.totalorder %s1149_s23, 1  ;;  %p188_p7 = scmp.lt.s32.totalorder %s1149_s23, 5 }
   0xf   : > { %p1231_p4 = por %p1513_p1, %p81_p0  ;;  %p1236_p6 = por %p181_p3, %p81_p0 }
  0x10   : > { %p1241_p8 = pnand %p732_p5, %p188_p7  ;;  %s1151_s29 = smov [#allocation8]  }
  0x11   : > { %s1527_s26 = scalar_select %p1231_p4, 1, 0 }
  0x12   : > { %s1528_s27 = scalar_select %p1236_p6, 1, 0 }
  0x13   : > { %s1530_s28 = scalar_select %p1241_p8, 1, 0 }
  0x14   : > { %1529 = sst [smem:[#allocation17_spill]] %s1528_s27  ;;  %s217_s30 = sshll.u32 %s1151_s29, 4  ;;  %s218_s30 = int_to_ptr.vmem [resolvable:$true] %s217_s30 }
  0x15   : > { %p809_p9 = pneg %p1241_p8  ;;  %s35_s7 = sadd.s32 1, %s1145_s22 }
  0x16   : > { %s68_s8 = sadd.s32 1, %s1137_s20  ;;  %p1255_p11 = scmp.ge.s32.totalorder %s35_s7, 4 }
  0x17   : > { %p1249_p10 = pnand %p809_p9, %p1513_p1  ;;  %s1533_s3 = sld [smem:[#allocation21_spill]] }
  0x18   : > { %s1532_s9 = scalar_select %p1255_p11, 1, 0 }
  0x19   : > { %s1531_s6 = scalar_select %p1249_p10, 1, 0 }
  0x1a   : > { %p1267_p13 = pneg %p1249_p10 }
  0x1d   : > { %s915_s12 = scalar_lea.hbm %s1533_s3, 16 }
  0x1e   : > { %p916_p12 = scmp.ne.s32.totalorder %s1533_s3, %s915_s12  ;;  %p922_p5 = scmp.lt.u32.totalorder %s915_s12, %s1533_s3 }
  0x20   : > { %p918_p0 = pnand %p1267_p13, %p916_p12 }
  0x22   : > { %p919_p3 = pneg %p918_p0 }
  0x24   : > { %p924_p7 = pnand %p922_p5, %p919_p3 }
  0x26   : > { %927 = shalt.err (!%p924_p7)
}
  0x27   : > { %s928_s25 = scalar_lea.vmem %s218_s30, 16  ;;  %s935_s29 = scalar_lea.vmem %s218_s30, 32 }
  0x28   : > { %p929_p9 = scmp.ne.s32.totalorder %s218_s30, %s928_s25  ;;  %p936_p6 = scmp.lt.s32.totalorder %s218_s30, %s218_s30 }
  0x29   : > { %p937_p4 = scmp.lt.s32.totalorder %s935_s29, %s928_s25 }
  0x2a   : > { %p931_p1 = pnand %p929_p9, %p1267_p13 }
  0x2b   : > { %p938_p8 = por %p937_p4, %p936_p6 }
  0x2c   : > { %p932_p2 = pneg %p931_p1 }
  0x2e   : > { %p939_p11 = pnand %p938_p8, %p932_p2 }
  0x30   : > { %942 = shalt.err (!%p939_p11)
}
  0x31   : > { %815 = dma.hbm_to_vmem [thread:$0]  (!%p1249_p10), %s1533_s3, 16, %s218_s30, [#allocation9]  }
  0x32   : > { %p1535_p1 = scmp.ne.s32.totalorder %s1532_s9, 0  ;;  %p75_p2 = scmp.ne.s32.totalorder %s1137_s20, %s1133_s19 }
  0x33   : > { %p76_p4 = scmp.eq.s32.totalorder %s1149_s23, 0  ;;  %p1537_p11 = scmp.eq.s32.totalorder %s1222_s24, 3 }
  0x34   : > { %s1564_s7 = smov (%p1535_p1, %s35_s7), 0  ;;  %p833_p0 = scmp.lt.s32.totalorder %s1149_s23, 4 }
  0x35   : > { %1536 = sst [smem:[#allocation18_spill]] %s1564_s7  ;;  %s65_s12 = ssub.s32 %s1145_s22, %s1564_s7 }
  0x36   : > { %p66_p6 = scmp.eq.s32.totalorder %s65_s12, 0  ;;  %p77_p8 = por %p76_p4, %p75_p2 }
  0x37   : > { %p1294_p12 = por %p1537_p11, %p75_p2  ;;  %s239_s16 = sand.u32 1, %s1149_s23  }
  0x38   : > { %s1299_s14 = scalar_select %p66_p6, %s1137_s20, %s68_s8  }
  0x39   : > { %s1538_s13 = scalar_select %p1294_p12, 1, 0 }
  0x3a   : > { %1539 = sst [smem:[#allocation19_spill]] %s1299_s14  ;;  %s1516_s17 = sand.u32 1, %s1137_s20  }
  0x3b   : > { %s737_s30 = sshll.u32 %s1516_s17, 5  ;;  %s767_s9 = sshll.u32 %s1145_s22, 9 }
  0x3c   : > { %s1540_s1 = sld [smem:[#allocation20_spill]]  ;;  %s243_s11 = scalar_lea.vmem [#allocation5], %s737_s30 }
  0x3d   : > { %s250_s12 = sshll.u32 %s243_s11, 4  ;;  %p1312_p3 = pnand %p833_p0, %p77_p8  ;;  %s1316_s12 = int_to_ptr.vmem [resolvable:$true] %s250_s12 }
  0x3e   : > { %s1318_s17 = scalar_lea.sflag [#allocation6], %s239_s16 }
  0x3f   : > { %p1523_p7 = pneg %p1312_p3 }
  0x42   : > { %s1310_s10 = scalar_lea.hbm %s1540_s1, %s767_s9  ;;  %s948_s25 = scalar_lea.hbm %s1540_s1, 2048 }
  0x43   : > { %s943_s3 = scalar_lea.hbm %s1310_s10, 512  ;;  %p949_p2 = scmp.lt.u32.totalorder %s1310_s10, %s1540_s1 }
  0x44   : > { %p944_p5 = scmp.ne.s32.totalorder %s1310_s10, %s943_s3  ;;  %p950_p4 = scmp.lt.u32.totalorder %s948_s25, %s943_s3 }
  0x45   : > { %p952_p8 = scmp.lt.u32.totalorder %s943_s3, %s1310_s10 }
  0x46   : > { %p946_p9 = pnand %p1523_p7, %p944_p5  ;;  %p951_p6 = por %p950_p4, %p949_p2 }
  0x48   : > { %p947_p1 = pneg %p946_p9  ;;  %p953_p11 = por %p952_p8, %p951_p6 }
  0x4a   : > { %p954_p0 = pnand %p953_p11, %p947_p1 }
  0x4c   : > { %957 = shalt.err (!%p954_p0)
}
  0x4d   : > { %s958_s16 = scalar_lea.vmem %s1316_s12, 512  ;;  %s1152_s30 = smov [#allocation5]  }
  0x4e   : > { %p959_p5 = scmp.ne.s32.totalorder %s1316_s12, %s958_s16  ;;  %s963_s9 = sshll.u32 %s1152_s30, 4  ;;  %s964_s9 = int_to_ptr.vmem [resolvable:$false] %s963_s9 }
  0x4f   : > { %s965_s29 = scalar_lea.vmem %s964_s9, 1024  ;;  %p966_p10 = scmp.lt.s32.totalorder %s1316_s12, %s964_s9 }
  0x50   : > { %p961_p9 = pnand %p959_p5, %p1523_p7  ;;  %p967_p2 = scmp.lt.s32.totalorder %s965_s29, %s958_s16 }
  0x52   : > { %p962_p12 = pneg %p961_p9  ;;  %p968_p4 = por %p967_p2, %p966_p10 }
  0x54   : > { %p969_p6 = pnand %p968_p4, %p962_p12 }
  0x56   : > { %972 = shalt.err (!%p969_p6)
}
  0x57   : > { %s1153_s3 = smov 64   ;;  %s1154_s25 = smov 4  }
  0x58   : > { %822 = dma.hbm_to_vmem [thread:$0]  (!%p1312_p3), %s1310_s10, 512, %s1316_s12, %s1318_s17, %s1153_s3, %s1153_s3, %s1154_s25  }
  0x59   : > { %s1155_s11 = smov [#allocation2]   ;;  %s1156_s7 = smov [#allocation10]  }
  0x5a   : > { %s203_s1 = sshll.u32 %s1155_s11, 4  ;;  %s228_s30 = sshll.u32 %s1156_s7, 4  ;;  %s204_s1 = int_to_ptr.vmem [resolvable:$true] %s203_s1  ;;  %s1346_s30 = int_to_ptr.vmem [resolvable:$true] %s228_s30 }
  0x5b   : > { %s973_s29 = scalar_lea.hbm %s1507_s0, 256 }
  0x5c   : > { %p974_p10 = scmp.ne.s32.totalorder %s1507_s0, %s973_s29  ;;  %p980_p8 = scmp.lt.u32.totalorder %s973_s29, %s1507_s0 }
  0x5e   : > { %p976_p12 = pnand %p974_p10, %p1267_p13 }
  0x60   : > { %p977_p1 = pneg %p976_p12 }
  0x62   : > { %p982_p11 = pnand %p980_p8, %p977_p1 }
  0x64   : > { %985 = shalt.err (!%p982_p11)
}
  0x65   : > { %s986_s7 = scalar_lea.vmem %s204_s1, 256  ;;  %p994_p2 = scmp.lt.s32.totalorder %s204_s1, %s204_s1 }
  0x66   : > { %p987_p0 = scmp.ne.s32.totalorder %s204_s1, %s986_s7  ;;  %p995_p4 = scmp.lt.s32.totalorder %s986_s7, %s986_s7 }
  0x68   : > { %p989_p5 = pnand %p987_p0, %p1267_p13  ;;  %p996_p6 = por %p995_p4, %p994_p2 }
  0x6a   : > { %p990_p9 = pneg %p989_p5 }
  0x6c   : > { %p997_p7 = pnand %p996_p6, %p990_p9 }
  0x6e   : > { %1000 = shalt.err (!%p997_p7)
}
  0x6f   : > { %p1542_p10 = scmp.ne.s32.totalorder %s1531_s6, 0  ;;  %s1001_s11 = scalar_lea.hbm %s1511_s4, 16 }
  0x70   : > { %p1002_p12 = scmp.ne.s32.totalorder %s1511_s4, %s1001_s11  ;;  %p1008_p7 = scmp.lt.u32.totalorder %s1001_s11, %s1511_s4 }
  0x71   : > { %812 = dma.hbm_to_vmem [thread:$0]  (!%p1542_p10), %s1507_s0, 256, %s204_s1, [#allocation3], %s1153_s3, %s1153_s3, %s1154_s25  }
  0x72   : > { %p1004_p1 = pnand %p1002_p12, %p1267_p13 }
  0x74   : > { %p1005_p8 = pneg %p1004_p1 }
  0x76   : > { %p1010_p11 = pnand %p1008_p7, %p1005_p8 }
  0x78   : > { %1013 = shalt.err (!%p1010_p11)
}
  0x79   : > { %s1014_s1 = scalar_lea.vmem %s1346_s30, 16  ;;  %s1021_s3 = scalar_lea.vmem %s1346_s30, 32 }
  0x7a   : > { %p1015_p0 = scmp.ne.s32.totalorder %s1346_s30, %s1014_s1  ;;  %p1022_p2 = scmp.lt.s32.totalorder %s1346_s30, %s1346_s30 }
  0x7b   : > { %p1023_p4 = scmp.lt.s32.totalorder %s1021_s3, %s1014_s1 }
  0x7c   : > { %p1017_p5 = pnand %p1015_p0, %p1267_p13 }
  0x7d   : > { %p1024_p6 = por %p1023_p4, %p1022_p2 }
  0x7e   : > { %p1018_p9 = pneg %p1017_p5 }
  0x80   : > { %p1025_p12 = pnand %p1024_p6, %p1018_p9 }
  0x82   : > { %1028 = shalt.err (!%p1025_p12)
}
  0x83   : > { %818 = dma.hbm_to_vmem [thread:$0]  (!%p1542_p10), %s1511_s4, 16, %s1346_s30, [#allocation9]  }
  0x84   : > { %s740_s15 = sshll.u32 %s1145_s22, 4  ;;  %s1543_s12 = sand.u32 1, %s1137_s20  }
  0x85   : > { %s1394_s18 = scalar_lea.hbm %s1509_s2, %s740_s15  ;;  %s263_s6 = scalar_lea.vmem [#allocation7], %s1543_s12 }
  0x86   : > { %s270_s11 = sshll.u32 %s263_s6, 4  ;;  %s1029_s16 = scalar_lea.hbm %s1394_s18, 16  ;;  %s271_s11 = int_to_ptr.vmem [resolvable:$true] %s270_s11 }
  0x87   : > { %p1030_p13 = scmp.ne.s32.totalorder %s1394_s18, %s1029_s16  ;;  %p1544_p1 = pneg %p1312_p3 }
  0x88   : > { %s1034_s29 = scalar_lea.hbm %s1509_s2, 64  ;;  %p1035_p7 = scmp.lt.u32.totalorder %s1394_s18, %s1509_s2 }
  0x89   : > { %p1032_p8 = pnand %p1030_p13, %p1544_p1  ;;  %p1036_p11 = scmp.lt.u32.totalorder %s1034_s29, %s1029_s16 }
  0x8a   : > { %p1038_p5 = scmp.lt.u32.totalorder %s1029_s16, %s1394_s18 }
  0x8b   : > { %p1033_p10 = pneg %p1032_p8  ;;  %p1037_p0 = por %p1036_p11, %p1035_p7 }
  0x8d   : > { %p1039_p9 = por %p1038_p5, %p1037_p0 }
  0x8f   : > { %p1040_p2 = pnand %p1039_p9, %p1033_p10 }
  0x91   : > { %1043 = shalt.err (!%p1040_p2)
}
  0x92   : > { %s1044_s3 = scalar_lea.vmem %s271_s11, 16  ;;  %p1545_p6 = pmov %p1544_p1 }
  0x93   : > { %p1045_p4 = scmp.ne.s32.totalorder %s271_s11, %s1044_s3  ;;  %s1157_s25 = smov [#allocation7]  }
  0x94   : > { %s1049_s7 = sshll.u32 %s1157_s25, 4  ;;  %s1050_s7 = int_to_ptr.vmem [resolvable:$false] %s1049_s7 }
  0x95   : > { %p1047_p12 = pnand %p1045_p4, %p1545_p6  ;;  %s1051_s15 = scalar_lea.vmem %s1050_s7, 32 }
  0x96   : > { %p1052_p1 = scmp.lt.s32.totalorder %s271_s11, %s1050_s7  ;;  %p1053_p8 = scmp.lt.s32.totalorder %s1051_s15, %s1044_s3 }
  0x97   : > { %p1048_p13 = pneg %p1047_p12 }
  0x98   : > { %p1054_p7 = por %p1053_p8, %p1052_p1 }
  0x9a   : > { %p1055_p11 = pnand %p1054_p7, %p1048_p13 }
  0x9c   : > { %1058 = shalt.err (!%p1055_p11)
}
  0x9d   : > { %825 = dma.hbm_to_vmem [thread:$0]  (!%p1312_p3), %s1394_s18, 16, %s271_s11, %s1318_s17  }
  0x9e   : > { %p1546_p10 = scmp.ne.s32.totalorder %s1530_s28, 0 }
  0x9f   : > { %p1547_p0 = scmp.eq.s32.totalorder (!%p1546_p10), %s1222_s24, 0 }
  0xa0   : > { %279 = sbr.rel (%p1546_p10) target bundleno = 773 (0x305), region = 40 }
  0xa7   : > { %1112 = dma.done.wait (%p1547_p0), [#allocation3], 256   ;;  %p1548_p5 = pmov %p1547_p0 }
  0xa8   : > { %s285_s27 = sand.u32 1, %s1222_s24   ;;  %s1426_s14 = sand.u32 1, %s1133_s19  }
  0xa9   : > { %1114 = vsyncadd (%p1548_p5), [#allocation3], 4294967040  ;;  %s743_s8 = sshll.u32 %s1426_s14, 5  ;;  %s286_s12 = scalar_lea.sflag [#allocation6], %s285_s27 }
  0xaa   : > { %s289_s6 = scalar_lea.vmem [#allocation5], %s743_s8  ;;  %p1549_p3 = scmp.ne.s32.totalorder %s1527_s26, 0 }
  0xac   : > { %1116 = dma.done.wait (%p1549_p3), %s286_s12, 528  }
  0xad   : > { %1118 = vsyncadd (%p1549_p3), %s286_s12, 4294966768  ;;  %s297_s28 = scalar_lea.vmem [#allocation7], %s1426_s14  ;;  %p1550_p9 = pmov %p1547_p0 }
  0xae   : > { %p1551_p2 = pmov %p1547_p0 }
  0xaf   : > { %1120 = dma.done.wait (%p1550_p9), [#allocation9], 32  }
  0xb0   : > { %1122 = vsyncadd (%p1551_p2), [#allocation9], 4294967264  ;;  %v893_v0 = vld [vmem:[%s289_s6] sm:$0xff]   ;;  %v894_v1 = vld [vmem:[%s289_s6 + $0x8] sm:$0xff]   ;;  %vm392_vm0 = vcmask 523264   ;;  %s746_s24 = sshll.u32 %s1426_s14, 4 }
  0xb1   : > { %779 = vmatprep.subr.bf16.mxu0 %v893_v0  ;;  %v895_v2 = vld [vmem:[%s289_s6 + $0x10] sm:$0xff]   ;;  %v896_v4 = vld [vmem:[%s289_s6 + $0x18] sm:$0xff]   ;;  %v756_v52 = vld [vmem:[#allocation8] ss:$0 sm:$0xff]  ;;  %vm575_vm1 = vcmask 519168   ;;  %s335_s26 = scalar_lea.vmem [#allocation11], %s746_s24 }
  0xb2   : > { %780 = vmatpush3.bf16.msra.mxu0 %v893_v0  ;;  %v897_v3 = vld [vmem:[#allocation2] sm:$0xff]   ;;  %v898_v5 = vld [vmem:[#allocation2 + $0x8] sm:$0xff]   ;;  %v757_v54 = vld [vmem:[#allocation10] ss:$0 sm:$0xff]  ;;  %s772_s17 = sshll.u32 %s1141_s21, 8  ;;  %s596_s18 = sshll.u32 %s335_s26, 4  ;;  %s1458_s18 = int_to_ptr.vmem [resolvable:$true] %s596_s18 }
  0xb3   : > { %781 = vmatprep.subr.bf16.mxu0 %v894_v1  ;;  %787 = vmatprep.mubr.msk.bf16.mxu0 %vm392_vm0, %v897_v3  ;;  %v747_v6 = vld [vmem:[%s297_s28] ss:$0 sm:$0xff]  ;;  %s1456_s30 = scalar_lea.hbm %s1512_s5, %s772_s17  ;;  %s581_s21 = scalar_lea.sflag [#allocation4], %s1426_s14 }
  0xb4   : > { %s1059_s9 = scalar_lea.vmem %s1458_s18, 256  ;;  %p1552_p6 = scmp.ne.s32.totalorder %s1538_s13, 0 }
  0xb5   : > { %p1060_p4 = scmp.ne.s32.totalorder %s1458_s18, %s1059_s9  ;;  %s1158_s29 = smov [#allocation11]  }
  0xb6   : > { %782 = vmatpush3.bf16.msra.mxu0 %v894_v1  ;;  %s1063_s10 = sshll.u32 %s1158_s29, 4  ;;  %s1064_s10 = int_to_ptr.vmem [resolvable:$false] %s1063_s10 }
  0xb7   : > { %783 = vmatprep.subr.bf16.mxu0 %v895_v2  ;;  %p1061_p12 = pnand %p1060_p4, %p1552_p6  ;;  %s1065_s1 = scalar_lea.vmem %s1064_s10, 512 }
  0xb8   : > { %p1066_p1 = scmp.lt.s32.totalorder %s1458_s18, %s1064_s10  ;;  %p1067_p8 = scmp.lt.s32.totalorder %s1065_s1, %s1059_s9 }
  0xb9   : > { %p1062_p13 = pneg %p1061_p12 }
  0xba   : > { %784 = vmatpush3.bf16.msra.mxu0 %v895_v2  ;;  %p1068_p7 = por %p1067_p8, %p1066_p1 }
  0xbb   : > { %785 = vmatprep.subr.bf16.mxu0 %v896_v4 }
  0xbc   : > { %p1069_p11 = pnand %p1068_p7, %p1062_p13 }
  0xbe   : > { %786 = vmatpush3.bf16.msra.mxu0 %v896_v4 }
  0xc1   : > { %788 = vmatmul.mubr.msk.bf16.vlgmr.msra.gmra.mrb[0].mxu0 %vm392_vm0, %v898_v5 }
 0x194   : > { %v789_v7 = vpop.f32.mrb[0].mxu0 }
 0x195   : > { %v442_v8 = vadd.f32 %v789_v7, %v747_v6  ;;  %v433_v9 = vpop.f32.mrb[1].mxu0 }
 0x196   : > { %v434_v10 = vadd.f32 %v747_v6, %v433_v9  ;;  %v790_v11 = vpop.f32.mrb[2].mxu0 }
 0x197   : > { %v445_v12 = vadd.f32 %v790_v11, %v747_v6  ;;  %v436_v13 = vpop.f32.mrb[3].mxu0  ;;  %v456_v14 = vsel %vm392_vm0, %v442_v8, 0.0 }
 0x198   : > { %v437_v15 = vadd.f32 %v747_v6, %v436_v13  ;;  %457 = vadd.xlane.f32.xlu1 %v456_v14  ;;  %v450_v16 = vsel %vm392_vm0, %v434_v10, 0.0 }
 0x199   : > { %451 = vadd.xlane.f32.xlu0 %v450_v16  ;;  %v459_v17 = vsel %vm392_vm0, %v445_v12, 0.0 }
 0x19a   : > { %v453_v18 = vsel %vm392_vm0, %v437_v15, 0.0 }
 0x19c   : > { %460 = vadd.xlane.f32.xlu1 %v459_v17 }
 0x19d   : > { %454 = vadd.xlane.f32.xlu0 %v453_v18 }
 0x225   : > { %v458_v19 = vpop.xlane.xlu1 %457 }
 0x226   : > { %v465_v20 = vmul.f32 0.015625, %v458_v19  ;;  %v452_v21 = vpop.xlane.xlu0 %451 }
 0x227   : > { %v463_v22 = vmul.f32 0.015625, %v452_v21 }
 0x228   : > { %v469_v23 = vsub.f32 %v442_v8, %v465_v20 }
 0x229   : > { %v467_v24 = vsub.f32 %v434_v10, %v463_v22  ;;  %v461_v25 = vpop.xlane.xlu1 %460 }
 0x22a   : > { %v466_v26 = vmul.f32 0.015625, %v461_v25  ;;  %v455_v27 = vpop.xlane.xlu0 %454  ;;  %v473_v33 = vmul.f32 %v469_v23, %v469_v23 }
 0x22b   : > { %v464_v28 = vmul.f32 0.015625, %v455_v27  ;;  %v471_v29 = vmul.f32 %v467_v24, %v467_v24 }
 0x22c   : > { %v470_v30 = vsub.f32 %v445_v12, %v466_v26  ;;  %v481_v35 = vsel %vm392_vm0, %v473_v33, 0.0 }
 0x22d   : > { %v468_v31 = vsub.f32 %v437_v15, %v464_v28  ;;  %v475_v32 = vsel %vm392_vm0, %v471_v29, 0.0 }
 0x22e   : > { %476 = vadd.xlane.f32.xlu0 %v475_v32  ;;  %v474_v37 = vmul.f32 %v470_v30, %v470_v30 }
 0x22f   : > { %v472_v34 = vmul.f32 %v468_v31, %v468_v31 }
 0x230   : > { %v484_v38 = vsel %vm392_vm0, %v474_v37, 0.0 }
 0x231   : > { %v478_v36 = vsel %vm392_vm0, %v472_v34, 0.0 }
 0x232   : > { %482 = vadd.xlane.f32.xlu0 %v481_v35  ;;  %479 = vadd.xlane.f32.xlu1 %v478_v36 }
 0x236   : > { %485 = vadd.xlane.f32.xlu1 %v484_v38 }
 0x2bb   : > { %v477_v39 = vpop.xlane.xlu0 %476 }
 0x2bc   : > { %v487_v40 = vmul.f32 0.015625, %v477_v39 }
 0x2be   : > { %v491_v41 = vadd.f32 1e-06, %v487_v40 }
 0x2bf   : > { %v480_v42 = vpop.xlane.xlu1 %479  ;;  %v483_v43 = vpop.xlane.xlu0 %482 }
 0x2c0   : > { %899 = vrsqrt.f32 %v491_v41  ;;  %v488_v44 = vmul.f32 0.015625, %v480_v42  ;;  %v489_v45 = vmul.f32 0.015625, %v483_v43 }
 0x2c2   : > { %v492_v46 = vadd.f32 1e-06, %v488_v44  ;;  %v493_v47 = vadd.f32 1e-06, %v489_v45 }
 0x2c3   : > { %v486_v48 = vpop.xlane.xlu1 %485 }
 0x2c4   : > { %901 = vrsqrt.f32 %v492_v46  ;;  %v490_v49 = vmul.f32 0.015625, %v486_v48 }
 0x2c5   : > { %903 = vrsqrt.f32 %v493_v47 }
 0x2c6   : > { %v494_v50 = vadd.f32 1e-06, %v490_v49 }
 0x2c8   : > { %905 = vrsqrt.f32 %v494_v50 }
 0x2ca   : > { %v900_v51 = vpop.eup %899 }
 0x2cb   : > { %v499_v53 = vmul.f32 %v900_v51, %v467_v24 }
 0x2cd   : > { %v509_v55 = vmul.f32 %v756_v52, %v499_v53 }
 0x2ce   : > { %v902_v56 = vpop.eup %901 }
 0x2cf   : > { %v904_v57 = vpop.eup %903  ;;  %v519_v58 = vadd.f32 %v757_v54, %v509_v55  ;;  %v500_v59 = vmul.f32 %v902_v56, %v468_v31 }
 0x2d0   : > { %v501_v60 = vmul.f32 %v904_v57, %v469_v23 }
 0x2d1   : > { %v523_v61 = vmul.f32 %v519_v58, %v519_v58  ;;  %v510_v62 = vmul.f32 %v756_v52, %v500_v59 }
 0x2d2   : > { %v906_v63 = vpop.eup %905  ;;  %v511_v0 = vmul.f32 %v756_v52, %v501_v60 }
 0x2d3   : > { %v527_v1 = vmul.f32 %v523_v61, %v519_v58  ;;  %v520_v2 = vadd.f32 %v757_v54, %v510_v62  ;;  %v502_v3 = vmul.f32 %v906_v63, %v470_v30 }
 0x2d4   : > { %v521_v4 = vadd.f32 %v757_v54, %v511_v0 }
 0x2d5   : > { %v531_v5 = vmul.f32 0.044715, %v527_v1  ;;  %v524_v6 = vmul.f32 %v520_v2, %v520_v2  ;;  %v512_v7 = vmul.f32 %v756_v52, %v502_v3 }
 0x2d6   : > { %v525_v8 = vmul.f32 %v521_v4, %v521_v4 }
 0x2d7   : > { %v535_v9 = vadd.f32 %v531_v5, %v519_v58  ;;  %v528_v10 = vmul.f32 %v524_v6, %v520_v2  ;;  %v522_v11 = vadd.f32 %v757_v54, %v512_v7 }
 0x2d8   : > { %v529_v12 = vmul.f32 %v525_v8, %v521_v4 }
 0x2d9   : > { %v539_v13 = vmul.f32 0.7978846, %v535_v9  ;;  %v532_v14 = vmul.f32 0.044715, %v528_v10  ;;  %v526_v15 = vmul.f32 %v522_v11, %v522_v11 }
 0x2da   : > { %v533_v16 = vmul.f32 0.044715, %v529_v12 }
 0x2db   : > { %907 = vtanh.f32 %v539_v13  ;;  %v536_v17 = vadd.f32 %v532_v14, %v520_v2  ;;  %v530_v18 = vmul.f32 %v526_v15, %v522_v11 }
 0x2dc   : > { %v537_v19 = vadd.f32 %v533_v16, %v521_v4 }
 0x2dd   : > { %v540_v20 = vmul.f32 0.7978846, %v536_v17  ;;  %v534_v21 = vmul.f32 0.044715, %v530_v18 }
 0x2de   : > { %v541_v22 = vmul.f32 0.7978846, %v537_v19 }
 0x2df   : > { %909 = vtanh.f32 %v540_v20  ;;  %v538_v23 = vadd.f32 %v534_v21, %v522_v11 }
 0x2e0   : > { %911 = vtanh.f32 %v541_v22 }
 0x2e1   : > { %v542_v24 = vmul.f32 0.7978846, %v538_v23 }
 0x2e3   : > { %913 = vtanh.f32 %v542_v24 }
 0x2e5   : > { %v908_v25 = vpop.eup %907 }
 0x2e6   : > { %v547_v26 = vadd.f32 1.0, %v908_v25 }
 0x2e8   : > { %v551_v27 = vmul.f32 0.5, %v547_v26 }
 0x2e9   : > { %v910_v28 = vpop.eup %909 }
 0x2ea   : > { %v912_v29 = vpop.eup %911  ;;  %v555_v30 = vmul.f32 %v551_v27, %v519_v58  ;;  %v548_v31 = vadd.f32 1.0, %v910_v28 }
 0x2eb   : > { %v549_v32 = vadd.f32 1.0, %v912_v29 }
 0x2ec   : > { %v768_v33 = vpack.c.bf16 %v555_v30, %v555_v30  ;;  %v552_v34 = vmul.f32 0.5, %v548_v31 }
 0x2ed   : > { %v914_v35 = vpop.eup %913  ;;  %v553_v36 = vmul.f32 0.5, %v549_v32 }
 0x2ee   : > { %v556_v37 = vmul.f32 %v552_v34, %v520_v2  ;;  %v550_v38 = vadd.f32 1.0, %v914_v35  ;;  %576 = vst.msk [vmem:[%s335_s26] sm:$0xf] %vm575_vm1, %v768_v33 }
 0x2ef   : > { %v557_v39 = vmul.f32 %v553_v36, %v521_v4 }
 0x2f0   : > { %v769_v40 = vpack.c.bf16 %v556_v37, %v556_v37  ;;  %v554_v41 = vmul.f32 0.5, %v550_v38 }
 0x2f1   : > { %v770_v42 = vpack.c.bf16 %v557_v39, %v557_v39 }
 0x2f2   : > { %v558_v43 = vmul.f32 %v554_v41, %v522_v11  ;;  %577 = vst.msk [vmem:[%s335_s26 + $0x4] sm:$0xf] %vm575_vm1, %v769_v40 }
 0x2f3   : > { %578 = vst.msk [vmem:[%s335_s26 + $0x8] sm:$0xf] %vm575_vm1, %v770_v42 }
 0x2f4   : > { %v771_v44 = vpack.c.bf16 %v558_v43, %v558_v43 }
 0x2f6   : > { %579 = vst.msk [vmem:[%s335_s26 + $0xc] sm:$0xf] %vm575_vm1, %v771_v44 }
 0x2f7   : > { %1072 = shalt.err (!%p1069_p11)
}
 0x2f8   : > { %s1073_s3 = scalar_lea.hbm %s1456_s30, 256  ;;  %s1077_s15 = scalar_lea.hbm %s1512_s5, 1024 }
 0x2f9   : > { %p1074_p10 = scmp.ne.s32.totalorder %s1456_s30, %s1073_s3  ;;  %p1078_p3 = scmp.lt.u32.totalorder %s1456_s30, %s1512_s5 }
 0x2fa   : > { %p1079_p9 = scmp.lt.u32.totalorder %s1077_s15, %s1073_s3  ;;  %p1081_p4 = scmp.lt.u32.totalorder %s1073_s3, %s1456_s30 }
 0x2fb   : > { %p1075_p0 = pnand %p1074_p10, %p1552_p6 }
 0x2fc   : > { %p1080_p2 = por %p1079_p9, %p1078_p3 }
 0x2fd   : > { %p1076_p5 = pneg %p1075_p0 }
 0x2fe   : > { %p1082_p12 = por %p1081_p4, %p1080_p2 }
 0x300   : > { %p1083_p13 = pnand %p1082_p12, %p1076_p5 }
 0x302   : > { %1086 = shalt.err (!%p1083_p13)
}
 0x303   : > { %s1159_s12 = smov 64   ;;  %s1160_s6 = smov 4  }
 0x304   : > { %807 = dma.vmem_to_hbm [thread:$0]  (%p1552_p6), %s1458_s18, 256, %s1456_s30, %s581_s21, %s1159_s12, %s1159_s12, %s1160_s6  }
 0x305 PF: > { %s1553_s28 = sld [smem:[#allocation16_spill]]  ;;  %s1554_s24 = sld [smem:[#allocation17_spill]] }
 0x306   : > { %p837_p1 = scmp.ge.s32.totalorder %s1149_s23, 2 }
 0x30b   : > { %s611_s26 = sand.u32 1, %s1553_s28   ;;  %p1555_p8 = scmp.ne.s32.totalorder %s1554_s24, 0 }
 0x30c   : > { %s612_s17 = scalar_lea.sflag [#allocation4], %s611_s26 }
 0x30d   : > { %p827_p7 = pnand %p837_p1, %p1555_p8 }
 0x30f   : > { %1124 = dma.done.wait (!%p827_p7), %s612_s17, 256  }
 0x310   : > { %1126 = vsyncadd (!%p827_p7), %s612_s17, 4294967040  ;;  %s23_s23 = sadd.s32 1, %s1149_s23   ;;  %s1556_s11 = sld [smem:[#allocation19_spill]] }
 0x311   : > { %p20_p11 = scmp.ge.s32.totalorder %s23_s23, 6   ;;  %s1557_s13 = sld [smem:[#allocation18_spill]] }
 0x312   : > { %s1558_s18 = smov %s1133_s19  ;;  %s1559_s19 = smov %s1137_s20 }
 0x313   : > { %s1561_s21 = smov %s1145_s22  ;;  %22 = sbr.rel (!%p20_p11) target bundleno = 11 (0xb), region = 110 }
 0x316   : > { %s1560_s20 = smov %s1556_s11 }
 0x317   : > { %s1562_s22 = smov %s1557_s13 }
 0x31a   :  { %617 = vsyncpa [#allocation3], 1 }
 0x31b   :  { %619 = vsyncpa [#allocation3 + $0x1], 1 }
 0x31c   :  { %620 = vsyncpa [#allocation6], 1 }
 0x31d   :  { %622 = vsyncpa [#allocation6 + $0x1], 1 }
 0x31e   :  { %623 = vsyncpa [#allocation9], 1 }
 0x31f   :  { %624 = vsyncpa [#allocation4], 1 }
 0x320   :  { %626 = vsyncpa [#allocation4 + $0x1], 1 }

// kernel: prithvi_wrapper_forward.12
= control target key start
LH: loop header
LB: loop body
LE: loop exit
PB: predicated region body
PF: predicated region fallthrough
CT: control target
= control target key end

     0   :  { %s2416_s0 = inlined_call_operand.hbm [shape: bf16[128,64], index: 0, kind: input, shape index: {}]   ;;  %s2417_s1 = inlined_call_operand.hbm [shape: bf16[4,64,64], index: 1, kind: input, shape index: {}]   ;;  %s2418_s2 = inlined_call_operand.hbm [shape: f32[4,1,64], index: 2, kind: input, shape index: {}]   ;;  %s2419_s3 = inlined_call_operand.hbm [shape: f32[1,64], index: 3, kind: input, shape index: {}]   ;;  %s2420_s4 = inlined_call_operand.hbm [shape: f32[1,64], index: 4, kind: input, shape index: {}]   ;;  %s2421_s5 = inlined_call_operand.hbm [shape: bf16[4,128,64], index: 5, kind: output, shape index: {}]  }
   0x1   :  { %2433 = sst [smem:[#allocation20_spill]] %s2417_s1 }
   0x2   :  { %2434 = sst [smem:[#allocation21_spill]] %s2419_s3 }
   0x3   :  { %10 = vsyncpa [#allocation3], 0 }
   0x4   :  { %11 = vsyncpa [#allocation6], 0 }
   0x5   :  { %13 = vsyncpa [#allocation6 + $0x1], 0 }
   0x6   :  { %14 = vsyncpa [#allocation9], 0 }
   0x7   :  { %15 = vsyncpa [#allocation4], 0 }
   0x8   :  { %17 = vsyncpa [#allocation4 + $0x1], 0  ;;  %s1763_s18 = smov 0   ;;  %s1765_s19 = smov 0  }
   0x9   :  { %s1767_s20 = smov 0   ;;  %s1769_s21 = smov 0  }
   0xa   :  { %s1771_s22 = smov 0   ;;  %s1773_s23 = smov 0  }
   0xb LB: > { %2435 = sst [smem:[#allocation16_spill]] %s1701_s18  ;;  %s1794_s24 = sadd.s32 4294967295, %s1721_s23   ;;  %s1721_s23 = sphi %s1773_s23, %s23_s23   ;;  %s1717_s22 = sphi %s1771_s22, %s2471_s22   ;;  %s1713_s21 = sphi %s1769_s21, %s2470_s21   ;;  %s1709_s20 = sphi %s1767_s20, %s2469_s20   ;;  %s1705_s19 = sphi %s1765_s19, %s2468_s19   ;;  %s1701_s18 = sphi %s1763_s18, %s2467_s18  }
   0xc   : > { %s1187_s25 = sadd.s32 4294967294, %s1721_s23   ;;  %p81_p0 = scmp.ne.s32.totalorder %s1705_s19, %s1701_s18 }
   0xd   : > { %p2422_p1 = scmp.eq.s32.totalorder %s1794_s24, 0  ;;  %p181_p3 = scmp.eq.s32.totalorder %s1187_s25, 3 }
   0xe   : > { %p1188_p5 = scmp.ge.s32.totalorder %s1721_s23, 1  ;;  %p188_p7 = scmp.lt.s32.totalorder %s1721_s23, 5 }
   0xf   : > { %p1803_p4 = por %p2422_p1, %p81_p0  ;;  %p1808_p6 = por %p181_p3, %p81_p0 }
  0x10   : > { %p1813_p8 = pnand %p1188_p5, %p188_p7  ;;  %s1723_s29 = smov [#allocation8]  }
  0x11   : > { %s2436_s26 = scalar_select %p1803_p4, 1, 0 }
  0x12   : > { %s2437_s27 = scalar_select %p1808_p6, 1, 0 }
  0x13   : > { %s2439_s28 = scalar_select %p1813_p8, 1, 0 }
  0x14   : > { %2438 = sst [smem:[#allocation17_spill]] %s2437_s27  ;;  %s217_s30 = sshll.u32 %s1723_s29, 4  ;;  %s218_s30 = int_to_ptr.vmem [resolvable:$true] %s217_s30 }
  0x15   : > { %p1327_p9 = pneg %p1813_p8  ;;  %s35_s7 = sadd.s32 1, %s1717_s22 }
  0x16   : > { %s68_s8 = sadd.s32 1, %s1709_s20  ;;  %p1827_p11 = scmp.ge.s32.totalorder %s35_s7, 4 }
  0x17   : > { %p1821_p10 = pnand %p1327_p9, %p2422_p1  ;;  %s2442_s3 = sld [smem:[#allocation21_spill]] }
  0x18   : > { %s2441_s9 = scalar_select %p1827_p11, 1, 0 }
  0x19   : > { %s2440_s6 = scalar_select %p1821_p10, 1, 0 }
  0x1a   : > { %p1839_p13 = pneg %p1821_p10 }
  0x1d   : > { %s1487_s12 = scalar_lea.hbm %s2442_s3, 16 }
  0x1e   : > { %p1488_p12 = scmp.ne.s32.totalorder %s2442_s3, %s1487_s12  ;;  %p1494_p5 = scmp.lt.u32.totalorder %s1487_s12, %s2442_s3 }
  0x20   : > { %p1490_p0 = pnand %p1839_p13, %p1488_p12 }
  0x22   : > { %p1491_p3 = pneg %p1490_p0 }
  0x24   : > { %p1496_p7 = pnand %p1494_p5, %p1491_p3 }
  0x26   : > { %1499 = shalt.err (!%p1496_p7)
}
  0x27   : > { %s1500_s25 = scalar_lea.vmem %s218_s30, 16  ;;  %s1507_s29 = scalar_lea.vmem %s218_s30, 32 }
  0x28   : > { %p1501_p9 = scmp.ne.s32.totalorder %s218_s30, %s1500_s25  ;;  %p1508_p6 = scmp.lt.s32.totalorder %s218_s30, %s218_s30 }
  0x29   : > { %p1509_p4 = scmp.lt.s32.totalorder %s1507_s29, %s1500_s25 }
  0x2a   : > { %p1503_p1 = pnand %p1501_p9, %p1839_p13 }
  0x2b   : > { %p1510_p8 = por %p1509_p4, %p1508_p6 }
  0x2c   : > { %p1504_p2 = pneg %p1503_p1 }
  0x2e   : > { %p1511_p11 = pnand %p1510_p8, %p1504_p2 }
  0x30   : > { %1514 = shalt.err (!%p1511_p11)
}
  0x31   : > { %1333 = dma.hbm_to_vmem [thread:$0]  (!%p1821_p10), %s2442_s3, 16, %s218_s30, [#allocation9]  }
  0x32   : > { %p2444_p1 = scmp.ne.s32.totalorder %s2441_s9, 0  ;;  %p75_p2 = scmp.ne.s32.totalorder %s1709_s20, %s1705_s19 }
  0x33   : > { %p76_p4 = scmp.eq.s32.totalorder %s1721_s23, 0  ;;  %p2446_p11 = scmp.eq.s32.totalorder %s1794_s24, 3 }
  0x34   : > { %s2473_s7 = smov (%p2444_p1, %s35_s7), 0  ;;  %p1351_p0 = scmp.lt.s32.totalorder %s1721_s23, 4 }
  0x35   : > { %2445 = sst [smem:[#allocation18_spill]] %s2473_s7  ;;  %s65_s12 = ssub.s32 %s1717_s22, %s2473_s7 }
  0x36   : > { %p66_p6 = scmp.eq.s32.totalorder %s65_s12, 0  ;;  %p77_p8 = por %p76_p4, %p75_p2 }
  0x37   : > { %p1866_p12 = por %p2446_p11, %p75_p2  ;;  %s239_s16 = sand.u32 1, %s1721_s23  }
  0x38   : > { %s1871_s14 = scalar_select %p66_p6, %s1709_s20, %s68_s8  }
  0x39   : > { %s2447_s13 = scalar_select %p1866_p12, 1, 0 }
  0x3a   : > { %2448 = sst [smem:[#allocation19_spill]] %s1871_s14  ;;  %s2425_s17 = sand.u32 1, %s1709_s20  }
  0x3b   : > { %s1193_s30 = sshll.u32 %s2425_s17, 5  ;;  %s1247_s9 = sshll.u32 %s1717_s22, 9 }
  0x3c   : > { %s2449_s1 = sld [smem:[#allocation20_spill]]  ;;  %s243_s11 = scalar_lea.vmem [#allocation5], %s1193_s30 }
  0x3d   : > { %s250_s12 = sshll.u32 %s243_s11, 4  ;;  %p1884_p3 = pnand %p1351_p0, %p77_p8  ;;  %s1888_s12 = int_to_ptr.vmem [resolvable:$true] %s250_s12 }
  0x3e   : > { %s1890_s17 = scalar_lea.sflag [#allocation6], %s239_s16 }
  0x3f   : > { %p2432_p7 = pneg %p1884_p3 }
  0x42   : > { %s1882_s10 = scalar_lea.hbm %s2449_s1, %s1247_s9  ;;  %s1520_s25 = scalar_lea.hbm %s2449_s1, 2048 }
  0x43   : > { %s1515_s3 = scalar_lea.hbm %s1882_s10, 512  ;;  %p1521_p2 = scmp.lt.u32.totalorder %s1882_s10, %s2449_s1 }
  0x44   : > { %p1516_p5 = scmp.ne.s32.totalorder %s1882_s10, %s1515_s3  ;;  %p1522_p4 = scmp.lt.u32.totalorder %s1520_s25, %s1515_s3 }
  0x45   : > { %p1524_p8 = scmp.lt.u32.totalorder %s1515_s3, %s1882_s10 }
  0x46   : > { %p1518_p9 = pnand %p2432_p7, %p1516_p5  ;;  %p1523_p6 = por %p1522_p4, %p1521_p2 }
  0x48   : > { %p1519_p1 = pneg %p1518_p9  ;;  %p1525_p11 = por %p1524_p8, %p1523_p6 }
  0x4a   : > { %p1526_p0 = pnand %p1525_p11, %p1519_p1 }
  0x4c   : > { %1529 = shalt.err (!%p1526_p0)
}
  0x4d   : > { %s1530_s16 = scalar_lea.vmem %s1888_s12, 512  ;;  %s1724_s30 = smov [#allocation5]  }
  0x4e   : > { %p1531_p5 = scmp.ne.s32.totalorder %s1888_s12, %s1530_s16  ;;  %s1535_s9 = sshll.u32 %s1724_s30, 4  ;;  %s1536_s9 = int_to_ptr.vmem [resolvable:$false] %s1535_s9 }
  0x4f   : > { %s1537_s29 = scalar_lea.vmem %s1536_s9, 1024  ;;  %p1538_p10 = scmp.lt.s32.totalorder %s1888_s12, %s1536_s9 }
  0x50   : > { %p1533_p9 = pnand %p1531_p5, %p2432_p7  ;;  %p1539_p2 = scmp.lt.s32.totalorder %s1537_s29, %s1530_s16 }
  0x52   : > { %p1534_p12 = pneg %p1533_p9  ;;  %p1540_p4 = por %p1539_p2, %p1538_p10 }
  0x54   : > { %p1541_p6 = pnand %p1540_p4, %p1534_p12 }
  0x56   : > { %1544 = shalt.err (!%p1541_p6)
}
  0x57   : > { %s1725_s3 = smov 64   ;;  %s1726_s25 = smov 4  }
  0x58   : > { %1340 = dma.hbm_to_vmem [thread:$0]  (!%p1884_p3), %s1882_s10, 512, %s1888_s12, %s1890_s17, %s1725_s3, %s1725_s3, %s1726_s25  }
  0x59   : > { %s1727_s11 = smov [#allocation2]   ;;  %s1728_s7 = smov [#allocation10]  }
  0x5a   : > { %s203_s1 = sshll.u32 %s1727_s11, 4  ;;  %s228_s30 = sshll.u32 %s1728_s7, 4  ;;  %s204_s1 = int_to_ptr.vmem [resolvable:$true] %s203_s1  ;;  %s1918_s30 = int_to_ptr.vmem [resolvable:$true] %s228_s30 }
  0x5b   : > { %s1545_s29 = scalar_lea.hbm %s2416_s0, 1024 }
  0x5c   : > { %p1546_p10 = scmp.ne.s32.totalorder %s2416_s0, %s1545_s29  ;;  %p1552_p8 = scmp.lt.u32.totalorder %s1545_s29, %s2416_s0 }
  0x5e   : > { %p1548_p12 = pnand %p1546_p10, %p1839_p13 }
  0x60   : > { %p1549_p1 = pneg %p1548_p12 }
  0x62   : > { %p1554_p11 = pnand %p1552_p8, %p1549_p1 }
  0x64   : > { %1557 = shalt.err (!%p1554_p11)
}
  0x65   : > { %s1558_s7 = scalar_lea.vmem %s204_s1, 1024  ;;  %p1566_p2 = scmp.lt.s32.totalorder %s204_s1, %s204_s1 }
  0x66   : > { %p1559_p0 = scmp.ne.s32.totalorder %s204_s1, %s1558_s7  ;;  %p1567_p4 = scmp.lt.s32.totalorder %s1558_s7, %s1558_s7 }
  0x68   : > { %p1561_p5 = pnand %p1559_p0, %p1839_p13  ;;  %p1568_p6 = por %p1567_p4, %p1566_p2 }
  0x6a   : > { %p1562_p9 = pneg %p1561_p5 }
  0x6c   : > { %p1569_p7 = pnand %p1568_p6, %p1562_p9 }
  0x6e   : > { %1572 = shalt.err (!%p1569_p7)
}
  0x6f   : > { %p2451_p10 = scmp.ne.s32.totalorder %s2440_s6, 0  ;;  %s1573_s11 = scalar_lea.hbm %s2420_s4, 16 }
  0x70   : > { %p1574_p12 = scmp.ne.s32.totalorder %s2420_s4, %s1573_s11  ;;  %p1580_p7 = scmp.lt.u32.totalorder %s1573_s11, %s2420_s4 }
  0x71   : > { %1330 = dma.hbm_to_vmem [thread:$0]  (!%p2451_p10), %s2416_s0, 1024, %s204_s1, [#allocation3], %s1725_s3, %s1725_s3, %s1726_s25  }
  0x72   : > { %p1576_p1 = pnand %p1574_p12, %p1839_p13 }
  0x74   : > { %p1577_p8 = pneg %p1576_p1 }
  0x76   : > { %p1582_p11 = pnand %p1580_p7, %p1577_p8 }
  0x78   : > { %1585 = shalt.err (!%p1582_p11)
}
  0x79   : > { %s1586_s1 = scalar_lea.vmem %s1918_s30, 16  ;;  %s1593_s3 = scalar_lea.vmem %s1918_s30, 32 }
  0x7a   : > { %p1587_p0 = scmp.ne.s32.totalorder %s1918_s30, %s1586_s1  ;;  %p1594_p2 = scmp.lt.s32.totalorder %s1918_s30, %s1918_s30 }
  0x7b   : > { %p1595_p4 = scmp.lt.s32.totalorder %s1593_s3, %s1586_s1 }
  0x7c   : > { %p1589_p5 = pnand %p1587_p0, %p1839_p13 }
  0x7d   : > { %p1596_p6 = por %p1595_p4, %p1594_p2 }
  0x7e   : > { %p1590_p9 = pneg %p1589_p5 }
  0x80   : > { %p1597_p12 = pnand %p1596_p6, %p1590_p9 }
  0x82   : > { %1600 = shalt.err (!%p1597_p12)
}
  0x83   : > { %1336 = dma.hbm_to_vmem [thread:$0]  (!%p2451_p10), %s2420_s4, 16, %s1918_s30, [#allocation9]  }
  0x84   : > { %s1196_s15 = sshll.u32 %s1717_s22, 4  ;;  %s2452_s12 = sand.u32 1, %s1709_s20  }
  0x85   : > { %s1966_s18 = scalar_lea.hbm %s2418_s2, %s1196_s15  ;;  %s263_s6 = scalar_lea.vmem [#allocation7], %s2452_s12 }
  0x86   : > { %s270_s11 = sshll.u32 %s263_s6, 4  ;;  %s1601_s16 = scalar_lea.hbm %s1966_s18, 16  ;;  %s271_s11 = int_to_ptr.vmem [resolvable:$true] %s270_s11 }
  0x87   : > { %p1602_p13 = scmp.ne.s32.totalorder %s1966_s18, %s1601_s16  ;;  %p2453_p1 = pneg %p1884_p3 }
  0x88   : > { %s1606_s29 = scalar_lea.hbm %s2418_s2, 64  ;;  %p1607_p7 = scmp.lt.u32.totalorder %s1966_s18, %s2418_s2 }
  0x89   : > { %p1604_p8 = pnand %p1602_p13, %p2453_p1  ;;  %p1608_p11 = scmp.lt.u32.totalorder %s1606_s29, %s1601_s16 }
  0x8a   : > { %p1610_p5 = scmp.lt.u32.totalorder %s1601_s16, %s1966_s18 }
  0x8b   : > { %p1605_p10 = pneg %p1604_p8  ;;  %p1609_p0 = por %p1608_p11, %p1607_p7 }
  0x8d   : > { %p1611_p9 = por %p1610_p5, %p1609_p0 }
  0x8f   : > { %p1612_p2 = pnand %p1611_p9, %p1605_p10 }
  0x91   : > { %1615 = shalt.err (!%p1612_p2)
}
  0x92   : > { %s1616_s3 = scalar_lea.vmem %s271_s11, 16  ;;  %p2454_p6 = pmov %p2453_p1 }
  0x93   : > { %p1617_p4 = scmp.ne.s32.totalorder %s271_s11, %s1616_s3  ;;  %s1729_s25 = smov [#allocation7]  }
  0x94   : > { %s1621_s7 = sshll.u32 %s1729_s25, 4  ;;  %s1622_s7 = int_to_ptr.vmem [resolvable:$false] %s1621_s7 }
  0x95   : > { %p1619_p12 = pnand %p1617_p4, %p2454_p6  ;;  %s1623_s15 = scalar_lea.vmem %s1622_s7, 32 }
  0x96   : > { %p1624_p1 = scmp.lt.s32.totalorder %s271_s11, %s1622_s7  ;;  %p1625_p8 = scmp.lt.s32.totalorder %s1623_s15, %s1616_s3 }
  0x97   : > { %p1620_p13 = pneg %p1619_p12 }
  0x98   : > { %p1626_p7 = por %p1625_p8, %p1624_p1 }
  0x9a   : > { %p1627_p11 = pnand %p1626_p7, %p1620_p13 }
  0x9c   : > { %1630 = shalt.err (!%p1627_p11)
}
  0x9d   : > { %1343 = dma.hbm_to_vmem [thread:$0]  (!%p1884_p3), %s1966_s18, 16, %s271_s11, %s1890_s17  }
  0x9e   : > { %p2455_p10 = scmp.ne.s32.totalorder %s2439_s28, 0 }
  0x9f   : > { %p2456_p0 = scmp.eq.s32.totalorder (!%p2455_p10), %s1794_s24, 0 }
  0xa0   : > { %279 = sbr.rel (%p2455_p10) target bundleno = 821 (0x335), region = 40 }
  0xa7   : > { %1684 = dma.done.wait (%p2456_p0), [#allocation3], 1024   ;;  %p2457_p5 = pmov %p2456_p0 }
  0xa8   : > { %s285_s27 = sand.u32 1, %s1794_s24   ;;  %s1998_s14 = sand.u32 1, %s1705_s19  }
  0xa9   : > { %1686 = vsyncadd (%p2457_p5), [#allocation3], 4294966272  ;;  %s1199_s8 = sshll.u32 %s1998_s14, 5  ;;  %s286_s12 = scalar_lea.sflag [#allocation6], %s285_s27 }
  0xaa   : > { %s289_s6 = scalar_lea.vmem [#allocation5], %s1199_s8  ;;  %p2458_p3 = scmp.ne.s32.totalorder %s2436_s26, 0 }
  0xac   : > { %1688 = dma.done.wait (%p2458_p3), %s286_s12, 528  }
  0xad   : > { %1690 = vsyncadd (%p2458_p3), %s286_s12, 4294966768  ;;  %s297_s28 = scalar_lea.vmem [#allocation7], %s1998_s14  ;;  %p2459_p9 = pmov %p2456_p0 }
  0xae   : > { %p2460_p2 = pmov %p2456_p0 }
  0xaf   : > { %1692 = dma.done.wait (%p2459_p9), [#allocation9], 32  }
  0xb0   : > { %1694 = vsyncadd (%p2460_p2), [#allocation9], 4294967264  ;;  %v1411_v0 = vld [vmem:[%s289_s6] sm:$0xff]   ;;  %v1412_v1 = vld [vmem:[%s289_s6 + $0x8] sm:$0xff]   ;;  %vm434_vm0 = vcmask 523264   ;;  %vm1019_vm1 = vcmask 519168  }
  0xb1   : > { %1277 = vmatprep.subr.bf16.mxu0 %v1411_v0  ;;  %1301 = vmatprep.subr.bf16.mxu1 %v1411_v0  ;;  %v1413_v2 = vld [vmem:[%s289_s6 + $0x10] sm:$0xff]   ;;  %v1415_v3 = vld [vmem:[#allocation2] sm:$0xff]   ;;  %v1414_v5 = vld [vmem:[%s289_s6 + $0x18] sm:$0xff]   ;;  %s1202_s24 = sshll.u32 %s1998_s14, 6  ;;  %s1264_s17 = sshll.u32 %s1713_s21, 10 }
  0xb2   : > { %1278 = vmatpush3.bf16.msra.mxu0 %v1411_v0  ;;  %1305 = vmatpush3.bf16.msra.mxu1 %v1411_v0  ;;  %v1416_v4 = vld [vmem:[#allocation2 + $0x20] sm:$0xff]   ;;  %v1417_v6 = vld [vmem:[#allocation2 + $0x8] sm:$0xff]   ;;  %v1419_v8 = vld [vmem:[#allocation2 + $0x10] sm:$0xff]   ;;  %s2295_s26 = scalar_lea.vmem [#allocation11], %s1202_s24  ;;  %s2364_s30 = scalar_lea.hbm %s2421_s5, %s1264_s17 }
  0xb3   : > { %1279 = vmatprep.subr.bf16.mxu0 %v1412_v1  ;;  %1302 = vmatprep.subr.bf16.mxu1 %v1412_v1  ;;  %v1418_v7 = vld [vmem:[#allocation2 + $0x28] sm:$0xff]   ;;  %v1421_v9 = vld [vmem:[#allocation2 + $0x30] sm:$0xff]   ;;  %v1420_v10 = vld [vmem:[#allocation2 + $0x18] sm:$0xff]   ;;  %s1052_s18 = sshll.u32 %s2295_s26, 4  ;;  %s1037_s9 = scalar_lea.sflag [#allocation4], %s1998_s14  ;;  %s2366_s18 = int_to_ptr.vmem [resolvable:$true] %s1052_s18 }
  0xb4   : > { %1285 = vmatprep.mubr.msk.bf16.mxu0 %vm434_vm0, %v1415_v3  ;;  %1293 = vmatprep.mubr.msk.bf16.mxu1 %vm434_vm0, %v1416_v4  ;;  %v1422_v11 = vld [vmem:[#allocation2 + $0x38] sm:$0xff]   ;;  %v1203_v12 = vld [vmem:[%s297_s28] ss:$0 sm:$0xff]  ;;  %s1631_s21 = scalar_lea.vmem %s2366_s18, 1024  ;;  %p2461_p6 = scmp.ne.s32.totalorder %s2447_s13, 0 }
  0xb5   : > { %p1632_p4 = scmp.ne.s32.totalorder %s2366_s18, %s1631_s21  ;;  %s1730_s29 = smov [#allocation11]  }
  0xb6   : > { %1280 = vmatpush3.bf16.msra.mxu0 %v1412_v1  ;;  %1306 = vmatpush3.bf16.msra.mxu1 %v1412_v1  ;;  %s1635_s10 = sshll.u32 %s1730_s29, 4  ;;  %s1636_s10 = int_to_ptr.vmem [resolvable:$false] %s1635_s10 }
  0xb7   : > { %1281 = vmatprep.subr.bf16.mxu0 %v1413_v2  ;;  %1303 = vmatprep.subr.bf16.mxu1 %v1413_v2  ;;  %p1633_p12 = pnand %p1632_p4, %p2461_p6  ;;  %s1637_s1 = scalar_lea.vmem %s1636_s10, 2048 }
  0xb8   : > { %p1638_p1 = scmp.lt.s32.totalorder %s2366_s18, %s1636_s10  ;;  %p1639_p8 = scmp.lt.s32.totalorder %s1637_s1, %s1631_s21 }
  0xb9   : > { %p1634_p13 = pneg %p1633_p12 }
  0xba   : > { %1282 = vmatpush3.bf16.msra.mxu0 %v1413_v2  ;;  %1307 = vmatpush3.bf16.msra.mxu1 %v1413_v2  ;;  %p1640_p7 = por %p1639_p8, %p1638_p1 }
  0xbb   : > { %1283 = vmatprep.subr.bf16.mxu0 %v1414_v5  ;;  %1304 = vmatprep.subr.bf16.mxu1 %v1414_v5 }
  0xbc   : > { %p1641_p11 = pnand %p1640_p7, %p1634_p13 }
  0xbe   : > { %1284 = vmatpush3.bf16.msra.mxu0 %v1414_v5  ;;  %1308 = vmatpush3.bf16.msra.mxu1 %v1414_v5 }
  0xc1   : > { %1286 = vmatmul.mubr.msk.bf16.vlgmr.msra.gmra.mrb[0].mxu0 %vm434_vm0, %v1417_v6  ;;  %1294 = vmatmul.mubr.msk.bf16.vlgmr.msra.gmra.mrb[0].mxu1 %vm434_vm0, %v1418_v7 }
  0xc2   : > { %1289 = vmatprep.mubr.msk.bf16.mxu0 %vm434_vm0, %v1419_v8  ;;  %1297 = vmatprep.mubr.msk.bf16.mxu1 %vm434_vm0, %v1421_v9 }
  0xc9   : > { %1290 = vmatmul.mubr.msk.bf16.gmra.mrb[4].mxu0 %vm434_vm0, %v1420_v10  ;;  %1298 = vmatmul.mubr.msk.bf16.gmra.mrb[4].mxu1 %vm434_vm0, %v1422_v11 }
 0x194   : > { %v1287_v13 = vpop.f32.mrb[0].mxu0  ;;  %v1295_v14 = vpop.f32.mrb[0].mxu1 }
 0x195   : > { %v2020_v15 = vadd.f32 %v1287_v13, %v1203_v12  ;;  %v2022_v16 = vadd.f32 %v1295_v14, %v1203_v12  ;;  %v493_v17 = vpop.f32.mrb[1].mxu0  ;;  %v525_v18 = vpop.f32.mrb[1].mxu1 }
 0x196   : > { %v1288_v19 = vpop.f32.mrb[2].mxu0  ;;  %v1296_v20 = vpop.f32.mrb[2].mxu1  ;;  %v2024_v21 = vadd.f32 %v1203_v12, %v493_v17  ;;  %v2032_v27 = vadd.f32 %v1203_v12, %v525_v18 }
 0x197   : > { %v2026_v22 = vadd.f32 %v1288_v19, %v1203_v12  ;;  %v496_v23 = vpop.f32.mrb[3].mxu0  ;;  %v528_v24 = vpop.f32.mrb[3].mxu1  ;;  %v588_v25 = vsel %vm434_vm0, %v2022_v16, 0.0  ;;  %v564_v26 = vsel %vm434_vm0, %v2020_v15, 0.0  ;;  %v2034_v28 = vadd.f32 %v1296_v20, %v1203_v12 }
 0x198   : > { %589 = vadd.xlane.f32.xlu0 %v588_v25  ;;  %565 = vadd.xlane.f32.xlu1 %v564_v26  ;;  %v558_v30 = vsel %vm434_vm0, %v2024_v21, 0.0  ;;  %v2040_v37 = vadd.f32 %v1203_v12, %v496_v23  ;;  %v2042_v38 = vadd.f32 %v1203_v12, %v528_v24  ;;  %v582_v40 = vsel %vm434_vm0, %v2032_v27, 0.0 }
 0x199   : > { %v567_v29 = vsel %vm434_vm0, %v2026_v22, 0.0  ;;  %v591_v39 = vsel %vm434_vm0, %v2034_v28, 0.0 }
 0x19a   : > { %v585_v45 = vsel %vm434_vm0, %v2042_v38, 0.0  ;;  %v561_v46 = vsel %vm434_vm0, %v2040_v37, 0.0 }
 0x19c   : > { %568 = vadd.xlane.f32.xlu1 %v567_v29  ;;  %559 = vadd.xlane.f32.xlu0 %v558_v30  ;;  %v1291_v31 = vpop.f32.mrb[4].mxu0  ;;  %v1299_v32 = vpop.f32.mrb[4].mxu1 }
 0x19d   : > { %v509_v33 = vpop.f32.mrb[5].mxu0  ;;  %v541_v34 = vpop.f32.mrb[5].mxu1  ;;  %v2048_v43 = vadd.f32 %v1291_v31, %v1203_v12  ;;  %v2076_v57 = vadd.f32 %v1299_v32, %v1203_v12 }
 0x19e   : > { %v1292_v35 = vpop.f32.mrb[6].mxu0  ;;  %v1300_v36 = vpop.f32.mrb[6].mxu1  ;;  %v2060_v49 = vadd.f32 %v1203_v12, %v509_v33  ;;  %v2064_v51 = vadd.f32 %v1203_v12, %v541_v34 }
 0x19f   : > { %v512_v41 = vpop.f32.mrb[7].mxu0  ;;  %v544_v42 = vpop.f32.mrb[7].mxu1  ;;  %v2050_v44 = vadd.f32 %v1292_v35, %v1203_v12  ;;  %v576_v48 = vsel %vm434_vm0, %v2048_v43, 0.0  ;;  %v2078_v58 = vadd.f32 %v1300_v36, %v1203_v12  ;;  %v600_v60 = vsel %vm434_vm0, %v2076_v57, 0.0 }
 0x1a0   : > { %592 = vadd.xlane.f32.xlu1 %v591_v39  ;;  %583 = vadd.xlane.f32.xlu0 %v582_v40  ;;  %v2062_v50 = vadd.f32 %v1203_v12, %v512_v41  ;;  %v2066_v52 = vadd.f32 %v1203_v12, %v544_v42  ;;  %v570_v54 = vsel %vm434_vm0, %v2060_v49, 0.0  ;;  %v594_v56 = vsel %vm434_vm0, %v2064_v51, 0.0 }
 0x1a1   : > { %v579_v47 = vsel %vm434_vm0, %v2050_v44, 0.0  ;;  %v603_v59 = vsel %vm434_vm0, %v2078_v58, 0.0 }
 0x1a2   : > { %v573_v53 = vsel %vm434_vm0, %v2062_v50, 0.0  ;;  %v597_v55 = vsel %vm434_vm0, %v2066_v52, 0.0 }
 0x1a4   : > { %586 = vadd.xlane.f32.xlu1 %v585_v45  ;;  %562 = vadd.xlane.f32.xlu0 %v561_v46 }
 0x1a8   : > { %580 = vadd.xlane.f32.xlu1 %v579_v47  ;;  %577 = vadd.xlane.f32.xlu0 %v576_v48 }
 0x1ac   : > { %574 = vadd.xlane.f32.xlu1 %v573_v53  ;;  %571 = vadd.xlane.f32.xlu0 %v570_v54 }
 0x1b0   : > { %598 = vadd.xlane.f32.xlu1 %v597_v55  ;;  %595 = vadd.xlane.f32.xlu0 %v594_v56 }
 0x1b4   : > { %604 = vadd.xlane.f32.xlu1 %v603_v59  ;;  %601 = vadd.xlane.f32.xlu0 %v600_v60 }
 0x225   : > { %v590_v61 = vpop.xlane.xlu0 %589  ;;  %v566_v62 = vpop.xlane.xlu1 %565 }
 0x226   : > { %v617_v63 = vmul.f32 0.015625, %v590_v61  ;;  %v609_v0 = vmul.f32 0.015625, %v566_v62 }
 0x228   : > { %v2085_v1 = vsub.f32 %v2022_v16, %v617_v63  ;;  %v2088_v2 = vsub.f32 %v2020_v15, %v609_v0 }
 0x229   : > { %v569_v3 = vpop.xlane.xlu1 %568  ;;  %v560_v4 = vpop.xlane.xlu0 %559 }
 0x22a   : > { %v610_v5 = vmul.f32 0.015625, %v569_v3  ;;  %v607_v6 = vmul.f32 0.015625, %v560_v4  ;;  %v641_v7 = vmul.f32 %v2088_v2, %v2088_v2  ;;  %v649_v11 = vmul.f32 %v2085_v1, %v2085_v1 }
 0x22c   : > { %v2093_v8 = vsub.f32 %v2026_v22, %v610_v5  ;;  %v2096_v9 = vsub.f32 %v2024_v21, %v607_v6  ;;  %v661_v10 = vsel %vm434_vm0, %v641_v7, 0.0  ;;  %v685_v21 = vsel %vm434_vm0, %v649_v11, 0.0 }
 0x22d   : > { %v593_v12 = vpop.xlane.xlu1 %592  ;;  %662 = vadd.xlane.f32.xlu0 %v661_v10  ;;  %v584_v13 = vpop.xlane.xlu0 %583 }
 0x22e   : > { %v618_v14 = vmul.f32 0.015625, %v593_v12  ;;  %v615_v15 = vmul.f32 0.015625, %v584_v13  ;;  %v642_v16 = vmul.f32 %v2093_v8, %v2093_v8  ;;  %v639_v17 = vmul.f32 %v2096_v9, %v2096_v9 }
 0x230   : > { %v2106_v18 = vsub.f32 %v2034_v28, %v618_v14  ;;  %v2109_v19 = vsub.f32 %v2032_v27, %v615_v15  ;;  %v664_v20 = vsel %vm434_vm0, %v642_v16, 0.0  ;;  %v655_v29 = vsel %vm434_vm0, %v639_v17, 0.0 }
 0x231   : > { %v587_v22 = vpop.xlane.xlu1 %586  ;;  %665 = vadd.xlane.f32.xlu1 %v664_v20  ;;  %686 = vadd.xlane.f32.xlu0 %v685_v21  ;;  %v563_v23 = vpop.xlane.xlu0 %562 }
 0x232   : > { %v616_v24 = vmul.f32 0.015625, %v587_v22  ;;  %v608_v25 = vmul.f32 0.015625, %v563_v23  ;;  %v650_v26 = vmul.f32 %v2106_v18, %v2106_v18  ;;  %v647_v31 = vmul.f32 %v2109_v19, %v2109_v19 }
 0x234   : > { %v2117_v28 = vsub.f32 %v2042_v38, %v616_v24  ;;  %v2120_v27 = vsub.f32 %v2040_v37, %v608_v25  ;;  %v688_v30 = vsel %vm434_vm0, %v650_v26, 0.0  ;;  %v679_v40 = vsel %vm434_vm0, %v647_v31, 0.0 }
 0x235   : > { %v581_v32 = vpop.xlane.xlu1 %580  ;;  %689 = vadd.xlane.f32.xlu1 %v688_v30  ;;  %656 = vadd.xlane.f32.xlu0 %v655_v29  ;;  %v578_v33 = vpop.xlane.xlu0 %577 }
 0x236   : > { %v614_v34 = vmul.f32 0.015625, %v581_v32  ;;  %v613_v35 = vmul.f32 0.015625, %v578_v33  ;;  %v640_v36 = vmul.f32 %v2120_v27, %v2120_v27  ;;  %v648_v38 = vmul.f32 %v2117_v28, %v2117_v28 }
 0x238   : > { %v2130_v37 = vsub.f32 %v2050_v44, %v614_v34  ;;  %v2133_v39 = vsub.f32 %v2048_v43, %v613_v35  ;;  %v658_v41 = vsel %vm434_vm0, %v640_v36, 0.0  ;;  %v682_v53 = vsel %vm434_vm0, %v648_v38, 0.0 }
 0x239   : > { %v575_v42 = vpop.xlane.xlu1 %574  ;;  %680 = vadd.xlane.f32.xlu0 %v679_v40  ;;  %659 = vadd.xlane.f32.xlu1 %v658_v41  ;;  %v572_v45 = vpop.xlane.xlu0 %571 }
 0x23a   : > { %v612_v46 = vmul.f32 0.015625, %v575_v42  ;;  %v611_v47 = vmul.f32 0.015625, %v572_v45  ;;  %v645_v48 = vmul.f32 %v2133_v39, %v2133_v39  ;;  %v646_v55 = vmul.f32 %v2130_v37, %v2130_v37  ;;  %v2180_v45 = vld [vmem:[#allocation8] ss:$0 sm:$0xff] }
 0x23c   : > { %v2141_v44 = vsub.f32 %v2062_v50, %v612_v46  ;;  %v2144_v43 = vsub.f32 %v2060_v49, %v611_v47  ;;  %v673_v54 = vsel %vm434_vm0, %v645_v48, 0.0  ;;  %v676_v0 = vsel %vm434_vm0, %v646_v55, 0.0  ;;  %v2183_v55 = vld [vmem:[#allocation10] ss:$0 sm:$0xff] }
 0x23d   : > { %v599_v56 = vpop.xlane.xlu1 %598  ;;  %683 = vadd.xlane.f32.xlu1 %v682_v53  ;;  %674 = vadd.xlane.f32.xlu0 %v673_v54  ;;  %v596_v59 = vpop.xlane.xlu0 %595 }
 0x23e   : > { %v620_v60 = vmul.f32 0.015625, %v599_v56  ;;  %v619_v61 = vmul.f32 0.015625, %v596_v59  ;;  %v643_v62 = vmul.f32 %v2144_v43, %v2144_v43  ;;  %v644_v50 = vmul.f32 %v2141_v44, %v2141_v44 }
 0x240   : > { %v2154_v49 = vsub.f32 %v2066_v52, %v620_v60  ;;  %v2157_v63 = vsub.f32 %v2064_v51, %v619_v61  ;;  %v667_v3 = vsel %vm434_vm0, %v643_v62, 0.0  ;;  %v670_v11 = vsel %vm434_vm0, %v644_v50, 0.0 }
 0x241   : > { %v605_v4 = vpop.xlane.xlu1 %604  ;;  %677 = vadd.xlane.f32.xlu1 %v676_v0  ;;  %668 = vadd.xlane.f32.xlu0 %v667_v3  ;;  %v602_v5 = vpop.xlane.xlu0 %601 }
 0x242   : > { %v622_v6 = vmul.f32 0.015625, %v605_v4  ;;  %v621_v7 = vmul.f32 0.015625, %v602_v5  ;;  %v651_v10 = vmul.f32 %v2157_v63, %v2157_v63  ;;  %v652_v13 = vmul.f32 %v2154_v49, %v2154_v49 }
 0x244   : > { %v2165_v52 = vsub.f32 %v2078_v58, %v622_v6  ;;  %v2168_v51 = vsub.f32 %v2076_v57, %v621_v7  ;;  %v691_v12 = vsel %vm434_vm0, %v651_v10, 0.0  ;;  %v694_v15 = vsel %vm434_vm0, %v652_v13, 0.0 }
 0x245   : > { %671 = vadd.xlane.f32.xlu1 %v670_v11  ;;  %692 = vadd.xlane.f32.xlu0 %v691_v12 }
 0x246   : > { %v653_v14 = vmul.f32 %v2168_v51, %v2168_v51  ;;  %v654_v58 = vmul.f32 %v2165_v52, %v2165_v52 }
 0x248   : > { %v697_v16 = vsel %vm434_vm0, %v653_v14, 0.0  ;;  %v700_v57 = vsel %vm434_vm0, %v654_v58, 0.0 }
 0x249   : > { %695 = vadd.xlane.f32.xlu1 %v694_v15  ;;  %698 = vadd.xlane.f32.xlu0 %v697_v16 }
 0x24d   : > { %701 = vadd.xlane.f32.xlu1 %v700_v57 }
 0x2ba   : > { %v663_v17 = vpop.xlane.xlu0 %662 }
 0x2bb   : > { %v705_v20 = vmul.f32 0.015625, %v663_v17 }
 0x2bd   : > { %v721_v21 = vadd.f32 1e-06, %v705_v20 }
 0x2be   : > { %v666_v22 = vpop.xlane.xlu1 %665  ;;  %v687_v23 = vpop.xlane.xlu0 %686 }
 0x2bf   : > { %1423 = vrsqrt.f32 %v721_v21  ;;  %v706_v24 = vmul.f32 0.015625, %v666_v22  ;;  %v713_v25 = vmul.f32 0.015625, %v687_v23 }
 0x2c1   : > { %v722_v26 = vadd.f32 1e-06, %v706_v24  ;;  %v729_v29 = vadd.f32 1e-06, %v713_v25 }
 0x2c2   : > { %v690_v30 = vpop.xlane.xlu1 %689  ;;  %v657_v31 = vpop.xlane.xlu0 %656 }
 0x2c3   : > { %1425 = vrsqrt.f32 %v722_v26  ;;  %v714_v32 = vmul.f32 0.015625, %v690_v30  ;;  %v703_v33 = vmul.f32 0.015625, %v657_v31 }
 0x2c4   : > { %1427 = vrsqrt.f32 %v729_v29 }
 0x2c5   : > { %v730_v34 = vadd.f32 1e-06, %v714_v32  ;;  %v719_v35 = vadd.f32 1e-06, %v703_v33 }
 0x2c6   : > { %v660_v36 = vpop.xlane.xlu1 %659  ;;  %v681_v38 = vpop.xlane.xlu0 %680 }
 0x2c7   : > { %1429 = vrsqrt.f32 %v730_v34  ;;  %v704_v40 = vmul.f32 0.015625, %v660_v36  ;;  %v711_v41 = vmul.f32 0.015625, %v681_v38 }
 0x2c8   : > { %1431 = vrsqrt.f32 %v719_v35 }
 0x2c9   : > { %v1424_v42 = vpop.eup %1423  ;;  %v720_v46 = vadd.f32 1e-06, %v704_v40  ;;  %v727_v47 = vadd.f32 1e-06, %v711_v41 }
 0x2ca   : > { %v753_v48 = vmul.f32 %v1424_v42, %v2088_v2  ;;  %v684_v53 = vpop.xlane.xlu1 %683  ;;  %v675_v54 = vpop.xlane.xlu0 %674 }
 0x2cb   : > { %1433 = vrsqrt.f32 %v720_v46  ;;  %v712_v56 = vmul.f32 0.015625, %v684_v53  ;;  %v709_v59 = vmul.f32 0.015625, %v675_v54 }
 0x2cc   : > { %v775_v60 = vmul.f32 %v2180_v45, %v753_v48  ;;  %1435 = vrsqrt.f32 %v727_v47 }
 0x2cd   : > { %v1426_v61 = vpop.eup %1425  ;;  %v728_v62 = vadd.f32 1e-06, %v712_v56  ;;  %v725_v50 = vadd.f32 1e-06, %v709_v59 }
 0x2ce   : > { %v1428_v0 = vpop.eup %1427  ;;  %v2187_v3 = vadd.f32 %v2183_v55, %v775_v60  ;;  %v754_v4 = vmul.f32 %v1426_v61, %v2093_v8  ;;  %v678_v2 = vpop.xlane.xlu1 %677 }
 0x2cf   : > { %v669_v5 = vpop.xlane.xlu0 %668  ;;  %v761_v6 = vmul.f32 %v1428_v0, %v2085_v1  ;;  %1437 = vrsqrt.f32 %v728_v62  ;;  %v710_v7 = vmul.f32 0.015625, %v678_v2 }
 0x2d0   : > { %v707_v10 = vmul.f32 0.015625, %v669_v5  ;;  %v813_v11 = vmul.f32 %v2187_v3, %v2187_v3  ;;  %v776_v12 = vmul.f32 %v2180_v45, %v754_v4  ;;  %1439 = vrsqrt.f32 %v725_v50 }
 0x2d1   : > { %v1430_v13 = vpop.eup %1429  ;;  %v783_v14 = vmul.f32 %v2180_v45, %v761_v6  ;;  %v726_v15 = vadd.f32 1e-06, %v710_v7 }
 0x2d2   : > { %v723_v16 = vadd.f32 1e-06, %v707_v10  ;;  %v1432_v58 = vpop.eup %1431  ;;  %v829_v8 = vmul.f32 %v813_v11, %v2187_v3  ;;  %v2197_v57 = vadd.f32 %v2183_v55, %v776_v12  ;;  %v762_v1 = vmul.f32 %v1430_v13, %v2106_v18  ;;  %v672_v17 = vpop.xlane.xlu1 %671 }
 0x2d3   : > { %v693_v20 = vpop.xlane.xlu0 %692  ;;  %v2201_v21 = vadd.f32 %v2183_v55, %v783_v14  ;;  %v751_v22 = vmul.f32 %v1432_v58, %v2096_v9  ;;  %1441 = vrsqrt.f32 %v726_v15  ;;  %v708_v23 = vmul.f32 0.015625, %v672_v17 }
 0x2d4   : > { %v845_v24 = vmul.f32 0.044715, %v829_v8  ;;  %v814_v25 = vmul.f32 %v2197_v57, %v2197_v57  ;;  %v784_v26 = vmul.f32 %v2180_v45, %v762_v1  ;;  %1443 = vrsqrt.f32 %v723_v16 }
 0x2d5   : > { %v1434_v29 = vpop.eup %1433  ;;  %v821_v18 = vmul.f32 %v2201_v21, %v2201_v21  ;;  %v773_v30 = vmul.f32 %v2180_v45, %v751_v22  ;;  %v724_v31 = vadd.f32 1e-06, %v708_v23  ;;  %v715_v32 = vmul.f32 0.015625, %v693_v20 }
 0x2d6   : > { %v1436_v33 = vpop.eup %1435  ;;  %v861_v9 = vadd.f32 %v845_v24, %v2187_v3  ;;  %v830_v34 = vmul.f32 %v814_v25, %v2197_v57  ;;  %v2213_v35 = vadd.f32 %v2183_v55, %v784_v26  ;;  %v752_v36 = vmul.f32 %v1434_v29, %v2120_v27 }
 0x2d7   : > { %v837_v38 = vmul.f32 %v821_v18, %v2201_v21  ;;  %v2218_v40 = vadd.f32 %v2183_v55, %v773_v30  ;;  %v759_v41 = vmul.f32 %v1436_v33, %v2109_v19  ;;  %1445 = vrsqrt.f32 %v724_v31 }
 0x2d8   : > { %v877_v42 = vmul.f32 0.7978846, %v861_v9  ;;  %v846_v46 = vmul.f32 0.044715, %v830_v34  ;;  %v822_v47 = vmul.f32 %v2213_v35, %v2213_v35  ;;  %v774_v48 = vmul.f32 %v2180_v45, %v752_v36 }
 0x2d9   : > { %v1438_v53 = vpop.eup %1437  ;;  %v853_v54 = vmul.f32 0.044715, %v837_v38  ;;  %v811_v27 = vmul.f32 %v2218_v40, %v2218_v40  ;;  %v781_v56 = vmul.f32 %v2180_v45, %v759_v41  ;;  %v2227_v59 = vadd.f32 1e-06, %v715_v32 }
 0x2da   : > { %v1440_v60 = vpop.eup %1439  ;;  %1447 = vtanh.f32 %v877_v42  ;;  %v862_v19 = vadd.f32 %v846_v46, %v2197_v57  ;;  %v838_v61 = vmul.f32 %v822_v47, %v2213_v35  ;;  %v2232_v62 = vadd.f32 %v2183_v55, %v774_v48 }
 0x2db   : > { %v869_v50 = vadd.f32 %v853_v54, %v2201_v21  ;;  %v827_v0 = vmul.f32 %v811_v27, %v2218_v40  ;;  %v2237_v4 = vadd.f32 %v2183_v55, %v781_v56  ;;  %v760_v2 = vmul.f32 %v1438_v53, %v2117_v28 }
 0x2dc   : > { %v878_v5 = vmul.f32 0.7978846, %v862_v19  ;;  %v854_v6 = vmul.f32 0.044715, %v838_v61  ;;  %v812_v7 = vmul.f32 %v2232_v62, %v2232_v62  ;;  %v757_v10 = vmul.f32 %v1440_v60, %v2133_v39 }
 0x2dd   : > { %v1442_v11 = vpop.eup %1441  ;;  %v885_v12 = vmul.f32 0.7978846, %v869_v50  ;;  %v843_v13 = vmul.f32 0.044715, %v827_v0  ;;  %v819_v14 = vmul.f32 %v2237_v4, %v2237_v4  ;;  %v782_v15 = vmul.f32 %v2180_v45, %v760_v2 }
 0x2de   : > { %v1444_v16 = vpop.eup %1443  ;;  %1449 = vtanh.f32 %v878_v5  ;;  %v870_v58 = vadd.f32 %v854_v6, %v2213_v35  ;;  %v828_v28 = vmul.f32 %v812_v7, %v2232_v62  ;;  %v779_v8 = vmul.f32 %v2180_v45, %v757_v10 }
 0x2df   : > { %1451 = vtanh.f32 %v885_v12  ;;  %v859_v1 = vadd.f32 %v843_v13, %v2218_v40  ;;  %v835_v39 = vmul.f32 %v819_v14, %v2237_v4  ;;  %v2252_v17 = vadd.f32 %v2183_v55, %v782_v15 }
 0x2e0   : > { %v886_v20 = vmul.f32 0.7978846, %v870_v58  ;;  %v844_v22 = vmul.f32 0.044715, %v828_v28  ;;  %v2255_v23 = vadd.f32 %v2183_v55, %v779_v8  ;;  %v758_v24 = vmul.f32 %v1442_v11, %v2130_v37 }
 0x2e1   : > { %v1446_v25 = vpop.eup %1445  ;;  %v875_v26 = vmul.f32 0.7978846, %v859_v1  ;;  %v851_v29 = vmul.f32 0.044715, %v835_v39  ;;  %v820_v18 = vmul.f32 %v2252_v17, %v2252_v17  ;;  %v755_v30 = vmul.f32 %v1444_v16, %v2144_v43  ;;  %v696_v16 = vpop.xlane.xlu1 %695 }
 0x2e2   : > { %1453 = vtanh.f32 %v886_v20  ;;  %v860_v31 = vadd.f32 %v844_v22, %v2232_v62  ;;  %v817_v32 = vmul.f32 %v2255_v23, %v2255_v23  ;;  %v780_v33 = vmul.f32 %v2180_v45, %v758_v24 }
 0x2e3   : > { %1455 = vtanh.f32 %v875_v26  ;;  %v867_v37 = vadd.f32 %v851_v29, %v2237_v4  ;;  %v836_v9 = vmul.f32 %v820_v18, %v2252_v17  ;;  %v777_v34 = vmul.f32 %v2180_v45, %v755_v30 }
 0x2e4   : > { %v1448_v36 = vpop.eup %1447  ;;  %v876_v38 = vmul.f32 0.7978846, %v860_v31  ;;  %v833_v43 = vmul.f32 %v817_v32, %v2255_v23  ;;  %v2270_v41 = vadd.f32 %v2183_v55, %v780_v33  ;;  %v756_v42 = vmul.f32 %v1446_v25, %v2141_v44  ;;  %v699_v32 = vpop.xlane.xlu0 %698 }
 0x2e5   : > { %v909_v46 = vadd.f32 1.0, %v1448_v36  ;;  %v883_v47 = vmul.f32 0.7978846, %v867_v37  ;;  %v852_v48 = vmul.f32 0.044715, %v836_v9  ;;  %v2274_v53 = vadd.f32 %v2183_v55, %v777_v34 }
 0x2e6   : > { %1457 = vtanh.f32 %v876_v38  ;;  %v849_v54 = vmul.f32 0.044715, %v833_v43  ;;  %v818_v27 = vmul.f32 %v2270_v41, %v2270_v41  ;;  %v778_v56 = vmul.f32 %v2180_v45, %v756_v42 }
 0x2e7   : > { %v925_v60 = vmul.f32 0.5, %v909_v46  ;;  %1459 = vtanh.f32 %v883_v47  ;;  %v868_v19 = vadd.f32 %v852_v48, %v2252_v17  ;;  %v815_v44 = vmul.f32 %v2274_v53, %v2274_v53  ;;  %v702_v48 = vpop.xlane.xlu1 %701 }
 0x2e8   : > { %v1450_v61 = vpop.eup %1449  ;;  %v865_v50 = vadd.f32 %v849_v54, %v2255_v23  ;;  %v834_v0 = vmul.f32 %v818_v27, %v2270_v41  ;;  %v2286_v2 = vadd.f32 %v2183_v55, %v778_v56  ;;  %1461 = vrsqrt.f32 %v2227_v59 }
 0x2e9   : > { %v1452_v5 = vpop.eup %1451  ;;  %v941_v6 = vmul.f32 %v925_v60, %v2187_v3  ;;  %v910_v7 = vadd.f32 1.0, %v1450_v61  ;;  %v884_v10 = vmul.f32 0.7978846, %v868_v19  ;;  %v831_v11 = vmul.f32 %v815_v44, %v2274_v53 }
 0x2ea   : > { %v917_v12 = vadd.f32 1.0, %v1452_v5  ;;  %v881_v13 = vmul.f32 0.7978846, %v865_v50  ;;  %v850_v14 = vmul.f32 0.044715, %v834_v0  ;;  %v816_v15 = vmul.f32 %v2286_v2, %v2286_v2 }
 0x2eb   : > { %v1250_v58 = vpack.c.bf16 %v941_v6, %v941_v6  ;;  %v926_v28 = vmul.f32 0.5, %v910_v7  ;;  %1463 = vtanh.f32 %v884_v10  ;;  %v847_v8 = vmul.f32 0.044715, %v831_v11 }
 0x2ec   : > { %v1454_v1 = vpop.eup %1453  ;;  %v933_v59 = vmul.f32 0.5, %v917_v12  ;;  %1465 = vtanh.f32 %v881_v13  ;;  %v866_v3 = vadd.f32 %v850_v14, %v2270_v41  ;;  %v832_v39 = vmul.f32 %v816_v15, %v2286_v2 }
 0x2ed   : > { %v1456_v20 = vpop.eup %1455  ;;  %1022 = vst.msk [vmem:[%s2295_s26 + $0x8] sm:$0xf] %vm1019_vm1, %v1250_v58  ;;  %v942_v22 = vmul.f32 %v926_v28, %v2197_v57  ;;  %v918_v24 = vadd.f32 1.0, %v1454_v1  ;;  %v863_v25 = vadd.f32 %v847_v8, %v2274_v53  ;;  %v716_v26 = vmul.f32 0.015625, %v696_v16 }
 0x2ee   : > { %v949_v29 = vmul.f32 %v933_v59, %v2201_v21  ;;  %v907_v18 = vadd.f32 1.0, %v1456_v20  ;;  %v882_v30 = vmul.f32 0.7978846, %v866_v3  ;;  %v848_v31 = vmul.f32 0.044715, %v832_v39 }
 0x2ef   : > { %v1251_v33 = vpack.c.bf16 %v942_v22, %v942_v22  ;;  %v934_v37 = vmul.f32 0.5, %v918_v24  ;;  %v879_v9 = vmul.f32 0.7978846, %v863_v25  ;;  %v732_v34 = vadd.f32 1e-06, %v716_v26 }
 0x2f0   : > { %v1458_v36 = vpop.eup %1457  ;;  %v1258_v38 = vpack.c.bf16 %v949_v29, %v949_v29  ;;  %v923_v43 = vmul.f32 0.5, %v907_v18  ;;  %1467 = vtanh.f32 %v882_v30  ;;  %v864_v57 = vadd.f32 %v848_v31, %v2286_v2 }
 0x2f1   : > { %v1460_v42 = vpop.eup %1459  ;;  %1023 = vst.msk [vmem:[%s2295_s26 + $0xc] sm:$0xf] %vm1019_vm1, %v1251_v33  ;;  %v950_v21 = vmul.f32 %v934_v37, %v2213_v35  ;;  %v908_v46 = vadd.f32 1.0, %v1458_v36  ;;  %1469 = vtanh.f32 %v879_v9  ;;  %v717_v47 = vmul.f32 0.015625, %v699_v32 }
 0x2f2   : > { %v1462_v54 = vpop.eup %1461  ;;  %1030 = vst.msk [vmem:[%s2295_s26 + $0x28] sm:$0xf] %vm1019_vm1, %v1258_v38  ;;  %v939_v27 = vmul.f32 %v923_v43, %v2218_v40  ;;  %v915_v56 = vadd.f32 1.0, %v1460_v42  ;;  %v880_v60 = vmul.f32 0.7978846, %v864_v57  ;;  %1471 = vrsqrt.f32 %v732_v34 }
 0x2f3   : > { %v1259_v19 = vpack.c.bf16 %v950_v21, %v950_v21  ;;  %v924_v44 = vmul.f32 0.5, %v908_v46  ;;  %v763_v61 = vmul.f32 %v1462_v54, %v2157_v63  ;;  %v733_v50 = vadd.f32 1e-06, %v717_v47 }
 0x2f4   : > { %v1248_v35 = vpack.c.bf16 %v939_v27, %v939_v27  ;;  %v931_v0 = vmul.f32 0.5, %v915_v56  ;;  %1473 = vtanh.f32 %v880_v60  ;;  %v718_v5 = vmul.f32 0.015625, %v702_v48 }
 0x2f5   : > { %v1464_v6 = vpop.eup %1463  ;;  %1031 = vst.msk [vmem:[%s2295_s26 + $0x2c] sm:$0xf] %vm1019_vm1, %v1259_v19  ;;  %v940_v7 = vmul.f32 %v924_v44, %v2232_v62  ;;  %v785_v40 = vmul.f32 %v2180_v45, %v763_v61  ;;  %1475 = vrsqrt.f32 %v733_v50 }
 0x2f6   : > { %v1466_v10 = vpop.eup %1465  ;;  %1020 = vst.msk [vmem:[%s2295_s26] sm:$0xf] %vm1019_vm1, %v1248_v35  ;;  %v947_v63 = vmul.f32 %v931_v0, %v2237_v4  ;;  %v916_v11 = vadd.f32 1.0, %v1464_v6  ;;  %v734_v12 = vadd.f32 1e-06, %v718_v5 }
 0x2f7   : > { %v1249_v13 = vpack.c.bf16 %v940_v7, %v940_v7  ;;  %v913_v14 = vadd.f32 1.0, %v1466_v10  ;;  %v2318_v15 = vadd.f32 %v2183_v55, %v785_v40 }
 0x2f8   : > { %v1256_v16 = vpack.c.bf16 %v947_v63, %v947_v63  ;;  %v932_v58 = vmul.f32 0.5, %v916_v11  ;;  %1477 = vrsqrt.f32 %v734_v12 }
 0x2f9   : > { %1021 = vst.msk [vmem:[%s2295_s26 + $0x4] sm:$0xf] %vm1019_vm1, %v1249_v13  ;;  %v929_v62 = vmul.f32 0.5, %v913_v14  ;;  %v823_v28 = vmul.f32 %v2318_v15, %v2318_v15 }
 0x2fa   : > { %v1468_v8 = vpop.eup %1467  ;;  %1028 = vst.msk [vmem:[%s2295_s26 + $0x20] sm:$0xf] %vm1019_vm1, %v1256_v16  ;;  %v948_v4 = vmul.f32 %v932_v58, %v2252_v17 }
 0x2fb   : > { %v1470_v1 = vpop.eup %1469  ;;  %v945_v59 = vmul.f32 %v929_v62, %v2255_v23  ;;  %v914_v3 = vadd.f32 1.0, %v1468_v8  ;;  %v839_v39 = vmul.f32 %v823_v28, %v2318_v15 }
 0x2fc   : > { %v1472_v20 = vpop.eup %1471  ;;  %v1257_v22 = vpack.c.bf16 %v948_v4, %v948_v4  ;;  %v911_v24 = vadd.f32 1.0, %v1470_v1 }
 0x2fd   : > { %v1254_v25 = vpack.c.bf16 %v945_v59, %v945_v59  ;;  %v930_v26 = vmul.f32 0.5, %v914_v3  ;;  %v855_v29 = vmul.f32 0.044715, %v839_v39  ;;  %v764_v18 = vmul.f32 %v1472_v20, %v2154_v49 }
 0x2fe   : > { %v1474_v30 = vpop.eup %1473  ;;  %1029 = vst.msk [vmem:[%s2295_s26 + $0x24] sm:$0xf] %vm1019_vm1, %v1257_v22  ;;  %v927_v31 = vmul.f32 0.5, %v911_v24 }
 0x2ff   : > { %v1476_v17 = vpop.eup %1475  ;;  %1026 = vst.msk [vmem:[%s2295_s26 + $0x18] sm:$0xf] %vm1019_vm1, %v1254_v25  ;;  %v946_v23 = vmul.f32 %v930_v26, %v2270_v41  ;;  %v912_v32 = vadd.f32 1.0, %v1474_v30  ;;  %v871_v33 = vadd.f32 %v855_v29, %v2318_v15  ;;  %v786_v37 = vmul.f32 %v2180_v45, %v764_v18 }
 0x300   : > { %v943_v9 = vmul.f32 %v927_v31, %v2274_v53  ;;  %v765_v49 = vmul.f32 %v1476_v17, %v2168_v51 }
 0x301   : > { %v1255_v34 = vpack.c.bf16 %v946_v23, %v946_v23  ;;  %v928_v36 = vmul.f32 0.5, %v912_v32  ;;  %v887_v38 = vmul.f32 0.7978846, %v871_v33  ;;  %v808_v43 = vadd.f32 %v2183_v55, %v786_v37 }
 0x302   : > { %v1478_v57 = vpop.eup %1477  ;;  %v1252_v42 = vpack.c.bf16 %v943_v9, %v943_v9  ;;  %v787_v41 = vmul.f32 %v2180_v45, %v765_v49 }
 0x303   : > { %1027 = vst.msk [vmem:[%s2295_s26 + $0x1c] sm:$0xf] %vm1019_vm1, %v1255_v34  ;;  %v944_v21 = vmul.f32 %v928_v36, %v2286_v2  ;;  %1479 = vtanh.f32 %v887_v38  ;;  %v824_v46 = vmul.f32 %v808_v43, %v808_v43  ;;  %v766_v53 = vmul.f32 %v1478_v57, %v2165_v52 }
 0x304   : > { %1024 = vst.msk [vmem:[%s2295_s26 + $0x10] sm:$0xf] %vm1019_vm1, %v1252_v42  ;;  %v809_v51 = vadd.f32 %v2183_v55, %v787_v41 }
 0x305   : > { %v1253_v47 = vpack.c.bf16 %v944_v21, %v944_v21  ;;  %v840_v48 = vmul.f32 %v824_v46, %v808_v43  ;;  %v788_v54 = vmul.f32 %v2180_v45, %v766_v53 }
 0x306   : > { %v825_v27 = vmul.f32 %v809_v51, %v809_v51 }
 0x307   : > { %1025 = vst.msk [vmem:[%s2295_s26 + $0x14] sm:$0xf] %vm1019_vm1, %v1253_v47  ;;  %v856_v56 = vmul.f32 0.044715, %v840_v48  ;;  %v810_v60 = vadd.f32 %v2183_v55, %v788_v54 }
 0x308   : > { %v841_v19 = vmul.f32 %v825_v27, %v809_v51 }
 0x309   : > { %v872_v2 = vadd.f32 %v856_v56, %v808_v43  ;;  %v826_v44 = vmul.f32 %v810_v60, %v810_v60 }
 0x30a   : > { %v857_v61 = vmul.f32 0.044715, %v841_v19 }
 0x30b   : > { %v888_v52 = vmul.f32 0.7978846, %v872_v2  ;;  %v842_v50 = vmul.f32 %v826_v44, %v810_v60 }
 0x30c   : > { %v873_v35 = vadd.f32 %v857_v61, %v809_v51 }
 0x30d   : > { %v1480_v0 = vpop.eup %1479  ;;  %1481 = vtanh.f32 %v888_v52  ;;  %v858_v5 = vmul.f32 0.044715, %v842_v50 }
 0x30e   : > { %v919_v6 = vadd.f32 1.0, %v1480_v0  ;;  %v889_v7 = vmul.f32 0.7978846, %v873_v35 }
 0x30f   : > { %v874_v45 = vadd.f32 %v858_v5, %v810_v60 }
 0x310   : > { %v935_v40 = vmul.f32 0.5, %v919_v6  ;;  %1483 = vtanh.f32 %v889_v7 }
 0x311   : > { %v890_v10 = vmul.f32 0.7978846, %v874_v45 }
 0x312   : > { %v951_v55 = vmul.f32 %v935_v40, %v2318_v15 }
 0x313   : > { %1485 = vtanh.f32 %v890_v10 }
 0x314   : > { %v1260_v63 = vpack.c.bf16 %v951_v55, %v951_v55 }
 0x316   : > { %1032 = vst.msk [vmem:[%s2295_s26 + $0x30] sm:$0xf] %vm1019_vm1, %v1260_v63 }
 0x317   : > { %v1482_v11 = vpop.eup %1481 }
 0x318   : > { %v920_v12 = vadd.f32 1.0, %v1482_v11 }
 0x31a   : > { %v1484_v13 = vpop.eup %1483  ;;  %v936_v14 = vmul.f32 0.5, %v920_v12 }
 0x31b   : > { %v921_v16 = vadd.f32 1.0, %v1484_v13 }
 0x31c   : > { %v952_v58 = vmul.f32 %v936_v14, %v808_v43 }
 0x31d   : > { %v1486_v62 = vpop.eup %1485  ;;  %v937_v28 = vmul.f32 0.5, %v921_v16 }
 0x31e   : > { %v1261_v8 = vpack.c.bf16 %v952_v58, %v952_v58  ;;  %v922_v4 = vadd.f32 1.0, %v1486_v62 }
 0x31f   : > { %v953_v15 = vmul.f32 %v937_v28, %v809_v51 }
 0x320   : > { %1033 = vst.msk [vmem:[%s2295_s26 + $0x34] sm:$0xf] %vm1019_vm1, %v1261_v8  ;;  %v938_v1 = vmul.f32 0.5, %v922_v4 }
 0x321   : > { %v1262_v59 = vpack.c.bf16 %v953_v15, %v953_v15 }
 0x322   : > { %v954_v3 = vmul.f32 %v938_v1, %v810_v60 }
 0x323   : > { %1034 = vst.msk [vmem:[%s2295_s26 + $0x38] sm:$0xf] %vm1019_vm1, %v1262_v59 }
 0x324   : > { %v1263_v39 = vpack.c.bf16 %v954_v3, %v954_v3 }
 0x326   : > { %1035 = vst.msk [vmem:[%s2295_s26 + $0x3c] sm:$0xf] %vm1019_vm1, %v1263_v39 }
 0x327   : > { %1644 = shalt.err (!%p1641_p11)
}
 0x328   : > { %s1645_s3 = scalar_lea.hbm %s2364_s30, 1024  ;;  %s1649_s15 = scalar_lea.hbm %s2421_s5, 4096 }
 0x329   : > { %p1646_p10 = scmp.ne.s32.totalorder %s2364_s30, %s1645_s3  ;;  %p1650_p3 = scmp.lt.u32.totalorder %s2364_s30, %s2421_s5 }
 0x32a   : > { %p1651_p9 = scmp.lt.u32.totalorder %s1649_s15, %s1645_s3  ;;  %p1653_p4 = scmp.lt.u32.totalorder %s1645_s3, %s2364_s30 }
 0x32b   : > { %p1647_p0 = pnand %p1646_p10, %p2461_p6 }
 0x32c   : > { %p1652_p2 = por %p1651_p9, %p1650_p3 }
 0x32d   : > { %p1648_p5 = pneg %p1647_p0 }
 0x32e   : > { %p1654_p12 = por %p1653_p4, %p1652_p2 }
 0x330   : > { %p1655_p13 = pnand %p1654_p12, %p1648_p5 }
 0x332   : > { %1658 = shalt.err (!%p1655_p13)
}
 0x333   : > { %s1731_s12 = smov 64   ;;  %s1732_s6 = smov 4  }
 0x334   : > { %1325 = dma.vmem_to_hbm [thread:$0]  (%p2461_p6), %s2366_s18, 1024, %s2364_s30, %s1037_s9, %s1731_s12, %s1731_s12, %s1732_s6  }
 0x335 PF: > { %s2462_s28 = sld [smem:[#allocation16_spill]]  ;;  %s2463_s24 = sld [smem:[#allocation17_spill]] }
 0x336   : > { %p1355_p1 = scmp.ge.s32.totalorder %s1721_s23, 2 }
 0x33b   : > { %s1067_s26 = sand.u32 1, %s2462_s28   ;;  %p2464_p8 = scmp.ne.s32.totalorder %s2463_s24, 0 }
 0x33c   : > { %s1068_s17 = scalar_lea.sflag [#allocation4], %s1067_s26 }
 0x33d   : > { %p1345_p7 = pnand %p1355_p1, %p2464_p8 }
 0x33f   : > { %1696 = dma.done.wait (!%p1345_p7), %s1068_s17, 1024  }
 0x340   : > { %1698 = vsyncadd (!%p1345_p7), %s1068_s17, 4294966272  ;;  %s23_s23 = sadd.s32 1, %s1721_s23   ;;  %s2465_s11 = sld [smem:[#allocation19_spill]] }
 0x341   : > { %p20_p11 = scmp.ge.s32.totalorder %s23_s23, 6   ;;  %s2466_s13 = sld [smem:[#allocation18_spill]] }
 0x342   : > { %s2467_s18 = smov %s1705_s19  ;;  %s2468_s19 = smov %s1709_s20 }
 0x343   : > { %s2470_s21 = smov %s1717_s22  ;;  %22 = sbr.rel (!%p20_p11) target bundleno = 11 (0xb), region = 110 }
 0x346   : > { %s2469_s20 = smov %s2465_s11 }
 0x347   : > { %s2471_s22 = smov %s2466_s13 }
 0x34a   :  { %1073 = vsyncpa [#allocation3], 1 }
 0x34b   :  { %1075 = vsyncpa [#allocation3 + $0x1], 1 }
 0x34c   :  { %1076 = vsyncpa [#allocation6], 1 }
 0x34d   :  { %1078 = vsyncpa [#allocation6 + $0x1], 1 }
 0x34e   :  { %1079 = vsyncpa [#allocation9], 1 }
 0x34f   :  { %1080 = vsyncpa [#allocation4], 1 }
 0x350   :  { %1082 = vsyncpa [#allocation4 + $0x1], 1 }

// kernel: prithvi_wrapper_forward.13
= control target key start
LH: loop header
LB: loop body
LE: loop exit
PB: predicated region body
PF: predicated region fallthrough
CT: control target
= control target key end

     0   :  { %10 = vsyncpa [#allocation3], 0  ;;  %s5391_s0 = inlined_call_operand.hbm [shape: bf16[512,576], index: 0, kind: input, shape index: {}]   ;;  %s5392_s1 = inlined_call_operand.hbm [shape: bf16[576,256], index: 1, kind: input, shape index: {}]   ;;  %s5393_s2 = inlined_call_operand.hbm [shape: f32[1,256], index: 2, kind: input, shape index: {}]   ;;  %s5394_s3 = inlined_call_operand.hbm [shape: bf16[256,3], index: 3, kind: input, shape index: {}]   ;;  %s5395_s4 = inlined_call_operand.hbm [shape: f32[1,3], index: 4, kind: input, shape index: {}]   ;;  %s5396_s5 = inlined_call_operand.hbm [shape: f32[512,3], index: 5, kind: output, shape index: {}]  }
   0x1   :  { %11 = vsyncpa [#allocation6], 0 }
   0x2   :  { %12 = vsyncpa [#allocation9], 0 }
   0x3   :  { %13 = vsyncpa [#allocation4], 0  ;;  %s4544_s18 = smov [#allocation5]   ;;  %s4404_s22 = scalar_lea.hbm %s5392_s1, 9216 }
   0x4   :  { %s31_s19 = sshll.u32 %s4544_s18, 4  ;;  %p4405_p0 = scmp.ne.s32.totalorder %s5392_s1, %s4404_s22  ;;  %s32_s19 = int_to_ptr.vmem [resolvable:$true] %s31_s19 }
   0x5   :  { %p4408_p1 = scmp.lt.u32.totalorder %s4404_s22, %s5392_s1 }
   0x7   :  { %p4410_p2 = pnand %p4408_p1, %p4405_p0 }
   0x9   :  { %4413 = shalt.err (!%p4410_p2)
}
   0xa   :  { %s4414_s27 = scalar_lea.vmem %s32_s19, 9216  ;;  %p4419_p4 = scmp.lt.s32.totalorder %s32_s19, %s32_s19 }
   0xb   :  { %p4415_p3 = scmp.ne.s32.totalorder %s32_s19, %s4414_s27  ;;  %p4420_p5 = scmp.lt.s32.totalorder %s4414_s27, %s4414_s27 }
   0xd   :  { %p4421_p6 = por %p4420_p5, %p4419_p4 }
   0xf   :  { %p4422_p7 = pnand %p4421_p6, %p4415_p3 }
  0x11   :  { %4425 = shalt.err (!%p4422_p7)
}
  0x12   :  { %s4545_s28 = smov 128   ;;  %s4546_s29 = smov 8  }
  0x13   :  { %37 = dma.hbm_to_vmem [thread:$0]  %s5392_s1, 9216, %s32_s19, [#allocation6], %s4545_s28, %s4545_s28, %s4546_s29  }
  0x14   :  { %s4547_s7 = smov [#allocation8]   ;;  %s4426_s11 = scalar_lea.hbm %s5394_s3, 2048 }
  0x15   :  { %s53_s8 = sshll.u32 %s4547_s7, 4  ;;  %p4427_p8 = scmp.ne.s32.totalorder %s5394_s3, %s4426_s11  ;;  %s54_s8 = int_to_ptr.vmem [resolvable:$true] %s53_s8 }
  0x16   :  { %p4430_p9 = scmp.lt.u32.totalorder %s4426_s11, %s5394_s3 }
  0x18   :  { %p4432_p10 = pnand %p4430_p9, %p4427_p8 }
  0x1a   :  { %4435 = shalt.err (!%p4432_p10)
}
  0x1b   :  { %s4436_s16 = scalar_lea.vmem %s54_s8, 2048  ;;  %p4441_p12 = scmp.lt.s32.totalorder %s54_s8, %s54_s8 }
  0x1c   :  { %p4437_p11 = scmp.ne.s32.totalorder %s54_s8, %s4436_s16  ;;  %p4442_p13 = scmp.lt.s32.totalorder %s4436_s16, %s4436_s16 }
  0x1e   :  { %p4443_p0 = por %p4442_p13, %p4441_p12 }
  0x20   :  { %p4444_p1 = pnand %p4443_p0, %p4437_p11 }
  0x22   :  { %4447 = shalt.err (!%p4444_p1)
}
  0x23   :  { %s4548_s1 = smov 64   ;;  %s4549_s17 = smov 4  }
  0x24   :  { %59 = dma.hbm_to_vmem [thread:$0]  %s5394_s3, 2048, %s54_s8, [#allocation9], %s4548_s1, %s4548_s1, %s4549_s17  }
  0x25   :  { %s4550_s20 = smov [#allocation2]   ;;  %s4448_s24 = scalar_lea.hbm %s5391_s0, 20480 }
  0x26   :  { %s19_s21 = sshll.u32 %s4550_s20, 4  ;;  %p4449_p2 = scmp.ne.s32.totalorder %s5391_s0, %s4448_s24  ;;  %s20_s21 = int_to_ptr.vmem [resolvable:$true] %s19_s21 }
  0x27   :  { %p4452_p3 = scmp.lt.u32.totalorder %s4448_s24, %s5391_s0 }
  0x29   :  { %p4454_p4 = pnand %p4452_p3, %p4449_p2 }
  0x2b   :  { %4457 = shalt.err (!%p4454_p4)
}
  0x2c   :  { %s4458_s6 = scalar_lea.vmem %s20_s21, 20480  ;;  %p4463_p6 = scmp.lt.s32.totalorder %s20_s21, %s20_s21 }
  0x2d   :  { %p4459_p5 = scmp.ne.s32.totalorder %s20_s21, %s4458_s6  ;;  %p4464_p7 = scmp.lt.s32.totalorder %s4458_s6, %s4458_s6 }
  0x2f   :  { %p4465_p8 = por %p4464_p7, %p4463_p6 }
  0x31   :  { %p4466_p9 = pnand %p4465_p8, %p4459_p5 }
  0x33   :  { %4469 = shalt.err (!%p4466_p9)
}
  0x34   :  { %s4551_s3 = smov 320   ;;  %s4552_s7 = smov 20  }
  0x35   :  { %25 = dma.hbm_to_vmem [thread:$0]  %s5391_s0, 20480, %s20_s21, [#allocation3], %s4551_s3, %s4551_s3, %s4552_s7  }
  0x36   :  { %s4553_s10 = smov [#allocation7]   ;;  %s4554_s12 = smov [#allocation10]  }
  0x37   :  { %s44_s11 = sshll.u32 %s4553_s10, 4  ;;  %s66_s13 = sshll.u32 %s4554_s12, 4  ;;  %s45_s11 = int_to_ptr.vmem [resolvable:$true] %s44_s11  ;;  %s67_s13 = int_to_ptr.vmem [resolvable:$true] %s66_s13 }
  0x38   :  { %s4470_s16 = scalar_lea.hbm %s5393_s2, 32 }
  0x39   :  { %p4471_p10 = scmp.ne.s32.totalorder %s5393_s2, %s4470_s16  ;;  %p4474_p11 = scmp.lt.u32.totalorder %s4470_s16, %s5393_s2 }
  0x3b   :  { %p4476_p12 = pnand %p4474_p11, %p4471_p10 }
  0x3d   :  { %4479 = shalt.err (!%p4476_p12)
}
  0x3e   :  { %s4480_s0 = scalar_lea.vmem %s45_s11, 32  ;;  %p4485_p0 = scmp.lt.s32.totalorder %s45_s11, %s45_s11 }
  0x3f   :  { %p4481_p13 = scmp.ne.s32.totalorder %s45_s11, %s4480_s0  ;;  %p4486_p1 = scmp.lt.s32.totalorder %s4480_s0, %s4480_s0 }
  0x41   :  { %p4487_p2 = por %p4486_p1, %p4485_p0 }
  0x43   :  { %p4488_p3 = pnand %p4487_p2, %p4481_p13 }
  0x45   :  { %4491 = shalt.err (!%p4488_p3)
}
  0x46   :  { %47 = dma.hbm_to_vmem [thread:$0]  %s5393_s2, 32, %s45_s11, [#allocation6]  }
  0x47   :  { %s4492_s24 = scalar_lea.hbm %s5395_s4, 16 }
  0x48   :  { %p4493_p4 = scmp.ne.s32.totalorder %s5395_s4, %s4492_s24  ;;  %p4496_p5 = scmp.lt.u32.totalorder %s4492_s24, %s5395_s4 }
  0x4a   :  { %p4498_p6 = pnand %p4496_p5, %p4493_p4 }
  0x4c   :  { %4501 = shalt.err (!%p4498_p6)
}
  0x4d   :  { %s4502_s6 = scalar_lea.vmem %s67_s13, 16  ;;  %s4506_s3 = scalar_lea.vmem %s67_s13, 32 }
  0x4e   :  { %p4503_p7 = scmp.ne.s32.totalorder %s67_s13, %s4502_s6  ;;  %p4507_p8 = scmp.lt.s32.totalorder %s67_s13, %s67_s13 }
  0x4f   :  { %p4508_p9 = scmp.lt.s32.totalorder %s4506_s3, %s4502_s6 }
  0x51   :  { %p4509_p10 = por %p4508_p9, %p4507_p8 }
  0x53   :  { %p4510_p11 = pnand %p4509_p10, %p4503_p7 }
  0x55   :  { %4513 = shalt.err (!%p4510_p11)
}
  0x56   :  { %69 = dma.hbm_to_vmem [thread:$0]  %s5395_s4, 16, %s67_s13, [#allocation9]  }
  0x57   :  { %4536 = dma.done.wait [#allocation3], 20480  }
  0x58   :  { %4537 = vsyncadd [#allocation3], 4294946816 }
  0x59   :  { %4538 = dma.done.wait [#allocation6], 9248  }
  0x5a   :  { %4539 = vsyncadd [#allocation6], 4294958048 }
  0x5b   :  { %4540 = dma.done.wait [#allocation9], 2064  }
  0x5c   :  { %4541 = vsyncadd [#allocation9], 4294965232  ;;  %v4056_v0 = vld [vmem:[#allocation5 + $0x104] ss:$8 sps:$4 sm:$0xff]   ;;  %v4058_v1 = vld [vmem:[#allocation5 + $0x100] ss:$8 sps:$4 sm:$0xff]  }
  0x5d   :  { %1972 = vmatprep.subr.bf16.mxu0 %v4056_v0  ;;  %v4059_v2 = vld [vmem:[#allocation5 + $0x114] ss:$8 sps:$4 sm:$0xff]   ;;  %v4061_v3 = vld [vmem:[#allocation5 + $0x110] ss:$8 sps:$4 sm:$0xff]   ;;  %v4062_v4 = vld [vmem:[#allocation5 + $0x124] ss:$8 sps:$4 sm:$0xff]  }
  0x5e   :  { %1973 = vmatpush1.bf16.msra.mxu0 %v4058_v1  ;;  %v4064_v5 = vld [vmem:[#allocation5 + $0x120] ss:$8 sps:$4 sm:$0xff]   ;;  %v4065_v6 = vld [vmem:[#allocation5 + $0x134] ss:$8 sps:$4 sm:$0xff]   ;;  %v4067_v7 = vld [vmem:[#allocation5 + $0x130] ss:$8 sps:$4 sm:$0xff]  }
  0x5f   :  { %1974 = vmatprep.subr.bf16.mxu0 %v4059_v2  ;;  %v4068_v8 = vld [vmem:[#allocation5 + $0x144] ss:$8 sps:$4 sm:$0xff]   ;;  %v4070_v9 = vld [vmem:[#allocation5 + $0x140] ss:$8 sps:$4 sm:$0xff]   ;;  %v4071_v10 = vld [vmem:[#allocation5 + $0x154] ss:$8 sps:$4 sm:$0xff]  }
  0x60   :  { %v4073_v11 = vld [vmem:[#allocation5 + $0x150] ss:$8 sps:$4 sm:$0xff]   ;;  %v4074_v12 = vld [vmem:[#allocation5 + $0x164] ss:$8 sps:$4 sm:$0xff]   ;;  %v4076_v14 = vld [vmem:[#allocation5 + $0x160] ss:$8 sps:$4 sm:$0xff]  }
  0x61   :  { %v4106_v13 = vld [vmem:[#allocation2 + $0xc] ss:$20 sps:$4 sm:$0xff]   ;;  %v4077_v15 = vld [vmem:[#allocation5 + $0x174] ss:$8 sps:$4 sm:$0xff]   ;;  %v4079_v16 = vld [vmem:[#allocation5 + $0x170] ss:$8 sps:$4 sm:$0xff]  }
  0x62   :  { %1975 = vmatpush1.bf16.msra.mxu0 %v4061_v3  ;;  %2004 = vmatprep.mubr.bf16.mxu0 %v4106_v13  ;;  %v4080_v17 = vld [vmem:[#allocation5 + $0x184] ss:$8 sps:$4 sm:$0xff]   ;;  %v4082_v18 = vld [vmem:[#allocation5 + $0x180] ss:$8 sps:$4 sm:$0xff]   ;;  %v4083_v19 = vld [vmem:[#allocation5 + $0x194] ss:$8 sps:$4 sm:$0xff]  }
  0x63   :  { %1976 = vmatprep.subr.bf16.mxu0 %v4062_v4  ;;  %v4085_v20 = vld [vmem:[#allocation5 + $0x190] ss:$8 sps:$4 sm:$0xff]   ;;  %v4086_v21 = vld [vmem:[#allocation5 + $0x1a4] ss:$8 sps:$4 sm:$0xff]   ;;  %v4088_v22 = vld [vmem:[#allocation5 + $0x1a0] ss:$8 sps:$4 sm:$0xff]  }
  0x64   :  { %v4089_v23 = vld [vmem:[#allocation5 + $0x1b4] ss:$8 sps:$4 sm:$0xff]   ;;  %v4091_v24 = vld [vmem:[#allocation5 + $0x1b0] ss:$8 sps:$4 sm:$0xff]   ;;  %v4092_v25 = vld [vmem:[#allocation5 + $0x1c4] ss:$8 sps:$4 sm:$0xff]  }
  0x65   :  { %v4094_v26 = vld [vmem:[#allocation5 + $0x1c0] ss:$8 sps:$4 sm:$0xff]   ;;  %v4095_v27 = vld [vmem:[#allocation5 + $0x1d4] ss:$8 sps:$4 sm:$0xff]   ;;  %v4097_v28 = vld [vmem:[#allocation5 + $0x1d0] ss:$8 sps:$4 sm:$0xff]  }
  0x66   :  { %1977 = vmatpush1.bf16.msra.mxu0 %v4064_v5  ;;  %v4098_v29 = vld [vmem:[#allocation5 + $0x1e4] ss:$8 sps:$4 sm:$0xff]   ;;  %v4100_v30 = vld [vmem:[#allocation5 + $0x1e0] ss:$8 sps:$4 sm:$0xff]   ;;  %v4101_v31 = vld [vmem:[#allocation5 + $0x1f4] ss:$8 sps:$4 sm:$0xff]  }
  0x67   :  { %1978 = vmatprep.subr.bf16.mxu0 %v4065_v6  ;;  %v4103_v32 = vld [vmem:[#allocation5 + $0x1f0] ss:$8 sps:$4 sm:$0xff]   ;;  %v4109_v33 = vld [vmem:[#allocation5 + $0x204] ss:$8 sps:$4 sm:$0xff]   ;;  %v4104_v34 = vld [vmem:[#allocation2 + $0x8] ss:$20 sps:$4 sm:$0xff]  }
  0x68   :  { %v4107_v35 = vld [vmem:[#allocation5 + $0x200] ss:$8 sps:$4 sm:$0xff]   ;;  %v4136_v37 = vld [vmem:[#allocation5 + $0x214] ss:$8 sps:$4 sm:$0xff]   ;;  %v4134_v38 = vld [vmem:[#allocation5 + $0x210] ss:$8 sps:$4 sm:$0xff]  }
  0x69   :  { %v4110_v36 = vld [vmem:[#allocation2 + $0x34] ss:$20 sps:$4 sm:$0xff]   ;;  %v4163_v39 = vld [vmem:[#allocation5 + $0x224] ss:$8 sps:$4 sm:$0xff]   ;;  %v4113_v41 = vld [vmem:[#allocation2 + $0x5c] ss:$20 sps:$4 sm:$0xff]  }
  0x6a   :  { %1979 = vmatpush1.bf16.msra.mxu0 %v4067_v7  ;;  %v4112_v40 = vld [vmem:[#allocation2 + $0x30] ss:$20 sps:$4 sm:$0xff]   ;;  %v4161_v42 = vld [vmem:[#allocation5 + $0x220] ss:$8 sps:$4 sm:$0xff]   ;;  %v4115_v43 = vld [vmem:[#allocation2 + $0x58] ss:$20 sps:$4 sm:$0xff]  }
  0x6b   :  { %1980 = vmatprep.subr.bf16.mxu0 %v4068_v8  ;;  %v4116_v44 = vld [vmem:[#allocation2 + $0x84] ss:$20 sps:$4 sm:$0xff]   ;;  %v4118_v45 = vld [vmem:[#allocation2 + $0x80] ss:$20 sps:$4 sm:$0xff]   ;;  %v4121_v50 = vld [vmem:[#allocation2 + $0xa8] ss:$20 sps:$4 sm:$0xff]  }
  0x6c   :  { %v4119_v46 = vld [vmem:[#allocation2 + $0xac] ss:$20 sps:$4 sm:$0xff]   ;;  %v4178_v49 = vld [vmem:[#allocation5 + $0x14] ss:$8 sps:$4 sm:$0xff]   ;;  %v4181_v52 = vld [vmem:[#allocation5 + $0x10] ss:$8 sps:$4 sm:$0xff]  }
  0x6d   :  { %v4173_v47 = vld [vmem:[#allocation5 + $0x4] ss:$8 sps:$4 sm:$0xff]   ;;  %v4175_v48 = vld [vmem:[#allocation5] ss:$8 sps:$4 sm:$0xff]   ;;  %v4187_v55 = vld [vmem:[#allocation5 + $0x34] ss:$8 sps:$4 sm:$0xff]  }
  0x6e   :  { %1981 = vmatpush1.bf16.msra.mxu0 %v4070_v9  ;;  %1619 = vmatprep.subr.bf16.mxu1 %v4173_v47  ;;  %v4122_v51 = vld [vmem:[#allocation2 + $0xd4] ss:$20 sps:$4 sm:$0xff]   ;;  %v4182_v53 = vld [vmem:[#allocation5 + $0x24] ss:$8 sps:$4 sm:$0xff]   ;;  %v4125_v57 = vld [vmem:[#allocation2 + $0xfc] ss:$20 sps:$4 sm:$0xff]  }
  0x6f   :  { %1982 = vmatprep.subr.bf16.mxu0 %v4071_v10  ;;  %1620 = vmatpush1.bf16.msra.mxu1 %v4175_v48  ;;  %v4184_v54 = vld [vmem:[#allocation5 + $0x20] ss:$8 sps:$4 sm:$0xff]   ;;  %v4124_v56 = vld [vmem:[#allocation2 + $0xd0] ss:$20 sps:$4 sm:$0xff]   ;;  %v4196_v61 = vld [vmem:[#allocation5 + $0x54] ss:$8 sps:$4 sm:$0xff]  }
  0x70   :  { %1621 = vmatprep.subr.bf16.mxu1 %v4178_v49  ;;  %v4190_v58 = vld [vmem:[#allocation5 + $0x30] ss:$8 sps:$4 sm:$0xff]   ;;  %v4191_v59 = vld [vmem:[#allocation5 + $0x44] ss:$8 sps:$4 sm:$0xff]   ;;  %v4193_v60 = vld [vmem:[#allocation5 + $0x40] ss:$8 sps:$4 sm:$0xff]  }
  0x71   :  { %v4127_v62 = vld [vmem:[#allocation2 + $0xf8] ss:$20 sps:$4 sm:$0xff]   ;;  %v4202_v2 = vld [vmem:[#allocation5 + $0x60] ss:$8 sps:$4 sm:$0xff]   ;;  %v4205_v3 = vld [vmem:[#allocation5 + $0x74] ss:$8 sps:$4 sm:$0xff]  }
  0x72   :  { %1983 = vmatpush1.bf16.msra.mxu0 %v4073_v11  ;;  %v4128_v63 = vld [vmem:[#allocation2 + $0x124] ss:$20 sps:$4 sm:$0xff]   ;;  %v4130_v4 = vld [vmem:[#allocation2 + $0x120] ss:$20 sps:$4 sm:$0xff]   ;;  %v4133_v10 = vld [vmem:[#allocation2 + $0x148] ss:$20 sps:$4 sm:$0xff]  }
  0x73   :  { %1984 = vmatprep.subr.bf16.mxu0 %v4074_v12  ;;  %1622 = vmatpush1.bf16.msra.mxu1 %v4181_v52  ;;  %v4199_v0 = vld [vmem:[#allocation5 + $0x50] ss:$8 sps:$4 sm:$0xff]   ;;  %v4200_v1 = vld [vmem:[#allocation5 + $0x64] ss:$8 sps:$4 sm:$0xff]   ;;  %v4211_v8 = vld [vmem:[#allocation5 + $0x80] ss:$8 sps:$4 sm:$0xff]  }
  0x74   :  { %1623 = vmatprep.subr.bf16.mxu1 %v4182_v53  ;;  %v4131_v5 = vld [vmem:[#allocation2 + $0x14c] ss:$20 sps:$4 sm:$0xff]   ;;  %v4208_v6 = vld [vmem:[#allocation5 + $0x70] ss:$8 sps:$4 sm:$0xff]   ;;  %v4214_v9 = vld [vmem:[#allocation5 + $0x94] ss:$8 sps:$4 sm:$0xff]  }
  0x75   :  { %v4209_v7 = vld [vmem:[#allocation5 + $0x84] ss:$8 sps:$4 sm:$0xff]   ;;  %v4137_v11 = vld [vmem:[#allocation2 + $0x174] ss:$20 sps:$4 sm:$0xff]   ;;  %v4220_v12 = vld [vmem:[#allocation5 + $0x90] ss:$8 sps:$4 sm:$0xff]  }
  0x76   :  { %1985 = vmatpush1.bf16.msra.mxu0 %v4076_v14  ;;  %v4217_v13 = vld [vmem:[#allocation5 + $0x230] ss:$8 sps:$4 sm:$0xff]   ;;  %v4219_v14 = vld [vmem:[#allocation5 + $0x234] ss:$8 sps:$4 sm:$0xff]   ;;  %vm1522_vm0 = vcmask 523264   ;;  %vm3294_vm1 = vcmask 23552  }
  0x77   :  { %1986 = vmatprep.subr.bf16.mxu0 %v4077_v15  ;;  %1624 = vmatpush1.bf16.msra.mxu1 %v4184_v54  ;;  %v4221_v15 = vld [vmem:[#allocation5 + $0xa4] ss:$8 sps:$4 sm:$0xff]   ;;  %v4268_v48 = vld [vmem:[#allocation2 + $0x7c] ss:$20 sps:$4 sm:$0xff]   ;;  %v4276_v53 = vld [vmem:[#allocation2 + $0xa0] ss:$20 sps:$4 sm:$0xff]  }
  0x78   :  { %1625 = vmatprep.subr.bf16.mxu1 %v4187_v55  ;;  %v4155_v47 = vld [vmem:[#allocation2 + $0x264] ss:$20 sps:$4 sm:$0xff]   ;;  %v4160_v55 = vld [vmem:[#allocation2 + $0x288] ss:$20 sps:$4 sm:$0xff]   ;;  %s4556_s4 = smov [#allocation11]  }
  0x79   :  { %v4270_v49 = vld [vmem:[#allocation2 + $0x78] ss:$20 sps:$4 sm:$0xff]   ;;  %s3364_s8 = sshll.u32 %s4556_s4, 4  ;;  %s3365_s8 = int_to_ptr.vmem [resolvable:$true] %s3364_s8 }
  0x7a   :  { %1987 = vmatpush1.bf16.msra.mxu0 %v4079_v16  ;;  %v4223_v16 = vld [vmem:[#allocation5 + $0xa0] ss:$8 sps:$4 sm:$0xff]   ;;  %v4274_v52 = vld [vmem:[#allocation2 + $0xa4] ss:$20 sps:$4 sm:$0xff]   ;;  %s4514_s9 = scalar_lea.vmem %s3365_s8, 8192  ;;  %p4519_p13 = scmp.lt.s32.totalorder %s3365_s8, %s3365_s8 }
  0x7b   :  { %1988 = vmatprep.subr.bf16.mxu0 %v4080_v17  ;;  %1626 = vmatpush1.bf16.msra.mxu1 %v4190_v58  ;;  %v4226_v17 = vld [vmem:[#allocation5 + $0xb4] ss:$8 sps:$4 sm:$0xff]   ;;  %p4515_p12 = scmp.ne.s32.totalorder %s3365_s8, %s4514_s9  ;;  %p4520_p0 = scmp.lt.s32.totalorder %s4514_s9, %s4514_s9 }
  0x7c   :  { %1627 = vmatprep.subr.bf16.mxu1 %v4191_v59  ;;  %v4277_v54 = vld [vmem:[#allocation8 + $0x10] sm:$0xff]   ;;  %v4281_v58 = vld [vmem:[#allocation2 + $0xc8] ss:$20 sps:$4 sm:$0xff]  }
  0x7d   :  { %v4166_v59 = vld [vmem:[#allocation2 + $0x2b0] ss:$20 sps:$4 sm:$0xff]   ;;  %p4521_p1 = por %p4520_p0, %p4519_p13 }
  0x7e   :  { %1989 = vmatpush1.bf16.msra.mxu0 %v4082_v18  ;;  %v4139_v18 = vld [vmem:[#allocation2 + $0x170] ss:$20 sps:$4 sm:$0xff]  }
  0x7f   :  { %1990 = vmatprep.subr.bf16.mxu0 %v4083_v19  ;;  %1628 = vmatpush1.bf16.msra.mxu1 %v4193_v60  ;;  %v4140_v19 = vld [vmem:[#allocation2 + $0x19c] ss:$20 sps:$4 sm:$0xff]   ;;  %p4522_p2 = pnand %p4521_p1, %p4515_p12 }
  0x80   :  { %1629 = vmatprep.subr.bf16.mxu1 %v4196_v61  ;;  %v4167_v60 = vld [vmem:[#allocation2 + $0x2dc] ss:$20 sps:$4 sm:$0xff]   ;;  %v4283_v61 = vld [vmem:[#allocation2 + $0xf4] ss:$20 sps:$4 sm:$0xff]  }
  0x82   :  { %1991 = vmatpush1.bf16.msra.mxu0 %v4085_v20  ;;  %v4229_v20 = vld [vmem:[#allocation5 + $0xb0] ss:$8 sps:$4 sm:$0xff]  }
  0x83   :  { %1992 = vmatprep.subr.bf16.mxu0 %v4086_v21  ;;  %1630 = vmatpush1.bf16.msra.mxu1 %v4199_v0  ;;  %v4230_v21 = vld [vmem:[#allocation5 + $0xc4] ss:$8 sps:$4 sm:$0xff]  }
  0x84   :  { %1631 = vmatprep.subr.bf16.mxu1 %v4200_v1  ;;  %v4169_v0 = vld [vmem:[#allocation2 + $0x2d8] ss:$20 sps:$4 sm:$0xff]  }
  0x85   :  { %v4170_v1 = vld [vmem:[#allocation2 + $0x304] ss:$20 sps:$4 sm:$0xff]  }
  0x86   :  { %1993 = vmatpush1.bf16.msra.mxu0 %v4088_v22  ;;  %v4232_v22 = vld [vmem:[#allocation5 + $0xc0] ss:$8 sps:$4 sm:$0xff]  }
  0x87   :  { %1994 = vmatprep.subr.bf16.mxu0 %v4089_v23  ;;  %1632 = vmatpush1.bf16.msra.mxu1 %v4202_v2  ;;  %v4235_v23 = vld [vmem:[#allocation5 + $0xd4] ss:$8 sps:$4 sm:$0xff]  }
  0x88   :  { %1633 = vmatprep.subr.bf16.mxu1 %v4205_v3  ;;  %v4288_v2 = vld [vmem:[#allocation2 + $0x11c] ss:$20 sps:$4 sm:$0xff]   ;;  %v4290_v3 = vld [vmem:[#allocation2 + $0x118] ss:$20 sps:$4 sm:$0xff]  }
  0x8a   :  { %1995 = vmatpush1.bf16.msra.mxu0 %v4091_v24  ;;  %v4142_v24 = vld [vmem:[#allocation2 + $0x198] ss:$20 sps:$4 sm:$0xff]  }
  0x8b   :  { %1996 = vmatprep.subr.bf16.mxu0 %v4092_v25  ;;  %1634 = vmatpush1.bf16.msra.mxu1 %v4208_v6  ;;  %v4143_v25 = vld [vmem:[#allocation2 + $0x1c4] ss:$20 sps:$4 sm:$0xff]  }
  0x8c   :  { %1635 = vmatprep.subr.bf16.mxu1 %v4209_v7  ;;  %v4292_v6 = vld [vmem:[#allocation2 + $0x144] ss:$20 sps:$4 sm:$0xff]   ;;  %v4294_v7 = vld [vmem:[#allocation2 + $0x140] ss:$20 sps:$4 sm:$0xff]  }
  0x8e   :  { %1997 = vmatpush1.bf16.msra.mxu0 %v4094_v26  ;;  %v4238_v26 = vld [vmem:[#allocation5 + $0xd0] ss:$8 sps:$4 sm:$0xff]  }
  0x8f   :  { %1998 = vmatprep.subr.bf16.mxu0 %v4095_v27  ;;  %1636 = vmatpush1.bf16.msra.mxu1 %v4211_v8  ;;  %v4239_v27 = vld [vmem:[#allocation5 + $0xe4] ss:$8 sps:$4 sm:$0xff]  }
  0x90   :  { %1637 = vmatprep.subr.bf16.mxu1 %v4214_v9  ;;  %v4295_v8 = vld [vmem:[#allocation8 + $0x20] sm:$0xff]  }
  0x91   :  { %v4180_v9 = vld [vmem:[#allocation2 + $0x328] ss:$20 sps:$4 sm:$0xff]  }
  0x92   :  { %1999 = vmatpush1.bf16.msra.mxu0 %v4097_v28  ;;  %v4241_v28 = vld [vmem:[#allocation5 + $0xe0] ss:$8 sps:$4 sm:$0xff]  }
  0x93   :  { %2000 = vmatprep.subr.bf16.mxu0 %v4098_v29  ;;  %1638 = vmatpush1.bf16.msra.mxu1 %v4220_v12  ;;  %v4244_v29 = vld [vmem:[#allocation5 + $0xf4] ss:$8 sps:$4 sm:$0xff]  }
  0x94   :  { %1639 = vmatprep.subr.bf16.mxu1 %v4221_v15  ;;  %v4299_v12 = vld [vmem:[#allocation2 + $0x168] ss:$20 sps:$4 sm:$0xff]  }
  0x95   :  { %v4301_v15 = vld [vmem:[#allocation2 + $0x194] ss:$20 sps:$4 sm:$0xff]  }
  0x96   :  { %2001 = vmatpush1.bf16.msra.mxu0 %v4100_v30  ;;  %v4145_v30 = vld [vmem:[#allocation2 + $0x1c0] ss:$20 sps:$4 sm:$0xff]  }
  0x97   :  { %2002 = vmatprep.subr.bf16.mxu0 %v4101_v31  ;;  %1640 = vmatpush1.bf16.msra.mxu1 %v4223_v16  ;;  %v4146_v31 = vld [vmem:[#allocation2 + $0x1ec] ss:$20 sps:$4 sm:$0xff]   ;;  %v4303_v16 = vld [vmem:[#allocation2 + $0x190] ss:$20 sps:$4 sm:$0xff]  }
  0x98   :  { %1641 = vmatprep.subr.bf16.mxu1 %v4226_v17  ;;  %v4304_v17 = vld [vmem:[#allocation8 + $0x28] sm:$0xff]  }
  0x9a   :  { %2003 = vmatpush1.bf16.msra.mxu0 %v4103_v32  ;;  %v4247_v32 = vld [vmem:[#allocation5 + $0xf0] ss:$8 sps:$4 sm:$0xff]  }
  0x9b   :  { %2325 = vmatprep.subr.bf16.mxu0 %v4109_v33  ;;  %1642 = vmatpush1.bf16.msra.mxu1 %v4229_v20  ;;  %v4248_v33 = vld [vmem:[#allocation2] ss:$20 sps:$4 sm:$0xff]   ;;  %v4306_v20 = vld [vmem:[#allocation2 + $0x1bc] ss:$20 sps:$4 sm:$0xff]  }
  0x9c   :  { %1643 = vmatprep.subr.bf16.mxu1 %v4230_v21  ;;  %v4308_v21 = vld [vmem:[#allocation2 + $0x1b8] ss:$20 sps:$4 sm:$0xff]  }
  0x9d   :  { %2005 = vmatmul.mubr.bf16.vlgmr.msra.gmra.mrb[0].mxu0 %v4104_v34  ;;  %v4250_v34 = vld [vmem:[#allocation2 + $0x4] ss:$20 sps:$4 sm:$0xff]  }
  0x9e   :  { %2326 = vmatpush1.bf16.msra.mxu0 %v4107_v35  ;;  %2014 = vmatprep.mubr.bf16.mxu0 %v4110_v36  ;;  %v5397_v35 = vmov 0   ;;  %v4253_v36 = vld [vmem:[#allocation8] sm:$0xff]  }
  0x9f   :  { %2327 = vmatprep.subr.bf16.mxu0 %v4136_v37  ;;  %1644 = vmatpush1.bf16.msra.mxu1 %v4232_v22  ;;  %v4148_v37 = vld [vmem:[#allocation2 + $0x1e8] ss:$20 sps:$4 sm:$0xff]   ;;  %v4207_v22 = vld [vmem:[#allocation2 + $0x3a0] ss:$20 sps:$4 sm:$0xff]  }
  0xa0   :  { %1645 = vmatprep.subr.bf16.mxu1 %v4235_v23  ;;  %1651 = vmatprep.mubr.bf16.mxu1 %v4250_v34  ;;  %v4212_v23 = vld [vmem:[#allocation2 + $0x3cc] ss:$20 sps:$4 sm:$0xff]   ;;  %v4321_v34 = vld [vmem:[#allocation2 + $0x230] ss:$20 sps:$4 sm:$0xff]  }
  0xa2   :  { %2328 = vmatpush1.bf16.msra.mxu0 %v4134_v38  ;;  %v4149_v38 = vld [vmem:[#allocation2 + $0x214] ss:$20 sps:$4 sm:$0xff]  }
  0xa3   :  { %2329 = vmatprep.subr.bf16.mxu0 %v4163_v39  ;;  %1646 = vmatpush1.bf16.msra.mxu1 %v4238_v26  ;;  %v4255_v39 = vld [vmem:[#allocation2 + $0x2c] ss:$20 sps:$4 sm:$0xff]   ;;  %v4313_v26 = vld [vmem:[#allocation8 + $0x30] sm:$0xff]  }
  0xa4   :  { %1647 = vmatprep.subr.bf16.mxu1 %v4239_v27  ;;  %v4216_v27 = vld [vmem:[#allocation2 + $0x3c8] ss:$20 sps:$4 sm:$0xff]  }
  0xa5   :  { %2015 = vmatmul.mubr.bf16.gmra.mrb[4].mxu0 %v4112_v40  ;;  %v4257_v40 = vld [vmem:[#allocation2 + $0x28] ss:$20 sps:$4 sm:$0xff]  }
  0xa6   :  { %2024 = vmatprep.mubr.bf16.mxu0 %v4113_v41  ;;  %2330 = vmatpush1.bf16.msra.mxu0 %v4161_v42  ;;  %v4151_v41 = vld [vmem:[#allocation2 + $0x210] ss:$20 sps:$4 sm:$0xff]  }
  0xa7   :  { %2331 = vmatprep.subr.bf16.mxu0 %v4219_v14  ;;  %1648 = vmatpush1.bf16.msra.mxu1 %v4241_v28  ;;  %v4152_v42 = vld [vmem:[#allocation2 + $0x23c] ss:$20 sps:$4 sm:$0xff]   ;;  %v4224_v28 = vld [vmem:[#allocation2 + $0x3f4] ss:$20 sps:$4 sm:$0xff]  }
  0xa8   :  { %1649 = vmatprep.subr.bf16.mxu1 %v4244_v29  ;;  %v4194_v14 = vld [vmem:[#allocation2 + $0x37c] ss:$20 sps:$4 sm:$0xff]   ;;  %v4315_v29 = vld [vmem:[#allocation2 + $0x20c] ss:$20 sps:$4 sm:$0xff]  }
  0xaa   :  { %2332 = vmatpush1.bf16.msra.mxu0 %v4217_v13  ;;  %v4189_v13 = vld [vmem:[#allocation2 + $0x350] ss:$20 sps:$4 sm:$0xff]  }
  0xab   :  { %1650 = vmatpush1.bf16.msra.mxu1 %v4247_v32  ;;  %v4233_v32 = vld [vmem:[#allocation2 + $0x41c] ss:$20 sps:$4 sm:$0xff]  }
  0xac   :  { %3005 = vmatprep.subr.bf16.mxu1 %v5397_v35 }
  0xad   :  { %2025 = vmatmul.mubr.bf16.gmra.mrb[8].mxu0 %v4115_v43  ;;  %v4261_v43 = vld [vmem:[#allocation2 + $0x54] ss:$20 sps:$4 sm:$0xff]  }
  0xae   :  { %2034 = vmatprep.mubr.bf16.mxu0 %v4116_v44  ;;  %1652 = vmatmul.mubr.bf16.vlgmr.msra.gmra.mrb[0].mxu1 %v4248_v33  ;;  %v4263_v44 = vld [vmem:[#allocation2 + $0x50] ss:$20 sps:$4 sm:$0xff]   ;;  %v4319_v33 = vld [vmem:[#allocation2 + $0x234] ss:$20 sps:$4 sm:$0xff]  }
  0xaf   :  { %3006 = vmatpush1.bf16.msra.mxu1 %v4253_v36  ;;  %1661 = vmatprep.mubr.bf16.mxu1 %v4255_v39  ;;  %v4322_v36 = vld [vmem:[#allocation8 + $0x38] sm:$0xff]  }
  0xb0   :  { %3007 = vmatprep.subr.bf16.mxu1 %v5397_v35  ;;  %v4324_v39 = vld [vmem:[#allocation2 + $0x25c] ss:$20 sps:$4 sm:$0xff]  }
  0xb5   :  { %2035 = vmatmul.mubr.bf16.gmra.mrb[12].mxu0 %v4118_v45  ;;  %v4266_v45 = vld [vmem:[#allocation8 + $0x8] sm:$0xff]  }
  0xb6   :  { %2044 = vmatprep.mubr.bf16.mxu0 %v4119_v46  ;;  %1662 = vmatmul.mubr.bf16.gmra.mrb[4].mxu1 %v4257_v40  ;;  %v4154_v46 = vld [vmem:[#allocation2 + $0x238] ss:$20 sps:$4 sm:$0xff]  }
  0xb7   :  { %1671 = vmatprep.mubr.bf16.mxu1 %v4261_v43  ;;  %3008 = vmatpush1.bf16.msra.mxu1 %v4266_v45  ;;  %v4326_v40 = vld [vmem:[#allocation2 + $0x258] ss:$20 sps:$4 sm:$0xff]   ;;  %v4331_v45 = vld [vmem:[#allocation8 + $0x40] sm:$0xff]  }
  0xb8   :  { %3009 = vmatprep.subr.bf16.mxu1 %v5397_v35  ;;  %v4328_v43 = vld [vmem:[#allocation2 + $0x284] ss:$20 sps:$4 sm:$0xff]  }
  0xbb   :  { %3010 = vmatpush1.bf16.msra.mxu1 %v4277_v54  ;;  %v4340_v54 = vld [vmem:[#allocation8 + $0x48] sm:$0xff]  }
  0xbc   :  { %3011 = vmatprep.subr.bf16.mxu1 %v5397_v35 }
  0xbd   :  { %2045 = vmatmul.mubr.bf16.gmra.mrb[16].mxu0 %v4121_v50  ;;  %v4157_v50 = vld [vmem:[#allocation2 + $0x260] ss:$20 sps:$4 sm:$0xff]  }
  0xbe   :  { %2054 = vmatprep.mubr.bf16.mxu0 %v4122_v51  ;;  %1672 = vmatmul.mubr.bf16.gmra.mrb[8].mxu1 %v4263_v44  ;;  %v4158_v51 = vld [vmem:[#allocation2 + $0x28c] ss:$20 sps:$4 sm:$0xff]  }
  0xbf   :  { %1681 = vmatprep.mubr.bf16.mxu1 %v4268_v48  ;;  %v4330_v44 = vld [vmem:[#allocation2 + $0x280] ss:$20 sps:$4 sm:$0xff]  }
  0xc0   :  { %v4333_v48 = vld [vmem:[#allocation2 + $0x2ac] ss:$20 sps:$4 sm:$0xff]  }
  0xc5   :  { %2055 = vmatmul.mubr.bf16.gmra.mrb[20].mxu0 %v4124_v56  ;;  %v4164_v56 = vld [vmem:[#allocation2 + $0x2b4] ss:$20 sps:$4 sm:$0xff]  }
  0xc6   :  { %2064 = vmatprep.mubr.bf16.mxu0 %v4125_v57  ;;  %1682 = vmatmul.mubr.bf16.gmra.mrb[12].mxu1 %v4270_v49  ;;  %v4279_v57 = vld [vmem:[#allocation2 + $0xcc] ss:$20 sps:$4 sm:$0xff]   ;;  %v4335_v49 = vld [vmem:[#allocation2 + $0x2a8] ss:$20 sps:$4 sm:$0xff]  }
  0xc7   :  { %1691 = vmatprep.mubr.bf16.mxu1 %v4274_v52  ;;  %v4337_v52 = vld [vmem:[#allocation2 + $0x2d4] ss:$20 sps:$4 sm:$0xff]  }
  0xcd   :  { %2065 = vmatmul.mubr.bf16.gmra.mrb[24].mxu0 %v4127_v62  ;;  %v4285_v62 = vld [vmem:[#allocation2 + $0xf0] ss:$20 sps:$4 sm:$0xff]  }
  0xce   :  { %2074 = vmatprep.mubr.bf16.mxu0 %v4128_v63  ;;  %1692 = vmatmul.mubr.bf16.gmra.mrb[16].mxu1 %v4276_v53  ;;  %v4286_v63 = vld [vmem:[#allocation8 + $0x18] sm:$0xff]   ;;  %v4339_v53 = vld [vmem:[#allocation2 + $0x2d0] ss:$20 sps:$4 sm:$0xff]  }
  0xcf   :  { %1701 = vmatprep.mubr.bf16.mxu1 %v4279_v57  ;;  %3012 = vmatpush1.bf16.msra.mxu1 %v4286_v63  ;;  %v4342_v57 = vld [vmem:[#allocation2 + $0x2fc] ss:$20 sps:$4 sm:$0xff]  }
  0xd0   :  { %3013 = vmatprep.subr.bf16.mxu1 %v5397_v35  ;;  %v4278_v63 = vld [vmem:[#allocation2 + $0x10] ss:$20 sps:$4 sm:$0xff]  }
  0xd3   :  { %3014 = vmatpush1.bf16.msra.mxu1 %v4295_v8  ;;  %v4362_v8 = vld [vmem:[#allocation2 + $0x398] ss:$20 sps:$4 sm:$0xff]  }
  0xd4   :  { %3015 = vmatprep.subr.bf16.mxu1 %v5397_v35 }
  0xd5   :  { %2075 = vmatmul.mubr.bf16.gmra.mrb[28].mxu0 %v4130_v4  ;;  %v4172_v4 = vld [vmem:[#allocation2 + $0x300] ss:$20 sps:$4 sm:$0xff]  }
  0xd6   :  { %2084 = vmatprep.mubr.bf16.mxu0 %v4131_v5  ;;  %1702 = vmatmul.mubr.bf16.gmra.mrb[20].mxu1 %v4281_v58  ;;  %v4176_v5 = vld [vmem:[#allocation2 + $0x32c] ss:$20 sps:$4 sm:$0xff]  }
  0xd7   :  { %1711 = vmatprep.mubr.bf16.mxu1 %v4283_v61  ;;  %3016 = vmatpush1.bf16.msra.mxu1 %v4304_v17  ;;  %v4344_v58 = vld [vmem:[#allocation2 + $0x2f8] ss:$20 sps:$4 sm:$0xff]   ;;  %v4348_v61 = vld [vmem:[#allocation2 + $0x320] ss:$20 sps:$4 sm:$0xff]  }
  0xd8   :  { %3017 = vmatprep.subr.bf16.mxu1 %v5397_v35  ;;  %v4373_v17 = vld [vmem:[#allocation2 + $0x414] ss:$20 sps:$4 sm:$0xff]  }
  0xdb   :  { %3018 = vmatpush1.bf16.msra.mxu1 %v4313_v26 }
  0xdc   :  { %3019 = vmatprep.subr.bf16.mxu1 %v5397_v35 }
  0xdd   :  { %2085 = vmatmul.mubr.bf16.gmra.mrb[32].mxu0 %v4133_v10  ;;  %v4185_v10 = vld [vmem:[#allocation2 + $0x354] ss:$20 sps:$4 sm:$0xff]  }
  0xde   :  { %2094 = vmatprep.mubr.bf16.mxu0 %v4137_v11  ;;  %1712 = vmatmul.mubr.bf16.gmra.mrb[24].mxu1 %v4285_v62  ;;  %v4297_v11 = vld [vmem:[#allocation2 + $0x16c] ss:$20 sps:$4 sm:$0xff]   ;;  %v4349_v62 = vld [vmem:[#allocation8 + $0x50] sm:$0xff]  }
  0xdf   :  { %1721 = vmatprep.mubr.bf16.mxu1 %v4288_v2  ;;  %3020 = vmatpush1.bf16.msra.mxu1 %v4322_v36  ;;  %v4282_v2 = vld [vmem:[#allocation2 + $0x38] ss:$20 sps:$4 sm:$0xff]   ;;  %v4314_v36 = vld [vmem:[#allocation2 + $0x150] ss:$20 sps:$4 sm:$0xff]  }
  0xe0   :  { %3021 = vmatprep.subr.bf16.mxu1 %v5397_v35 }
  0xe3   :  { %3022 = vmatpush1.bf16.msra.mxu1 %v4331_v45 }
  0xe4   :  { %3023 = vmatprep.subr.bf16.mxu1 %v5397_v35 }
  0xe5   :  { %2095 = vmatmul.mubr.bf16.gmra.mrb[36].mxu0 %v4139_v18  ;;  %v4198_v18 = vld [vmem:[#allocation2 + $0x378] ss:$20 sps:$4 sm:$0xff]  }
  0xe6   :  { %2104 = vmatprep.mubr.bf16.mxu0 %v4140_v19  ;;  %1722 = vmatmul.mubr.bf16.gmra.mrb[28].mxu1 %v4290_v3  ;;  %v4203_v19 = vld [vmem:[#allocation2 + $0x3a4] ss:$20 sps:$4 sm:$0xff]   ;;  %v4355_v3 = vld [vmem:[#allocation2 + $0x374] ss:$20 sps:$4 sm:$0xff]  }
  0xe7   :  { %1731 = vmatprep.mubr.bf16.mxu1 %v4292_v6  ;;  %3024 = vmatpush1.bf16.msra.mxu1 %v4340_v54  ;;  %v4287_v6 = vld [vmem:[#allocation2 + $0x60] ss:$20 sps:$4 sm:$0xff]  }
  0xe8   :  { %3025 = vmatprep.subr.bf16.mxu1 %v5397_v35 }
  0xeb   :  { %3026 = vmatpush1.bf16.msra.mxu1 %v4349_v62 }
  0xec   :  { %3027 = vmatprep.subr.bf16.mxu1 %v5397_v35 }
  0xed   :  { %2105 = vmatmul.mubr.bf16.gmra.mrb[40].mxu0 %v4142_v24  ;;  %v4310_v24 = vld [vmem:[#allocation2 + $0x1e4] ss:$20 sps:$4 sm:$0xff]  }
  0xee   :  { %2114 = vmatprep.mubr.bf16.mxu0 %v4143_v25  ;;  %1732 = vmatmul.mubr.bf16.gmra.mrb[32].mxu1 %v4294_v7  ;;  %v4312_v25 = vld [vmem:[#allocation2 + $0x1e0] ss:$20 sps:$4 sm:$0xff]   ;;  %v4360_v7 = vld [vmem:[#allocation2 + $0x39c] ss:$20 sps:$4 sm:$0xff]  }
  0xef   :  { %1741 = vmatprep.mubr.bf16.mxu1 %v4297_v11  ;;  %v4366_v11 = vld [vmem:[#allocation2 + $0x3c0] ss:$20 sps:$4 sm:$0xff]  }
  0xf5   :  { %2115 = vmatmul.mubr.bf16.gmra.mrb[44].mxu0 %v4145_v30  ;;  %v4317_v30 = vld [vmem:[#allocation2 + $0x208] ss:$20 sps:$4 sm:$0xff]  }
  0xf6   :  { %2124 = vmatprep.mubr.bf16.mxu0 %v4146_v31  ;;  %1742 = vmatmul.mubr.bf16.gmra.mrb[36].mxu1 %v4299_v12  ;;  %v4228_v31 = vld [vmem:[#allocation2 + $0x3f0] ss:$20 sps:$4 sm:$0xff]  }
  0xf7   :  { %1751 = vmatprep.mubr.bf16.mxu1 %v4301_v15  ;;  %v4367_v12 = vld [vmem:[#allocation8 + $0x60] sm:$0xff]  }
  0xf8   :  { %v4371_v15 = vld [vmem:[#allocation2 + $0x3e8] ss:$20 sps:$4 sm:$0xff]  }
  0xfd   :  { %2125 = vmatmul.mubr.bf16.gmra.mrb[48].mxu0 %v4148_v37  ;;  %v4237_v37 = vld [vmem:[#allocation2 + $0x418] ss:$20 sps:$4 sm:$0xff]  }
  0xfe   :  { %2134 = vmatprep.mubr.bf16.mxu0 %v4149_v38  ;;  %1752 = vmatmul.mubr.bf16.gmra.mrb[40].mxu1 %v4303_v16  ;;  %v4242_v38 = vld [vmem:[#allocation2 + $0x444] ss:$20 sps:$4 sm:$0xff]  }
  0xff   :  { %1761 = vmatprep.mubr.bf16.mxu1 %v4306_v20  ;;  %v4300_v16 = vld [vmem:[#allocation2 + $0xd8] ss:$20 sps:$4 sm:$0xff]   ;;  %v4305_v20 = vld [vmem:[#allocation2 + $0x100] ss:$20 sps:$4 sm:$0xff]  }
 0x105   :  { %2135 = vmatmul.mubr.bf16.gmra.mrb[52].mxu0 %v4151_v41  ;;  %v4246_v41 = vld [vmem:[#allocation2 + $0x440] ss:$20 sps:$4 sm:$0xff]  }
 0x106   :  { %2144 = vmatprep.mubr.bf16.mxu0 %v4152_v42  ;;  %1762 = vmatmul.mubr.bf16.gmra.mrb[44].mxu1 %v4308_v21  ;;  %v4251_v42 = vld [vmem:[#allocation2 + $0x46c] ss:$20 sps:$4 sm:$0xff]  }
 0x107   :  { %1771 = vmatprep.mubr.bf16.mxu1 %v4310_v24  ;;  %v4378_v24 = vld [vmem:[#allocation2 + $0x43c] ss:$20 sps:$4 sm:$0xff]  }
 0x10d   :  { %2145 = vmatmul.mubr.bf16.gmra.mrb[56].mxu0 %v4154_v46  ;;  %v4254_v46 = vld [vmem:[#allocation2 + $0x468] ss:$20 sps:$4 sm:$0xff]  }
 0x10e   :  { %2154 = vmatprep.mubr.bf16.mxu0 %v4155_v47  ;;  %1772 = vmatmul.mubr.bf16.gmra.mrb[48].mxu1 %v4312_v25  ;;  %v4258_v47 = vld [vmem:[#allocation2 + $0x494] ss:$20 sps:$4 sm:$0xff]   ;;  %v4380_v25 = vld [vmem:[#allocation2 + $0x438] ss:$20 sps:$4 sm:$0xff]  }
 0x10f   :  { %1781 = vmatprep.mubr.bf16.mxu1 %v4315_v29 }
 0x115   :  { %2155 = vmatmul.mubr.bf16.gmra.mrb[60].mxu0 %v4157_v50  ;;  %v4260_v50 = vld [vmem:[#allocation2 + $0x490] ss:$20 sps:$4 sm:$0xff]  }
 0x116   :  { %2164 = vmatprep.mubr.bf16.mxu0 %v4158_v51  ;;  %1782 = vmatmul.mubr.bf16.gmra.mrb[52].mxu1 %v4317_v30  ;;  %v4264_v51 = vld [vmem:[#allocation2 + $0x4bc] ss:$20 sps:$4 sm:$0xff]  }
 0x117   :  { %1791 = vmatprep.mubr.bf16.mxu1 %v4319_v33 }
 0x11d   :  { %2165 = vmatmul.mubr.bf16.gmra.mrb[64].mxu0 %v4160_v55  ;;  %v4267_v55 = vld [vmem:[#allocation2 + $0x4b8] ss:$20 sps:$4 sm:$0xff]  }
 0x11e   :  { %2174 = vmatprep.mubr.bf16.mxu0 %v4164_v56  ;;  %1792 = vmatmul.mubr.bf16.gmra.mrb[56].mxu1 %v4321_v34  ;;  %v4271_v56 = vld [vmem:[#allocation2 + $0x4e4] ss:$20 sps:$4 sm:$0xff]  }
 0x11f   :  { %1801 = vmatprep.mubr.bf16.mxu1 %v4324_v39  ;;  %v4385_v34 = vld [vmem:[#allocation8 + $0x70] sm:$0xff]  }
 0x125   :  { %2175 = vmatmul.mubr.bf16.gmra.mrb[68].mxu0 %v4166_v59  ;;  %v4273_v59 = vld [vmem:[#allocation2 + $0x4e0] ss:$20 sps:$4 sm:$0xff]  }
 0x126   :  { %2184 = vmatprep.mubr.bf16.mxu0 %v4167_v60  ;;  %1802 = vmatmul.mubr.bf16.gmra.mrb[60].mxu1 %v4326_v40  ;;  %v4346_v60 = vld [vmem:[#allocation2 + $0x324] ss:$20 sps:$4 sm:$0xff]   ;;  %v4387_v40 = vld [vmem:[#allocation2 + $0x48c] ss:$20 sps:$4 sm:$0xff]  }
 0x127   :  { %1811 = vmatprep.mubr.bf16.mxu1 %v4328_v43  ;;  %v4318_v43 = vld [vmem:[#allocation2 + $0x178] ss:$20 sps:$4 sm:$0xff]  }
 0x12d   :  { %2185 = vmatmul.mubr.bf16.gmra.mrb[72].mxu0 %v4169_v0  ;;  %v4351_v0 = vld [vmem:[#allocation2 + $0x34c] ss:$20 sps:$4 sm:$0xff]  }
 0x12e   :  { %2194 = vmatprep.mubr.bf16.mxu0 %v4170_v1  ;;  %1812 = vmatmul.mubr.bf16.gmra.mrb[64].mxu1 %v4330_v44  ;;  %v4353_v1 = vld [vmem:[#allocation2 + $0x348] ss:$20 sps:$4 sm:$0xff]  }
 0x12f   :  { %1821 = vmatprep.mubr.bf16.mxu1 %v4333_v48  ;;  %v4393_v48 = vld [vmem:[#allocation2 + $0x4b0] ss:$20 sps:$4 sm:$0xff]  }
 0x135   :  { %2195 = vmatmul.mubr.bf16.gmra.mrb[76].mxu0 %v4172_v4  ;;  %v4357_v4 = vld [vmem:[#allocation2 + $0x370] ss:$20 sps:$4 sm:$0xff]  }
 0x136   :  { %2204 = vmatprep.mubr.bf16.mxu0 %v4176_v5  ;;  %1822 = vmatmul.mubr.bf16.gmra.mrb[68].mxu1 %v4335_v49  ;;  %v4358_v5 = vld [vmem:[#allocation8 + $0x58] sm:$0xff]  }
 0x137   :  { %1831 = vmatprep.mubr.bf16.mxu1 %v4337_v52  ;;  %3028 = vmatpush1.bf16.msra.mxu1 %v4358_v5 }
 0x138   :  { %3029 = vmatprep.subr.bf16.mxu1 %v5397_v35 }
 0x13b   :  { %3030 = vmatpush1.bf16.msra.mxu1 %v4367_v12 }
 0x13c   :  { %3031 = vmatprep.subr.bf16.mxu1 %v5397_v35 }
 0x13d   :  { %2205 = vmatmul.mubr.bf16.gmra.mrb[80].mxu0 %v4180_v9  ;;  %v4291_v9 = vld [vmem:[#allocation2 + $0x88] ss:$20 sps:$4 sm:$0xff]  }
 0x13e   :  { %2214 = vmatprep.mubr.bf16.mxu0 %v4185_v10  ;;  %1832 = vmatmul.mubr.bf16.gmra.mrb[72].mxu1 %v4339_v53  ;;  %v4364_v10 = vld [vmem:[#allocation2 + $0x3c4] ss:$20 sps:$4 sm:$0xff]  }
 0x13f   :  { %1841 = vmatprep.mubr.bf16.mxu1 %v4342_v57  ;;  %v4398_v57 = vld [vmem:[#allocation2 + $0x4d8] ss:$20 sps:$4 sm:$0xff]  }
 0x145   :  { %2215 = vmatmul.mubr.bf16.gmra.mrb[84].mxu0 %v4189_v13  ;;  %v4296_v13 = vld [vmem:[#allocation2 + $0xb0] ss:$20 sps:$4 sm:$0xff]  }
 0x146   :  { %2224 = vmatprep.mubr.bf16.mxu0 %v4194_v14  ;;  %1842 = vmatmul.mubr.bf16.gmra.mrb[76].mxu1 %v4344_v58  ;;  %v4369_v14 = vld [vmem:[#allocation2 + $0x3ec] ss:$20 sps:$4 sm:$0xff]   ;;  %v4327_v58 = vld [vmem:[#allocation2 + $0x1c8] ss:$20 sps:$4 sm:$0xff]  }
 0x147   :  { %1851 = vmatprep.mubr.bf16.mxu1 %v4346_v60 }
 0x14d   :  { %2225 = vmatmul.mubr.bf16.gmra.mrb[88].mxu0 %v4198_v18  ;;  %v4375_v18 = vld [vmem:[#allocation2 + $0x410] ss:$20 sps:$4 sm:$0xff]  }
 0x14e   :  { %2234 = vmatprep.mubr.bf16.mxu0 %v4203_v19  ;;  %1852 = vmatmul.mubr.bf16.gmra.mrb[80].mxu1 %v4348_v61  ;;  %v4376_v19 = vld [vmem:[#allocation8 + $0x68] sm:$0xff]  }
 0x14f   :  { %1861 = vmatprep.mubr.bf16.mxu1 %v4351_v0  ;;  %3032 = vmatpush1.bf16.msra.mxu1 %v4376_v19  ;;  %v4350_v19 = vld [vmem:[#allocation2 + $0x290] ss:$20 sps:$4 sm:$0xff]  }
 0x150   :  { %3033 = vmatprep.subr.bf16.mxu1 %v5397_v35 }
 0x153   :  { %3034 = vmatpush1.bf16.msra.mxu1 %v4385_v34 }
 0x154   :  { %3035 = vmatprep.subr.bf16.mxu1 %v5397_v35 }
 0x155   :  { %2235 = vmatmul.mubr.bf16.gmra.mrb[92].mxu0 %v4207_v22 }
 0x156   :  { %2244 = vmatprep.mubr.bf16.mxu0 %v4212_v23  ;;  %1862 = vmatmul.mubr.bf16.gmra.mrb[84].mxu1 %v4353_v1 }
 0x157   :  { %1871 = vmatprep.mubr.bf16.mxu1 %v4355_v3 }
 0x15d   :  { %2245 = vmatmul.mubr.bf16.gmra.mrb[96].mxu0 %v4216_v27  ;;  %v4309_v27 = vld [vmem:[#allocation2 + $0x128] ss:$20 sps:$4 sm:$0xff]  }
 0x15e   :  { %2254 = vmatprep.mubr.bf16.mxu0 %v4224_v28  ;;  %1872 = vmatmul.mubr.bf16.gmra.mrb[88].mxu1 %v4357_v4  ;;  %v4336_v4 = vld [vmem:[#allocation2 + $0x218] ss:$20 sps:$4 sm:$0xff]  }
 0x15f   :  { %1881 = vmatprep.mubr.bf16.mxu1 %v4360_v7 }
 0x165   :  { %2255 = vmatmul.mubr.bf16.gmra.mrb[100].mxu0 %v4228_v31  ;;  %v4382_v31 = vld [vmem:[#allocation2 + $0x464] ss:$20 sps:$4 sm:$0xff]  }
 0x166   :  { %2264 = vmatprep.mubr.bf16.mxu0 %v4233_v32  ;;  %1882 = vmatmul.mubr.bf16.gmra.mrb[92].mxu1 %v4362_v8  ;;  %v4384_v32 = vld [vmem:[#allocation2 + $0x460] ss:$20 sps:$4 sm:$0xff]  }
 0x167   :  { %1891 = vmatprep.mubr.bf16.mxu1 %v4364_v10 }
 0x16d   :  { %2265 = vmatmul.mubr.bf16.gmra.mrb[104].mxu0 %v4237_v37 }
 0x16e   :  { %2274 = vmatprep.mubr.bf16.mxu0 %v4242_v38  ;;  %1892 = vmatmul.mubr.bf16.gmra.mrb[96].mxu1 %v4366_v11 }
 0x16f   :  { %1901 = vmatprep.mubr.bf16.mxu1 %v4369_v14  ;;  %v4345_v14 = vld [vmem:[#allocation2 + $0x268] ss:$20 sps:$4 sm:$0xff]  }
 0x175   :  { %2275 = vmatmul.mubr.bf16.gmra.mrb[108].mxu0 %v4246_v41  ;;  %v4389_v41 = vld [vmem:[#allocation2 + $0x488] ss:$20 sps:$4 sm:$0xff]  }
 0x176   :  { %2284 = vmatprep.mubr.bf16.mxu0 %v4251_v42  ;;  %1902 = vmatmul.mubr.bf16.gmra.mrb[100].mxu1 %v4371_v15 }
 0x177   :  { %1911 = vmatprep.mubr.bf16.mxu1 %v4373_v17 }
 0x17d   :  { %2285 = vmatmul.mubr.bf16.gmra.mrb[112].mxu0 %v4254_v46 }
 0x17e   :  { %2294 = vmatprep.mubr.bf16.mxu0 %v4258_v47  ;;  %1912 = vmatmul.mubr.bf16.gmra.mrb[104].mxu1 %v4375_v18  ;;  %v4391_v47 = vld [vmem:[#allocation2 + $0x4b4] ss:$20 sps:$4 sm:$0xff]  }
 0x17f   :  { %1921 = vmatprep.mubr.bf16.mxu1 %v4378_v24 }
 0x181   :  { %v4678_v21 = vpop.f32.mrb[0].mxu1 }
 0x182   :  { %v4680_v22 = vpop.f32.mrb[1].mxu1 }
 0x183   :  { %v4683_v23 = vpop.f32.mrb[2].mxu1 }
 0x184   :  { %v4686_v26 = vpop.f32.mrb[3].mxu1 }
 0x185   :  { %2295 = vmatmul.mubr.bf16.gmra.mrb[116].mxu0 %v4260_v50  ;;  %v4394_v50 = vld [vmem:[#allocation8 + $0x78] sm:$0xff]  }
 0x186   :  { %2304 = vmatprep.mubr.bf16.mxu0 %v4264_v51  ;;  %1922 = vmatmul.mubr.bf16.gmra.mrb[108].mxu1 %v4380_v25  ;;  %v4323_v51 = vld [vmem:[#allocation2 + $0x1a0] ss:$20 sps:$4 sm:$0xff]  }
 0x187   :  { %1931 = vmatprep.mubr.bf16.mxu1 %v4382_v31  ;;  %3036 = vmatpush1.bf16.msra.mxu1 %v4394_v50  ;;  %v4354_v31 = vld [vmem:[#allocation2 + $0x2b8] ss:$20 sps:$4 sm:$0xff]  }
 0x189   :  { %v4688_v28 = vpop.f32.mrb[4].mxu1 }
 0x18a   :  { %v4690_v29 = vpop.f32.mrb[5].mxu1 }
 0x18b   :  { %v4693_v30 = vpop.f32.mrb[6].mxu1 }
 0x18c   :  { %v4696_v33 = vpop.f32.mrb[7].mxu1 }
 0x18d   :  { %2305 = vmatmul.mubr.bf16.gmra.mrb[120].mxu0 %v4267_v55  ;;  %v4396_v55 = vld [vmem:[#allocation2 + $0x4dc] ss:$20 sps:$4 sm:$0xff]  }
 0x18e   :  { %2314 = vmatprep.mubr.bf16.mxu0 %v4271_v56  ;;  %1932 = vmatmul.mubr.bf16.gmra.mrb[112].mxu1 %v4384_v32 }
 0x18f   :  { %1941 = vmatprep.mubr.bf16.mxu1 %v4387_v40 }
 0x191   :  { %v4699_v37 = vpop.f32.mrb[8].mxu1 }
 0x192   :  { %v4701_v38 = vpop.f32.mrb[9].mxu1 }
 0x193   :  { %v4704_v39 = vpop.f32.mrb[10].mxu1 }
 0x194   :  { %v4707_v42 = vpop.f32.mrb[11].mxu1 }
 0x195   :  { %2315 = vmatmul.mubr.bf16.gmra.mrb[124].mxu0 %v4273_v59 }
 0x196   :  { %2357 = vmatprep.mubr.bf16.mxu0 %v5397_v35  ;;  %1942 = vmatmul.mubr.bf16.gmra.mrb[116].mxu1 %v4389_v41  ;;  %v4359_v41 = vld [vmem:[#allocation2 + $0x2e0] ss:$20 sps:$4 sm:$0xff]  }
 0x197   :  { %1951 = vmatprep.mubr.bf16.mxu1 %v4391_v47 }
 0x199   :  { %v4709_v44 = vpop.f32.mrb[12].mxu1 }
 0x19a   :  { %v4711_v45 = vpop.f32.mrb[13].mxu1 }
 0x19b   :  { %v4714_v46 = vpop.f32.mrb[14].mxu1 }
 0x19c   :  { %v4717_v49 = vpop.f32.mrb[15].mxu1 }
 0x19d   :  { %3610 = vmatmul.mubr.msk.bf16.vlgmr.msra.gmra.mrb[0].mxu0 %vm1522_vm0, %v4278_v63  ;;  %v4332_v63 = vld [vmem:[#allocation2 + $0x1f0] ss:$20 sps:$4 sm:$0xff]  }
 0x19e   :  { %2367 = vmatprep.mubr.bf16.mxu0 %v5397_v35  ;;  %1952 = vmatmul.mubr.bf16.gmra.mrb[120].mxu1 %v4393_v48 }
 0x19f   :  { %1961 = vmatprep.mubr.bf16.mxu1 %v4396_v55 }
 0x1a1   :  { %v4719_v52 = vpop.f32.mrb[16].mxu1 }
 0x1a2   :  { %v4721_v53 = vpop.f32.mrb[17].mxu1 }
 0x1a3   :  { %v4724_v54 = vpop.f32.mrb[18].mxu1 }
 0x1a4   :  { %v4727_v56 = vpop.f32.mrb[19].mxu1 }
 0x1a5   :  { %3611 = vmatmul.mubr.msk.bf16.gmra.mrb[4].mxu0 %vm1522_vm0, %v4282_v2 }
 0x1a6   :  { %2377 = vmatprep.mubr.bf16.mxu0 %v5397_v35  ;;  %1962 = vmatmul.mubr.bf16.gmra.mrb[124].mxu1 %v4398_v57 }
 0x1a9   :  { %v4729_v59 = vpop.f32.mrb[20].mxu1 }
 0x1aa   :  { %v4731_v60 = vpop.f32.mrb[21].mxu1 }
 0x1ab   :  { %v4734_v61 = vpop.f32.mrb[22].mxu1 }
 0x1ac   :  { %v4737_v62 = vpop.f32.mrb[23].mxu1 }
 0x1ad   :  { %3612 = vmatmul.mubr.msk.bf16.gmra.mrb[8].mxu0 %vm1522_vm0, %v4287_v6 }
 0x1ae   :  { %2387 = vmatprep.mubr.bf16.mxu0 %v5397_v35 }
 0x1b1   :  { %v4739_v0 = vpop.f32.mrb[24].mxu1 }
 0x1b2   :  { %v4741_v1 = vpop.f32.mrb[25].mxu1 }
 0x1b3   :  { %v4744_v2 = vpop.f32.mrb[26].mxu1 }
 0x1b4   :  { %v4747_v3 = vpop.f32.mrb[27].mxu1 }
 0x1b5   :  { %3613 = vmatmul.mubr.msk.bf16.gmra.mrb[12].mxu0 %vm1522_vm0, %v4291_v9  ;;  %v4341_v9 = vld [vmem:[#allocation2 + $0x240] ss:$20 sps:$4 sm:$0xff]  }
 0x1b6   :  { %2397 = vmatprep.mubr.bf16.mxu0 %v5397_v35 }
 0x1b9   :  { %v4749_v5 = vpop.f32.mrb[28].mxu1 }
 0x1ba   :  { %v4751_v6 = vpop.f32.mrb[29].mxu1 }
 0x1bb   :  { %v4754_v7 = vpop.f32.mrb[30].mxu1 }
 0x1bc   :  { %v4757_v8 = vpop.f32.mrb[31].mxu1 }
 0x1bd   :  { %3614 = vmatmul.mubr.msk.bf16.gmra.mrb[16].mxu0 %vm1522_vm0, %v4296_v13 }
 0x1be   :  { %2407 = vmatprep.mubr.bf16.mxu0 %v5397_v35 }
 0x1c1   :  { %v4759_v10 = vpop.f32.mrb[32].mxu1 }
 0x1c2   :  { %v4761_v11 = vpop.f32.mrb[33].mxu1 }
 0x1c3   :  { %v4764_v12 = vpop.f32.mrb[34].mxu1 }
 0x1c4   :  { %v4767_v13 = vpop.f32.mrb[35].mxu1 }
 0x1c5   :  { %3615 = vmatmul.mubr.msk.bf16.gmra.mrb[20].mxu0 %vm1522_vm0, %v4300_v16 }
 0x1c6   :  { %2417 = vmatprep.mubr.bf16.mxu0 %v5397_v35 }
 0x1c9   :  { %v4769_v15 = vpop.f32.mrb[36].mxu1 }
 0x1ca   :  { %v4771_v16 = vpop.f32.mrb[37].mxu1 }
 0x1cb   :  { %v4774_v17 = vpop.f32.mrb[38].mxu1 }
 0x1cc   :  { %v4777_v18 = vpop.f32.mrb[39].mxu1 }
 0x1cd   :  { %3616 = vmatmul.mubr.msk.bf16.gmra.mrb[24].mxu0 %vm1522_vm0, %v4305_v20 }
 0x1ce   :  { %2427 = vmatprep.mubr.bf16.mxu0 %v5397_v35 }
 0x1d1   :  { %v4779_v20 = vpop.f32.mrb[40].mxu1 }
 0x1d2   :  { %v4781_v24 = vpop.f32.mrb[41].mxu1 }
 0x1d3   :  { %v4784_v25 = vpop.f32.mrb[42].mxu1 }
 0x1d5   :  { %3617 = vmatmul.mubr.msk.bf16.gmra.mrb[28].mxu0 %vm1522_vm0, %v4309_v27  ;;  %v4787_v27 = vpop.f32.mrb[43].mxu1 }
 0x1d6   :  { %2437 = vmatprep.mubr.bf16.mxu0 %v5397_v35 }
 0x1d9   :  { %v4789_v32 = vpop.f32.mrb[44].mxu1 }
 0x1da   :  { %v4791_v34 = vpop.f32.mrb[45].mxu1 }
 0x1dd   :  { %3618 = vmatmul.mubr.msk.bf16.gmra.mrb[32].mxu0 %vm1522_vm0, %v4314_v36  ;;  %v4794_v36 = vpop.f32.mrb[46].mxu1 }
 0x1de   :  { %2447 = vmatprep.mubr.bf16.mxu0 %v5397_v35  ;;  %5399 = vst [vmem:[#allocation16_spill] sm:$0xff] %v4794_v36  ;;  %v4797_v40 = vpop.f32.mrb[47].mxu1  ;;  %v5438_v36 = vmov 0  }
 0x1df   :  { %5400 = vst [vmem:[#allocation17_spill] sm:$0xff] %v4797_v40 }
 0x1e5   :  { %3619 = vmatmul.mubr.msk.bf16.gmra.mrb[36].mxu0 %vm1522_vm0, %v4318_v43  ;;  %v4799_v43 = vpop.f32.mrb[48].mxu1 }
 0x1e6   :  { %2457 = vmatprep.mubr.bf16.mxu0 %v5397_v35  ;;  %5401 = vst [vmem:[#allocation18_spill] sm:$0xff] %v4799_v43  ;;  %v4801_v47 = vpop.f32.mrb[49].mxu1 }
 0x1e7   :  { %5402 = vst [vmem:[#allocation19_spill] sm:$0xff] %v4801_v47  ;;  %v4804_v48 = vpop.f32.mrb[50].mxu1 }
 0x1e8   :  { %5403 = vst [vmem:[#allocation20_spill] sm:$0xff] %v4804_v48  ;;  %v4807_v50 = vpop.f32.mrb[51].mxu1 }
 0x1e9   :  { %5404 = vst [vmem:[#allocation21_spill] sm:$0xff] %v4807_v50  ;;  %v4809_v55 = vpop.f32.mrb[52].mxu1  ;;  %v4395_v50 = vld [vmem:[#allocation2 + $0x420] ss:$20 sps:$4 sm:$0xff]  }
 0x1ea   :  { %5405 = vst [vmem:[#allocation22_spill] sm:$0xff] %v4809_v55  ;;  %v4811_v57 = vpop.f32.mrb[53].mxu1 }
 0x1eb   :  { %5406 = vst [vmem:[#allocation23_spill] sm:$0xff] %v4811_v57 }
 0x1ed   :  { %3620 = vmatmul.mubr.msk.bf16.gmra.mrb[40].mxu0 %vm1522_vm0, %v4323_v51  ;;  %v4363_v51 = vld [vmem:[#allocation2 + $0x308] ss:$20 sps:$4 sm:$0xff]  }
 0x1ee   :  { %2467 = vmatprep.mubr.bf16.mxu0 %v5397_v35 }
 0x1f5   :  { %3621 = vmatmul.mubr.msk.bf16.gmra.mrb[44].mxu0 %vm1522_vm0, %v4327_v58  ;;  %v4814_v58 = vpop.f32.mrb[54].mxu1 }
 0x1f6   :  { %2477 = vmatprep.mubr.bf16.mxu0 %v5397_v35  ;;  %5407 = vst [vmem:[#allocation24_spill] sm:$0xff] %v4814_v58 }
 0x1fd   :  { %3622 = vmatmul.mubr.msk.bf16.gmra.mrb[48].mxu0 %vm1522_vm0, %v4332_v63  ;;  %v4817_v63 = vpop.f32.mrb[55].mxu1 }
 0x1fe   :  { %2487 = vmatprep.mubr.bf16.mxu0 %v5397_v35  ;;  %5408 = vst [vmem:[#allocation25_spill] sm:$0xff] %v4817_v63 }
 0x205   :  { %3623 = vmatmul.mubr.msk.bf16.gmra.mrb[52].mxu0 %vm1522_vm0, %v4336_v4  ;;  %v4368_v4 = vld [vmem:[#allocation2 + $0x330] ss:$20 sps:$4 sm:$0xff]  }
 0x206   :  { %2497 = vmatprep.mubr.bf16.mxu0 %v5397_v35 }
 0x20d   :  { %3624 = vmatmul.mubr.msk.bf16.gmra.mrb[56].mxu0 %vm1522_vm0, %v4341_v9  ;;  %v4819_v9 = vpop.f32.mrb[56].mxu1 }
 0x20e   :  { %2507 = vmatprep.mubr.bf16.mxu0 %v5397_v35  ;;  %5409 = vst [vmem:[#allocation26_spill] sm:$0xff] %v4819_v9 }
 0x215   :  { %3625 = vmatmul.mubr.msk.bf16.gmra.mrb[60].mxu0 %vm1522_vm0, %v4345_v14  ;;  %v4821_v14 = vpop.f32.mrb[57].mxu1 }
 0x216   :  { %2517 = vmatprep.mubr.bf16.mxu0 %v5397_v35  ;;  %5410 = vst [vmem:[#allocation27_spill] sm:$0xff] %v4821_v14 }
 0x21d   :  { %3626 = vmatmul.mubr.msk.bf16.gmra.mrb[64].mxu0 %vm1522_vm0, %v4350_v19  ;;  %v4824_v19 = vpop.f32.mrb[58].mxu1 }
 0x21e   :  { %2527 = vmatprep.mubr.bf16.mxu0 %v5397_v35  ;;  %5411 = vst [vmem:[#allocation28_spill] sm:$0xff] %v4824_v19 }
 0x225   :  { %3627 = vmatmul.mubr.msk.bf16.gmra.mrb[68].mxu0 %vm1522_vm0, %v4354_v31  ;;  %v4827_v31 = vpop.f32.mrb[59].mxu1 }
 0x226   :  { %2537 = vmatprep.mubr.bf16.mxu0 %v5397_v35  ;;  %5412 = vst [vmem:[#allocation29_spill] sm:$0xff] %v4827_v31 }
 0x22d   :  { %3628 = vmatmul.mubr.msk.bf16.gmra.mrb[72].mxu0 %vm1522_vm0, %v4359_v41  ;;  %v4372_v41 = vld [vmem:[#allocation2 + $0x358] ss:$20 sps:$4 sm:$0xff]  }
 0x22e   :  { %2547 = vmatprep.mubr.bf16.mxu0 %v5397_v35 }
 0x235   :  { %3629 = vmatmul.mubr.msk.bf16.gmra.mrb[76].mxu0 %vm1522_vm0, %v4363_v51  ;;  %v4829_v51 = vpop.f32.mrb[60].mxu1 }
 0x236   :  { %2557 = vmatprep.mubr.bf16.mxu0 %v5397_v35  ;;  %5413 = vst [vmem:[#allocation30_spill] sm:$0xff] %v4829_v51  ;;  %v4831_v58 = vpop.f32.mrb[61].mxu1 }
 0x237   :  { %5414 = vst [vmem:[#allocation31_spill] sm:$0xff] %v4831_v58  ;;  %v4834_v63 = vpop.f32.mrb[62].mxu1 }
 0x238   :  { %5415 = vst [vmem:[#allocation32_spill] sm:$0xff] %v4834_v63  ;;  %v4837_v14 = vpop.f32.mrb[63].mxu1 }
 0x239   :  { %5416 = vst [vmem:[#allocation33_spill] sm:$0xff] %v4837_v14  ;;  %v4839_v9 = vpop.f32.mrb[64].mxu1 }
 0x23a   :  { %5417 = vst [vmem:[#allocation34_spill] sm:$0xff] %v4839_v9  ;;  %v4841_v19 = vpop.f32.mrb[65].mxu1 }
 0x23b   :  { %5418 = vst [vmem:[#allocation35_spill] sm:$0xff] %v4841_v19  ;;  %v4844_v31 = vpop.f32.mrb[66].mxu1 }
 0x23c   :  { %5419 = vst [vmem:[#allocation36_spill] sm:$0xff] %v4844_v31  ;;  %v4847_v58 = vpop.f32.mrb[67].mxu1 }
 0x23d   :  { %3630 = vmatmul.mubr.msk.bf16.gmra.mrb[80].mxu0 %vm1522_vm0, %v4368_v4  ;;  %v4377_v4 = vld [vmem:[#allocation2 + $0x380] ss:$20 sps:$4 sm:$0xff]   ;;  %5420 = vst [vmem:[#allocation37_spill] sm:$0xff] %v4847_v58  ;;  %v4849_v51 = vpop.f32.mrb[68].mxu1 }
 0x23e   :  { %2567 = vmatprep.mubr.bf16.mxu0 %v5397_v35  ;;  %5421 = vst [vmem:[#allocation38_spill] sm:$0xff] %v4849_v51  ;;  %v4851_v63 = vpop.f32.mrb[69].mxu1  ;;  %v4390_v51 = vld [vmem:[#allocation2 + $0x3f8] ss:$20 sps:$4 sm:$0xff]  }
 0x23f   :  { %5422 = vst [vmem:[#allocation39_spill] sm:$0xff] %v4851_v63  ;;  %v4854_v14 = vpop.f32.mrb[70].mxu1 }
 0x240   :  { %5423 = vst [vmem:[#allocation40_spill] sm:$0xff] %v4854_v14  ;;  %v4857_v19 = vpop.f32.mrb[71].mxu1 }
 0x241   :  { %5424 = vst [vmem:[#allocation41_spill] sm:$0xff] %v4857_v19  ;;  %v4859_v9 = vpop.f32.mrb[72].mxu1 }
 0x242   :  { %5425 = vst [vmem:[#allocation42_spill] sm:$0xff] %v4859_v9  ;;  %v4861_v31 = vpop.f32.mrb[73].mxu1 }
 0x243   :  { %5426 = vst [vmem:[#allocation43_spill] sm:$0xff] %v4861_v31  ;;  %v4864_v58 = vpop.f32.mrb[74].mxu1  ;;  %v350_v31 = vld [vmem:[#allocation7] sm:$0x3] }
 0x244   :  { %5427 = vst [vmem:[#allocation44_spill] sm:$0xff] %v4864_v58  ;;  %v4867_v63 = vpop.f32.mrb[75].mxu1 }
 0x245   :  { %3631 = vmatmul.mubr.msk.bf16.gmra.mrb[84].mxu0 %vm1522_vm0, %v4372_v41  ;;  %v4381_v41 = vld [vmem:[#allocation2 + $0x3a8] ss:$20 sps:$4 sm:$0xff]   ;;  %5428 = vst [vmem:[#allocation45_spill] sm:$0xff] %v4867_v63  ;;  %v4869_v57 = vpop.f32.mrb[76].mxu1 }
 0x246   :  { %2577 = vmatprep.mubr.bf16.mxu0 %v5397_v35  ;;  %5429 = vst [vmem:[#allocation46_spill] sm:$0xff] %v4869_v57  ;;  %v4871_v55 = vpop.f32.mrb[77].mxu1 }
 0x247   :  { %5430 = vst [vmem:[#allocation47_spill] sm:$0xff] %v4871_v55  ;;  %v4874_v9 = vpop.f32.mrb[78].mxu1 }
 0x248   :  { %5431 = vst [vmem:[#allocation48_spill] sm:$0xff] %v4874_v9 }
 0x24d   :  { %3632 = vmatmul.mubr.msk.bf16.gmra.mrb[88].mxu0 %vm1522_vm0, %v4377_v4  ;;  %v4386_v4 = vld [vmem:[#allocation2 + $0x3d0] ss:$20 sps:$4 sm:$0xff]  }
 0x24e   :  { %2587 = vmatprep.mubr.bf16.mxu0 %v5397_v35 }
 0x255   :  { %3633 = vmatmul.mubr.msk.bf16.gmra.mrb[92].mxu0 %vm1522_vm0, %v4381_v41  ;;  %v352_v41 = vlaneseq }
 0x256   :  { %2597 = vmatprep.mubr.bf16.mxu0 %v5397_v35 }
 0x257   :  { %v353_v14 = vshrl.u32 %v352_v41, 7 }
 0x259   :  { %v354_v58 = vsub.s32 0, %v353_v14  ;;  %v358_v19 = vsub.s32 1, %v353_v14 }
 0x25b   :  { %v4879_v63 = vrot.slane %v350_v31, %v354_v58  ;;  %v4883_v41 = vrot.slane %v350_v31, %v358_v19 }
 0x25d   :  { %3634 = vmatmul.mubr.msk.bf16.gmra.mrb[96].mxu0 %vm1522_vm0, %v4386_v4  ;;  %v4877_v4 = vpop.f32.mrb[79].mxu1  ;;  %v1654_v14 = vadd.f32 %v4678_v21, %v4879_v63  ;;  %v1656_v58 = vadd.f32 %v4680_v22, %v4883_v41  ;;  %v1658_v19 = vadd.f32 %v4683_v23, %v4879_v63 }
 0x25e   :  { %2607 = vmatprep.mubr.bf16.mxu0 %v5397_v35  ;;  %5432 = vst [vmem:[#allocation49_spill] sm:$0xff] %v4877_v4  ;;  %v4881_v48 = vpop.f32.mrb[80].mxu1 }
 0x25f   :  { %5433 = vst [vmem:[#allocation50_spill] sm:$0xff] %v4881_v48  ;;  %v4885_v57 = vpop.f32.mrb[81].mxu1  ;;  %v4399_v48 = vld [vmem:[#allocation2 + $0x448] ss:$20 sps:$4 sm:$0xff]  }
 0x260   :  { %5434 = vst [vmem:[#allocation51_spill] sm:$0xff] %v4885_v57 }
 0x265   :  { %3635 = vmatmul.mubr.msk.bf16.gmra.mrb[100].mxu0 %vm1522_vm0, %v4390_v51  ;;  %v4888_v51 = vpop.f32.mrb[82].mxu1 }
 0x266   :  { %2617 = vmatprep.mubr.bf16.mxu0 %v5397_v35  ;;  %5435 = vst [vmem:[#allocation52_spill] sm:$0xff] %v4888_v51  ;;  %v4891_v9 = vpop.f32.mrb[83].mxu1 }
 0x267   :  { %5436 = vst [vmem:[#allocation53_spill] sm:$0xff] %v4891_v9  ;;  %v4901_v47 = vpop.f32.mrb[84].mxu1 }
 0x268   :  { %v4903_v43 = vpop.f32.mrb[85].mxu1 }
 0x269   :  { %v4906_v23 = vpop.f32.mrb[86].mxu1 }
 0x26a   :  { %5437 = vst [vmem:[#allocation54_spill] sm:$0xff] %v4906_v23 }
 0x26d   :  { %3636 = vmatmul.mubr.msk.bf16.gmra.mrb[104].mxu0 %vm1522_vm0, %v4395_v50  ;;  %v1660_v50 = vadd.f32 %v4686_v26, %v4883_v41  ;;  %v4909_v26 = vpop.f32.mrb[87].mxu1 }
 0x26e   :  { %2627 = vmatprep.mubr.bf16.mxu0 %v5397_v35  ;;  %5439 = vst [vmem:[#allocation55_spill] sm:$0xff] %v4909_v26 }
 0x270   :  { %v2359_v4 = vpop.f32.mrb[0].mxu0 }
 0x271   :  { %v3660_v31 = vadd.f32 %v2359_v4, %v1654_v14  ;;  %v2361_v57 = vpop.f32.mrb[1].mxu0 }
 0x272   :  { %v3662_v51 = vadd.f32 %v2361_v57, %v1656_v58  ;;  %v2363_v35 = vpop.f32.mrb[2].mxu0 }
 0x273   :  { %v3664_v55 = vadd.f32 %v2363_v35, %v1658_v19  ;;  %v2365_v9 = vpop.f32.mrb[3].mxu0  ;;  %v2678_v22 = vmax.f32 %v3660_v31, 0.0  ;;  %v1664_v35 = vadd.f32 %v4688_v28, %v4879_v63 }
 0x274   :  { %v3666_v21 = vadd.f32 %v2365_v9, %v1660_v50  ;;  %v2679_v4 = vmax.f32 %v3662_v51, 0.0  ;;  %v1666_v9 = vadd.f32 %v4690_v29, %v4883_v41  ;;  %v4400_v51 = vld [vmem:[#allocation2 + $0x470] ss:$20 sps:$4 sm:$0xff]   ;;  %v1670_v50 = vadd.f32 %v4696_v33, %v4883_v41 }
 0x275   :  { %v2680_v40 = vmax.f32 %v3664_v55, 0.0  ;;  %3637 = vmatmul.mubr.msk.bf16.gmra.mrb[108].mxu0 %vm1522_vm0, %v4399_v48  ;;  %v1668_v48 = vadd.f32 %v4693_v30, %v4879_v63 }
 0x276   :  { %v2681_v14 = vmax.f32 %v3666_v21, 0.0  ;;  %2637 = vmatprep.mubr.bf16.mxu0 %v5438_v36 }
 0x277   :  { %v2806_v57 = vpack.c.bf16 %v2680_v40, %v2678_v22  ;;  %v4919_v40 = vpop.f32.mrb[88].mxu1 }
 0x278   :  { %v2807_v58 = vpack.c.bf16 %v2681_v14, %v2679_v4  ;;  %v2369_v19 = vpop.f32.mrb[4].mxu0  ;;  %v4921_v22 = vpop.f32.mrb[89].mxu1 }
 0x279   :  { %v3668_v55 = vadd.f32 %v2369_v19, %v1664_v35  ;;  %v2371_v31 = vpop.f32.mrb[5].mxu0  ;;  %v4924_v30 = vpop.f32.mrb[90].mxu1 }
 0x27a   :  { %v3670_v21 = vadd.f32 %v2371_v31, %v1666_v9  ;;  %v2373_v26 = vpop.f32.mrb[6].mxu0  ;;  %3037 = vmatprep.mubr.bf16.mxu1 %v2807_v58  ;;  %v4927_v33 = vpop.f32.mrb[91].mxu1  ;;  %v1676_v9 = vadd.f32 %v4701_v38, %v4883_v41 }
 0x27b   :  { %v3672_v23 = vadd.f32 %v2373_v26, %v1668_v48  ;;  %v2375_v28 = vpop.f32.mrb[7].mxu0  ;;  %3038 = vmatmul.mubr.bf16.vlgmr.msra.gmra.mrb[128].mxu1 %v2806_v57  ;;  %v2682_v4 = vmax.f32 %v3668_v55, 0.0  ;;  %v1674_v26 = vadd.f32 %v4699_v37, %v4879_v63 }
 0x27c   :  { %v3674_v29 = vadd.f32 %v2375_v28, %v1670_v50  ;;  %v2683_v35 = vmax.f32 %v3670_v21, 0.0  ;;  %v1680_v50 = vadd.f32 %v4707_v42, %v4883_v41 }
 0x27d   :  { %v2684_v14 = vmax.f32 %v3672_v23, 0.0  ;;  %3638 = vmatmul.mubr.msk.bf16.gmra.mrb[112].mxu0 %vm1522_vm0, %v4400_v51  ;;  %v1678_v23 = vadd.f32 %v4704_v39, %v4879_v63  ;;  %v4401_v51 = vld [vmem:[#allocation2 + $0x498] ss:$20 sps:$4 sm:$0xff]  }
 0x27e   :  { %v2685_v19 = vmax.f32 %v3674_v29, 0.0  ;;  %2647 = vmatprep.mubr.bf16.mxu0 %v5438_v36 }
 0x27f   :  { %v2808_v57 = vpack.c.bf16 %v2684_v14, %v2682_v4  ;;  %v4937_v4 = vpop.f32.mrb[92].mxu1 }
 0x280   :  { %v2809_v58 = vpack.c.bf16 %v2685_v19, %v2683_v35  ;;  %v2379_v48 = vpop.f32.mrb[8].mxu0  ;;  %v4939_v14 = vpop.f32.mrb[93].mxu1 }
 0x281   :  { %v3676_v55 = vadd.f32 %v2379_v48, %v1674_v26  ;;  %v2381_v31 = vpop.f32.mrb[9].mxu0  ;;  %v4942_v39 = vpop.f32.mrb[94].mxu1 }
 0x282   :  { %v3678_v21 = vadd.f32 %v2381_v31, %v1676_v9  ;;  %v2383_v28 = vpop.f32.mrb[10].mxu0  ;;  %3045 = vmatprep.mubr.bf16.mxu1 %v2809_v58  ;;  %v4945_v42 = vpop.f32.mrb[95].mxu1  ;;  %v1686_v58 = vadd.f32 %v4711_v45, %v4883_v41  ;;  %v1688_v31 = vadd.f32 %v4714_v46, %v4879_v63 }
 0x283   :  { %v3680_v29 = vadd.f32 %v2383_v28, %v1678_v23  ;;  %v2385_v37 = vpop.f32.mrb[11].mxu0  ;;  %3046 = vmatmul.mubr.bf16.gmra.mrb[132].mxu1 %v2808_v57  ;;  %v2686_v35 = vmax.f32 %v3676_v55, 0.0  ;;  %v1684_v57 = vadd.f32 %v4709_v44, %v4879_v63  ;;  %v1690_v28 = vadd.f32 %v4717_v49, %v4883_v41 }
 0x284   :  { %v3682_v38 = vadd.f32 %v2385_v37, %v1680_v50  ;;  %v2687_v26 = vmax.f32 %v3678_v21, 0.0  ;;  %v4402_v21 = vld [vmem:[#allocation2 + $0x4c0] ss:$20 sps:$4 sm:$0xff]  }
 0x285   :  { %v2688_v19 = vmax.f32 %v3680_v29, 0.0  ;;  %3639 = vmatmul.mubr.msk.bf16.gmra.mrb[116].mxu0 %vm1522_vm0, %v4401_v51 }
 0x286   :  { %v2689_v48 = vmax.f32 %v3682_v38, 0.0  ;;  %2657 = vmatprep.mubr.bf16.mxu0 %v5438_v36 }
 0x287   :  { %v2810_v9 = vpack.c.bf16 %v2688_v19, %v2686_v35  ;;  %v4955_v35 = vpop.f32.mrb[96].mxu1 }
 0x288   :  { %v2811_v23 = vpack.c.bf16 %v2689_v48, %v2687_v26  ;;  %v2389_v55 = vpop.f32.mrb[12].mxu0  ;;  %v4957_v19 = vpop.f32.mrb[97].mxu1 }
 0x289   :  { %v3684_v51 = vadd.f32 %v2389_v55, %v1684_v57  ;;  %v2391_v50 = vpop.f32.mrb[13].mxu0  ;;  %v4960_v46 = vpop.f32.mrb[98].mxu1 }
 0x28a   :  { %v3686_v29 = vadd.f32 %v2391_v50, %v1686_v58  ;;  %v2393_v37 = vpop.f32.mrb[14].mxu0  ;;  %3053 = vmatprep.mubr.bf16.mxu1 %v2811_v23  ;;  %v4963_v49 = vpop.f32.mrb[99].mxu1  ;;  %v1696_v23 = vadd.f32 %v4721_v53, %v4883_v41  ;;  %v1698_v50 = vadd.f32 %v4724_v54, %v4879_v63 }
 0x28b   :  { %v3688_v38 = vadd.f32 %v2393_v37, %v1688_v31  ;;  %v2395_v44 = vpop.f32.mrb[15].mxu0  ;;  %3054 = vmatmul.mubr.bf16.gmra.mrb[136].mxu1 %v2810_v9  ;;  %v2690_v26 = vmax.f32 %v3684_v51, 0.0  ;;  %v1694_v9 = vadd.f32 %v4719_v52, %v4879_v63 }
 0x28c   :  { %v3690_v45 = vadd.f32 %v2395_v44, %v1690_v28  ;;  %v2691_v57 = vmax.f32 %v3686_v29, 0.0  ;;  %v4403_v29 = vld [vmem:[#allocation2 + $0x4e8] ss:$20 sps:$4 sm:$0xff]  }
 0x28d   :  { %v2692_v48 = vmax.f32 %v3688_v38, 0.0  ;;  %3640 = vmatmul.mubr.msk.bf16.gmra.mrb[120].mxu0 %vm1522_vm0, %v4402_v21 }
 0x28e   :  { %v2693_v55 = vmax.f32 %v3690_v45, 0.0  ;;  %2667 = vmatprep.mubr.bf16.mxu0 %v5438_v36  ;;  %v1700_v36 = vadd.f32 %v4727_v56, %v4883_v41  ;;  %v4973_v45 = vpop.f32.mrb[100].mxu1 }
 0x28f   :  { %v2812_v58 = vpack.c.bf16 %v2692_v48, %v2690_v26  ;;  %v4975_v26 = vpop.f32.mrb[101].mxu1 }
 0x290   :  { %v2813_v31 = vpack.c.bf16 %v2693_v55, %v2691_v57  ;;  %v2399_v51 = vpop.f32.mrb[16].mxu0  ;;  %v4978_v54 = vpop.f32.mrb[102].mxu1 }
 0x291   :  { %v3692_v21 = vadd.f32 %v2399_v51, %v1694_v9  ;;  %v2401_v28 = vpop.f32.mrb[17].mxu0  ;;  %v4980_v56 = vpop.f32.mrb[103].mxu1 }
 0x292   :  { %v3694_v37 = vadd.f32 %v2401_v28, %v1696_v23  ;;  %v2403_v38 = vpop.f32.mrb[18].mxu0  ;;  %3061 = vmatprep.mubr.bf16.mxu1 %v2813_v31  ;;  %v1704_v23 = vadd.f32 %v4729_v59, %v4879_v63  ;;  %v4990_v59 = vpop.f32.mrb[104].mxu1 }
 0x293   :  { %v3696_v44 = vadd.f32 %v2403_v38, %v1698_v50  ;;  %v2405_v52 = vpop.f32.mrb[19].mxu0  ;;  %3062 = vmatmul.mubr.bf16.gmra.mrb[140].mxu1 %v2812_v58  ;;  %v2694_v48 = vmax.f32 %v3692_v21, 0.0  ;;  %v1706_v58 = vadd.f32 %v4731_v60, %v4883_v41  ;;  %v1708_v21 = vadd.f32 %v4734_v61, %v4879_v63  ;;  %v4992_v60 = vpop.f32.mrb[105].mxu1 }
 0x294   :  { %v3698_v53 = vadd.f32 %v2405_v52, %v1700_v36  ;;  %v2695_v55 = vmax.f32 %v3694_v37, 0.0  ;;  %v1710_v36 = vadd.f32 %v4737_v62, %v4883_v41  ;;  %v1714_v62 = vadd.f32 %v4739_v0, %v4879_v63 }
 0x295   :  { %v2696_v57 = vmax.f32 %v3696_v44, 0.0  ;;  %3641 = vmatmul.mubr.msk.bf16.gmra.mrb[124].mxu0 %vm1522_vm0, %v4403_v29 }
 0x296   :  { %v2697_v9 = vmax.f32 %v3698_v53, 0.0 }
 0x297   :  { %v2814_v31 = vpack.c.bf16 %v2696_v57, %v2694_v48 }
 0x298   :  { %v2815_v51 = vpack.c.bf16 %v2697_v9, %v2695_v55  ;;  %v2409_v50 = vpop.f32.mrb[20].mxu0  ;;  %v4994_v55 = vpop.f32.mrb[106].mxu1 }
 0x299   :  { %v3700_v28 = vadd.f32 %v2409_v50, %v1704_v23  ;;  %v2411_v29 = vpop.f32.mrb[21].mxu0  ;;  %v4996_v23 = vpop.f32.mrb[107].mxu1 }
 0x29a   :  { %v3702_v37 = vadd.f32 %v2411_v29, %v1706_v58  ;;  %v2413_v38 = vpop.f32.mrb[22].mxu0  ;;  %3069 = vmatprep.mubr.bf16.mxu1 %v2815_v51  ;;  %v5006_v0 = vpop.f32.mrb[108].mxu1 }
 0x29b   :  { %v3704_v44 = vadd.f32 %v2413_v38, %v1708_v21  ;;  %v2415_v52 = vpop.f32.mrb[23].mxu0  ;;  %3070 = vmatmul.mubr.bf16.gmra.mrb[144].mxu1 %v2814_v31  ;;  %v2698_v48 = vmax.f32 %v3700_v28, 0.0  ;;  %v1716_v31 = vadd.f32 %v4741_v1, %v4883_v41  ;;  %v1718_v21 = vadd.f32 %v4744_v2, %v4879_v63  ;;  %v5008_v1 = vpop.f32.mrb[109].mxu1 }
 0x29c   :  { %v3706_v53 = vadd.f32 %v2415_v52, %v1710_v36  ;;  %v2699_v61 = vmax.f32 %v3702_v37, 0.0  ;;  %v1720_v36 = vadd.f32 %v4747_v3, %v4883_v41  ;;  %v1724_v3 = vadd.f32 %v4749_v5, %v4879_v63 }
 0x29d   :  { %v2700_v57 = vmax.f32 %v3704_v44, 0.0 }
 0x29e   :  { %v2701_v9 = vmax.f32 %v3706_v53, 0.0 }
 0x29f   :  { %v2816_v58 = vpack.c.bf16 %v2700_v57, %v2698_v48 }
 0x2a0   :  { %v2817_v51 = vpack.c.bf16 %v2701_v9, %v2699_v61  ;;  %v2419_v50 = vpop.f32.mrb[24].mxu0  ;;  %v5010_v61 = vpop.f32.mrb[110].mxu1 }
 0x2a1   :  { %v3708_v28 = vadd.f32 %v2419_v50, %v1714_v62  ;;  %v2421_v29 = vpop.f32.mrb[25].mxu0  ;;  %v5012_v62 = vpop.f32.mrb[111].mxu1 }
 0x2a2   :  { %v3710_v37 = vadd.f32 %v2421_v29, %v1716_v31  ;;  %v2423_v38 = vpop.f32.mrb[26].mxu0  ;;  %3077 = vmatprep.mubr.bf16.mxu1 %v2817_v51  ;;  %v5022_v5 = vpop.f32.mrb[112].mxu1 }
 0x2a3   :  { %v3712_v44 = vadd.f32 %v2423_v38, %v1718_v21  ;;  %v2425_v52 = vpop.f32.mrb[27].mxu0  ;;  %3078 = vmatmul.mubr.bf16.gmra.mrb[148].mxu1 %v2816_v58  ;;  %v2702_v48 = vmax.f32 %v3708_v28, 0.0  ;;  %v1726_v58 = vadd.f32 %v4751_v6, %v4883_v41  ;;  %v1728_v21 = vadd.f32 %v4754_v7, %v4879_v63  ;;  %v5024_v6 = vpop.f32.mrb[113].mxu1 }
 0x2a4   :  { %v3714_v53 = vadd.f32 %v2425_v52, %v1720_v36  ;;  %v2703_v2 = vmax.f32 %v3710_v37, 0.0  ;;  %v1730_v36 = vadd.f32 %v4757_v8, %v4883_v41  ;;  %v1734_v8 = vadd.f32 %v4759_v10, %v4879_v63 }
 0x2a5   :  { %v2704_v57 = vmax.f32 %v3712_v44, 0.0 }
 0x2a6   :  { %v2705_v9 = vmax.f32 %v3714_v53, 0.0 }
 0x2a7   :  { %v2818_v31 = vpack.c.bf16 %v2704_v57, %v2702_v48 }
 0x2a8   :  { %v2819_v51 = vpack.c.bf16 %v2705_v9, %v2703_v2  ;;  %v2429_v50 = vpop.f32.mrb[28].mxu0  ;;  %v5026_v2 = vpop.f32.mrb[114].mxu1 }
 0x2a9   :  { %v3716_v28 = vadd.f32 %v2429_v50, %v1724_v3  ;;  %v2431_v29 = vpop.f32.mrb[29].mxu0  ;;  %v5028_v3 = vpop.f32.mrb[115].mxu1 }
 0x2aa   :  { %v3718_v37 = vadd.f32 %v2431_v29, %v1726_v58  ;;  %v2433_v38 = vpop.f32.mrb[30].mxu0  ;;  %3085 = vmatprep.mubr.bf16.mxu1 %v2819_v51  ;;  %v5038_v10 = vpop.f32.mrb[116].mxu1 }
 0x2ab   :  { %v3720_v44 = vadd.f32 %v2433_v38, %v1728_v21  ;;  %v2435_v52 = vpop.f32.mrb[31].mxu0  ;;  %3086 = vmatmul.mubr.bf16.gmra.mrb[152].mxu1 %v2818_v31  ;;  %v2706_v48 = vmax.f32 %v3716_v28, 0.0  ;;  %v1736_v31 = vadd.f32 %v4761_v11, %v4883_v41  ;;  %v1738_v21 = vadd.f32 %v4764_v12, %v4879_v63  ;;  %v5040_v11 = vpop.f32.mrb[117].mxu1 }
 0x2ac   :  { %v3722_v53 = vadd.f32 %v2435_v52, %v1730_v36  ;;  %v2707_v7 = vmax.f32 %v3718_v37, 0.0  ;;  %v1740_v36 = vadd.f32 %v4767_v13, %v4883_v41  ;;  %v1744_v13 = vadd.f32 %v4769_v15, %v4879_v63 }
 0x2ad   :  { %v2708_v57 = vmax.f32 %v3720_v44, 0.0 }
 0x2ae   :  { %v2709_v9 = vmax.f32 %v3722_v53, 0.0 }
 0x2af   :  { %v2820_v58 = vpack.c.bf16 %v2708_v57, %v2706_v48 }
 0x2b0   :  { %v2821_v51 = vpack.c.bf16 %v2709_v9, %v2707_v7  ;;  %v2439_v50 = vpop.f32.mrb[32].mxu0  ;;  %v5042_v7 = vpop.f32.mrb[118].mxu1 }
 0x2b1   :  { %v3724_v28 = vadd.f32 %v2439_v50, %v1734_v8  ;;  %v2441_v29 = vpop.f32.mrb[33].mxu0  ;;  %v5044_v8 = vpop.f32.mrb[119].mxu1 }
 0x2b2   :  { %v3726_v37 = vadd.f32 %v2441_v29, %v1736_v31  ;;  %v2443_v38 = vpop.f32.mrb[34].mxu0  ;;  %3093 = vmatprep.mubr.bf16.mxu1 %v2821_v51  ;;  %v5054_v15 = vpop.f32.mrb[120].mxu1 }
 0x2b3   :  { %v3728_v44 = vadd.f32 %v2443_v38, %v1738_v21  ;;  %v2445_v52 = vpop.f32.mrb[35].mxu0  ;;  %3094 = vmatmul.mubr.bf16.gmra.mrb[156].mxu1 %v2820_v58  ;;  %v2710_v48 = vmax.f32 %v3724_v28, 0.0  ;;  %v1746_v58 = vadd.f32 %v4771_v16, %v4883_v41  ;;  %v1748_v21 = vadd.f32 %v4774_v17, %v4879_v63  ;;  %v5056_v16 = vpop.f32.mrb[121].mxu1 }
 0x2b4   :  { %v3730_v53 = vadd.f32 %v2445_v52, %v1740_v36  ;;  %v2711_v12 = vmax.f32 %v3726_v37, 0.0  ;;  %v1750_v36 = vadd.f32 %v4777_v18, %v4883_v41  ;;  %v1754_v18 = vadd.f32 %v4779_v20, %v4879_v63 }
 0x2b5   :  { %v2712_v57 = vmax.f32 %v3728_v44, 0.0 }
 0x2b6   :  { %v2713_v9 = vmax.f32 %v3730_v53, 0.0 }
 0x2b7   :  { %v2822_v31 = vpack.c.bf16 %v2712_v57, %v2710_v48 }
 0x2b8   :  { %v2823_v51 = vpack.c.bf16 %v2713_v9, %v2711_v12  ;;  %v2449_v50 = vpop.f32.mrb[36].mxu0  ;;  %v5058_v12 = vpop.f32.mrb[122].mxu1 }
 0x2b9   :  { %v3732_v28 = vadd.f32 %v2449_v50, %v1744_v13  ;;  %v2451_v29 = vpop.f32.mrb[37].mxu0  ;;  %v5060_v13 = vpop.f32.mrb[123].mxu1 }
 0x2ba   :  { %v3734_v37 = vadd.f32 %v2451_v29, %v1746_v58  ;;  %v2453_v38 = vpop.f32.mrb[38].mxu0  ;;  %3101 = vmatprep.mubr.bf16.mxu1 %v2823_v51  ;;  %v5070_v20 = vpop.f32.mrb[124].mxu1 }
 0x2bb   :  { %v3736_v44 = vadd.f32 %v2453_v38, %v1748_v21  ;;  %v2455_v52 = vpop.f32.mrb[39].mxu0  ;;  %3102 = vmatmul.mubr.bf16.gmra.mrb[160].mxu1 %v2822_v31  ;;  %v2714_v48 = vmax.f32 %v3732_v28, 0.0  ;;  %v1756_v31 = vadd.f32 %v4781_v24, %v4883_v41  ;;  %v1758_v21 = vadd.f32 %v4784_v25, %v4879_v63  ;;  %v5072_v24 = vpop.f32.mrb[125].mxu1 }
 0x2bc   :  { %v3738_v53 = vadd.f32 %v2455_v52, %v1750_v36  ;;  %v2715_v17 = vmax.f32 %v3734_v37, 0.0  ;;  %v1760_v36 = vadd.f32 %v4787_v27, %v4883_v41  ;;  %5440 = vst [vmem:[#allocation56_spill] sm:$0xff] %v5072_v24  ;;  %v1764_v27 = vadd.f32 %v4789_v32, %v4879_v63 }
 0x2bd   :  { %v2716_v57 = vmax.f32 %v3736_v44, 0.0 }
 0x2be   :  { %v2717_v9 = vmax.f32 %v3738_v53, 0.0 }
 0x2bf   :  { %v2824_v58 = vpack.c.bf16 %v2716_v57, %v2714_v48 }
 0x2c0   :  { %v2825_v51 = vpack.c.bf16 %v2717_v9, %v2715_v17  ;;  %v2459_v50 = vpop.f32.mrb[40].mxu0  ;;  %v5074_v17 = vpop.f32.mrb[126].mxu1 }
 0x2c1   :  { %v3740_v28 = vadd.f32 %v2459_v50, %v1754_v18  ;;  %v2461_v29 = vpop.f32.mrb[41].mxu0  ;;  %5441 = vst [vmem:[#allocation57_spill] sm:$0xff] %v5074_v17  ;;  %v5076_v18 = vpop.f32.mrb[127].mxu1 }
 0x2c2   :  { %v3742_v37 = vadd.f32 %v2461_v29, %v1756_v31  ;;  %v2463_v38 = vpop.f32.mrb[42].mxu0  ;;  %3109 = vmatprep.mubr.bf16.mxu1 %v2825_v51  ;;  %5442 = vst [vmem:[#allocation58_spill] sm:$0xff] %v5076_v18 }
 0x2c3   :  { %v3744_v44 = vadd.f32 %v2463_v38, %v1758_v21  ;;  %v2465_v52 = vpop.f32.mrb[43].mxu0  ;;  %3110 = vmatmul.mubr.bf16.gmra.mrb[164].mxu1 %v2824_v58  ;;  %v2718_v48 = vmax.f32 %v3740_v28, 0.0  ;;  %v1766_v58 = vadd.f32 %v4791_v34, %v4883_v41  ;;  %v5443_v21 = vld [vmem:[#allocation16_spill] sm:$0xff]  ;;  %v5444_v38 = vld [vmem:[#allocation17_spill] sm:$0xff] }
 0x2c4   :  { %v3746_v53 = vadd.f32 %v2465_v52, %v1760_v36  ;;  %v2719_v25 = vmax.f32 %v3742_v37, 0.0  ;;  %v1768_v29 = vadd.f32 %v5443_v21, %v4879_v63  ;;  %v1770_v37 = vadd.f32 %v5444_v38, %v4883_v41 }
 0x2c5   :  { %v2720_v57 = vmax.f32 %v3744_v44, 0.0 }
 0x2c6   :  { %v2721_v9 = vmax.f32 %v3746_v53, 0.0 }
 0x2c7   :  { %v2826_v31 = vpack.c.bf16 %v2720_v57, %v2718_v48 }
 0x2c8   :  { %v2827_v51 = vpack.c.bf16 %v2721_v9, %v2719_v25  ;;  %v2469_v50 = vpop.f32.mrb[44].mxu0  ;;  %v5445_v9 = vld [vmem:[#allocation18_spill] sm:$0xff] }
 0x2c9   :  { %v3748_v28 = vadd.f32 %v2469_v50, %v1764_v27  ;;  %v2471_v36 = vpop.f32.mrb[45].mxu0  ;;  %v1774_v17 = vadd.f32 %v5445_v9, %v4879_v63  ;;  %v5446_v27 = vld [vmem:[#allocation19_spill] sm:$0xff] }
 0x2ca   :  { %v3750_v44 = vadd.f32 %v2471_v36, %v1766_v58  ;;  %v2473_v52 = vpop.f32.mrb[46].mxu0  ;;  %3117 = vmatprep.mubr.bf16.mxu1 %v2827_v51  ;;  %v1776_v50 = vadd.f32 %v5446_v27, %v4883_v41  ;;  %v5447_v58 = vld [vmem:[#allocation20_spill] sm:$0xff] }
 0x2cb   :  { %v3752_v53 = vadd.f32 %v2473_v52, %v1768_v29  ;;  %v2475_v18 = vpop.f32.mrb[47].mxu0  ;;  %3118 = vmatmul.mubr.bf16.gmra.mrb[168].mxu1 %v2826_v31  ;;  %v2722_v48 = vmax.f32 %v3748_v28, 0.0  ;;  %v1778_v51 = vadd.f32 %v5447_v58, %v4879_v63 }
 0x2cc   :  { %v3754_v32 = vadd.f32 %v2475_v18, %v1770_v37  ;;  %v2723_v34 = vmax.f32 %v3750_v44, 0.0  ;;  %v5448_v18 = vld [vmem:[#allocation21_spill] sm:$0xff] }
 0x2cd   :  { %v2724_v57 = vmax.f32 %v3752_v53, 0.0  ;;  %v1780_v31 = vadd.f32 %v5448_v18, %v4883_v41 }
 0x2ce   :  { %v2725_v25 = vmax.f32 %v3754_v32, 0.0 }
 0x2cf   :  { %v2828_v21 = vpack.c.bf16 %v2724_v57, %v2722_v48 }
 0x2d0   :  { %v2829_v24 = vpack.c.bf16 %v2725_v25, %v2723_v34  ;;  %v2479_v38 = vpop.f32.mrb[48].mxu0  ;;  %v5449_v25 = vld [vmem:[#allocation22_spill] sm:$0xff] }
 0x2d1   :  { %v3756_v29 = vadd.f32 %v2479_v38, %v1774_v17  ;;  %v2481_v36 = vpop.f32.mrb[49].mxu0  ;;  %v1784_v9 = vadd.f32 %v5449_v25, %v4879_v63  ;;  %v5450_v17 = vld [vmem:[#allocation23_spill] sm:$0xff] }
 0x2d2   :  { %v3758_v28 = vadd.f32 %v2481_v36, %v1776_v50  ;;  %v2483_v37 = vpop.f32.mrb[50].mxu0  ;;  %3125 = vmatprep.mubr.bf16.mxu1 %v2829_v24  ;;  %v1786_v38 = vadd.f32 %v5450_v17, %v4883_v41  ;;  %v5451_v50 = vld [vmem:[#allocation24_spill] sm:$0xff] }
 0x2d3   :  { %v3760_v44 = vadd.f32 %v2483_v37, %v1778_v51  ;;  %v2485_v52 = vpop.f32.mrb[51].mxu0  ;;  %3126 = vmatmul.mubr.bf16.gmra.mrb[172].mxu1 %v2828_v21  ;;  %v2726_v32 = vmax.f32 %v3756_v29, 0.0  ;;  %v1788_v24 = vadd.f32 %v5451_v50, %v4879_v63  ;;  %v5452_v21 = vld [vmem:[#allocation25_spill] sm:$0xff] }
 0x2d4   :  { %v3762_v53 = vadd.f32 %v2485_v52, %v1780_v31  ;;  %v2727_v57 = vmax.f32 %v3758_v28, 0.0  ;;  %v1790_v29 = vadd.f32 %v5452_v21, %v4883_v41 }
 0x2d5   :  { %v2728_v48 = vmax.f32 %v3760_v44, 0.0 }
 0x2d6   :  { %v2729_v34 = vmax.f32 %v3762_v53, 0.0 }
 0x2d7   :  { %v2830_v27 = vpack.c.bf16 %v2728_v48, %v2726_v32 }
 0x2d8   :  { %v2831_v58 = vpack.c.bf16 %v2729_v34, %v2727_v57  ;;  %v2489_v18 = vpop.f32.mrb[52].mxu0  ;;  %v5453_v34 = vld [vmem:[#allocation26_spill] sm:$0xff] }
 0x2d9   :  { %v3764_v51 = vadd.f32 %v2489_v18, %v1784_v9  ;;  %v2491_v36 = vpop.f32.mrb[53].mxu0  ;;  %v1794_v25 = vadd.f32 %v5453_v34, %v4879_v63  ;;  %v5454_v9 = vld [vmem:[#allocation27_spill] sm:$0xff] }
 0x2da   :  { %v3766_v31 = vadd.f32 %v2491_v36, %v1786_v38  ;;  %v2493_v28 = vpop.f32.mrb[54].mxu0  ;;  %3133 = vmatprep.mubr.bf16.mxu1 %v2831_v58  ;;  %v1796_v18 = vadd.f32 %v5454_v9, %v4883_v41  ;;  %v5455_v38 = vld [vmem:[#allocation28_spill] sm:$0xff] }
 0x2db   :  { %v3768_v37 = vadd.f32 %v2493_v28, %v1788_v24  ;;  %v2495_v44 = vpop.f32.mrb[55].mxu0  ;;  %3134 = vmatmul.mubr.bf16.gmra.mrb[176].mxu1 %v2830_v27  ;;  %v2730_v53 = vmax.f32 %v3764_v51, 0.0  ;;  %v1798_v58 = vadd.f32 %v5455_v38, %v4879_v63  ;;  %v5456_v27 = vld [vmem:[#allocation29_spill] sm:$0xff] }
 0x2dc   :  { %v3770_v52 = vadd.f32 %v2495_v44, %v1790_v29  ;;  %v2731_v48 = vmax.f32 %v3766_v31, 0.0  ;;  %v1800_v51 = vadd.f32 %v5456_v27, %v4883_v41 }
 0x2dd   :  { %v2732_v32 = vmax.f32 %v3768_v37, 0.0 }
 0x2de   :  { %v2733_v57 = vmax.f32 %v3770_v52, 0.0 }
 0x2df   :  { %v2832_v17 = vpack.c.bf16 %v2732_v32, %v2730_v53 }
 0x2e0   :  { %v2833_v50 = vpack.c.bf16 %v2733_v57, %v2731_v48  ;;  %v2499_v21 = vpop.f32.mrb[56].mxu0  ;;  %v5457_v57 = vld [vmem:[#allocation30_spill] sm:$0xff] }
 0x2e1   :  { %v3772_v24 = vadd.f32 %v2499_v21, %v1794_v25  ;;  %v2501_v36 = vpop.f32.mrb[57].mxu0  ;;  %v1804_v34 = vadd.f32 %v5457_v57, %v4879_v63  ;;  %v5458_v25 = vld [vmem:[#allocation31_spill] sm:$0xff] }
 0x2e2   :  { %v3774_v29 = vadd.f32 %v2501_v36, %v1796_v18  ;;  %v2503_v31 = vpop.f32.mrb[58].mxu0  ;;  %3141 = vmatprep.mubr.bf16.mxu1 %v2833_v50  ;;  %v1806_v21 = vadd.f32 %v5458_v25, %v4883_v41  ;;  %v5459_v18 = vld [vmem:[#allocation32_spill] sm:$0xff] }
 0x2e3   :  { %v3776_v28 = vadd.f32 %v2503_v31, %v1798_v58  ;;  %v2505_v37 = vpop.f32.mrb[59].mxu0  ;;  %3142 = vmatmul.mubr.bf16.gmra.mrb[180].mxu1 %v2832_v17  ;;  %v2734_v52 = vmax.f32 %v3772_v24, 0.0  ;;  %v1808_v50 = vadd.f32 %v5459_v18, %v4879_v63  ;;  %v5460_v17 = vld [vmem:[#allocation33_spill] sm:$0xff] }
 0x2e4   :  { %v3778_v44 = vadd.f32 %v2505_v37, %v1800_v51  ;;  %v2735_v32 = vmax.f32 %v3774_v29, 0.0  ;;  %v1810_v24 = vadd.f32 %v5460_v17, %v4883_v41 }
 0x2e5   :  { %v2736_v53 = vmax.f32 %v3776_v28, 0.0 }
 0x2e6   :  { %v2737_v48 = vmax.f32 %v3778_v44, 0.0 }
 0x2e7   :  { %v2834_v9 = vpack.c.bf16 %v2736_v53, %v2734_v52 }
 0x2e8   :  { %v2835_v38 = vpack.c.bf16 %v2737_v48, %v2735_v32  ;;  %v2509_v27 = vpop.f32.mrb[60].mxu0  ;;  %v5461_v48 = vld [vmem:[#allocation34_spill] sm:$0xff] }
 0x2e9   :  { %v3780_v58 = vadd.f32 %v2509_v27, %v1804_v34  ;;  %v2511_v36 = vpop.f32.mrb[61].mxu0  ;;  %v1814_v57 = vadd.f32 %v5461_v48, %v4879_v63  ;;  %v5462_v34 = vld [vmem:[#allocation35_spill] sm:$0xff] }
 0x2ea   :  { %v3782_v51 = vadd.f32 %v2511_v36, %v1806_v21  ;;  %v2513_v29 = vpop.f32.mrb[62].mxu0  ;;  %3149 = vmatprep.mubr.bf16.mxu1 %v2835_v38  ;;  %v1816_v27 = vadd.f32 %v5462_v34, %v4883_v41  ;;  %v5463_v21 = vld [vmem:[#allocation36_spill] sm:$0xff] }
 0x2eb   :  { %v3784_v31 = vadd.f32 %v2513_v29, %v1808_v50  ;;  %v2515_v28 = vpop.f32.mrb[63].mxu0  ;;  %3150 = vmatmul.mubr.bf16.gmra.mrb[184].mxu1 %v2834_v9  ;;  %v2738_v44 = vmax.f32 %v3780_v58, 0.0  ;;  %v1818_v38 = vadd.f32 %v5463_v21, %v4879_v63  ;;  %v5464_v9 = vld [vmem:[#allocation37_spill] sm:$0xff] }
 0x2ec   :  { %v3786_v37 = vadd.f32 %v2515_v28, %v1810_v24  ;;  %v2739_v53 = vmax.f32 %v3782_v51, 0.0  ;;  %v1820_v58 = vadd.f32 %v5464_v9, %v4883_v41 }
 0x2ed   :  { %v2740_v52 = vmax.f32 %v3784_v31, 0.0 }
 0x2ee   :  { %v2741_v32 = vmax.f32 %v3786_v37, 0.0 }
 0x2ef   :  { %v2836_v25 = vpack.c.bf16 %v2740_v52, %v2738_v44 }
 0x2f0   :  { %v2837_v18 = vpack.c.bf16 %v2741_v32, %v2739_v53  ;;  %v2519_v17 = vpop.f32.mrb[64].mxu0  ;;  %v5465_v32 = vld [vmem:[#allocation38_spill] sm:$0xff] }
 0x2f1   :  { %v3788_v50 = vadd.f32 %v2519_v17, %v1814_v57  ;;  %v2521_v36 = vpop.f32.mrb[65].mxu0  ;;  %v1824_v48 = vadd.f32 %v5465_v32, %v4879_v63  ;;  %v5466_v57 = vld [vmem:[#allocation39_spill] sm:$0xff] }
 0x2f2   :  { %v3790_v24 = vadd.f32 %v2521_v36, %v1816_v27  ;;  %v2523_v51 = vpop.f32.mrb[66].mxu0  ;;  %3157 = vmatprep.mubr.bf16.mxu1 %v2837_v18  ;;  %v1826_v17 = vadd.f32 %v5466_v57, %v4883_v41  ;;  %v5467_v27 = vld [vmem:[#allocation40_spill] sm:$0xff] }
 0x2f3   :  { %v3792_v29 = vadd.f32 %v2523_v51, %v1818_v38  ;;  %v2525_v31 = vpop.f32.mrb[67].mxu0  ;;  %3158 = vmatmul.mubr.bf16.gmra.mrb[188].mxu1 %v2836_v25  ;;  %v2742_v37 = vmax.f32 %v3788_v50, 0.0  ;;  %v1828_v18 = vadd.f32 %v5467_v27, %v4879_v63  ;;  %v5468_v25 = vld [vmem:[#allocation41_spill] sm:$0xff] }
 0x2f4   :  { %v3794_v28 = vadd.f32 %v2525_v31, %v1820_v58  ;;  %v2743_v52 = vmax.f32 %v3790_v24, 0.0  ;;  %v1830_v50 = vadd.f32 %v5468_v25, %v4883_v41 }
 0x2f5   :  { %v2744_v44 = vmax.f32 %v3792_v29, 0.0 }
 0x2f6   :  { %v2745_v53 = vmax.f32 %v3794_v28, 0.0 }
 0x2f7   :  { %v2838_v34 = vpack.c.bf16 %v2744_v44, %v2742_v37 }
 0x2f8   :  { %v2839_v21 = vpack.c.bf16 %v2745_v53, %v2743_v52  ;;  %v2529_v9 = vpop.f32.mrb[68].mxu0  ;;  %v5469_v53 = vld [vmem:[#allocation42_spill] sm:$0xff] }
 0x2f9   :  { %v3796_v38 = vadd.f32 %v2529_v9, %v1824_v48  ;;  %v2531_v36 = vpop.f32.mrb[69].mxu0  ;;  %v1834_v32 = vadd.f32 %v5469_v53, %v4879_v63  ;;  %v5470_v48 = vld [vmem:[#allocation43_spill] sm:$0xff] }
 0x2fa   :  { %v3798_v58 = vadd.f32 %v2531_v36, %v1826_v17  ;;  %v2533_v24 = vpop.f32.mrb[70].mxu0  ;;  %3165 = vmatprep.mubr.bf16.mxu1 %v2839_v21  ;;  %v1836_v9 = vadd.f32 %v5470_v48, %v4883_v41  ;;  %v5471_v17 = vld [vmem:[#allocation44_spill] sm:$0xff] }
 0x2fb   :  { %v3800_v51 = vadd.f32 %v2533_v24, %v1828_v18  ;;  %v2535_v29 = vpop.f32.mrb[71].mxu0  ;;  %3166 = vmatmul.mubr.bf16.gmra.mrb[192].mxu1 %v2838_v34  ;;  %v2746_v28 = vmax.f32 %v3796_v38, 0.0  ;;  %v1838_v21 = vadd.f32 %v5471_v17, %v4879_v63  ;;  %v5472_v34 = vld [vmem:[#allocation45_spill] sm:$0xff] }
 0x2fc   :  { %v3802_v31 = vadd.f32 %v2535_v29, %v1830_v50  ;;  %v2747_v44 = vmax.f32 %v3798_v58, 0.0  ;;  %v1840_v38 = vadd.f32 %v5472_v34, %v4883_v41 }
 0x2fd   :  { %v2748_v37 = vmax.f32 %v3800_v51, 0.0 }
 0x2fe   :  { %v2749_v52 = vmax.f32 %v3802_v31, 0.0 }
 0x2ff   :  { %v2840_v57 = vpack.c.bf16 %v2748_v37, %v2746_v28 }
 0x300   :  { %v2841_v27 = vpack.c.bf16 %v2749_v52, %v2747_v44  ;;  %v2539_v25 = vpop.f32.mrb[72].mxu0  ;;  %v5473_v52 = vld [vmem:[#allocation46_spill] sm:$0xff] }
 0x301   :  { %v3804_v18 = vadd.f32 %v2539_v25, %v1834_v32  ;;  %v2541_v36 = vpop.f32.mrb[73].mxu0  ;;  %v1844_v53 = vadd.f32 %v5473_v52, %v4879_v63  ;;  %v5474_v32 = vld [vmem:[#allocation47_spill] sm:$0xff] }
 0x302   :  { %v3806_v50 = vadd.f32 %v2541_v36, %v1836_v9  ;;  %v2543_v58 = vpop.f32.mrb[74].mxu0  ;;  %3173 = vmatprep.mubr.bf16.mxu1 %v2841_v27  ;;  %v1846_v25 = vadd.f32 %v5474_v32, %v4883_v41  ;;  %v5475_v9 = vld [vmem:[#allocation48_spill] sm:$0xff] }
 0x303   :  { %v3808_v24 = vadd.f32 %v2543_v58, %v1838_v21  ;;  %v2545_v51 = vpop.f32.mrb[75].mxu0  ;;  %3174 = vmatmul.mubr.bf16.gmra.mrb[196].mxu1 %v2840_v57  ;;  %v2750_v31 = vmax.f32 %v3804_v18, 0.0  ;;  %v1848_v27 = vadd.f32 %v5475_v9, %v4879_v63  ;;  %v5476_v57 = vld [vmem:[#allocation49_spill] sm:$0xff] }
 0x304   :  { %v3810_v29 = vadd.f32 %v2545_v51, %v1840_v38  ;;  %v2751_v37 = vmax.f32 %v3806_v50, 0.0  ;;  %v1850_v18 = vadd.f32 %v5476_v57, %v4883_v41 }
 0x305   :  { %v2752_v28 = vmax.f32 %v3808_v24, 0.0 }
 0x306   :  { %v2753_v44 = vmax.f32 %v3810_v29, 0.0 }
 0x307   :  { %v2842_v48 = vpack.c.bf16 %v2752_v28, %v2750_v31 }
 0x308   :  { %v2843_v17 = vpack.c.bf16 %v2753_v44, %v2751_v37  ;;  %v2549_v34 = vpop.f32.mrb[76].mxu0  ;;  %v5477_v44 = vld [vmem:[#allocation50_spill] sm:$0xff] }
 0x309   :  { %v3812_v21 = vadd.f32 %v2549_v34, %v1844_v53  ;;  %v2551_v36 = vpop.f32.mrb[77].mxu0  ;;  %v1854_v52 = vadd.f32 %v5477_v44, %v4879_v63  ;;  %v5478_v53 = vld [vmem:[#allocation51_spill] sm:$0xff] }
 0x30a   :  { %v3814_v38 = vadd.f32 %v2551_v36, %v1846_v25  ;;  %v2553_v50 = vpop.f32.mrb[78].mxu0  ;;  %3181 = vmatprep.mubr.bf16.mxu1 %v2843_v17  ;;  %v1856_v34 = vadd.f32 %v5478_v53, %v4883_v41  ;;  %v5479_v25 = vld [vmem:[#allocation52_spill] sm:$0xff] }
 0x30b   :  { %v3816_v58 = vadd.f32 %v2553_v50, %v1848_v27  ;;  %v2555_v24 = vpop.f32.mrb[79].mxu0  ;;  %3182 = vmatmul.mubr.bf16.gmra.mrb[200].mxu1 %v2842_v48  ;;  %v2754_v29 = vmax.f32 %v3812_v21, 0.0  ;;  %v1858_v17 = vadd.f32 %v5479_v25, %v4879_v63  ;;  %v5480_v48 = vld [vmem:[#allocation53_spill] sm:$0xff] }
 0x30c   :  { %v3818_v51 = vadd.f32 %v2555_v24, %v1850_v18  ;;  %v2755_v28 = vmax.f32 %v3814_v38, 0.0  ;;  %v1860_v21 = vadd.f32 %v5480_v48, %v4883_v41 }
 0x30d   :  { %v2756_v31 = vmax.f32 %v3816_v58, 0.0 }
 0x30e   :  { %v2757_v37 = vmax.f32 %v3818_v51, 0.0 }
 0x30f   :  { %v2844_v32 = vpack.c.bf16 %v2756_v31, %v2754_v29 }
 0x310   :  { %v2845_v9 = vpack.c.bf16 %v2757_v37, %v2755_v28  ;;  %v2559_v57 = vpop.f32.mrb[80].mxu0  ;;  %v1864_v37 = vadd.f32 %v4901_v47, %v4879_v63 }
 0x311   :  { %v3820_v27 = vadd.f32 %v2559_v57, %v1854_v52  ;;  %v2561_v36 = vpop.f32.mrb[81].mxu0  ;;  %v1866_v52 = vadd.f32 %v4903_v43, %v4883_v41 }
 0x312   :  { %v3822_v18 = vadd.f32 %v2561_v36, %v1856_v34  ;;  %v2563_v38 = vpop.f32.mrb[82].mxu0  ;;  %3189 = vmatprep.mubr.bf16.mxu1 %v2845_v9  ;;  %v5481_v34 = vld [vmem:[#allocation54_spill] sm:$0xff] }
 0x313   :  { %v3824_v50 = vadd.f32 %v2563_v38, %v1858_v17  ;;  %v2565_v58 = vpop.f32.mrb[83].mxu0  ;;  %3190 = vmatmul.mubr.bf16.gmra.mrb[204].mxu1 %v2844_v32  ;;  %v2758_v51 = vmax.f32 %v3820_v27, 0.0  ;;  %v1868_v9 = vadd.f32 %v5481_v34, %v4879_v63  ;;  %v5482_v32 = vld [vmem:[#allocation55_spill] sm:$0xff] }
 0x314   :  { %v3826_v24 = vadd.f32 %v2565_v58, %v1860_v21  ;;  %v2759_v31 = vmax.f32 %v3822_v18, 0.0  ;;  %v1870_v27 = vadd.f32 %v5482_v32, %v4883_v41 }
 0x315   :  { %v2760_v29 = vmax.f32 %v3824_v50, 0.0 }
 0x316   :  { %v2761_v28 = vmax.f32 %v3826_v24, 0.0  ;;  %v1874_v24 = vadd.f32 %v4919_v40, %v4879_v63 }
 0x317   :  { %v2846_v44 = vpack.c.bf16 %v2760_v29, %v2758_v51  ;;  %v1876_v29 = vadd.f32 %v4921_v22, %v4883_v41 }
 0x318   :  { %v2847_v53 = vpack.c.bf16 %v2761_v28, %v2759_v31  ;;  %v2569_v57 = vpop.f32.mrb[84].mxu0 }
 0x319   :  { %v3828_v25 = vadd.f32 %v2569_v57, %v1864_v37  ;;  %v2571_v17 = vpop.f32.mrb[85].mxu0  ;;  %v1878_v37 = vadd.f32 %v4924_v30, %v4879_v63 }
 0x31a   :  { %v3830_v36 = vadd.f32 %v2571_v17, %v1866_v52  ;;  %v2573_v48 = vpop.f32.mrb[86].mxu0  ;;  %3197 = vmatprep.mubr.bf16.mxu1 %v2847_v53 }
 0x31b   :  { %v3832_v21 = vadd.f32 %v2573_v48, %v1868_v9  ;;  %v2575_v18 = vpop.f32.mrb[87].mxu0  ;;  %3198 = vmatmul.mubr.bf16.gmra.mrb[208].mxu1 %v2846_v44  ;;  %v2762_v38 = vmax.f32 %v3828_v25, 0.0  ;;  %v1880_v44 = vadd.f32 %v4927_v33, %v4883_v41  ;;  %v1886_v48 = vadd.f32 %v4939_v14, %v4883_v41 }
 0x31c   :  { %v3834_v47 = vadd.f32 %v2575_v18, %v1870_v27  ;;  %v2763_v43 = vmax.f32 %v3830_v36, 0.0  ;;  %v1884_v36 = vadd.f32 %v4937_v4, %v4879_v63  ;;  %v1888_v18 = vadd.f32 %v4942_v39, %v4879_v63 }
 0x31d   :  { %v2764_v50 = vmax.f32 %v3832_v21, 0.0 }
 0x31e   :  { %v2765_v58 = vmax.f32 %v3834_v47, 0.0 }
 0x31f   :  { %v2848_v51 = vpack.c.bf16 %v2764_v50, %v2762_v38  ;;  %v1890_v50 = vadd.f32 %v4945_v42, %v4883_v41 }
 0x320   :  { %v2849_v31 = vpack.c.bf16 %v2765_v58, %v2763_v43  ;;  %v2579_v28 = vpop.f32.mrb[88].mxu0 }
 0x321   :  { %v3836_v52 = vadd.f32 %v2579_v28, %v1874_v24  ;;  %v2581_v53 = vpop.f32.mrb[89].mxu0 }
 0x322   :  { %v3838_v57 = vadd.f32 %v2581_v53, %v1876_v29  ;;  %v2583_v34 = vpop.f32.mrb[90].mxu0  ;;  %3205 = vmatprep.mubr.bf16.mxu1 %v2849_v31 }
 0x323   :  { %v3840_v9 = vadd.f32 %v2583_v34, %v1878_v37  ;;  %v2585_v25 = vpop.f32.mrb[91].mxu0  ;;  %3206 = vmatmul.mubr.bf16.gmra.mrb[212].mxu1 %v2848_v51  ;;  %v2766_v17 = vmax.f32 %v3836_v52, 0.0  ;;  %v1894_v37 = vadd.f32 %v4955_v35, %v4879_v63  ;;  %v1896_v52 = vadd.f32 %v4957_v19, %v4883_v41 }
 0x324   :  { %v3842_v40 = vadd.f32 %v2585_v25, %v1880_v44  ;;  %v2767_v22 = vmax.f32 %v3838_v57, 0.0  ;;  %v1898_v44 = vadd.f32 %v4960_v46, %v4879_v63 }
 0x325   :  { %v2768_v32 = vmax.f32 %v3840_v9, 0.0  ;;  %v1900_v9 = vadd.f32 %v4963_v49, %v4883_v41 }
 0x326   :  { %v2769_v27 = vmax.f32 %v3842_v40, 0.0 }
 0x327   :  { %v2850_v30 = vpack.c.bf16 %v2768_v32, %v2766_v17 }
 0x328   :  { %v2851_v21 = vpack.c.bf16 %v2769_v27, %v2767_v22  ;;  %v2589_v33 = vpop.f32.mrb[92].mxu0 }
 0x329   :  { %v3844_v47 = vadd.f32 %v2589_v33, %v1884_v36  ;;  %v2591_v38 = vpop.f32.mrb[93].mxu0  ;;  %v1908_v33 = vadd.f32 %v4978_v54, %v4879_v63 }
 0x32a   :  { %v3846_v43 = vadd.f32 %v2591_v38, %v1886_v48  ;;  %v2593_v58 = vpop.f32.mrb[94].mxu0  ;;  %3213 = vmatprep.mubr.bf16.mxu1 %v2851_v21  ;;  %v1906_v48 = vadd.f32 %v4975_v26, %v4883_v41  ;;  %v1910_v38 = vadd.f32 %v4980_v56, %v4883_v41 }
 0x32b   :  { %v3848_v24 = vadd.f32 %v2593_v58, %v1888_v18  ;;  %v2595_v51 = vpop.f32.mrb[95].mxu0  ;;  %3214 = vmatmul.mubr.bf16.gmra.mrb[216].mxu1 %v2850_v30  ;;  %v2770_v29 = vmax.f32 %v3844_v47, 0.0  ;;  %v1904_v30 = vadd.f32 %v4973_v45, %v4879_v63 }
 0x32c   :  { %v3850_v4 = vadd.f32 %v2595_v51, %v1890_v50  ;;  %v2771_v14 = vmax.f32 %v3846_v43, 0.0 }
 0x32d   :  { %v2772_v31 = vmax.f32 %v3848_v24, 0.0 }
 0x32e   :  { %v2773_v28 = vmax.f32 %v3850_v4, 0.0 }
 0x32f   :  { %v2852_v39 = vpack.c.bf16 %v2772_v31, %v2770_v29  ;;  %v1914_v31 = vadd.f32 %v4990_v59, %v4879_v63 }
 0x330   :  { %v2853_v53 = vpack.c.bf16 %v2773_v28, %v2771_v14  ;;  %v2599_v42 = vpop.f32.mrb[96].mxu0  ;;  %v1916_v14 = vadd.f32 %v4992_v60, %v4883_v41 }
 0x331   :  { %v3852_v57 = vadd.f32 %v2599_v42, %v1894_v37  ;;  %v2601_v34 = vpop.f32.mrb[97].mxu0  ;;  %v1918_v37 = vadd.f32 %v4994_v55, %v4879_v63 }
 0x332   :  { %v3854_v25 = vadd.f32 %v2601_v34, %v1896_v52  ;;  %v2603_v40 = vpop.f32.mrb[98].mxu0  ;;  %3221 = vmatprep.mubr.bf16.mxu1 %v2853_v53  ;;  %v1920_v53 = vadd.f32 %v4996_v23, %v4883_v41 }
 0x333   :  { %v3856_v17 = vadd.f32 %v2603_v40, %v1898_v44  ;;  %v2605_v32 = vpop.f32.mrb[99].mxu0  ;;  %3222 = vmatmul.mubr.bf16.gmra.mrb[220].mxu1 %v2852_v39  ;;  %v2774_v22 = vmax.f32 %v3852_v57, 0.0 }
 0x334   :  { %v3858_v35 = vadd.f32 %v2605_v32, %v1900_v9  ;;  %v2775_v19 = vmax.f32 %v3854_v25, 0.0  ;;  %v1926_v32 = vadd.f32 %v5008_v1, %v4883_v41 }
 0x335   :  { %v2776_v27 = vmax.f32 %v3856_v17, 0.0  ;;  %v1924_v17 = vadd.f32 %v5006_v0, %v4879_v63 }
 0x336   :  { %v2777_v36 = vmax.f32 %v3858_v35, 0.0 }
 0x337   :  { %v2854_v46 = vpack.c.bf16 %v2776_v27, %v2774_v22  ;;  %v1928_v22 = vadd.f32 %v5010_v61, %v4879_v63  ;;  %v1934_v61 = vadd.f32 %v5022_v5, %v4879_v63 }
 0x338   :  { %v2855_v21 = vpack.c.bf16 %v2777_v36, %v2775_v19  ;;  %v2609_v49 = vpop.f32.mrb[100].mxu0  ;;  %v1930_v36 = vadd.f32 %v5012_v62, %v4883_v41 }
 0x339   :  { %v3860_v18 = vadd.f32 %v2609_v49, %v1904_v30  ;;  %v2611_v47 = vpop.f32.mrb[101].mxu0  ;;  %v5214_v49 = vld [vmem:[#allocation10] ss:$0 sm:$0xff] }
 0x33a   :  { %v3862_v50 = vadd.f32 %v2611_v47, %v1906_v48  ;;  %v2613_v43 = vpop.f32.mrb[102].mxu0  ;;  %3229 = vmatprep.mubr.bf16.mxu1 %v2855_v21 }
 0x33b   :  { %v3864_v58 = vadd.f32 %v2613_v43, %v1908_v33  ;;  %v2615_v24 = vpop.f32.mrb[103].mxu0  ;;  %3230 = vmatmul.mubr.bf16.gmra.mrb[224].mxu1 %v2854_v46  ;;  %v2778_v51 = vmax.f32 %v3860_v18, 0.0 }
 0x33c   :  { %v3866_v45 = vadd.f32 %v2615_v24, %v1910_v38  ;;  %v2779_v26 = vmax.f32 %v3862_v50, 0.0 }
 0x33d   :  { %v2780_v4 = vmax.f32 %v3864_v58, 0.0  ;;  %v1936_v58 = vadd.f32 %v5024_v6, %v4883_v41 }
 0x33e   :  { %v2781_v29 = vmax.f32 %v3866_v45, 0.0 }
 0x33f   :  { %v2856_v54 = vpack.c.bf16 %v2780_v4, %v2778_v51  ;;  %v1938_v4 = vadd.f32 %v5026_v2, %v4879_v63 }
 0x340   :  { %v2857_v28 = vpack.c.bf16 %v2781_v29, %v2779_v26  ;;  %v2619_v56 = vpop.f32.mrb[104].mxu0 }
 0x341   :  { %v3868_v39 = vadd.f32 %v2619_v56, %v1914_v31  ;;  %v2621_v52 = vpop.f32.mrb[105].mxu0 }
 0x342   :  { %v3870_v42 = vadd.f32 %v2621_v52, %v1916_v14  ;;  %v2623_v44 = vpop.f32.mrb[106].mxu0  ;;  %3237 = vmatprep.mubr.bf16.mxu1 %v2857_v28 }
 0x343   :  { %v3872_v57 = vadd.f32 %v2623_v44, %v1918_v37  ;;  %v2625_v34 = vpop.f32.mrb[107].mxu0  ;;  %3238 = vmatmul.mubr.bf16.gmra.mrb[228].mxu1 %v2856_v54  ;;  %v2782_v9 = vmax.f32 %v3868_v39, 0.0  ;;  %v1940_v54 = vadd.f32 %v5028_v3, %v4883_v41  ;;  %v1944_v44 = vadd.f32 %v5038_v10, %v4879_v63 }
 0x344   :  { %v3874_v59 = vadd.f32 %v2625_v34, %v1920_v53  ;;  %v2783_v60 = vmax.f32 %v3870_v42, 0.0 }
 0x345   :  { %v2784_v25 = vmax.f32 %v3872_v57, 0.0 }
 0x346   :  { %v2785_v40 = vmax.f32 %v3874_v59, 0.0  ;;  %v1946_v59 = vadd.f32 %v5040_v11, %v4883_v41 }
 0x347   :  { %v2858_v55 = vpack.c.bf16 %v2784_v25, %v2782_v9 }
 0x348   :  { %v2859_v35 = vpack.c.bf16 %v2785_v40, %v2783_v60  ;;  %v2629_v23 = vpop.f32.mrb[108].mxu0  ;;  %v1948_v40 = vadd.f32 %v5042_v7, %v4879_v63 }
 0x349   :  { %v3876_v27 = vadd.f32 %v2629_v23, %v1924_v17  ;;  %v2631_v19 = vpop.f32.mrb[109].mxu0 }
 0x34a   :  { %v3878_v30 = vadd.f32 %v2631_v19, %v1926_v32  ;;  %v2633_v46 = vpop.f32.mrb[110].mxu0  ;;  %3245 = vmatprep.mubr.bf16.mxu1 %v2859_v35  ;;  %v1950_v35 = vadd.f32 %v5044_v8, %v4883_v41 }
 0x34b   :  { %v3880_v48 = vadd.f32 %v2633_v46, %v1928_v22  ;;  %v2635_v21 = vpop.f32.mrb[111].mxu0  ;;  %3246 = vmatmul.mubr.bf16.gmra.mrb[232].mxu1 %v2858_v55  ;;  %v2786_v1 = vmax.f32 %v3876_v27, 0.0 }
 0x34c   :  { %v3882_v0 = vadd.f32 %v2635_v21, %v1930_v36  ;;  %v2787_v18 = vmax.f32 %v3878_v30, 0.0  ;;  %v1954_v21 = vadd.f32 %v5054_v15, %v4879_v63 }
 0x34d   :  { %v2788_v33 = vmax.f32 %v3880_v48, 0.0 }
 0x34e   :  { %v2789_v47 = vmax.f32 %v3882_v0, 0.0  ;;  %v3039_v38 = vpop.f32.mrb[128].mxu1 }
 0x34f   :  { %v2860_v50 = vpack.c.bf16 %v2788_v33, %v2786_v1  ;;  %v3040_v62 = vadd.f32 %v5214_v49, %v3039_v38  ;;  %v3041_v43 = vpop.f32.mrb[129].mxu1  ;;  %v1956_v33 = vadd.f32 %v5056_v16, %v4883_v41 }
 0x350   :  { %v2861_v24 = vpack.c.bf16 %v2789_v47, %v2787_v18  ;;  %v2639_v45 = vpop.f32.mrb[112].mxu0  ;;  %v3042_v51 = vpop.f32.mrb[130].mxu1 }
 0x351   :  { %3295 = vst.msk [vmem:[#allocation11] sm:$0xff] %vm3294_vm1, %v3040_v62  ;;  %v3884_v26 = vadd.f32 %v2639_v45, %v1934_v61  ;;  %v3043_v29 = vadd.f32 %v5214_v49, %v3042_v51  ;;  %v2641_v31 = vpop.f32.mrb[113].mxu0  ;;  %v3044_v5 = vpop.f32.mrb[131].mxu1  ;;  %v1958_v61 = vadd.f32 %v5058_v12, %v4879_v63 }
 0x352   :  { %v3886_v14 = vadd.f32 %v2641_v31, %v1936_v58  ;;  %v2643_v28 = vpop.f32.mrb[114].mxu0  ;;  %3253 = vmatprep.mubr.bf16.mxu1 %v2861_v24  ;;  %v1960_v58 = vadd.f32 %v5060_v13, %v4883_v41 }
 0x353   :  { %3296 = vst.msk [vmem:[#allocation11 + $0x8] sm:$0xff] %vm3294_vm1, %v3043_v29  ;;  %v3888_v6 = vadd.f32 %v2643_v28, %v1938_v4  ;;  %v2645_v56 = vpop.f32.mrb[115].mxu0  ;;  %3254 = vmatmul.mubr.bf16.gmra.mrb[236].mxu1 %v2860_v50  ;;  %v2790_v2 = vmax.f32 %v3884_v26, 0.0 }
 0x354   :  { %v3890_v37 = vadd.f32 %v2645_v56, %v1940_v54  ;;  %v2791_v52 = vmax.f32 %v3886_v14, 0.0  ;;  %v1964_v54 = vadd.f32 %v5070_v20, %v4879_v63 }
 0x355   :  { %v2792_v39 = vmax.f32 %v3888_v6, 0.0  ;;  %v5483_v6 = vld [vmem:[#allocation56_spill] sm:$0xff] }
 0x356   :  { %v2793_v53 = vmax.f32 %v3890_v37, 0.0  ;;  %v3047_v42 = vpop.f32.mrb[132].mxu1  ;;  %v1966_v56 = vadd.f32 %v5483_v6, %v4883_v41 }
 0x357   :  { %v2862_v57 = vpack.c.bf16 %v2792_v39, %v2790_v2  ;;  %v3048_v3 = vadd.f32 %v5214_v49, %v3047_v42  ;;  %v3049_v34 = vpop.f32.mrb[133].mxu1 }
 0x358   :  { %v2863_v9 = vpack.c.bf16 %v2793_v53, %v2791_v52  ;;  %v2649_v25 = vpop.f32.mrb[116].mxu0  ;;  %v3050_v60 = vpop.f32.mrb[134].mxu1  ;;  %v5484_v52 = vld [vmem:[#allocation57_spill] sm:$0xff] }
 0x359   :  { %3297 = vst.msk [vmem:[#allocation11 + $0x10] sm:$0xff] %vm3294_vm1, %v3048_v3  ;;  %v3892_v17 = vadd.f32 %v2649_v25, %v1944_v44  ;;  %v3051_v55 = vadd.f32 %v5214_v49, %v3050_v60  ;;  %v2651_v32 = vpop.f32.mrb[117].mxu0  ;;  %v3052_v10 = vpop.f32.mrb[135].mxu1  ;;  %v1968_v53 = vadd.f32 %v5484_v52, %v4879_v63  ;;  %v5485_v3 = vld [vmem:[#allocation58_spill] sm:$0xff] }
 0x35a   :  { %v3894_v23 = vadd.f32 %v2651_v32, %v1946_v59  ;;  %v2653_v22 = vpop.f32.mrb[118].mxu0  ;;  %3261 = vmatprep.mubr.bf16.mxu1 %v2863_v9  ;;  %v1970_v34 = vadd.f32 %v5485_v3, %v4883_v41 }
 0x35b   :  { %3298 = vst.msk [vmem:[#allocation11 + $0x18] sm:$0xff] %vm3294_vm1, %v3051_v55  ;;  %v3896_v11 = vadd.f32 %v2653_v22, %v1948_v40  ;;  %v2655_v27 = vpop.f32.mrb[119].mxu0  ;;  %3262 = vmatmul.mubr.bf16.gmra.mrb[240].mxu1 %v2862_v57  ;;  %v2794_v7 = vmax.f32 %v3892_v17, 0.0 }
 0x35c   :  { %v3898_v19 = vadd.f32 %v2655_v27, %v1950_v35  ;;  %v2795_v30 = vmax.f32 %v3894_v23, 0.0 }
 0x35d   :  { %v2796_v36 = vmax.f32 %v3896_v11, 0.0 }
 0x35e   :  { %v2797_v46 = vmax.f32 %v3898_v19, 0.0  ;;  %v3055_v48 = vpop.f32.mrb[136].mxu1 }
 0x35f   :  { %v2864_v0 = vpack.c.bf16 %v2796_v36, %v2794_v7  ;;  %v3056_v8 = vadd.f32 %v5214_v49, %v3055_v48  ;;  %v3057_v1 = vpop.f32.mrb[137].mxu1 }
 0x360   :  { %v2865_v18 = vpack.c.bf16 %v2797_v46, %v2795_v30  ;;  %v2659_v47 = vpop.f32.mrb[120].mxu0  ;;  %v3058_v38 = vpop.f32.mrb[138].mxu1 }
 0x361   :  { %3299 = vst.msk [vmem:[#allocation11 + $0x20] sm:$0xff] %vm3294_vm1, %v3056_v8  ;;  %v3900_v50 = vadd.f32 %v2659_v47, %v1954_v21  ;;  %v3059_v62 = vadd.f32 %v5214_v49, %v3058_v38  ;;  %v2661_v43 = vpop.f32.mrb[121].mxu0  ;;  %v3060_v15 = vpop.f32.mrb[139].mxu1 }
 0x362   :  { %v3902_v24 = vadd.f32 %v2661_v43, %v1956_v33  ;;  %v2663_v45 = vpop.f32.mrb[122].mxu0  ;;  %3269 = vmatprep.mubr.bf16.mxu1 %v2865_v18 }
 0x363   :  { %3300 = vst.msk [vmem:[#allocation11 + $0x28] sm:$0xff] %vm3294_vm1, %v3059_v62  ;;  %v3904_v16 = vadd.f32 %v2663_v45, %v1958_v61  ;;  %v2665_v51 = vpop.f32.mrb[123].mxu0  ;;  %3270 = vmatmul.mubr.bf16.gmra.mrb[244].mxu1 %v2864_v0  ;;  %v2798_v12 = vmax.f32 %v3900_v50, 0.0 }
 0x364   :  { %v3906_v4 = vadd.f32 %v2665_v51, %v1960_v58  ;;  %v2799_v29 = vmax.f32 %v3902_v24, 0.0 }
 0x365   :  { %v2800_v26 = vmax.f32 %v3904_v16, 0.0 }
 0x366   :  { %v2801_v31 = vmax.f32 %v3906_v4, 0.0  ;;  %v3063_v5 = vpop.f32.mrb[140].mxu1 }
 0x367   :  { %v2866_v14 = vpack.c.bf16 %v2800_v26, %v2798_v12  ;;  %v3064_v13 = vadd.f32 %v5214_v49, %v3063_v5  ;;  %v3065_v28 = vpop.f32.mrb[141].mxu1 }
 0x368   :  { %v2867_v37 = vpack.c.bf16 %v2801_v31, %v2799_v29  ;;  %v2669_v2 = vpop.f32.mrb[124].mxu0  ;;  %v3066_v39 = vpop.f32.mrb[142].mxu1 }
 0x369   :  { %3301 = vst.msk [vmem:[#allocation11 + $0x30] sm:$0xff] %vm3294_vm1, %v3064_v13  ;;  %v3908_v42 = vadd.f32 %v2669_v2, %v1964_v54  ;;  %v3067_v44 = vadd.f32 %v5214_v49, %v3066_v39  ;;  %v2671_v57 = vpop.f32.mrb[125].mxu0  ;;  %v3068_v20 = vpop.f32.mrb[143].mxu1 }
 0x36a   :  { %v3910_v59 = vadd.f32 %v2671_v57, %v1966_v56  ;;  %v2673_v9 = vpop.f32.mrb[126].mxu0  ;;  %3277 = vmatprep.mubr.bf16.mxu1 %v2867_v37 }
 0x36b   :  { %3302 = vst.msk [vmem:[#allocation11 + $0x38] sm:$0xff] %vm3294_vm1, %v3067_v44  ;;  %v3912_v25 = vadd.f32 %v2673_v9, %v1968_v53  ;;  %v2675_v60 = vpop.f32.mrb[127].mxu0  ;;  %3278 = vmatmul.mubr.bf16.gmra.mrb[248].mxu1 %v2866_v14  ;;  %v2802_v63 = vmax.f32 %v3908_v42, 0.0 }
 0x36c   :  { %v3914_v40 = vadd.f32 %v2675_v60, %v1970_v34  ;;  %v2803_v55 = vmax.f32 %v3910_v59, 0.0 }
 0x36d   :  { %v2804_v17 = vmax.f32 %v3912_v25, 0.0 }
 0x36e   :  { %v2805_v32 = vmax.f32 %v3914_v40, 0.0  ;;  %v3071_v10 = vpop.f32.mrb[144].mxu1 }
 0x36f   :  { %v2868_v35 = vpack.c.bf16 %v2804_v17, %v2802_v63  ;;  %v3072_v23 = vadd.f32 %v5214_v49, %v3071_v10  ;;  %v3073_v22 = vpop.f32.mrb[145].mxu1 }
 0x370   :  { %v2869_v11 = vpack.c.bf16 %v2805_v32, %v2803_v55  ;;  %v3074_v41 = vpop.f32.mrb[146].mxu1 }
 0x371   :  { %3303 = vst.msk [vmem:[#allocation11 + $0x40] sm:$0xff] %vm3294_vm1, %v3072_v23  ;;  %v3075_v27 = vadd.f32 %v5214_v49, %v3074_v41  ;;  %v3076_v19 = vpop.f32.mrb[147].mxu1 }
 0x372   :  { %3285 = vmatprep.mubr.bf16.mxu1 %v2869_v11 }
 0x373   :  { %3304 = vst.msk [vmem:[#allocation11 + $0x48] sm:$0xff] %vm3294_vm1, %v3075_v27  ;;  %3286 = vmatmul.mubr.bf16.gmra.mrb[252].mxu1 %v2868_v35 }
 0x376   :  { %v3079_v7 = vpop.f32.mrb[148].mxu1 }
 0x377   :  { %v3080_v36 = vadd.f32 %v5214_v49, %v3079_v7  ;;  %v3081_v30 = vpop.f32.mrb[149].mxu1 }
 0x378   :  { %v3082_v46 = vpop.f32.mrb[150].mxu1 }
 0x379   :  { %3305 = vst.msk [vmem:[#allocation11 + $0x50] sm:$0xff] %vm3294_vm1, %v3080_v36  ;;  %v3083_v48 = vadd.f32 %v5214_v49, %v3082_v46  ;;  %v3084_v21 = vpop.f32.mrb[151].mxu1 }
 0x37b   :  { %3306 = vst.msk [vmem:[#allocation11 + $0x58] sm:$0xff] %vm3294_vm1, %v3083_v48 }
 0x37e   :  { %v3087_v0 = vpop.f32.mrb[152].mxu1 }
 0x37f   :  { %v3088_v8 = vadd.f32 %v5214_v49, %v3087_v0  ;;  %v3089_v1 = vpop.f32.mrb[153].mxu1 }
 0x380   :  { %v3090_v33 = vpop.f32.mrb[154].mxu1 }
 0x381   :  { %3307 = vst.msk [vmem:[#allocation11 + $0x60] sm:$0xff] %vm3294_vm1, %v3088_v8  ;;  %v3091_v18 = vadd.f32 %v5214_v49, %v3090_v33  ;;  %v3092_v47 = vpop.f32.mrb[155].mxu1 }
 0x383   :  { %3308 = vst.msk [vmem:[#allocation11 + $0x68] sm:$0xff] %vm3294_vm1, %v3091_v18 }
 0x386   :  { %v3095_v38 = vpop.f32.mrb[156].mxu1 }
 0x387   :  { %v3096_v61 = vadd.f32 %v5214_v49, %v3095_v38  ;;  %v3097_v50 = vpop.f32.mrb[157].mxu1 }
 0x388   :  { %v3098_v62 = vpop.f32.mrb[158].mxu1 }
 0x389   :  { %3309 = vst.msk [vmem:[#allocation11 + $0x70] sm:$0xff] %vm3294_vm1, %v3096_v61  ;;  %v3099_v43 = vadd.f32 %v5214_v49, %v3098_v62  ;;  %v3100_v15 = vpop.f32.mrb[159].mxu1 }
 0x38b   :  { %3310 = vst.msk [vmem:[#allocation11 + $0x78] sm:$0xff] %vm3294_vm1, %v3099_v43 }
 0x38e   :  { %v3103_v58 = vpop.f32.mrb[160].mxu1 }
 0x38f   :  { %v3104_v24 = vadd.f32 %v5214_v49, %v3103_v58  ;;  %v3105_v45 = vpop.f32.mrb[161].mxu1 }
 0x390   :  { %v3106_v16 = vpop.f32.mrb[162].mxu1 }
 0x391   :  { %3311 = vst.msk [vmem:[#allocation11 + $0x80] sm:$0xff] %vm3294_vm1, %v3104_v24  ;;  %v3107_v51 = vadd.f32 %v5214_v49, %v3106_v16  ;;  %v3108_v4 = vpop.f32.mrb[163].mxu1 }
 0x393   :  { %3312 = vst.msk [vmem:[#allocation11 + $0x88] sm:$0xff] %vm3294_vm1, %v3107_v51 }
 0x396   :  { %v3111_v12 = vpop.f32.mrb[164].mxu1 }
 0x397   :  { %v3112_v26 = vadd.f32 %v5214_v49, %v3111_v12  ;;  %v3113_v29 = vpop.f32.mrb[165].mxu1 }
 0x398   :  { %v3114_v31 = vpop.f32.mrb[166].mxu1 }
 0x399   :  { %3313 = vst.msk [vmem:[#allocation11 + $0x90] sm:$0xff] %vm3294_vm1, %v3112_v26  ;;  %v3115_v5 = vadd.f32 %v5214_v49, %v3114_v31  ;;  %v3116_v54 = vpop.f32.mrb[167].mxu1 }
 0x39b   :  { %3314 = vst.msk [vmem:[#allocation11 + $0x98] sm:$0xff] %vm3294_vm1, %v3115_v5 }
 0x39e   :  { %v3119_v14 = vpop.f32.mrb[168].mxu1 }
 0x39f   :  { %v3120_v13 = vadd.f32 %v5214_v49, %v3119_v14  ;;  %v3121_v28 = vpop.f32.mrb[169].mxu1 }
 0x3a0   :  { %v3122_v6 = vpop.f32.mrb[170].mxu1 }
 0x3a1   :  { %3315 = vst.msk [vmem:[#allocation11 + $0xa0] sm:$0xff] %vm3294_vm1, %v3120_v13  ;;  %v3123_v56 = vadd.f32 %v5214_v49, %v3122_v6  ;;  %v3124_v37 = vpop.f32.mrb[171].mxu1 }
 0x3a3   :  { %3316 = vst.msk [vmem:[#allocation11 + $0xa8] sm:$0xff] %vm3294_vm1, %v3123_v56 }
 0x3a6   :  { %v3127_v2 = vpop.f32.mrb[172].mxu1 }
 0x3a7   :  { %v3128_v39 = vadd.f32 %v5214_v49, %v3127_v2  ;;  %v3129_v52 = vpop.f32.mrb[173].mxu1 }
 0x3a8   :  { %v3130_v53 = vpop.f32.mrb[174].mxu1 }
 0x3a9   :  { %3317 = vst.msk [vmem:[#allocation11 + $0xb0] sm:$0xff] %vm3294_vm1, %v3128_v39  ;;  %v3131_v42 = vadd.f32 %v5214_v49, %v3130_v53  ;;  %v3132_v44 = vpop.f32.mrb[175].mxu1 }
 0x3ab   :  { %3318 = vst.msk [vmem:[#allocation11 + $0xb8] sm:$0xff] %vm3294_vm1, %v3131_v42 }
 0x3ae   :  { %v3135_v57 = vpop.f32.mrb[176].mxu1 }
 0x3af   :  { %v3136_v20 = vadd.f32 %v5214_v49, %v3135_v57  ;;  %v3137_v3 = vpop.f32.mrb[177].mxu1 }
 0x3b0   :  { %v3138_v34 = vpop.f32.mrb[178].mxu1 }
 0x3b1   :  { %3319 = vst.msk [vmem:[#allocation11 + $0xc0] sm:$0xff] %vm3294_vm1, %v3136_v20  ;;  %v3139_v59 = vadd.f32 %v5214_v49, %v3138_v34  ;;  %v3140_v9 = vpop.f32.mrb[179].mxu1 }
 0x3b3   :  { %3320 = vst.msk [vmem:[#allocation11 + $0xc8] sm:$0xff] %vm3294_vm1, %v3139_v59 }
 0x3b6   :  { %v3143_v25 = vpop.f32.mrb[180].mxu1 }
 0x3b7   :  { %v3144_v60 = vadd.f32 %v5214_v49, %v3143_v25  ;;  %v3145_v40 = vpop.f32.mrb[181].mxu1 }
 0x3b8   :  { %v3146_v63 = vpop.f32.mrb[182].mxu1 }
 0x3b9   :  { %3321 = vst.msk [vmem:[#allocation11 + $0xd0] sm:$0xff] %vm3294_vm1, %v3144_v60  ;;  %v3147_v17 = vadd.f32 %v5214_v49, %v3146_v63  ;;  %v3148_v55 = vpop.f32.mrb[183].mxu1 }
 0x3bb   :  { %3322 = vst.msk [vmem:[#allocation11 + $0xd8] sm:$0xff] %vm3294_vm1, %v3147_v17 }
 0x3be   :  { %v3151_v32 = vpop.f32.mrb[184].mxu1 }
 0x3bf   :  { %v3152_v10 = vadd.f32 %v5214_v49, %v3151_v32  ;;  %v3153_v35 = vpop.f32.mrb[185].mxu1 }
 0x3c0   :  { %v3154_v23 = vpop.f32.mrb[186].mxu1 }
 0x3c1   :  { %3323 = vst.msk [vmem:[#allocation11 + $0xe0] sm:$0xff] %vm3294_vm1, %v3152_v10  ;;  %v3155_v22 = vadd.f32 %v5214_v49, %v3154_v23  ;;  %v3156_v11 = vpop.f32.mrb[187].mxu1 }
 0x3c3   :  { %3324 = vst.msk [vmem:[#allocation11 + $0xe8] sm:$0xff] %vm3294_vm1, %v3155_v22 }
 0x3c6   :  { %v3159_v41 = vpop.f32.mrb[188].mxu1 }
 0x3c7   :  { %v3160_v27 = vadd.f32 %v5214_v49, %v3159_v41  ;;  %v3161_v19 = vpop.f32.mrb[189].mxu1 }
 0x3c8   :  { %v3162_v7 = vpop.f32.mrb[190].mxu1 }
 0x3c9   :  { %3325 = vst.msk [vmem:[#allocation11 + $0xf0] sm:$0xff] %vm3294_vm1, %v3160_v27  ;;  %v3163_v36 = vadd.f32 %v5214_v49, %v3162_v7  ;;  %v3164_v30 = vpop.f32.mrb[191].mxu1 }
 0x3cb   :  { %3326 = vst.msk [vmem:[#allocation11 + $0xf8] sm:$0xff] %vm3294_vm1, %v3163_v36 }
 0x3ce   :  { %v3167_v46 = vpop.f32.mrb[192].mxu1 }
 0x3cf   :  { %v3168_v48 = vadd.f32 %v5214_v49, %v3167_v46  ;;  %v3169_v21 = vpop.f32.mrb[193].mxu1 }
 0x3d0   :  { %v3170_v0 = vpop.f32.mrb[194].mxu1 }
 0x3d1   :  { %3327 = vst.msk [vmem:[#allocation11 + $0x100] sm:$0xff] %vm3294_vm1, %v3168_v48  ;;  %v3171_v8 = vadd.f32 %v5214_v49, %v3170_v0  ;;  %v3172_v1 = vpop.f32.mrb[195].mxu1 }
 0x3d3   :  { %3328 = vst.msk [vmem:[#allocation11 + $0x108] sm:$0xff] %vm3294_vm1, %v3171_v8 }
 0x3d6   :  { %v3175_v33 = vpop.f32.mrb[196].mxu1 }
 0x3d7   :  { %v3176_v18 = vadd.f32 %v5214_v49, %v3175_v33  ;;  %v3177_v47 = vpop.f32.mrb[197].mxu1 }
 0x3d8   :  { %v3178_v38 = vpop.f32.mrb[198].mxu1 }
 0x3d9   :  { %3329 = vst.msk [vmem:[#allocation11 + $0x110] sm:$0xff] %vm3294_vm1, %v3176_v18  ;;  %v3179_v61 = vadd.f32 %v5214_v49, %v3178_v38  ;;  %v3180_v50 = vpop.f32.mrb[199].mxu1 }
 0x3db   :  { %3330 = vst.msk [vmem:[#allocation11 + $0x118] sm:$0xff] %vm3294_vm1, %v3179_v61 }
 0x3de   :  { %v3183_v62 = vpop.f32.mrb[200].mxu1 }
 0x3df   :  { %v3184_v43 = vadd.f32 %v5214_v49, %v3183_v62  ;;  %v3185_v15 = vpop.f32.mrb[201].mxu1 }
 0x3e0   :  { %v3186_v58 = vpop.f32.mrb[202].mxu1 }
 0x3e1   :  { %3331 = vst.msk [vmem:[#allocation11 + $0x120] sm:$0xff] %vm3294_vm1, %v3184_v43  ;;  %v3187_v24 = vadd.f32 %v5214_v49, %v3186_v58  ;;  %v3188_v45 = vpop.f32.mrb[203].mxu1 }
 0x3e3   :  { %3332 = vst.msk [vmem:[#allocation11 + $0x128] sm:$0xff] %vm3294_vm1, %v3187_v24 }
 0x3e6   :  { %v3191_v16 = vpop.f32.mrb[204].mxu1 }
 0x3e7   :  { %v3192_v51 = vadd.f32 %v5214_v49, %v3191_v16  ;;  %v3193_v4 = vpop.f32.mrb[205].mxu1 }
 0x3e8   :  { %v3194_v12 = vpop.f32.mrb[206].mxu1 }
 0x3e9   :  { %3333 = vst.msk [vmem:[#allocation11 + $0x130] sm:$0xff] %vm3294_vm1, %v3192_v51  ;;  %v3195_v26 = vadd.f32 %v5214_v49, %v3194_v12  ;;  %v3196_v29 = vpop.f32.mrb[207].mxu1 }
 0x3eb   :  { %3334 = vst.msk [vmem:[#allocation11 + $0x138] sm:$0xff] %vm3294_vm1, %v3195_v26 }
 0x3ee   :  { %v3199_v31 = vpop.f32.mrb[208].mxu1 }
 0x3ef   :  { %v3200_v5 = vadd.f32 %v5214_v49, %v3199_v31  ;;  %v3201_v54 = vpop.f32.mrb[209].mxu1 }
 0x3f0   :  { %v3202_v14 = vpop.f32.mrb[210].mxu1 }
 0x3f1   :  { %3335 = vst.msk [vmem:[#allocation11 + $0x140] sm:$0xff] %vm3294_vm1, %v3200_v5  ;;  %v3203_v13 = vadd.f32 %v5214_v49, %v3202_v14  ;;  %v3204_v28 = vpop.f32.mrb[211].mxu1 }
 0x3f3   :  { %3336 = vst.msk [vmem:[#allocation11 + $0x148] sm:$0xff] %vm3294_vm1, %v3203_v13 }
 0x3f6   :  { %v3207_v6 = vpop.f32.mrb[212].mxu1 }
 0x3f7   :  { %v3208_v56 = vadd.f32 %v5214_v49, %v3207_v6  ;;  %v3209_v37 = vpop.f32.mrb[213].mxu1 }
 0x3f8   :  { %v3210_v2 = vpop.f32.mrb[214].mxu1 }
 0x3f9   :  { %3337 = vst.msk [vmem:[#allocation11 + $0x150] sm:$0xff] %vm3294_vm1, %v3208_v56  ;;  %v3211_v39 = vadd.f32 %v5214_v49, %v3210_v2  ;;  %v3212_v52 = vpop.f32.mrb[215].mxu1 }
 0x3fb   :  { %3338 = vst.msk [vmem:[#allocation11 + $0x158] sm:$0xff] %vm3294_vm1, %v3211_v39 }
 0x3fe   :  { %v3215_v53 = vpop.f32.mrb[216].mxu1 }
 0x3ff   :  { %v3216_v42 = vadd.f32 %v5214_v49, %v3215_v53  ;;  %v3217_v44 = vpop.f32.mrb[217].mxu1 }
 0x400   :  { %v3218_v57 = vpop.f32.mrb[218].mxu1 }
 0x401   :  { %3339 = vst.msk [vmem:[#allocation11 + $0x160] sm:$0xff] %vm3294_vm1, %v3216_v42  ;;  %v3219_v20 = vadd.f32 %v5214_v49, %v3218_v57  ;;  %v3220_v3 = vpop.f32.mrb[219].mxu1 }
 0x403   :  { %3340 = vst.msk [vmem:[#allocation11 + $0x168] sm:$0xff] %vm3294_vm1, %v3219_v20 }
 0x406   :  { %v3223_v34 = vpop.f32.mrb[220].mxu1 }
 0x407   :  { %v3224_v59 = vadd.f32 %v5214_v49, %v3223_v34  ;;  %v3225_v9 = vpop.f32.mrb[221].mxu1 }
 0x408   :  { %v3226_v25 = vpop.f32.mrb[222].mxu1 }
 0x409   :  { %3341 = vst.msk [vmem:[#allocation11 + $0x170] sm:$0xff] %vm3294_vm1, %v3224_v59  ;;  %v3227_v60 = vadd.f32 %v5214_v49, %v3226_v25  ;;  %v3228_v40 = vpop.f32.mrb[223].mxu1 }
 0x40b   :  { %3342 = vst.msk [vmem:[#allocation11 + $0x178] sm:$0xff] %vm3294_vm1, %v3227_v60 }
 0x40e   :  { %v3231_v63 = vpop.f32.mrb[224].mxu1 }
 0x40f   :  { %v3232_v17 = vadd.f32 %v5214_v49, %v3231_v63  ;;  %v3233_v55 = vpop.f32.mrb[225].mxu1 }
 0x410   :  { %v3234_v32 = vpop.f32.mrb[226].mxu1 }
 0x411   :  { %3343 = vst.msk [vmem:[#allocation11 + $0x180] sm:$0xff] %vm3294_vm1, %v3232_v17  ;;  %v3235_v10 = vadd.f32 %v5214_v49, %v3234_v32  ;;  %v3236_v35 = vpop.f32.mrb[227].mxu1 }
 0x413   :  { %3344 = vst.msk [vmem:[#allocation11 + $0x188] sm:$0xff] %vm3294_vm1, %v3235_v10 }
 0x416   :  { %v3239_v23 = vpop.f32.mrb[228].mxu1 }
 0x417   :  { %v3240_v22 = vadd.f32 %v5214_v49, %v3239_v23  ;;  %v3241_v11 = vpop.f32.mrb[229].mxu1 }
 0x418   :  { %v3242_v41 = vpop.f32.mrb[230].mxu1 }
 0x419   :  { %3345 = vst.msk [vmem:[#allocation11 + $0x190] sm:$0xff] %vm3294_vm1, %v3240_v22  ;;  %v3243_v27 = vadd.f32 %v5214_v49, %v3242_v41  ;;  %v3244_v19 = vpop.f32.mrb[231].mxu1 }
 0x41b   :  { %3346 = vst.msk [vmem:[#allocation11 + $0x198] sm:$0xff] %vm3294_vm1, %v3243_v27 }
 0x41e   :  { %v3247_v7 = vpop.f32.mrb[232].mxu1 }
 0x41f   :  { %v3248_v36 = vadd.f32 %v5214_v49, %v3247_v7  ;;  %v3249_v30 = vpop.f32.mrb[233].mxu1 }
 0x420   :  { %v3250_v46 = vpop.f32.mrb[234].mxu1 }
 0x421   :  { %3347 = vst.msk [vmem:[#allocation11 + $0x1a0] sm:$0xff] %vm3294_vm1, %v3248_v36  ;;  %v3251_v48 = vadd.f32 %v5214_v49, %v3250_v46  ;;  %v3252_v21 = vpop.f32.mrb[235].mxu1 }
 0x423   :  { %3348 = vst.msk [vmem:[#allocation11 + $0x1a8] sm:$0xff] %vm3294_vm1, %v3251_v48 }
 0x426   :  { %v3255_v0 = vpop.f32.mrb[236].mxu1 }
 0x427   :  { %v3256_v8 = vadd.f32 %v5214_v49, %v3255_v0  ;;  %v3257_v1 = vpop.f32.mrb[237].mxu1 }
 0x428   :  { %v3258_v33 = vpop.f32.mrb[238].mxu1 }
 0x429   :  { %3349 = vst.msk [vmem:[#allocation11 + $0x1b0] sm:$0xff] %vm3294_vm1, %v3256_v8  ;;  %v3259_v18 = vadd.f32 %v5214_v49, %v3258_v33  ;;  %v3260_v47 = vpop.f32.mrb[239].mxu1 }
 0x42b   :  { %3350 = vst.msk [vmem:[#allocation11 + $0x1b8] sm:$0xff] %vm3294_vm1, %v3259_v18 }
 0x42e   :  { %v3263_v38 = vpop.f32.mrb[240].mxu1 }
 0x42f   :  { %v3264_v61 = vadd.f32 %v5214_v49, %v3263_v38  ;;  %v3265_v50 = vpop.f32.mrb[241].mxu1 }
 0x430   :  { %v3266_v62 = vpop.f32.mrb[242].mxu1 }
 0x431   :  { %3351 = vst.msk [vmem:[#allocation11 + $0x1c0] sm:$0xff] %vm3294_vm1, %v3264_v61  ;;  %v3267_v43 = vadd.f32 %v5214_v49, %v3266_v62  ;;  %v3268_v15 = vpop.f32.mrb[243].mxu1 }
 0x433   :  { %3352 = vst.msk [vmem:[#allocation11 + $0x1c8] sm:$0xff] %vm3294_vm1, %v3267_v43 }
 0x436   :  { %v3271_v58 = vpop.f32.mrb[244].mxu1 }
 0x437   :  { %v3272_v24 = vadd.f32 %v5214_v49, %v3271_v58  ;;  %v3273_v45 = vpop.f32.mrb[245].mxu1 }
 0x438   :  { %v3274_v16 = vpop.f32.mrb[246].mxu1 }
 0x439   :  { %3353 = vst.msk [vmem:[#allocation11 + $0x1d0] sm:$0xff] %vm3294_vm1, %v3272_v24  ;;  %v3275_v51 = vadd.f32 %v5214_v49, %v3274_v16  ;;  %v3276_v4 = vpop.f32.mrb[247].mxu1 }
 0x43b   :  { %3354 = vst.msk [vmem:[#allocation11 + $0x1d8] sm:$0xff] %vm3294_vm1, %v3275_v51 }
 0x43e   :  { %v3279_v12 = vpop.f32.mrb[248].mxu1 }
 0x43f   :  { %v3280_v26 = vadd.f32 %v5214_v49, %v3279_v12  ;;  %v3281_v29 = vpop.f32.mrb[249].mxu1 }
 0x440   :  { %v3282_v31 = vpop.f32.mrb[250].mxu1 }
 0x441   :  { %3355 = vst.msk [vmem:[#allocation11 + $0x1e0] sm:$0xff] %vm3294_vm1, %v3280_v26  ;;  %v3283_v5 = vadd.f32 %v5214_v49, %v3282_v31  ;;  %v3284_v54 = vpop.f32.mrb[251].mxu1 }
 0x443   :  { %3356 = vst.msk [vmem:[#allocation11 + $0x1e8] sm:$0xff] %vm3294_vm1, %v3283_v5 }
 0x446   :  { %v3287_v14 = vpop.f32.mrb[252].mxu1 }
 0x447   :  { %v3288_v13 = vadd.f32 %v5214_v49, %v3287_v14  ;;  %v3289_v28 = vpop.f32.mrb[253].mxu1 }
 0x448   :  { %v3290_v6 = vpop.f32.mrb[254].mxu1 }
 0x449   :  { %3357 = vst.msk [vmem:[#allocation11 + $0x1f0] sm:$0xff] %vm3294_vm1, %v3288_v13  ;;  %v3291_v56 = vadd.f32 %v5214_v49, %v3290_v6  ;;  %v3292_v37 = vpop.f32.mrb[255].mxu1 }
 0x44b   :  { %3358 = vst.msk [vmem:[#allocation11 + $0x1f8] sm:$0xff] %vm3294_vm1, %v3291_v56 }
 0x44c   :  { %4525 = shalt.err (!%p4522_p2)
}
 0x44d   :  { %s4526_s12 = scalar_lea.hbm %s5396_s5, 8192 }
 0x44e   :  { %p4527_p3 = scmp.ne.s32.totalorder %s5396_s5, %s4526_s12  ;;  %p4530_p4 = scmp.lt.u32.totalorder %s4526_s12, %s5396_s5 }
 0x450   :  { %p4532_p5 = pnand %p4530_p4, %p4527_p3 }
 0x452   :  { %4535 = shalt.err (!%p4532_p5)
}
 0x453   :  { %3370 = dma.vmem_to_hbm [thread:$0]  %s3365_s8, 8192, %s5396_s5, [#allocation4], %s4545_s28, %s4545_s28, %s4546_s29  }
 0x454   :  { %4542 = dma.done.wait [#allocation4], 8192  }
 0x455   :  { %4543 = vsyncadd [#allocation4], 4294959104 }
 0x456   :  { %3374 = vsyncpa [#allocation3], 1 }
 0x457   :  { %3375 = vsyncpa [#allocation6], 1 }
 0x458   :  { %3376 = vsyncpa [#allocation9], 1 }
 0x459   :  { %3377 = vsyncpa [#allocation4], 1 }

</bundles_post_ra>
